<compile_context>
chip_gen: v7x
topology: tpu7x:2x2x1
jax: 0.10.0
libtpu: 0.0.40
codegen_flags: <defaults>
</compile_context>

<pallas_src>
import functools

import jax
import jax.numpy as jnp
from jax.experimental import pallas as pl
from jax.experimental.pallas import tpu as pltpu

LN_EPS = 1e-12        # BERT LayerNorm eps
NEG_MASK = -10000.0   # additive attention-mask constant used by HF BERT


# ----------------------------------------------------------------------------- config
class Config:
    hidden = 32
    num_heads = 4
    intermediate = 64
    num_layers = 2
    vocab = 96
    vocab_pad = 128     # pad vocab to a full 128-lane store (lane-dense logits)
    max_pos = 64


# ----------------------------------------------------------------------------- in-kernel helpers
def _gelu(x):
    # TODO(synk): HF BERT uses exact erf-GELU; tanh approximation kept for guaranteed
    # Mosaic elementwise lowering (EUP tanh).
    c = 0.7978845608028654  # sqrt(2/pi)
    return 0.5 * x * (1.0 + jnp.tanh(c * (x + 0.044715 * x * x * x)))


def _layernorm(x, g, b):
    mu = jnp.mean(x, axis=-1, keepdims=True)
    xc = x - mu
    var = jnp.mean(xc * xc, axis=-1, keepdims=True)
    return xc * jax.lax.rsqrt(var + LN_EPS) * g + b


# ----------------------------------------------------------------------------- fused whole-model kernel
def _model_kernel(enc_ref, ids_ref, pos_ref, wbank_ref, vbank_ref, o_ref, *,
                  batch, se, sd, num_heads, head_dim, vocab_pad, num_layers,
                  widx, vidx):
    """One fused kernel for the whole forward pass.  All weights live in two packed
    VMEM banks and are sliced at static offsets; activations never leave VMEM."""
    H = num_heads * head_dim
    f32 = jnp.float32

    def W(name):                                   # weight matrix [rows, cols]
        r, n, c = widx[name]
        return wbank_ref[r:r + n, :c]

    def V(name):                                   # bias / LN vector [1, cols]
        r, _, c = vidx[name]
        return vbank_ref[r:r + 1, :c]

    def dot(a, b):
        return jnp.dot(a, b, preferred_element_type=f32)

    # causal additive mask: built ONCE and reused by both decoder layers / all heads.
    rows = jax.lax.broadcasted_iota(jnp.int32, (sd, sd), 0)
    cols = jax.lax.broadcasted_iota(jnp.int32, (sd, sd), 1)
    causal_add = jnp.where(rows >= cols, 0.0, NEG_MASK)[None, :, :]     # [1, Sd, Sd]

    def mha(q, k, v, wo, bo, sq, sk, mask_add):
        """Multi-head attention.  Per-head scores/PV (heads on the lane axis), then the
        per-head contexts are lane-concatenated and projected with ONE full-Wo matmul."""
        scale = 1.0 / float(head_dim) ** 0.5
        ctx_heads = []
        for h in range(num_heads):
            sl = slice(h * head_dim, (h + 1) * head_dim)
            qh = q[:, sl].reshape(batch, sq, head_dim)
            kh = k[:, sl].reshape(batch, sk, head_dim)
            vh = v[:, sl].reshape(batch, sk, head_dim)
            s = jnp.einsum("bqd,bkd->bqk", qh, kh, preferred_element_type=f32) * scale
            if mask_add is not None:
                s = s + mask_add
            s = s - jnp.max(s, axis=-1, keepdims=True)
            p = jnp.exp(s)
            p = p * pl.reciprocal(jnp.sum(p, axis=-1, keepdims=True), approx=True)
            ch = jnp.einsum("bqk,bkd->bqd", p, vh, preferred_element_type=f32)
            ctx_heads.append(ch.reshape(batch * sq, head_dim))
        ctx = jnp.concatenate(ctx_heads, axis=-1)                       # [B*sq, H]
        return dot(ctx, wo) + bo                                        # single O-proj matmul

    # ---------------------------------------------- encoder (IdentityEmbedding -> inputs as-is,
    # all-ones encoder_attention_mask -> zero additive mask)
    h = enc_ref[...].astype(f32)                                        # [B*Se, H]
    for li in range(num_layers):
        p = f"enc{li}_"
        qkv = dot(h, W(p + "wqkv")) + V(p + "bqkv")
        attn = mha(qkv[:, :H], qkv[:, H:2 * H], qkv[:, 2 * H:],
                   W(p + "wo"), V(p + "bo"), se, se, None)
        h1 = _layernorm(attn + h, V(p + "ln1g"), V(p + "ln1b"))
        up = _gelu(dot(h1, W(p + "wup")) + V(p + "bup"))
        dn = dot(up, W(p + "wdn")) + V(p + "bdn")
        h = _layernorm(dn + h1, V(p + "ln2g"), V(p + "ln2b"))
    enc_out = h                                                          # [B*Se, H]

    # ---------------------------------------------- decoder embeddings
    # word lookup as one-hot matmul + position (pre-broadcast on host) + token_type(0), LayerNorm
    ids = ids_ref[...]                                                   # [B*Sd, 1] int32
    classes = jax.lax.broadcasted_iota(jnp.int32, (batch * sd, vocab_pad), 1)
    onehot = (ids == classes).astype(f32)                                # [B*Sd, VP]
    emb = dot(onehot, W("word_emb"))                                     # [B*Sd, H]
    emb = emb + pos_ref[...] + V("type_row")
    hd = _layernorm(emb, V("emb_lng"), V("emb_lnb"))

    # ---------------------------------------------- decoder layers
    for li in range(num_layers):
        p = f"dec{li}_"
        # cross-attention KV projection hoisted: depends only on enc_out, so its MXU
        # latency hides under the self-attention softmax VPU/EUP work.
        ckv = dot(enc_out, W(p + "c_wkv")) + V(p + "c_bkv")              # [B*Se, 2H]
        # causal self-attention
        qkv = dot(hd, W(p + "s_wqkv")) + V(p + "s_bqkv")
        attn = mha(qkv[:, :H], qkv[:, H:2 * H], qkv[:, 2 * H:],
                   W(p + "s_wo"), V(p + "s_bo"), sd, sd, causal_add)
        h1 = _layernorm(attn + hd, V(p + "s_lng"), V(p + "s_lnb"))
        # cross-attention over encoder output (all-ones mask -> no additive mask)
        cq = dot(h1, W(p + "c_wq")) + V(p + "c_bq")
        attn = mha(cq, ckv[:, :H], ckv[:, H:], W(p + "c_wo"), V(p + "c_bo"),
                   sd, se, None)
        h2 = _layernorm(attn + h1, V(p + "c_lng"), V(p + "c_lnb"))
        # FFN
        up = _gelu(dot(h2, W(p + "wup")) + V(p + "bup"))
        dn = dot(up, W(p + "wdn")) + V(p + "bdn")
        hd = _layernorm(dn + h2, V(p + "ln2g"), V(p + "ln2b"))

    # ---------------------------------------------- MLM head (tied embedding, pre-transposed)
    t = _gelu(dot(hd, W("head_tw")) + V("head_tb"))
    t = _layernorm(t, V("head_lng"), V("head_lnb"))
    logits = dot(t, W("word_emb_T")) + V("head_bias")                    # [B*Sd, 128]
    o_ref[...] = logits.astype(o_ref.dtype)                              # lane-dense store


# ----------------------------------------------------------------------------- parameter packing
def _pack_rows(entries, lanes=128):
    """Pack a list of (name, 2-D array with cols<=128) into a single [R,128] f32 bank.
    Returns (bank, index) where index[name] = (row_offset, n_rows, n_cols)."""
    index = {}
    chunks = []
    off = 0
    for name, arr in entries:
        arr = jnp.asarray(arr, jnp.float32)
        r, c = arr.shape
        index[name] = (off, r, c)
        chunks.append(jnp.zeros((r, lanes), jnp.float32).at[:, :c].set(arr))
        off += r
    pad = (-off) % 8                                  # keep the bank 8-sublane aligned
    if pad:
        chunks.append(jnp.zeros((pad, lanes), jnp.float32))
    return jnp.concatenate(chunks, axis=0), index


def init_params(key, cfg):
    H, I, Vn, VP = cfg.hidden, cfg.intermediate, cfg.vocab, cfg.vocab_pad
    nl = cfg.num_layers

    def dense(k, din, dout):
        return jax.random.normal(k, (din, dout), jnp.float32) * 0.02

    kenc, kdec, kemb, khead = jax.random.split(key, 4)
    w_entries, v_entries = [], []

    # encoder layers
    for li, k in enumerate(jax.random.split(kenc, nl)):
        kq, kk, kv, ko, ku, kd_ = jax.random.split(k, 6)
        w_entries += [
            (f"enc{li}_wqkv", jnp.concatenate([dense(kq, H, H), dense(kk, H, H),
                                               dense(kv, H, H)], axis=1)),
            (f"enc{li}_wo", dense(ko, H, H)),
            (f"enc{li}_wup", dense(ku, H, I)),
            (f"enc{li}_wdn", dense(kd_, I, H)),
        ]
        v_entries += [
            (f"enc{li}_bqkv", jnp.zeros((1, 3 * H))),
            (f"enc{li}_bo", jnp.zeros((1, H))),
            (f"enc{li}_ln1g", jnp.ones((1, H))),
            (f"enc{li}_ln1b", jnp.zeros((1, H))),
            (f"enc{li}_bup", jnp.zeros((1, I))),
            (f"enc{li}_bdn", jnp.zeros((1, H))),
            (f"enc{li}_ln2g", jnp.ones((1, H))),
            (f"enc{li}_ln2b", jnp.zeros((1, H))),
        ]

    # decoder layers
    for li, k in enumerate(jax.random.split(kdec, nl)):
        ksq, ksk, ksv, kso, kcq, kck, kcv, kco, ku, kd_ = jax.random.split(k, 10)
        w_entries += [
            (f"dec{li}_s_wqkv", jnp.concatenate([dense(ksq, H, H), dense(ksk, H, H),
                                                 dense(ksv, H, H)], axis=1)),
            (f"dec{li}_s_wo", dense(kso, H, H)),
            (f"dec{li}_c_wq", dense(kcq, H, H)),
            (f"dec{li}_c_wkv", jnp.concatenate([dense(kck, H, H), dense(kcv, H, H)], axis=1)),
            (f"dec{li}_c_wo", dense(kco, H, H)),
            (f"dec{li}_wup", dense(ku, H, I)),
            (f"dec{li}_wdn", dense(kd_, I, H)),
        ]
        v_entries += [
            (f"dec{li}_s_bqkv", jnp.zeros((1, 3 * H))),
            (f"dec{li}_s_bo", jnp.zeros((1, H))),
            (f"dec{li}_s_lng", jnp.ones((1, H))),
            (f"dec{li}_s_lnb", jnp.zeros((1, H))),
            (f"dec{li}_c_bq", jnp.zeros((1, H))),
            (f"dec{li}_c_bkv", jnp.zeros((1, 2 * H))),
            (f"dec{li}_c_bo", jnp.zeros((1, H))),
            (f"dec{li}_c_lng", jnp.ones((1, H))),
            (f"dec{li}_c_lnb", jnp.zeros((1, H))),
            (f"dec{li}_bup", jnp.zeros((1, I))),
            (f"dec{li}_bdn", jnp.zeros((1, H))),
            (f"dec{li}_ln2g", jnp.ones((1, H))),
            (f"dec{li}_ln2b", jnp.zeros((1, H))),
        ]

    # embeddings + MLM head (tied word embedding; vocab padded to 128 lanes, padded
    # rows are zero and never match a real token id in the one-hot lookup)
    ke1, ke2, ke3 = jax.random.split(kemb, 3)
    word_emb = jax.random.normal(ke1, (Vn, H), jnp.float32) * 0.02
    word_emb_pad = jnp.zeros((VP, H), jnp.float32).at[:Vn, :].set(word_emb)
    w_entries += [
        ("word_emb", word_emb_pad),          # [VP, H] for the one-hot lookup
        ("word_emb_T", word_emb_pad.T),      # [H, VP] pre-transposed for the logits matmul
        ("head_tw", dense(khead, H, H)),
    ]
    v_entries += [
        ("type_row", (jax.random.normal(ke3, (2, H), jnp.float32) * 0.02)[0:1, :]),
        ("emb_lng", jnp.ones((1, H))),
        ("emb_lnb", jnp.zeros((1, H))),
        ("head_tb", jnp.zeros((1, H))),
        ("head_lng", jnp.ones((1, H))),
        ("head_lnb", jnp.zeros((1, H))),
        ("head_bias", jnp.zeros((1, VP))),
    ]

    wbank, widx = _pack_rows(w_entries)
    vbank, vidx = _pack_rows(v_entries)
    pos_emb = jax.random.normal(ke2, (cfg.max_pos, H), jnp.float32) * 0.02

    params = {"wbank": wbank, "vbank": vbank, "pos_emb": pos_emb}   # arrays only (jit-traced)
    meta = {"widx": widx, "vidx": vidx}                             # static offsets (closure)
    return params, meta


# ----------------------------------------------------------------------------- forward
def nlp_model_forward(params, meta, encoder_inputs, decoder_input_ids, cfg):
    """encoder_inputs: [B, Se, H] float video embeddings (IdentityEmbedding passthrough);
    decoder_input_ids: [B, Sd] int32 tokens.  Returns MLM logits [B, Sd, vocab]."""
    B, Se, H = encoder_inputs.shape
    Sd = decoder_input_ids.shape[1]

    enc2 = encoder_inputs.astype(jnp.float32).reshape(B * Se, H)
    ids2 = decoder_input_ids.astype(jnp.int32).reshape(B * Sd, 1)
    pos2 = jnp.tile(params["pos_emb"][:Sd], (B, 1))                 # host-side pre-broadcast

    kernel = functools.partial(
        _model_kernel, batch=B, se=Se, sd=Sd,
        num_heads=cfg.num_heads, head_dim=H // cfg.num_heads,
        vocab_pad=cfg.vocab_pad, num_layers=cfg.num_layers,
        widx=meta["widx"], vidx=meta["vidx"])

    arrays = (enc2, ids2, pos2, params["wbank"], params["vbank"])
    out_shape = jax.ShapeDtypeStruct((B * Sd, cfg.vocab_pad), jnp.float32)

    logits_pad = pl.pallas_call(
        kernel,
        out_shape=out_shape,
        grid=(1,),                                                  # whole model = one grid step
        in_specs=[pl.BlockSpec(a.shape, lambda i, n=a.ndim: (0,) * n) for a in arrays],
        out_specs=pl.BlockSpec(out_shape.shape, lambda i: (0, 0)),
        compiler_params=pltpu.CompilerParams(dimension_semantics=("arbitrary",)),
    )(*arrays)

    return logits_pad[:, :cfg.vocab].reshape(B, Sd, cfg.vocab)


# ----------------------------------------------------------------------------- main
if __name__ == "__main__":
    cfg = Config()
    B, Se, Sd = 2, 8, 8

    key = jax.random.PRNGKey(0)
    kp, ke, kd = jax.random.split(key, 3)
    params, meta = init_params(kp, cfg)
    encoder_inputs = jax.random.normal(ke, (B, Se, cfg.hidden), jnp.float32)
    decoder_inputs = jax.random.randint(kd, (B, Sd), 0, cfg.vocab, dtype=jnp.int32)

    fwd = jax.jit(lambda p, e, di: nlp_model_forward(p, meta, e, di, cfg))
    logits = fwd(params, encoder_inputs, decoder_inputs)
    jax.block_until_ready(logits)
    assert logits.shape == (B, Sd, cfg.vocab)
    assert bool(jnp.all(jnp.isfinite(logits)))
    print("KERNEL_OK")
</pallas_src>

<mosaic_0001>
module attributes {stable_mosaic.version = 11 : i64} {
  func.func @_model_kernel(%arg0: i32, %arg1: memref<16x32xf32, #tpu.memory_space<vmem>>, %arg2: memref<16x1xi32, #tpu.memory_space<vmem>>, %arg3: memref<16x32xf32, #tpu.memory_space<vmem>>, %arg4: memref<1024x128xf32, #tpu.memory_space<vmem>>, %arg5: memref<56x128xf32, #tpu.memory_space<vmem>>, %arg6: memref<16x128xf32, #tpu.memory_space<vmem>>) attributes {dimension_semantics = [#tpu.dimension_semantics<arbitrary>], iteration_bounds = array<i64: 1>, scalar_prefetch = 0 : i64, scratch_operands = 0 : i64, tpu.core_type = #tpu.core_type<tc>, window_params = [{pipeline_mode = #tpu.pipeline_mode<synchronous>, transform_indices = @transform_0, window_bounds = array<i64: 16, 32>}, {pipeline_mode = #tpu.pipeline_mode<synchronous>, transform_indices = @transform_1, window_bounds = array<i64: 16, 1>}, {pipeline_mode = #tpu.pipeline_mode<synchronous>, transform_indices = @transform_2, window_bounds = array<i64: 16, 32>}, {pipeline_mode = #tpu.pipeline_mode<synchronous>, transform_indices = @transform_3, window_bounds = array<i64: 1024, 128>}, {pipeline_mode = #tpu.pipeline_mode<synchronous>, transform_indices = @transform_4, window_bounds = array<i64: 56, 128>}, {pipeline_mode = #tpu.pipeline_mode<synchronous>, transform_indices = @transform_5, window_bounds = array<i64: 16, 128>}]} {
    %0 = tpu.iota {dimensions = array<i32: 0>} : vector<8x8xi32>
    %1 = tpu.iota {dimensions = array<i32: 1>} : vector<8x8xi32>
    %2 = arith.cmpi sge, %0, %1 : vector<8x8xi32>
    %cst = arith.constant 0.000000e+00 : f32
    %cst_0 = arith.constant -1.000000e+04 : f32
    %3 = vector.broadcast %cst : f32 to vector<8x8xf32>
    %4 = vector.broadcast %cst_0 : f32 to vector<8x8xf32>
    %5 = arith.select %2, %3, %4 : vector<8x8xi1>, vector<8x8xf32>
    %6 = vector.shape_cast %5 : vector<8x8xf32> to vector<1x8x8xf32>
    %c0 = arith.constant 0 : index
    %c0_1 = arith.constant 0 : index
    %7 = vector.load %arg1[%c0, %c0_1] : memref<16x32xf32, #tpu.memory_space<vmem>>, vector<16x32xf32>
    %c0_2 = arith.constant 0 : index
    %c0_3 = arith.constant 0 : index
    %8 = vector.load %arg4[%c0_2, %c0_3] : memref<1024x128xf32, #tpu.memory_space<vmem>>, vector<32x96xf32>
    %cst_4 = arith.constant dense<0.000000e+00> : vector<16x96xf32>
    %9 = tpu.matmul %7, %8, %cst_4 {dimension_numbers = #tpu.dot_dimension_numbers<[1], [0], [0], [1], [0, 0, 1, 1], [], []>} : vector<16x32xf32>, vector<32x96xf32>, vector<16x96xf32> -> vector<16x96xf32>
    %c0_5 = arith.constant 0 : index
    %c0_6 = arith.constant 0 : index
    %10 = vector.load %arg5[%c0_5, %c0_6] : memref<56x128xf32, #tpu.memory_space<vmem>>, vector<1x96xf32>
    %11 = vector.broadcast %10 : vector<1x96xf32> to vector<16x96xf32>
    %12 = arith.addf %9, %11 : vector<16x96xf32>
    %13 = vector.extract_strided_slice %12 {offsets = [0, 0], sizes = [16, 32], strides = [1, 1]} : vector<16x96xf32> to vector<16x32xf32>
    %14 = vector.extract_strided_slice %12 {offsets = [0, 32], sizes = [16, 32], strides = [1, 1]} : vector<16x96xf32> to vector<16x32xf32>
    %15 = vector.extract_strided_slice %12 {offsets = [0, 64], sizes = [16, 32], strides = [1, 1]} : vector<16x96xf32> to vector<16x32xf32>
    %c32 = arith.constant 32 : index
    %c0_7 = arith.constant 0 : index
    %16 = vector.load %arg4[%c32, %c0_7] : memref<1024x128xf32, #tpu.memory_space<vmem>>, vector<32x32xf32>
    %c1 = arith.constant 1 : index
    %c0_8 = arith.constant 0 : index
    %17 = vector.load %arg5[%c1, %c0_8] : memref<56x128xf32, #tpu.memory_space<vmem>>, vector<1x32xf32>
    %18 = vector.extract_strided_slice %13 {offsets = [0, 0], sizes = [16, 8], strides = [1, 1]} : vector<16x32xf32> to vector<16x8xf32>
    %19 = vector.shape_cast %18 : vector<16x8xf32> to vector<2x8x8xf32>
    %20 = vector.extract_strided_slice %14 {offsets = [0, 0], sizes = [16, 8], strides = [1, 1]} : vector<16x32xf32> to vector<16x8xf32>
    %21 = vector.shape_cast %20 : vector<16x8xf32> to vector<2x8x8xf32>
    %22 = vector.extract_strided_slice %15 {offsets = [0, 0], sizes = [16, 8], strides = [1, 1]} : vector<16x32xf32> to vector<16x8xf32>
    %23 = vector.shape_cast %22 : vector<16x8xf32> to vector<2x8x8xf32>
    "tpu.trace_start"() <{level = 10 : i32, message = "bqd,bkd->bqk"}> : () -> ()
    %cst_9 = arith.constant dense<0.000000e+00> : vector<2x8x8xf32>
    %24 = tpu.matmul %19, %21, %cst_9 {dimension_numbers = #tpu.dot_dimension_numbers<[2], [2], [1], [1], [0, 0, 0, 1, 1, 1], [0], [0]>} : vector<2x8x8xf32>, vector<2x8x8xf32>, vector<2x8x8xf32> -> vector<2x8x8xf32>
    "tpu.trace_stop"() : () -> ()
    %cst_10 = arith.constant 0.353553385 : f32
    %25 = vector.broadcast %cst_10 : f32 to vector<2x8x8xf32>
    %26 = arith.mulf %24, %25 : vector<2x8x8xf32>
    %cst_11 = arith.constant dense<0xFF800000> : vector<2x8xf32>
    %27 = vector.multi_reduction <maximumf>, %26, %cst_11 [2] : vector<2x8x8xf32> to vector<2x8xf32>
    %28 = vector.shape_cast %27 : vector<2x8xf32> to vector<2x8x1xf32>
    %29 = vector.broadcast %28 : vector<2x8x1xf32> to vector<2x8x8xf32>
    %30 = arith.subf %26, %29 : vector<2x8x8xf32>
    %31 = math.exp %30 : vector<2x8x8xf32>
    %cst_12 = arith.constant dense<0.000000e+00> : vector<2x8xf32>
    %32 = vector.multi_reduction <add>, %31, %cst_12 [2] : vector<2x8x8xf32> to vector<2x8xf32>
    %33 = vector.shape_cast %32 : vector<2x8xf32> to vector<2x8x1xf32>
    %34 = tpu.reciprocal %33 {approx = true} : vector<2x8x1xf32> -> vector<2x8x1xf32>
    %35 = vector.broadcast %34 : vector<2x8x1xf32> to vector<2x8x8xf32>
    %36 = arith.mulf %31, %35 : vector<2x8x8xf32>
    "tpu.trace_start"() <{level = 10 : i32, message = "bqk,bkd->bqd"}> : () -> ()
    %cst_13 = arith.constant dense<0.000000e+00> : vector<2x8x8xf32>
    %37 = tpu.matmul %36, %23, %cst_13 {dimension_numbers = #tpu.dot_dimension_numbers<[2], [1], [1], [2], [0, 0, 0, 1, 1, 2], [0], [0]>} : vector<2x8x8xf32>, vector<2x8x8xf32>, vector<2x8x8xf32> -> vector<2x8x8xf32>
    "tpu.trace_stop"() : () -> ()
    %38 = vector.shape_cast %37 : vector<2x8x8xf32> to vector<16x8xf32>
    %39 = vector.extract_strided_slice %13 {offsets = [0, 8], sizes = [16, 8], strides = [1, 1]} : vector<16x32xf32> to vector<16x8xf32>
    %40 = vector.shape_cast %39 : vector<16x8xf32> to vector<2x8x8xf32>
    %41 = vector.extract_strided_slice %14 {offsets = [0, 8], sizes = [16, 8], strides = [1, 1]} : vector<16x32xf32> to vector<16x8xf32>
    %42 = vector.shape_cast %41 : vector<16x8xf32> to vector<2x8x8xf32>
    %43 = vector.extract_strided_slice %15 {offsets = [0, 8], sizes = [16, 8], strides = [1, 1]} : vector<16x32xf32> to vector<16x8xf32>
    %44 = vector.shape_cast %43 : vector<16x8xf32> to vector<2x8x8xf32>
    "tpu.trace_start"() <{level = 10 : i32, message = "bqd,bkd->bqk"}> : () -> ()
    %cst_14 = arith.constant dense<0.000000e+00> : vector<2x8x8xf32>
    %45 = tpu.matmul %40, %42, %cst_14 {dimension_numbers = #tpu.dot_dimension_numbers<[2], [2], [1], [1], [0, 0, 0, 1, 1, 1], [0], [0]>} : vector<2x8x8xf32>, vector<2x8x8xf32>, vector<2x8x8xf32> -> vector<2x8x8xf32>
    "tpu.trace_stop"() : () -> ()
    %cst_15 = arith.constant 0.353553385 : f32
    %46 = vector.broadcast %cst_15 : f32 to vector<2x8x8xf32>
    %47 = arith.mulf %45, %46 : vector<2x8x8xf32>
    %cst_16 = arith.constant dense<0xFF800000> : vector<2x8xf32>
    %48 = vector.multi_reduction <maximumf>, %47, %cst_16 [2] : vector<2x8x8xf32> to vector<2x8xf32>
    %49 = vector.shape_cast %48 : vector<2x8xf32> to vector<2x8x1xf32>
    %50 = vector.broadcast %49 : vector<2x8x1xf32> to vector<2x8x8xf32>
    %51 = arith.subf %47, %50 : vector<2x8x8xf32>
    %52 = math.exp %51 : vector<2x8x8xf32>
    %cst_17 = arith.constant dense<0.000000e+00> : vector<2x8xf32>
    %53 = vector.multi_reduction <add>, %52, %cst_17 [2] : vector<2x8x8xf32> to vector<2x8xf32>
    %54 = vector.shape_cast %53 : vector<2x8xf32> to vector<2x8x1xf32>
    %55 = tpu.reciprocal %54 {approx = true} : vector<2x8x1xf32> -> vector<2x8x1xf32>
    %56 = vector.broadcast %55 : vector<2x8x1xf32> to vector<2x8x8xf32>
    %57 = arith.mulf %52, %56 : vector<2x8x8xf32>
    "tpu.trace_start"() <{level = 10 : i32, message = "bqk,bkd->bqd"}> : () -> ()
    %cst_18 = arith.constant dense<0.000000e+00> : vector<2x8x8xf32>
    %58 = tpu.matmul %57, %44, %cst_18 {dimension_numbers = #tpu.dot_dimension_numbers<[2], [1], [1], [2], [0, 0, 0, 1, 1, 2], [0], [0]>} : vector<2x8x8xf32>, vector<2x8x8xf32>, vector<2x8x8xf32> -> vector<2x8x8xf32>
    "tpu.trace_stop"() : () -> ()
    %59 = vector.shape_cast %58 : vector<2x8x8xf32> to vector<16x8xf32>
    %60 = vector.extract_strided_slice %13 {offsets = [0, 16], sizes = [16, 8], strides = [1, 1]} : vector<16x32xf32> to vector<16x8xf32>
    %61 = vector.shape_cast %60 : vector<16x8xf32> to vector<2x8x8xf32>
    %62 = vector.extract_strided_slice %14 {offsets = [0, 16], sizes = [16, 8], strides = [1, 1]} : vector<16x32xf32> to vector<16x8xf32>
    %63 = vector.shape_cast %62 : vector<16x8xf32> to vector<2x8x8xf32>
    %64 = vector.extract_strided_slice %15 {offsets = [0, 16], sizes = [16, 8], strides = [1, 1]} : vector<16x32xf32> to vector<16x8xf32>
    %65 = vector.shape_cast %64 : vector<16x8xf32> to vector<2x8x8xf32>
    "tpu.trace_start"() <{level = 10 : i32, message = "bqd,bkd->bqk"}> : () -> ()
    %cst_19 = arith.constant dense<0.000000e+00> : vector<2x8x8xf32>
    %66 = tpu.matmul %61, %63, %cst_19 {dimension_numbers = #tpu.dot_dimension_numbers<[2], [2], [1], [1], [0, 0, 0, 1, 1, 1], [0], [0]>} : vector<2x8x8xf32>, vector<2x8x8xf32>, vector<2x8x8xf32> -> vector<2x8x8xf32>
    "tpu.trace_stop"() : () -> ()
    %cst_20 = arith.constant 0.353553385 : f32
    %67 = vector.broadcast %cst_20 : f32 to vector<2x8x8xf32>
    %68 = arith.mulf %66, %67 : vector<2x8x8xf32>
    %cst_21 = arith.constant dense<0xFF800000> : vector<2x8xf32>
    %69 = vector.multi_reduction <maximumf>, %68, %cst_21 [2] : vector<2x8x8xf32> to vector<2x8xf32>
    %70 = vector.shape_cast %69 : vector<2x8xf32> to vector<2x8x1xf32>
    %71 = vector.broadcast %70 : vector<2x8x1xf32> to vector<2x8x8xf32>
    %72 = arith.subf %68, %71 : vector<2x8x8xf32>
    %73 = math.exp %72 : vector<2x8x8xf32>
    %cst_22 = arith.constant dense<0.000000e+00> : vector<2x8xf32>
    %74 = vector.multi_reduction <add>, %73, %cst_22 [2] : vector<2x8x8xf32> to vector<2x8xf32>
    %75 = vector.shape_cast %74 : vector<2x8xf32> to vector<2x8x1xf32>
    %76 = tpu.reciprocal %75 {approx = true} : vector<2x8x1xf32> -> vector<2x8x1xf32>
    %77 = vector.broadcast %76 : vector<2x8x1xf32> to vector<2x8x8xf32>
    %78 = arith.mulf %73, %77 : vector<2x8x8xf32>
    "tpu.trace_start"() <{level = 10 : i32, message = "bqk,bkd->bqd"}> : () -> ()
    %cst_23 = arith.constant dense<0.000000e+00> : vector<2x8x8xf32>
    %79 = tpu.matmul %78, %65, %cst_23 {dimension_numbers = #tpu.dot_dimension_numbers<[2], [1], [1], [2], [0, 0, 0, 1, 1, 2], [0], [0]>} : vector<2x8x8xf32>, vector<2x8x8xf32>, vector<2x8x8xf32> -> vector<2x8x8xf32>
    "tpu.trace_stop"() : () -> ()
    %80 = vector.shape_cast %79 : vector<2x8x8xf32> to vector<16x8xf32>
    %81 = vector.extract_strided_slice %13 {offsets = [0, 24], sizes = [16, 8], strides = [1, 1]} : vector<16x32xf32> to vector<16x8xf32>
    %82 = vector.shape_cast %81 : vector<16x8xf32> to vector<2x8x8xf32>
    %83 = vector.extract_strided_slice %14 {offsets = [0, 24], sizes = [16, 8], strides = [1, 1]} : vector<16x32xf32> to vector<16x8xf32>
    %84 = vector.shape_cast %83 : vector<16x8xf32> to vector<2x8x8xf32>
    %85 = vector.extract_strided_slice %15 {offsets = [0, 24], sizes = [16, 8], strides = [1, 1]} : vector<16x32xf32> to vector<16x8xf32>
    %86 = vector.shape_cast %85 : vector<16x8xf32> to vector<2x8x8xf32>
    "tpu.trace_start"() <{level = 10 : i32, message = "bqd,bkd->bqk"}> : () -> ()
    %cst_24 = arith.constant dense<0.000000e+00> : vector<2x8x8xf32>
    %87 = tpu.matmul %82, %84, %cst_24 {dimension_numbers = #tpu.dot_dimension_numbers<[2], [2], [1], [1], [0, 0, 0, 1, 1, 1], [0], [0]>} : vector<2x8x8xf32>, vector<2x8x8xf32>, vector<2x8x8xf32> -> vector<2x8x8xf32>
    "tpu.trace_stop"() : () -> ()
    %cst_25 = arith.constant 0.353553385 : f32
    %88 = vector.broadcast %cst_25 : f32 to vector<2x8x8xf32>
    %89 = arith.mulf %87, %88 : vector<2x8x8xf32>
    %cst_26 = arith.constant dense<0xFF800000> : vector<2x8xf32>
    %90 = vector.multi_reduction <maximumf>, %89, %cst_26 [2] : vector<2x8x8xf32> to vector<2x8xf32>
    %91 = vector.shape_cast %90 : vector<2x8xf32> to vector<2x8x1xf32>
    %92 = vector.broadcast %91 : vector<2x8x1xf32> to vector<2x8x8xf32>
    %93 = arith.subf %89, %92 : vector<2x8x8xf32>
    %94 = math.exp %93 : vector<2x8x8xf32>
    %cst_27 = arith.constant dense<0.000000e+00> : vector<2x8xf32>
    %95 = vector.multi_reduction <add>, %94, %cst_27 [2] : vector<2x8x8xf32> to vector<2x8xf32>
    %96 = vector.shape_cast %95 : vector<2x8xf32> to vector<2x8x1xf32>
    %97 = tpu.reciprocal %96 {approx = true} : vector<2x8x1xf32> -> vector<2x8x1xf32>
    %98 = vector.broadcast %97 : vector<2x8x1xf32> to vector<2x8x8xf32>
    %99 = arith.mulf %94, %98 : vector<2x8x8xf32>
    "tpu.trace_start"() <{level = 10 : i32, message = "bqk,bkd->bqd"}> : () -> ()
    %cst_28 = arith.constant dense<0.000000e+00> : vector<2x8x8xf32>
    %100 = tpu.matmul %99, %86, %cst_28 {dimension_numbers = #tpu.dot_dimension_numbers<[2], [1], [1], [2], [0, 0, 0, 1, 1, 2], [0], [0]>} : vector<2x8x8xf32>, vector<2x8x8xf32>, vector<2x8x8xf32> -> vector<2x8x8xf32>
    "tpu.trace_stop"() : () -> ()
    %101 = vector.shape_cast %100 : vector<2x8x8xf32> to vector<16x8xf32>
    %102 = tpu.concatenate %38, %59, %80, %101 in 1 : vector<16x8xf32>, vector<16x8xf32>, vector<16x8xf32>, vector<16x8xf32> -> vector<16x32xf32>
    %cst_29 = arith.constant dense<0.000000e+00> : vector<16x32xf32>
    %103 = tpu.matmul %102, %16, %cst_29 {dimension_numbers = #tpu.dot_dimension_numbers<[1], [0], [0], [1], [0, 0, 1, 1], [], []>} : vector<16x32xf32>, vector<32x32xf32>, vector<16x32xf32> -> vector<16x32xf32>
    %104 = vector.broadcast %17 : vector<1x32xf32> to vector<16x32xf32>
    %105 = arith.addf %103, %104 : vector<16x32xf32>
    %106 = arith.addf %105, %7 : vector<16x32xf32>
    %c2 = arith.constant 2 : index
    %c0_30 = arith.constant 0 : index
    %107 = vector.load %arg5[%c2, %c0_30] : memref<56x128xf32, #tpu.memory_space<vmem>>, vector<1x32xf32>
    %c3 = arith.constant 3 : index
    %c0_31 = arith.constant 0 : index
    %108 = vector.load %arg5[%c3, %c0_31] : memref<56x128xf32, #tpu.memory_space<vmem>>, vector<1x32xf32>
    %cst_32 = arith.constant dense<0.000000e+00> : vector<16xf32>
    %109 = vector.multi_reduction <add>, %106, %cst_32 [1] : vector<16x32xf32> to vector<16xf32>
    %110 = vector.shape_cast %109 : vector<16xf32> to vector<16x1xf32>
    %cst_33 = arith.constant 3.200000e+01 : f32
    %111 = vector.broadcast %cst_33 : f32 to vector<16x1xf32>
    %112 = arith.divf %110, %111 : vector<16x1xf32>
    %113 = vector.broadcast %112 : vector<16x1xf32> to vector<16x32xf32>
    %114 = arith.subf %106, %113 : vector<16x32xf32>
    %115 = arith.mulf %114, %114 : vector<16x32xf32>
    %cst_34 = arith.constant dense<0.000000e+00> : vector<16xf32>
    %116 = vector.multi_reduction <add>, %115, %cst_34 [1] : vector<16x32xf32> to vector<16xf32>
    %117 = vector.shape_cast %116 : vector<16xf32> to vector<16x1xf32>
    %cst_35 = arith.constant 3.200000e+01 : f32
    %118 = vector.broadcast %cst_35 : f32 to vector<16x1xf32>
    %119 = arith.divf %117, %118 : vector<16x1xf32>
    %cst_36 = arith.constant 9.99999996E-13 : f32
    %120 = vector.broadcast %cst_36 : f32 to vector<16x1xf32>
    %121 = arith.addf %119, %120 : vector<16x1xf32>
    %122 = math.rsqrt %121 : vector<16x1xf32>
    %123 = vector.broadcast %122 : vector<16x1xf32> to vector<16x32xf32>
    %124 = arith.mulf %114, %123 : vector<16x32xf32>
    %125 = vector.broadcast %107 : vector<1x32xf32> to vector<16x32xf32>
    %126 = arith.mulf %124, %125 : vector<16x32xf32>
    %127 = vector.broadcast %108 : vector<1x32xf32> to vector<16x32xf32>
    %128 = arith.addf %126, %127 : vector<16x32xf32>
    %c64 = arith.constant 64 : index
    %c0_37 = arith.constant 0 : index
    %129 = vector.load %arg4[%c64, %c0_37] : memref<1024x128xf32, #tpu.memory_space<vmem>>, vector<32x64xf32>
    %cst_38 = arith.constant dense<0.000000e+00> : vector<16x64xf32>
    %130 = tpu.matmul %128, %129, %cst_38 {dimension_numbers = #tpu.dot_dimension_numbers<[1], [0], [0], [1], [0, 0, 1, 1], [], []>} : vector<16x32xf32>, vector<32x64xf32>, vector<16x64xf32> -> vector<16x64xf32>
    %c4 = arith.constant 4 : index
    %c0_39 = arith.constant 0 : index
    %131 = vector.load %arg5[%c4, %c0_39] : memref<56x128xf32, #tpu.memory_space<vmem>>, vector<1x64xf32>
    %132 = vector.broadcast %131 : vector<1x64xf32> to vector<16x64xf32>
    %133 = arith.addf %130, %132 : vector<16x64xf32>
    %cst_40 = arith.constant 5.000000e-01 : f32
    %134 = vector.broadcast %cst_40 : f32 to vector<16x64xf32>
    %135 = arith.mulf %134, %133 : vector<16x64xf32>
    %cst_41 = arith.constant 4.471500e-02 : f32
    %136 = vector.broadcast %cst_41 : f32 to vector<16x64xf32>
    %137 = arith.mulf %136, %133 : vector<16x64xf32>
    %138 = arith.mulf %137, %133 : vector<16x64xf32>
    %139 = arith.mulf %138, %133 : vector<16x64xf32>
    %140 = arith.addf %133, %139 : vector<16x64xf32>
    %cst_42 = arith.constant 0.797884583 : f32
    %141 = vector.broadcast %cst_42 : f32 to vector<16x64xf32>
    %142 = arith.mulf %141, %140 : vector<16x64xf32>
    %143 = math.tanh %142 : vector<16x64xf32>
    %cst_43 = arith.constant 1.000000e+00 : f32
    %144 = vector.broadcast %cst_43 : f32 to vector<16x64xf32>
    %145 = arith.addf %144, %143 : vector<16x64xf32>
    %146 = arith.mulf %135, %145 : vector<16x64xf32>
    %c96 = arith.constant 96 : index
    %c0_44 = arith.constant 0 : index
    %147 = vector.load %arg4[%c96, %c0_44] : memref<1024x128xf32, #tpu.memory_space<vmem>>, vector<64x32xf32>
    %cst_45 = arith.constant dense<0.000000e+00> : vector<16x32xf32>
    %148 = tpu.matmul %146, %147, %cst_45 {dimension_numbers = #tpu.dot_dimension_numbers<[1], [0], [0], [1], [0, 0, 1, 1], [], []>} : vector<16x64xf32>, vector<64x32xf32>, vector<16x32xf32> -> vector<16x32xf32>
    %c5 = arith.constant 5 : index
    %c0_46 = arith.constant 0 : index
    %149 = vector.load %arg5[%c5, %c0_46] : memref<56x128xf32, #tpu.memory_space<vmem>>, vector<1x32xf32>
    %150 = vector.broadcast %149 : vector<1x32xf32> to vector<16x32xf32>
    %151 = arith.addf %148, %150 : vector<16x32xf32>
    %152 = arith.addf %151, %128 : vector<16x32xf32>
    %c6 = arith.constant 6 : index
    %c0_47 = arith.constant 0 : index
    %153 = vector.load %arg5[%c6, %c0_47] : memref<56x128xf32, #tpu.memory_space<vmem>>, vector<1x32xf32>
    %c7 = arith.constant 7 : index
    %c0_48 = arith.constant 0 : index
    %154 = vector.load %arg5[%c7, %c0_48] : memref<56x128xf32, #tpu.memory_space<vmem>>, vector<1x32xf32>
    %cst_49 = arith.constant dense<0.000000e+00> : vector<16xf32>
    %155 = vector.multi_reduction <add>, %152, %cst_49 [1] : vector<16x32xf32> to vector<16xf32>
    %156 = vector.shape_cast %155 : vector<16xf32> to vector<16x1xf32>
    %cst_50 = arith.constant 3.200000e+01 : f32
    %157 = vector.broadcast %cst_50 : f32 to vector<16x1xf32>
    %158 = arith.divf %156, %157 : vector<16x1xf32>
    %159 = vector.broadcast %158 : vector<16x1xf32> to vector<16x32xf32>
    %160 = arith.subf %152, %159 : vector<16x32xf32>
    %161 = arith.mulf %160, %160 : vector<16x32xf32>
    %cst_51 = arith.constant dense<0.000000e+00> : vector<16xf32>
    %162 = vector.multi_reduction <add>, %161, %cst_51 [1] : vector<16x32xf32> to vector<16xf32>
    %163 = vector.shape_cast %162 : vector<16xf32> to vector<16x1xf32>
    %cst_52 = arith.constant 3.200000e+01 : f32
    %164 = vector.broadcast %cst_52 : f32 to vector<16x1xf32>
    %165 = arith.divf %163, %164 : vector<16x1xf32>
    %cst_53 = arith.constant 9.99999996E-13 : f32
    %166 = vector.broadcast %cst_53 : f32 to vector<16x1xf32>
    %167 = arith.addf %165, %166 : vector<16x1xf32>
    %168 = math.rsqrt %167 : vector<16x1xf32>
    %169 = vector.broadcast %168 : vector<16x1xf32> to vector<16x32xf32>
    %170 = arith.mulf %160, %169 : vector<16x32xf32>
    %171 = vector.broadcast %153 : vector<1x32xf32> to vector<16x32xf32>
    %172 = arith.mulf %170, %171 : vector<16x32xf32>
    %173 = vector.broadcast %154 : vector<1x32xf32> to vector<16x32xf32>
    %174 = arith.addf %172, %173 : vector<16x32xf32>
    %c160 = arith.constant 160 : index
    %c0_54 = arith.constant 0 : index
    %175 = vector.load %arg4[%c160, %c0_54] : memref<1024x128xf32, #tpu.memory_space<vmem>>, vector<32x96xf32>
    %cst_55 = arith.constant dense<0.000000e+00> : vector<16x96xf32>
    %176 = tpu.matmul %174, %175, %cst_55 {dimension_numbers = #tpu.dot_dimension_numbers<[1], [0], [0], [1], [0, 0, 1, 1], [], []>} : vector<16x32xf32>, vector<32x96xf32>, vector<16x96xf32> -> vector<16x96xf32>
    %c8 = arith.constant 8 : index
    %c0_56 = arith.constant 0 : index
    %177 = vector.load %arg5[%c8, %c0_56] : memref<56x128xf32, #tpu.memory_space<vmem>>, vector<1x96xf32>
    %178 = vector.broadcast %177 : vector<1x96xf32> to vector<16x96xf32>
    %179 = arith.addf %176, %178 : vector<16x96xf32>
    %180 = vector.extract_strided_slice %179 {offsets = [0, 0], sizes = [16, 32], strides = [1, 1]} : vector<16x96xf32> to vector<16x32xf32>
    %181 = vector.extract_strided_slice %179 {offsets = [0, 32], sizes = [16, 32], strides = [1, 1]} : vector<16x96xf32> to vector<16x32xf32>
    %182 = vector.extract_strided_slice %179 {offsets = [0, 64], sizes = [16, 32], strides = [1, 1]} : vector<16x96xf32> to vector<16x32xf32>
    %c192 = arith.constant 192 : index
    %c0_57 = arith.constant 0 : index
    %183 = vector.load %arg4[%c192, %c0_57] : memref<1024x128xf32, #tpu.memory_space<vmem>>, vector<32x32xf32>
    %c9 = arith.constant 9 : index
    %c0_58 = arith.constant 0 : index
    %184 = vector.load %arg5[%c9, %c0_58] : memref<56x128xf32, #tpu.memory_space<vmem>>, vector<1x32xf32>
    %185 = vector.extract_strided_slice %180 {offsets = [0, 0], sizes = [16, 8], strides = [1, 1]} : vector<16x32xf32> to vector<16x8xf32>
    %186 = vector.shape_cast %185 : vector<16x8xf32> to vector<2x8x8xf32>
    %187 = vector.extract_strided_slice %181 {offsets = [0, 0], sizes = [16, 8], strides = [1, 1]} : vector<16x32xf32> to vector<16x8xf32>
    %188 = vector.shape_cast %187 : vector<16x8xf32> to vector<2x8x8xf32>
    %189 = vector.extract_strided_slice %182 {offsets = [0, 0], sizes = [16, 8], strides = [1, 1]} : vector<16x32xf32> to vector<16x8xf32>
    %190 = vector.shape_cast %189 : vector<16x8xf32> to vector<2x8x8xf32>
    "tpu.trace_start"() <{level = 10 : i32, message = "bqd,bkd->bqk"}> : () -> ()
    %cst_59 = arith.constant dense<0.000000e+00> : vector<2x8x8xf32>
    %191 = tpu.matmul %186, %188, %cst_59 {dimension_numbers = #tpu.dot_dimension_numbers<[2], [2], [1], [1], [0, 0, 0, 1, 1, 1], [0], [0]>} : vector<2x8x8xf32>, vector<2x8x8xf32>, vector<2x8x8xf32> -> vector<2x8x8xf32>
    "tpu.trace_stop"() : () -> ()
    %cst_60 = arith.constant 0.353553385 : f32
    %192 = vector.broadcast %cst_60 : f32 to vector<2x8x8xf32>
    %193 = arith.mulf %191, %192 : vector<2x8x8xf32>
    %cst_61 = arith.constant dense<0xFF800000> : vector<2x8xf32>
    %194 = vector.multi_reduction <maximumf>, %193, %cst_61 [2] : vector<2x8x8xf32> to vector<2x8xf32>
    %195 = vector.shape_cast %194 : vector<2x8xf32> to vector<2x8x1xf32>
    %196 = vector.broadcast %195 : vector<2x8x1xf32> to vector<2x8x8xf32>
    %197 = arith.subf %193, %196 : vector<2x8x8xf32>
    %198 = math.exp %197 : vector<2x8x8xf32>
    %cst_62 = arith.constant dense<0.000000e+00> : vector<2x8xf32>
    %199 = vector.multi_reduction <add>, %198, %cst_62 [2] : vector<2x8x8xf32> to vector<2x8xf32>
    %200 = vector.shape_cast %199 : vector<2x8xf32> to vector<2x8x1xf32>
    %201 = tpu.reciprocal %200 {approx = true} : vector<2x8x1xf32> -> vector<2x8x1xf32>
    %202 = vector.broadcast %201 : vector<2x8x1xf32> to vector<2x8x8xf32>
    %203 = arith.mulf %198, %202 : vector<2x8x8xf32>
    "tpu.trace_start"() <{level = 10 : i32, message = "bqk,bkd->bqd"}> : () -> ()
    %cst_63 = arith.constant dense<0.000000e+00> : vector<2x8x8xf32>
    %204 = tpu.matmul %203, %190, %cst_63 {dimension_numbers = #tpu.dot_dimension_numbers<[2], [1], [1], [2], [0, 0, 0, 1, 1, 2], [0], [0]>} : vector<2x8x8xf32>, vector<2x8x8xf32>, vector<2x8x8xf32> -> vector<2x8x8xf32>
    "tpu.trace_stop"() : () -> ()
    %205 = vector.shape_cast %204 : vector<2x8x8xf32> to vector<16x8xf32>
    %206 = vector.extract_strided_slice %180 {offsets = [0, 8], sizes = [16, 8], strides = [1, 1]} : vector<16x32xf32> to vector<16x8xf32>
    %207 = vector.shape_cast %206 : vector<16x8xf32> to vector<2x8x8xf32>
    %208 = vector.extract_strided_slice %181 {offsets = [0, 8], sizes = [16, 8], strides = [1, 1]} : vector<16x32xf32> to vector<16x8xf32>
    %209 = vector.shape_cast %208 : vector<16x8xf32> to vector<2x8x8xf32>
    %210 = vector.extract_strided_slice %182 {offsets = [0, 8], sizes = [16, 8], strides = [1, 1]} : vector<16x32xf32> to vector<16x8xf32>
    %211 = vector.shape_cast %210 : vector<16x8xf32> to vector<2x8x8xf32>
    "tpu.trace_start"() <{level = 10 : i32, message = "bqd,bkd->bqk"}> : () -> ()
    %cst_64 = arith.constant dense<0.000000e+00> : vector<2x8x8xf32>
    %212 = tpu.matmul %207, %209, %cst_64 {dimension_numbers = #tpu.dot_dimension_numbers<[2], [2], [1], [1], [0, 0, 0, 1, 1, 1], [0], [0]>} : vector<2x8x8xf32>, vector<2x8x8xf32>, vector<2x8x8xf32> -> vector<2x8x8xf32>
    "tpu.trace_stop"() : () -> ()
    %cst_65 = arith.constant 0.353553385 : f32
    %213 = vector.broadcast %cst_65 : f32 to vector<2x8x8xf32>
    %214 = arith.mulf %212, %213 : vector<2x8x8xf32>
    %cst_66 = arith.constant dense<0xFF800000> : vector<2x8xf32>
    %215 = vector.multi_reduction <maximumf>, %214, %cst_66 [2] : vector<2x8x8xf32> to vector<2x8xf32>
    %216 = vector.shape_cast %215 : vector<2x8xf32> to vector<2x8x1xf32>
    %217 = vector.broadcast %216 : vector<2x8x1xf32> to vector<2x8x8xf32>
    %218 = arith.subf %214, %217 : vector<2x8x8xf32>
    %219 = math.exp %218 : vector<2x8x8xf32>
    %cst_67 = arith.constant dense<0.000000e+00> : vector<2x8xf32>
    %220 = vector.multi_reduction <add>, %219, %cst_67 [2] : vector<2x8x8xf32> to vector<2x8xf32>
    %221 = vector.shape_cast %220 : vector<2x8xf32> to vector<2x8x1xf32>
    %222 = tpu.reciprocal %221 {approx = true} : vector<2x8x1xf32> -> vector<2x8x1xf32>
    %223 = vector.broadcast %222 : vector<2x8x1xf32> to vector<2x8x8xf32>
    %224 = arith.mulf %219, %223 : vector<2x8x8xf32>
    "tpu.trace_start"() <{level = 10 : i32, message = "bqk,bkd->bqd"}> : () -> ()
    %cst_68 = arith.constant dense<0.000000e+00> : vector<2x8x8xf32>
    %225 = tpu.matmul %224, %211, %cst_68 {dimension_numbers = #tpu.dot_dimension_numbers<[2], [1], [1], [2], [0, 0, 0, 1, 1, 2], [0], [0]>} : vector<2x8x8xf32>, vector<2x8x8xf32>, vector<2x8x8xf32> -> vector<2x8x8xf32>
    "tpu.trace_stop"() : () -> ()
    %226 = vector.shape_cast %225 : vector<2x8x8xf32> to vector<16x8xf32>
    %227 = vector.extract_strided_slice %180 {offsets = [0, 16], sizes = [16, 8], strides = [1, 1]} : vector<16x32xf32> to vector<16x8xf32>
    %228 = vector.shape_cast %227 : vector<16x8xf32> to vector<2x8x8xf32>
    %229 = vector.extract_strided_slice %181 {offsets = [0, 16], sizes = [16, 8], strides = [1, 1]} : vector<16x32xf32> to vector<16x8xf32>
    %230 = vector.shape_cast %229 : vector<16x8xf32> to vector<2x8x8xf32>
    %231 = vector.extract_strided_slice %182 {offsets = [0, 16], sizes = [16, 8], strides = [1, 1]} : vector<16x32xf32> to vector<16x8xf32>
    %232 = vector.shape_cast %231 : vector<16x8xf32> to vector<2x8x8xf32>
    "tpu.trace_start"() <{level = 10 : i32, message = "bqd,bkd->bqk"}> : () -> ()
    %cst_69 = arith.constant dense<0.000000e+00> : vector<2x8x8xf32>
    %233 = tpu.matmul %228, %230, %cst_69 {dimension_numbers = #tpu.dot_dimension_numbers<[2], [2], [1], [1], [0, 0, 0, 1, 1, 1], [0], [0]>} : vector<2x8x8xf32>, vector<2x8x8xf32>, vector<2x8x8xf32> -> vector<2x8x8xf32>
    "tpu.trace_stop"() : () -> ()
    %cst_70 = arith.constant 0.353553385 : f32
    %234 = vector.broadcast %cst_70 : f32 to vector<2x8x8xf32>
    %235 = arith.mulf %233, %234 : vector<2x8x8xf32>
    %cst_71 = arith.constant dense<0xFF800000> : vector<2x8xf32>
    %236 = vector.multi_reduction <maximumf>, %235, %cst_71 [2] : vector<2x8x8xf32> to vector<2x8xf32>
    %237 = vector.shape_cast %236 : vector<2x8xf32> to vector<2x8x1xf32>
    %238 = vector.broadcast %237 : vector<2x8x1xf32> to vector<2x8x8xf32>
    %239 = arith.subf %235, %238 : vector<2x8x8xf32>
    %240 = math.exp %239 : vector<2x8x8xf32>
    %cst_72 = arith.constant dense<0.000000e+00> : vector<2x8xf32>
    %241 = vector.multi_reduction <add>, %240, %cst_72 [2] : vector<2x8x8xf32> to vector<2x8xf32>
    %242 = vector.shape_cast %241 : vector<2x8xf32> to vector<2x8x1xf32>
    %243 = tpu.reciprocal %242 {approx = true} : vector<2x8x1xf32> -> vector<2x8x1xf32>
    %244 = vector.broadcast %243 : vector<2x8x1xf32> to vector<2x8x8xf32>
    %245 = arith.mulf %240, %244 : vector<2x8x8xf32>
    "tpu.trace_start"() <{level = 10 : i32, message = "bqk,bkd->bqd"}> : () -> ()
    %cst_73 = arith.constant dense<0.000000e+00> : vector<2x8x8xf32>
    %246 = tpu.matmul %245, %232, %cst_73 {dimension_numbers = #tpu.dot_dimension_numbers<[2], [1], [1], [2], [0, 0, 0, 1, 1, 2], [0], [0]>} : vector<2x8x8xf32>, vector<2x8x8xf32>, vector<2x8x8xf32> -> vector<2x8x8xf32>
    "tpu.trace_stop"() : () -> ()
    %247 = vector.shape_cast %246 : vector<2x8x8xf32> to vector<16x8xf32>
    %248 = vector.extract_strided_slice %180 {offsets = [0, 24], sizes = [16, 8], strides = [1, 1]} : vector<16x32xf32> to vector<16x8xf32>
    %249 = vector.shape_cast %248 : vector<16x8xf32> to vector<2x8x8xf32>
    %250 = vector.extract_strided_slice %181 {offsets = [0, 24], sizes = [16, 8], strides = [1, 1]} : vector<16x32xf32> to vector<16x8xf32>
    %251 = vector.shape_cast %250 : vector<16x8xf32> to vector<2x8x8xf32>
    %252 = vector.extract_strided_slice %182 {offsets = [0, 24], sizes = [16, 8], strides = [1, 1]} : vector<16x32xf32> to vector<16x8xf32>
    %253 = vector.shape_cast %252 : vector<16x8xf32> to vector<2x8x8xf32>
    "tpu.trace_start"() <{level = 10 : i32, message = "bqd,bkd->bqk"}> : () -> ()
    %cst_74 = arith.constant dense<0.000000e+00> : vector<2x8x8xf32>
    %254 = tpu.matmul %249, %251, %cst_74 {dimension_numbers = #tpu.dot_dimension_numbers<[2], [2], [1], [1], [0, 0, 0, 1, 1, 1], [0], [0]>} : vector<2x8x8xf32>, vector<2x8x8xf32>, vector<2x8x8xf32> -> vector<2x8x8xf32>
    "tpu.trace_stop"() : () -> ()
    %cst_75 = arith.constant 0.353553385 : f32
    %255 = vector.broadcast %cst_75 : f32 to vector<2x8x8xf32>
    %256 = arith.mulf %254, %255 : vector<2x8x8xf32>
    %cst_76 = arith.constant dense<0xFF800000> : vector<2x8xf32>
    %257 = vector.multi_reduction <maximumf>, %256, %cst_76 [2] : vector<2x8x8xf32> to vector<2x8xf32>
    %258 = vector.shape_cast %257 : vector<2x8xf32> to vector<2x8x1xf32>
    %259 = vector.broadcast %258 : vector<2x8x1xf32> to vector<2x8x8xf32>
    %260 = arith.subf %256, %259 : vector<2x8x8xf32>
    %261 = math.exp %260 : vector<2x8x8xf32>
    %cst_77 = arith.constant dense<0.000000e+00> : vector<2x8xf32>
    %262 = vector.multi_reduction <add>, %261, %cst_77 [2] : vector<2x8x8xf32> to vector<2x8xf32>
    %263 = vector.shape_cast %262 : vector<2x8xf32> to vector<2x8x1xf32>
    %264 = tpu.reciprocal %263 {approx = true} : vector<2x8x1xf32> -> vector<2x8x1xf32>
    %265 = vector.broadcast %264 : vector<2x8x1xf32> to vector<2x8x8xf32>
    %266 = arith.mulf %261, %265 : vector<2x8x8xf32>
    "tpu.trace_start"() <{level = 10 : i32, message = "bqk,bkd->bqd"}> : () -> ()
    %cst_78 = arith.constant dense<0.000000e+00> : vector<2x8x8xf32>
    %267 = tpu.matmul %266, %253, %cst_78 {dimension_numbers = #tpu.dot_dimension_numbers<[2], [1], [1], [2], [0, 0, 0, 1, 1, 2], [0], [0]>} : vector<2x8x8xf32>, vector<2x8x8xf32>, vector<2x8x8xf32> -> vector<2x8x8xf32>
    "tpu.trace_stop"() : () -> ()
    %268 = vector.shape_cast %267 : vector<2x8x8xf32> to vector<16x8xf32>
    %269 = tpu.concatenate %205, %226, %247, %268 in 1 : vector<16x8xf32>, vector<16x8xf32>, vector<16x8xf32>, vector<16x8xf32> -> vector<16x32xf32>
    %cst_79 = arith.constant dense<0.000000e+00> : vector<16x32xf32>
    %270 = tpu.matmul %269, %183, %cst_79 {dimension_numbers = #tpu.dot_dimension_numbers<[1], [0], [0], [1], [0, 0, 1, 1], [], []>} : vector<16x32xf32>, vector<32x32xf32>, vector<16x32xf32> -> vector<16x32xf32>
    %271 = vector.broadcast %184 : vector<1x32xf32> to vector<16x32xf32>
    %272 = arith.addf %270, %271 : vector<16x32xf32>
    %273 = arith.addf %272, %174 : vector<16x32xf32>
    %c10 = arith.constant 10 : index
    %c0_80 = arith.constant 0 : index
    %274 = vector.load %arg5[%c10, %c0_80] : memref<56x128xf32, #tpu.memory_space<vmem>>, vector<1x32xf32>
    %c11 = arith.constant 11 : index
    %c0_81 = arith.constant 0 : index
    %275 = vector.load %arg5[%c11, %c0_81] : memref<56x128xf32, #tpu.memory_space<vmem>>, vector<1x32xf32>
    %cst_82 = arith.constant dense<0.000000e+00> : vector<16xf32>
    %276 = vector.multi_reduction <add>, %273, %cst_82 [1] : vector<16x32xf32> to vector<16xf32>
    %277 = vector.shape_cast %276 : vector<16xf32> to vector<16x1xf32>
    %cst_83 = arith.constant 3.200000e+01 : f32
    %278 = vector.broadcast %cst_83 : f32 to vector<16x1xf32>
    %279 = arith.divf %277, %278 : vector<16x1xf32>
    %280 = vector.broadcast %279 : vector<16x1xf32> to vector<16x32xf32>
    %281 = arith.subf %273, %280 : vector<16x32xf32>
    %282 = arith.mulf %281, %281 : vector<16x32xf32>
    %cst_84 = arith.constant dense<0.000000e+00> : vector<16xf32>
    %283 = vector.multi_reduction <add>, %282, %cst_84 [1] : vector<16x32xf32> to vector<16xf32>
    %284 = vector.shape_cast %283 : vector<16xf32> to vector<16x1xf32>
    %cst_85 = arith.constant 3.200000e+01 : f32
    %285 = vector.broadcast %cst_85 : f32 to vector<16x1xf32>
    %286 = arith.divf %284, %285 : vector<16x1xf32>
    %cst_86 = arith.constant 9.99999996E-13 : f32
    %287 = vector.broadcast %cst_86 : f32 to vector<16x1xf32>
    %288 = arith.addf %286, %287 : vector<16x1xf32>
    %289 = math.rsqrt %288 : vector<16x1xf32>
    %290 = vector.broadcast %289 : vector<16x1xf32> to vector<16x32xf32>
    %291 = arith.mulf %281, %290 : vector<16x32xf32>
    %292 = vector.broadcast %274 : vector<1x32xf32> to vector<16x32xf32>
    %293 = arith.mulf %291, %292 : vector<16x32xf32>
    %294 = vector.broadcast %275 : vector<1x32xf32> to vector<16x32xf32>
    %295 = arith.addf %293, %294 : vector<16x32xf32>
    %c224 = arith.constant 224 : index
    %c0_87 = arith.constant 0 : index
    %296 = vector.load %arg4[%c224, %c0_87] : memref<1024x128xf32, #tpu.memory_space<vmem>>, vector<32x64xf32>
    %cst_88 = arith.constant dense<0.000000e+00> : vector<16x64xf32>
    %297 = tpu.matmul %295, %296, %cst_88 {dimension_numbers = #tpu.dot_dimension_numbers<[1], [0], [0], [1], [0, 0, 1, 1], [], []>} : vector<16x32xf32>, vector<32x64xf32>, vector<16x64xf32> -> vector<16x64xf32>
    %c12 = arith.constant 12 : index
    %c0_89 = arith.constant 0 : index
    %298 = vector.load %arg5[%c12, %c0_89] : memref<56x128xf32, #tpu.memory_space<vmem>>, vector<1x64xf32>
    %299 = vector.broadcast %298 : vector<1x64xf32> to vector<16x64xf32>
    %300 = arith.addf %297, %299 : vector<16x64xf32>
    %cst_90 = arith.constant 5.000000e-01 : f32
    %301 = vector.broadcast %cst_90 : f32 to vector<16x64xf32>
    %302 = arith.mulf %301, %300 : vector<16x64xf32>
    %cst_91 = arith.constant 4.471500e-02 : f32
    %303 = vector.broadcast %cst_91 : f32 to vector<16x64xf32>
    %304 = arith.mulf %303, %300 : vector<16x64xf32>
    %305 = arith.mulf %304, %300 : vector<16x64xf32>
    %306 = arith.mulf %305, %300 : vector<16x64xf32>
    %307 = arith.addf %300, %306 : vector<16x64xf32>
    %cst_92 = arith.constant 0.797884583 : f32
    %308 = vector.broadcast %cst_92 : f32 to vector<16x64xf32>
    %309 = arith.mulf %308, %307 : vector<16x64xf32>
    %310 = math.tanh %309 : vector<16x64xf32>
    %cst_93 = arith.constant 1.000000e+00 : f32
    %311 = vector.broadcast %cst_93 : f32 to vector<16x64xf32>
    %312 = arith.addf %311, %310 : vector<16x64xf32>
    %313 = arith.mulf %302, %312 : vector<16x64xf32>
    %c256 = arith.constant 256 : index
    %c0_94 = arith.constant 0 : index
    %314 = vector.load %arg4[%c256, %c0_94] : memref<1024x128xf32, #tpu.memory_space<vmem>>, vector<64x32xf32>
    %cst_95 = arith.constant dense<0.000000e+00> : vector<16x32xf32>
    %315 = tpu.matmul %313, %314, %cst_95 {dimension_numbers = #tpu.dot_dimension_numbers<[1], [0], [0], [1], [0, 0, 1, 1], [], []>} : vector<16x64xf32>, vector<64x32xf32>, vector<16x32xf32> -> vector<16x32xf32>
    %c13 = arith.constant 13 : index
    %c0_96 = arith.constant 0 : index
    %316 = vector.load %arg5[%c13, %c0_96] : memref<56x128xf32, #tpu.memory_space<vmem>>, vector<1x32xf32>
    %317 = vector.broadcast %316 : vector<1x32xf32> to vector<16x32xf32>
    %318 = arith.addf %315, %317 : vector<16x32xf32>
    %319 = arith.addf %318, %295 : vector<16x32xf32>
    %c14 = arith.constant 14 : index
    %c0_97 = arith.constant 0 : index
    %320 = vector.load %arg5[%c14, %c0_97] : memref<56x128xf32, #tpu.memory_space<vmem>>, vector<1x32xf32>
    %c15 = arith.constant 15 : index
    %c0_98 = arith.constant 0 : index
    %321 = vector.load %arg5[%c15, %c0_98] : memref<56x128xf32, #tpu.memory_space<vmem>>, vector<1x32xf32>
    %cst_99 = arith.constant dense<0.000000e+00> : vector<16xf32>
    %322 = vector.multi_reduction <add>, %319, %cst_99 [1] : vector<16x32xf32> to vector<16xf32>
    %323 = vector.shape_cast %322 : vector<16xf32> to vector<16x1xf32>
    %cst_100 = arith.constant 3.200000e+01 : f32
    %324 = vector.broadcast %cst_100 : f32 to vector<16x1xf32>
    %325 = arith.divf %323, %324 : vector<16x1xf32>
    %326 = vector.broadcast %325 : vector<16x1xf32> to vector<16x32xf32>
    %327 = arith.subf %319, %326 : vector<16x32xf32>
    %328 = arith.mulf %327, %327 : vector<16x32xf32>
    %cst_101 = arith.constant dense<0.000000e+00> : vector<16xf32>
    %329 = vector.multi_reduction <add>, %328, %cst_101 [1] : vector<16x32xf32> to vector<16xf32>
    %330 = vector.shape_cast %329 : vector<16xf32> to vector<16x1xf32>
    %cst_102 = arith.constant 3.200000e+01 : f32
    %331 = vector.broadcast %cst_102 : f32 to vector<16x1xf32>
    %332 = arith.divf %330, %331 : vector<16x1xf32>
    %cst_103 = arith.constant 9.99999996E-13 : f32
    %333 = vector.broadcast %cst_103 : f32 to vector<16x1xf32>
    %334 = arith.addf %332, %333 : vector<16x1xf32>
    %335 = math.rsqrt %334 : vector<16x1xf32>
    %336 = vector.broadcast %335 : vector<16x1xf32> to vector<16x32xf32>
    %337 = arith.mulf %327, %336 : vector<16x32xf32>
    %338 = vector.broadcast %320 : vector<1x32xf32> to vector<16x32xf32>
    %339 = arith.mulf %337, %338 : vector<16x32xf32>
    %340 = vector.broadcast %321 : vector<1x32xf32> to vector<16x32xf32>
    %341 = arith.addf %339, %340 : vector<16x32xf32>
    %c0_104 = arith.constant 0 : index
    %c0_105 = arith.constant 0 : index
    %342 = vector.load %arg2[%c0_104, %c0_105] : memref<16x1xi32, #tpu.memory_space<vmem>>, vector<16x1xi32>
    %343 = tpu.iota {dimensions = array<i32: 1>} : vector<16x128xi32>
    %344 = vector.broadcast %342 : vector<16x1xi32> to vector<16x128xi32>
    %345 = arith.cmpi eq, %344, %343 : vector<16x128xi32>
    %346 = arith.extui %345 : vector<16x128xi1> to vector<16x128xi32>
    %347 = arith.sitofp %346 : vector<16x128xi32> to vector<16x128xf32>
    %c832 = arith.constant 832 : index
    %c0_106 = arith.constant 0 : index
    %348 = vector.load %arg4[%c832, %c0_106] : memref<1024x128xf32, #tpu.memory_space<vmem>>, vector<128x32xf32>
    %cst_107 = arith.constant dense<0.000000e+00> : vector<16x32xf32>
    %349 = tpu.matmul %347, %348, %cst_107 {dimension_numbers = #tpu.dot_dimension_numbers<[1], [0], [0], [1], [0, 0, 1, 1], [], []>} : vector<16x128xf32>, vector<128x32xf32>, vector<16x32xf32> -> vector<16x32xf32>
    %c0_108 = arith.constant 0 : index
    %c0_109 = arith.constant 0 : index
    %350 = vector.load %arg3[%c0_108, %c0_109] : memref<16x32xf32, #tpu.memory_space<vmem>>, vector<16x32xf32>
    %351 = arith.addf %349, %350 : vector<16x32xf32>
    %c42 = arith.constant 42 : index
    %c0_110 = arith.constant 0 : index
    %352 = vector.load %arg5[%c42, %c0_110] : memref<56x128xf32, #tpu.memory_space<vmem>>, vector<1x32xf32>
    %353 = vector.broadcast %352 : vector<1x32xf32> to vector<16x32xf32>
    %354 = arith.addf %351, %353 : vector<16x32xf32>
    %c43 = arith.constant 43 : index
    %c0_111 = arith.constant 0 : index
    %355 = vector.load %arg5[%c43, %c0_111] : memref<56x128xf32, #tpu.memory_space<vmem>>, vector<1x32xf32>
    %c44 = arith.constant 44 : index
    %c0_112 = arith.constant 0 : index
    %356 = vector.load %arg5[%c44, %c0_112] : memref<56x128xf32, #tpu.memory_space<vmem>>, vector<1x32xf32>
    %cst_113 = arith.constant dense<0.000000e+00> : vector<16xf32>
    %357 = vector.multi_reduction <add>, %354, %cst_113 [1] : vector<16x32xf32> to vector<16xf32>
    %358 = vector.shape_cast %357 : vector<16xf32> to vector<16x1xf32>
    %cst_114 = arith.constant 3.200000e+01 : f32
    %359 = vector.broadcast %cst_114 : f32 to vector<16x1xf32>
    %360 = arith.divf %358, %359 : vector<16x1xf32>
    %361 = vector.broadcast %360 : vector<16x1xf32> to vector<16x32xf32>
    %362 = arith.subf %354, %361 : vector<16x32xf32>
    %363 = arith.mulf %362, %362 : vector<16x32xf32>
    %cst_115 = arith.constant dense<0.000000e+00> : vector<16xf32>
    %364 = vector.multi_reduction <add>, %363, %cst_115 [1] : vector<16x32xf32> to vector<16xf32>
    %365 = vector.shape_cast %364 : vector<16xf32> to vector<16x1xf32>
    %cst_116 = arith.constant 3.200000e+01 : f32
    %366 = vector.broadcast %cst_116 : f32 to vector<16x1xf32>
    %367 = arith.divf %365, %366 : vector<16x1xf32>
    %cst_117 = arith.constant 9.99999996E-13 : f32
    %368 = vector.broadcast %cst_117 : f32 to vector<16x1xf32>
    %369 = arith.addf %367, %368 : vector<16x1xf32>
    %370 = math.rsqrt %369 : vector<16x1xf32>
    %371 = vector.broadcast %370 : vector<16x1xf32> to vector<16x32xf32>
    %372 = arith.mulf %362, %371 : vector<16x32xf32>
    %373 = vector.broadcast %355 : vector<1x32xf32> to vector<16x32xf32>
    %374 = arith.mulf %372, %373 : vector<16x32xf32>
    %375 = vector.broadcast %356 : vector<1x32xf32> to vector<16x32xf32>
    %376 = arith.addf %374, %375 : vector<16x32xf32>
    %c416 = arith.constant 416 : index
    %c0_118 = arith.constant 0 : index
    %377 = vector.load %arg4[%c416, %c0_118] : memref<1024x128xf32, #tpu.memory_space<vmem>>, vector<32x64xf32>
    %cst_119 = arith.constant dense<0.000000e+00> : vector<16x64xf32>
    %378 = tpu.matmul %341, %377, %cst_119 {dimension_numbers = #tpu.dot_dimension_numbers<[1], [0], [0], [1], [0, 0, 1, 1], [], []>} : vector<16x32xf32>, vector<32x64xf32>, vector<16x64xf32> -> vector<16x64xf32>
    %c21 = arith.constant 21 : index
    %c0_120 = arith.constant 0 : index
    %379 = vector.load %arg5[%c21, %c0_120] : memref<56x128xf32, #tpu.memory_space<vmem>>, vector<1x64xf32>
    %380 = vector.broadcast %379 : vector<1x64xf32> to vector<16x64xf32>
    %381 = arith.addf %378, %380 : vector<16x64xf32>
    %c320 = arith.constant 320 : index
    %c0_121 = arith.constant 0 : index
    %382 = vector.load %arg4[%c320, %c0_121] : memref<1024x128xf32, #tpu.memory_space<vmem>>, vector<32x96xf32>
    %cst_122 = arith.constant dense<0.000000e+00> : vector<16x96xf32>
    %383 = tpu.matmul %376, %382, %cst_122 {dimension_numbers = #tpu.dot_dimension_numbers<[1], [0], [0], [1], [0, 0, 1, 1], [], []>} : vector<16x32xf32>, vector<32x96xf32>, vector<16x96xf32> -> vector<16x96xf32>
    %c16 = arith.constant 16 : index
    %c0_123 = arith.constant 0 : index
    %384 = vector.load %arg5[%c16, %c0_123] : memref<56x128xf32, #tpu.memory_space<vmem>>, vector<1x96xf32>
    %385 = vector.broadcast %384 : vector<1x96xf32> to vector<16x96xf32>
    %386 = arith.addf %383, %385 : vector<16x96xf32>
    %387 = vector.extract_strided_slice %386 {offsets = [0, 0], sizes = [16, 32], strides = [1, 1]} : vector<16x96xf32> to vector<16x32xf32>
    %388 = vector.extract_strided_slice %386 {offsets = [0, 32], sizes = [16, 32], strides = [1, 1]} : vector<16x96xf32> to vector<16x32xf32>
    %389 = vector.extract_strided_slice %386 {offsets = [0, 64], sizes = [16, 32], strides = [1, 1]} : vector<16x96xf32> to vector<16x32xf32>
    %c352 = arith.constant 352 : index
    %c0_124 = arith.constant 0 : index
    %390 = vector.load %arg4[%c352, %c0_124] : memref<1024x128xf32, #tpu.memory_space<vmem>>, vector<32x32xf32>
    %c17 = arith.constant 17 : index
    %c0_125 = arith.constant 0 : index
    %391 = vector.load %arg5[%c17, %c0_125] : memref<56x128xf32, #tpu.memory_space<vmem>>, vector<1x32xf32>
    %392 = vector.extract_strided_slice %387 {offsets = [0, 0], sizes = [16, 8], strides = [1, 1]} : vector<16x32xf32> to vector<16x8xf32>
    %393 = vector.shape_cast %392 : vector<16x8xf32> to vector<2x8x8xf32>
    %394 = vector.extract_strided_slice %388 {offsets = [0, 0], sizes = [16, 8], strides = [1, 1]} : vector<16x32xf32> to vector<16x8xf32>
    %395 = vector.shape_cast %394 : vector<16x8xf32> to vector<2x8x8xf32>
    %396 = vector.extract_strided_slice %389 {offsets = [0, 0], sizes = [16, 8], strides = [1, 1]} : vector<16x32xf32> to vector<16x8xf32>
    %397 = vector.shape_cast %396 : vector<16x8xf32> to vector<2x8x8xf32>
    "tpu.trace_start"() <{level = 10 : i32, message = "bqd,bkd->bqk"}> : () -> ()
    %cst_126 = arith.constant dense<0.000000e+00> : vector<2x8x8xf32>
    %398 = tpu.matmul %393, %395, %cst_126 {dimension_numbers = #tpu.dot_dimension_numbers<[2], [2], [1], [1], [0, 0, 0, 1, 1, 1], [0], [0]>} : vector<2x8x8xf32>, vector<2x8x8xf32>, vector<2x8x8xf32> -> vector<2x8x8xf32>
    "tpu.trace_stop"() : () -> ()
    %cst_127 = arith.constant 0.353553385 : f32
    %399 = vector.broadcast %cst_127 : f32 to vector<2x8x8xf32>
    %400 = arith.mulf %398, %399 : vector<2x8x8xf32>
    %401 = vector.broadcast %6 : vector<1x8x8xf32> to vector<2x8x8xf32>
    %402 = arith.addf %400, %401 : vector<2x8x8xf32>
    %cst_128 = arith.constant dense<0xFF800000> : vector<2x8xf32>
    %403 = vector.multi_reduction <maximumf>, %402, %cst_128 [2] : vector<2x8x8xf32> to vector<2x8xf32>
    %404 = vector.shape_cast %403 : vector<2x8xf32> to vector<2x8x1xf32>
    %405 = vector.broadcast %404 : vector<2x8x1xf32> to vector<2x8x8xf32>
    %406 = arith.subf %402, %405 : vector<2x8x8xf32>
    %407 = math.exp %406 : vector<2x8x8xf32>
    %cst_129 = arith.constant dense<0.000000e+00> : vector<2x8xf32>
    %408 = vector.multi_reduction <add>, %407, %cst_129 [2] : vector<2x8x8xf32> to vector<2x8xf32>
    %409 = vector.shape_cast %408 : vector<2x8xf32> to vector<2x8x1xf32>
    %410 = tpu.reciprocal %409 {approx = true} : vector<2x8x1xf32> -> vector<2x8x1xf32>
    %411 = vector.broadcast %410 : vector<2x8x1xf32> to vector<2x8x8xf32>
    %412 = arith.mulf %407, %411 : vector<2x8x8xf32>
    "tpu.trace_start"() <{level = 10 : i32, message = "bqk,bkd->bqd"}> : () -> ()
    %cst_130 = arith.constant dense<0.000000e+00> : vector<2x8x8xf32>
    %413 = tpu.matmul %412, %397, %cst_130 {dimension_numbers = #tpu.dot_dimension_numbers<[2], [1], [1], [2], [0, 0, 0, 1, 1, 2], [0], [0]>} : vector<2x8x8xf32>, vector<2x8x8xf32>, vector<2x8x8xf32> -> vector<2x8x8xf32>
    "tpu.trace_stop"() : () -> ()
    %414 = vector.shape_cast %413 : vector<2x8x8xf32> to vector<16x8xf32>
    %415 = vector.extract_strided_slice %387 {offsets = [0, 8], sizes = [16, 8], strides = [1, 1]} : vector<16x32xf32> to vector<16x8xf32>
    %416 = vector.shape_cast %415 : vector<16x8xf32> to vector<2x8x8xf32>
    %417 = vector.extract_strided_slice %388 {offsets = [0, 8], sizes = [16, 8], strides = [1, 1]} : vector<16x32xf32> to vector<16x8xf32>
    %418 = vector.shape_cast %417 : vector<16x8xf32> to vector<2x8x8xf32>
    %419 = vector.extract_strided_slice %389 {offsets = [0, 8], sizes = [16, 8], strides = [1, 1]} : vector<16x32xf32> to vector<16x8xf32>
    %420 = vector.shape_cast %419 : vector<16x8xf32> to vector<2x8x8xf32>
    "tpu.trace_start"() <{level = 10 : i32, message = "bqd,bkd->bqk"}> : () -> ()
    %cst_131 = arith.constant dense<0.000000e+00> : vector<2x8x8xf32>
    %421 = tpu.matmul %416, %418, %cst_131 {dimension_numbers = #tpu.dot_dimension_numbers<[2], [2], [1], [1], [0, 0, 0, 1, 1, 1], [0], [0]>} : vector<2x8x8xf32>, vector<2x8x8xf32>, vector<2x8x8xf32> -> vector<2x8x8xf32>
    "tpu.trace_stop"() : () -> ()
    %cst_132 = arith.constant 0.353553385 : f32
    %422 = vector.broadcast %cst_132 : f32 to vector<2x8x8xf32>
    %423 = arith.mulf %421, %422 : vector<2x8x8xf32>
    %424 = vector.broadcast %6 : vector<1x8x8xf32> to vector<2x8x8xf32>
    %425 = arith.addf %423, %424 : vector<2x8x8xf32>
    %cst_133 = arith.constant dense<0xFF800000> : vector<2x8xf32>
    %426 = vector.multi_reduction <maximumf>, %425, %cst_133 [2] : vector<2x8x8xf32> to vector<2x8xf32>
    %427 = vector.shape_cast %426 : vector<2x8xf32> to vector<2x8x1xf32>
    %428 = vector.broadcast %427 : vector<2x8x1xf32> to vector<2x8x8xf32>
    %429 = arith.subf %425, %428 : vector<2x8x8xf32>
    %430 = math.exp %429 : vector<2x8x8xf32>
    %cst_134 = arith.constant dense<0.000000e+00> : vector<2x8xf32>
    %431 = vector.multi_reduction <add>, %430, %cst_134 [2] : vector<2x8x8xf32> to vector<2x8xf32>
    %432 = vector.shape_cast %431 : vector<2x8xf32> to vector<2x8x1xf32>
    %433 = tpu.reciprocal %432 {approx = true} : vector<2x8x1xf32> -> vector<2x8x1xf32>
    %434 = vector.broadcast %433 : vector<2x8x1xf32> to vector<2x8x8xf32>
    %435 = arith.mulf %430, %434 : vector<2x8x8xf32>
    "tpu.trace_start"() <{level = 10 : i32, message = "bqk,bkd->bqd"}> : () -> ()
    %cst_135 = arith.constant dense<0.000000e+00> : vector<2x8x8xf32>
    %436 = tpu.matmul %435, %420, %cst_135 {dimension_numbers = #tpu.dot_dimension_numbers<[2], [1], [1], [2], [0, 0, 0, 1, 1, 2], [0], [0]>} : vector<2x8x8xf32>, vector<2x8x8xf32>, vector<2x8x8xf32> -> vector<2x8x8xf32>
    "tpu.trace_stop"() : () -> ()
    %437 = vector.shape_cast %436 : vector<2x8x8xf32> to vector<16x8xf32>
    %438 = vector.extract_strided_slice %387 {offsets = [0, 16], sizes = [16, 8], strides = [1, 1]} : vector<16x32xf32> to vector<16x8xf32>
    %439 = vector.shape_cast %438 : vector<16x8xf32> to vector<2x8x8xf32>
    %440 = vector.extract_strided_slice %388 {offsets = [0, 16], sizes = [16, 8], strides = [1, 1]} : vector<16x32xf32> to vector<16x8xf32>
    %441 = vector.shape_cast %440 : vector<16x8xf32> to vector<2x8x8xf32>
    %442 = vector.extract_strided_slice %389 {offsets = [0, 16], sizes = [16, 8], strides = [1, 1]} : vector<16x32xf32> to vector<16x8xf32>
    %443 = vector.shape_cast %442 : vector<16x8xf32> to vector<2x8x8xf32>
    "tpu.trace_start"() <{level = 10 : i32, message = "bqd,bkd->bqk"}> : () -> ()
    %cst_136 = arith.constant dense<0.000000e+00> : vector<2x8x8xf32>
    %444 = tpu.matmul %439, %441, %cst_136 {dimension_numbers = #tpu.dot_dimension_numbers<[2], [2], [1], [1], [0, 0, 0, 1, 1, 1], [0], [0]>} : vector<2x8x8xf32>, vector<2x8x8xf32>, vector<2x8x8xf32> -> vector<2x8x8xf32>
    "tpu.trace_stop"() : () -> ()
    %cst_137 = arith.constant 0.353553385 : f32
    %445 = vector.broadcast %cst_137 : f32 to vector<2x8x8xf32>
    %446 = arith.mulf %444, %445 : vector<2x8x8xf32>
    %447 = vector.broadcast %6 : vector<1x8x8xf32> to vector<2x8x8xf32>
    %448 = arith.addf %446, %447 : vector<2x8x8xf32>
    %cst_138 = arith.constant dense<0xFF800000> : vector<2x8xf32>
    %449 = vector.multi_reduction <maximumf>, %448, %cst_138 [2] : vector<2x8x8xf32> to vector<2x8xf32>
    %450 = vector.shape_cast %449 : vector<2x8xf32> to vector<2x8x1xf32>
    %451 = vector.broadcast %450 : vector<2x8x1xf32> to vector<2x8x8xf32>
    %452 = arith.subf %448, %451 : vector<2x8x8xf32>
    %453 = math.exp %452 : vector<2x8x8xf32>
    %cst_139 = arith.constant dense<0.000000e+00> : vector<2x8xf32>
    %454 = vector.multi_reduction <add>, %453, %cst_139 [2] : vector<2x8x8xf32> to vector<2x8xf32>
    %455 = vector.shape_cast %454 : vector<2x8xf32> to vector<2x8x1xf32>
    %456 = tpu.reciprocal %455 {approx = true} : vector<2x8x1xf32> -> vector<2x8x1xf32>
    %457 = vector.broadcast %456 : vector<2x8x1xf32> to vector<2x8x8xf32>
    %458 = arith.mulf %453, %457 : vector<2x8x8xf32>
    "tpu.trace_start"() <{level = 10 : i32, message = "bqk,bkd->bqd"}> : () -> ()
    %cst_140 = arith.constant dense<0.000000e+00> : vector<2x8x8xf32>
    %459 = tpu.matmul %458, %443, %cst_140 {dimension_numbers = #tpu.dot_dimension_numbers<[2], [1], [1], [2], [0, 0, 0, 1, 1, 2], [0], [0]>} : vector<2x8x8xf32>, vector<2x8x8xf32>, vector<2x8x8xf32> -> vector<2x8x8xf32>
    "tpu.trace_stop"() : () -> ()
    %460 = vector.shape_cast %459 : vector<2x8x8xf32> to vector<16x8xf32>
    %461 = vector.extract_strided_slice %387 {offsets = [0, 24], sizes = [16, 8], strides = [1, 1]} : vector<16x32xf32> to vector<16x8xf32>
    %462 = vector.shape_cast %461 : vector<16x8xf32> to vector<2x8x8xf32>
    %463 = vector.extract_strided_slice %388 {offsets = [0, 24], sizes = [16, 8], strides = [1, 1]} : vector<16x32xf32> to vector<16x8xf32>
    %464 = vector.shape_cast %463 : vector<16x8xf32> to vector<2x8x8xf32>
    %465 = vector.extract_strided_slice %389 {offsets = [0, 24], sizes = [16, 8], strides = [1, 1]} : vector<16x32xf32> to vector<16x8xf32>
    %466 = vector.shape_cast %465 : vector<16x8xf32> to vector<2x8x8xf32>
    "tpu.trace_start"() <{level = 10 : i32, message = "bqd,bkd->bqk"}> : () -> ()
    %cst_141 = arith.constant dense<0.000000e+00> : vector<2x8x8xf32>
    %467 = tpu.matmul %462, %464, %cst_141 {dimension_numbers = #tpu.dot_dimension_numbers<[2], [2], [1], [1], [0, 0, 0, 1, 1, 1], [0], [0]>} : vector<2x8x8xf32>, vector<2x8x8xf32>, vector<2x8x8xf32> -> vector<2x8x8xf32>
    "tpu.trace_stop"() : () -> ()
    %cst_142 = arith.constant 0.353553385 : f32
    %468 = vector.broadcast %cst_142 : f32 to vector<2x8x8xf32>
    %469 = arith.mulf %467, %468 : vector<2x8x8xf32>
    %470 = vector.broadcast %6 : vector<1x8x8xf32> to vector<2x8x8xf32>
    %471 = arith.addf %469, %470 : vector<2x8x8xf32>
    %cst_143 = arith.constant dense<0xFF800000> : vector<2x8xf32>
    %472 = vector.multi_reduction <maximumf>, %471, %cst_143 [2] : vector<2x8x8xf32> to vector<2x8xf32>
    %473 = vector.shape_cast %472 : vector<2x8xf32> to vector<2x8x1xf32>
    %474 = vector.broadcast %473 : vector<2x8x1xf32> to vector<2x8x8xf32>
    %475 = arith.subf %471, %474 : vector<2x8x8xf32>
    %476 = math.exp %475 : vector<2x8x8xf32>
    %cst_144 = arith.constant dense<0.000000e+00> : vector<2x8xf32>
    %477 = vector.multi_reduction <add>, %476, %cst_144 [2] : vector<2x8x8xf32> to vector<2x8xf32>
    %478 = vector.shape_cast %477 : vector<2x8xf32> to vector<2x8x1xf32>
    %479 = tpu.reciprocal %478 {approx = true} : vector<2x8x1xf32> -> vector<2x8x1xf32>
    %480 = vector.broadcast %479 : vector<2x8x1xf32> to vector<2x8x8xf32>
    %481 = arith.mulf %476, %480 : vector<2x8x8xf32>
    "tpu.trace_start"() <{level = 10 : i32, message = "bqk,bkd->bqd"}> : () -> ()
    %cst_145 = arith.constant dense<0.000000e+00> : vector<2x8x8xf32>
    %482 = tpu.matmul %481, %466, %cst_145 {dimension_numbers = #tpu.dot_dimension_numbers<[2], [1], [1], [2], [0, 0, 0, 1, 1, 2], [0], [0]>} : vector<2x8x8xf32>, vector<2x8x8xf32>, vector<2x8x8xf32> -> vector<2x8x8xf32>
    "tpu.trace_stop"() : () -> ()
    %483 = vector.shape_cast %482 : vector<2x8x8xf32> to vector<16x8xf32>
    %484 = tpu.concatenate %414, %437, %460, %483 in 1 : vector<16x8xf32>, vector<16x8xf32>, vector<16x8xf32>, vector<16x8xf32> -> vector<16x32xf32>
    %cst_146 = arith.constant dense<0.000000e+00> : vector<16x32xf32>
    %485 = tpu.matmul %484, %390, %cst_146 {dimension_numbers = #tpu.dot_dimension_numbers<[1], [0], [0], [1], [0, 0, 1, 1], [], []>} : vector<16x32xf32>, vector<32x32xf32>, vector<16x32xf32> -> vector<16x32xf32>
    %486 = vector.broadcast %391 : vector<1x32xf32> to vector<16x32xf32>
    %487 = arith.addf %485, %486 : vector<16x32xf32>
    %488 = arith.addf %487, %376 : vector<16x32xf32>
    %c18 = arith.constant 18 : index
    %c0_147 = arith.constant 0 : index
    %489 = vector.load %arg5[%c18, %c0_147] : memref<56x128xf32, #tpu.memory_space<vmem>>, vector<1x32xf32>
    %c19 = arith.constant 19 : index
    %c0_148 = arith.constant 0 : index
    %490 = vector.load %arg5[%c19, %c0_148] : memref<56x128xf32, #tpu.memory_space<vmem>>, vector<1x32xf32>
    %cst_149 = arith.constant dense<0.000000e+00> : vector<16xf32>
    %491 = vector.multi_reduction <add>, %488, %cst_149 [1] : vector<16x32xf32> to vector<16xf32>
    %492 = vector.shape_cast %491 : vector<16xf32> to vector<16x1xf32>
    %cst_150 = arith.constant 3.200000e+01 : f32
    %493 = vector.broadcast %cst_150 : f32 to vector<16x1xf32>
    %494 = arith.divf %492, %493 : vector<16x1xf32>
    %495 = vector.broadcast %494 : vector<16x1xf32> to vector<16x32xf32>
    %496 = arith.subf %488, %495 : vector<16x32xf32>
    %497 = arith.mulf %496, %496 : vector<16x32xf32>
    %cst_151 = arith.constant dense<0.000000e+00> : vector<16xf32>
    %498 = vector.multi_reduction <add>, %497, %cst_151 [1] : vector<16x32xf32> to vector<16xf32>
    %499 = vector.shape_cast %498 : vector<16xf32> to vector<16x1xf32>
    %cst_152 = arith.constant 3.200000e+01 : f32
    %500 = vector.broadcast %cst_152 : f32 to vector<16x1xf32>
    %501 = arith.divf %499, %500 : vector<16x1xf32>
    %cst_153 = arith.constant 9.99999996E-13 : f32
    %502 = vector.broadcast %cst_153 : f32 to vector<16x1xf32>
    %503 = arith.addf %501, %502 : vector<16x1xf32>
    %504 = math.rsqrt %503 : vector<16x1xf32>
    %505 = vector.broadcast %504 : vector<16x1xf32> to vector<16x32xf32>
    %506 = arith.mulf %496, %505 : vector<16x32xf32>
    %507 = vector.broadcast %489 : vector<1x32xf32> to vector<16x32xf32>
    %508 = arith.mulf %506, %507 : vector<16x32xf32>
    %509 = vector.broadcast %490 : vector<1x32xf32> to vector<16x32xf32>
    %510 = arith.addf %508, %509 : vector<16x32xf32>
    %c384 = arith.constant 384 : index
    %c0_154 = arith.constant 0 : index
    %511 = vector.load %arg4[%c384, %c0_154] : memref<1024x128xf32, #tpu.memory_space<vmem>>, vector<32x32xf32>
    %cst_155 = arith.constant dense<0.000000e+00> : vector<16x32xf32>
    %512 = tpu.matmul %510, %511, %cst_155 {dimension_numbers = #tpu.dot_dimension_numbers<[1], [0], [0], [1], [0, 0, 1, 1], [], []>} : vector<16x32xf32>, vector<32x32xf32>, vector<16x32xf32> -> vector<16x32xf32>
    %c20 = arith.constant 20 : index
    %c0_156 = arith.constant 0 : index
    %513 = vector.load %arg5[%c20, %c0_156] : memref<56x128xf32, #tpu.memory_space<vmem>>, vector<1x32xf32>
    %514 = vector.broadcast %513 : vector<1x32xf32> to vector<16x32xf32>
    %515 = arith.addf %512, %514 : vector<16x32xf32>
    %516 = vector.extract_strided_slice %381 {offsets = [0, 0], sizes = [16, 32], strides = [1, 1]} : vector<16x64xf32> to vector<16x32xf32>
    %517 = vector.extract_strided_slice %381 {offsets = [0, 32], sizes = [16, 32], strides = [1, 1]} : vector<16x64xf32> to vector<16x32xf32>
    %c448 = arith.constant 448 : index
    %c0_157 = arith.constant 0 : index
    %518 = vector.load %arg4[%c448, %c0_157] : memref<1024x128xf32, #tpu.memory_space<vmem>>, vector<32x32xf32>
    %c22 = arith.constant 22 : index
    %c0_158 = arith.constant 0 : index
    %519 = vector.load %arg5[%c22, %c0_158] : memref<56x128xf32, #tpu.memory_space<vmem>>, vector<1x32xf32>
    %520 = vector.extract_strided_slice %515 {offsets = [0, 0], sizes = [16, 8], strides = [1, 1]} : vector<16x32xf32> to vector<16x8xf32>
    %521 = vector.shape_cast %520 : vector<16x8xf32> to vector<2x8x8xf32>
    %522 = vector.extract_strided_slice %516 {offsets = [0, 0], sizes = [16, 8], strides = [1, 1]} : vector<16x32xf32> to vector<16x8xf32>
    %523 = vector.shape_cast %522 : vector<16x8xf32> to vector<2x8x8xf32>
    %524 = vector.extract_strided_slice %517 {offsets = [0, 0], sizes = [16, 8], strides = [1, 1]} : vector<16x32xf32> to vector<16x8xf32>
    %525 = vector.shape_cast %524 : vector<16x8xf32> to vector<2x8x8xf32>
    "tpu.trace_start"() <{level = 10 : i32, message = "bqd,bkd->bqk"}> : () -> ()
    %cst_159 = arith.constant dense<0.000000e+00> : vector<2x8x8xf32>
    %526 = tpu.matmul %521, %523, %cst_159 {dimension_numbers = #tpu.dot_dimension_numbers<[2], [2], [1], [1], [0, 0, 0, 1, 1, 1], [0], [0]>} : vector<2x8x8xf32>, vector<2x8x8xf32>, vector<2x8x8xf32> -> vector<2x8x8xf32>
    "tpu.trace_stop"() : () -> ()
    %cst_160 = arith.constant 0.353553385 : f32
    %527 = vector.broadcast %cst_160 : f32 to vector<2x8x8xf32>
    %528 = arith.mulf %526, %527 : vector<2x8x8xf32>
    %cst_161 = arith.constant dense<0xFF800000> : vector<2x8xf32>
    %529 = vector.multi_reduction <maximumf>, %528, %cst_161 [2] : vector<2x8x8xf32> to vector<2x8xf32>
    %530 = vector.shape_cast %529 : vector<2x8xf32> to vector<2x8x1xf32>
    %531 = vector.broadcast %530 : vector<2x8x1xf32> to vector<2x8x8xf32>
    %532 = arith.subf %528, %531 : vector<2x8x8xf32>
    %533 = math.exp %532 : vector<2x8x8xf32>
    %cst_162 = arith.constant dense<0.000000e+00> : vector<2x8xf32>
    %534 = vector.multi_reduction <add>, %533, %cst_162 [2] : vector<2x8x8xf32> to vector<2x8xf32>
    %535 = vector.shape_cast %534 : vector<2x8xf32> to vector<2x8x1xf32>
    %536 = tpu.reciprocal %535 {approx = true} : vector<2x8x1xf32> -> vector<2x8x1xf32>
    %537 = vector.broadcast %536 : vector<2x8x1xf32> to vector<2x8x8xf32>
    %538 = arith.mulf %533, %537 : vector<2x8x8xf32>
    "tpu.trace_start"() <{level = 10 : i32, message = "bqk,bkd->bqd"}> : () -> ()
    %cst_163 = arith.constant dense<0.000000e+00> : vector<2x8x8xf32>
    %539 = tpu.matmul %538, %525, %cst_163 {dimension_numbers = #tpu.dot_dimension_numbers<[2], [1], [1], [2], [0, 0, 0, 1, 1, 2], [0], [0]>} : vector<2x8x8xf32>, vector<2x8x8xf32>, vector<2x8x8xf32> -> vector<2x8x8xf32>
    "tpu.trace_stop"() : () -> ()
    %540 = vector.shape_cast %539 : vector<2x8x8xf32> to vector<16x8xf32>
    %541 = vector.extract_strided_slice %515 {offsets = [0, 8], sizes = [16, 8], strides = [1, 1]} : vector<16x32xf32> to vector<16x8xf32>
    %542 = vector.shape_cast %541 : vector<16x8xf32> to vector<2x8x8xf32>
    %543 = vector.extract_strided_slice %516 {offsets = [0, 8], sizes = [16, 8], strides = [1, 1]} : vector<16x32xf32> to vector<16x8xf32>
    %544 = vector.shape_cast %543 : vector<16x8xf32> to vector<2x8x8xf32>
    %545 = vector.extract_strided_slice %517 {offsets = [0, 8], sizes = [16, 8], strides = [1, 1]} : vector<16x32xf32> to vector<16x8xf32>
    %546 = vector.shape_cast %545 : vector<16x8xf32> to vector<2x8x8xf32>
    "tpu.trace_start"() <{level = 10 : i32, message = "bqd,bkd->bqk"}> : () -> ()
    %cst_164 = arith.constant dense<0.000000e+00> : vector<2x8x8xf32>
    %547 = tpu.matmul %542, %544, %cst_164 {dimension_numbers = #tpu.dot_dimension_numbers<[2], [2], [1], [1], [0, 0, 0, 1, 1, 1], [0], [0]>} : vector<2x8x8xf32>, vector<2x8x8xf32>, vector<2x8x8xf32> -> vector<2x8x8xf32>
    "tpu.trace_stop"() : () -> ()
    %cst_165 = arith.constant 0.353553385 : f32
    %548 = vector.broadcast %cst_165 : f32 to vector<2x8x8xf32>
    %549 = arith.mulf %547, %548 : vector<2x8x8xf32>
    %cst_166 = arith.constant dense<0xFF800000> : vector<2x8xf32>
    %550 = vector.multi_reduction <maximumf>, %549, %cst_166 [2] : vector<2x8x8xf32> to vector<2x8xf32>
    %551 = vector.shape_cast %550 : vector<2x8xf32> to vector<2x8x1xf32>
    %552 = vector.broadcast %551 : vector<2x8x1xf32> to vector<2x8x8xf32>
    %553 = arith.subf %549, %552 : vector<2x8x8xf32>
    %554 = math.exp %553 : vector<2x8x8xf32>
    %cst_167 = arith.constant dense<0.000000e+00> : vector<2x8xf32>
    %555 = vector.multi_reduction <add>, %554, %cst_167 [2] : vector<2x8x8xf32> to vector<2x8xf32>
    %556 = vector.shape_cast %555 : vector<2x8xf32> to vector<2x8x1xf32>
    %557 = tpu.reciprocal %556 {approx = true} : vector<2x8x1xf32> -> vector<2x8x1xf32>
    %558 = vector.broadcast %557 : vector<2x8x1xf32> to vector<2x8x8xf32>
    %559 = arith.mulf %554, %558 : vector<2x8x8xf32>
    "tpu.trace_start"() <{level = 10 : i32, message = "bqk,bkd->bqd"}> : () -> ()
    %cst_168 = arith.constant dense<0.000000e+00> : vector<2x8x8xf32>
    %560 = tpu.matmul %559, %546, %cst_168 {dimension_numbers = #tpu.dot_dimension_numbers<[2], [1], [1], [2], [0, 0, 0, 1, 1, 2], [0], [0]>} : vector<2x8x8xf32>, vector<2x8x8xf32>, vector<2x8x8xf32> -> vector<2x8x8xf32>
    "tpu.trace_stop"() : () -> ()
    %561 = vector.shape_cast %560 : vector<2x8x8xf32> to vector<16x8xf32>
    %562 = vector.extract_strided_slice %515 {offsets = [0, 16], sizes = [16, 8], strides = [1, 1]} : vector<16x32xf32> to vector<16x8xf32>
    %563 = vector.shape_cast %562 : vector<16x8xf32> to vector<2x8x8xf32>
    %564 = vector.extract_strided_slice %516 {offsets = [0, 16], sizes = [16, 8], strides = [1, 1]} : vector<16x32xf32> to vector<16x8xf32>
    %565 = vector.shape_cast %564 : vector<16x8xf32> to vector<2x8x8xf32>
    %566 = vector.extract_strided_slice %517 {offsets = [0, 16], sizes = [16, 8], strides = [1, 1]} : vector<16x32xf32> to vector<16x8xf32>
    %567 = vector.shape_cast %566 : vector<16x8xf32> to vector<2x8x8xf32>
    "tpu.trace_start"() <{level = 10 : i32, message = "bqd,bkd->bqk"}> : () -> ()
    %cst_169 = arith.constant dense<0.000000e+00> : vector<2x8x8xf32>
    %568 = tpu.matmul %563, %565, %cst_169 {dimension_numbers = #tpu.dot_dimension_numbers<[2], [2], [1], [1], [0, 0, 0, 1, 1, 1], [0], [0]>} : vector<2x8x8xf32>, vector<2x8x8xf32>, vector<2x8x8xf32> -> vector<2x8x8xf32>
    "tpu.trace_stop"() : () -> ()
    %cst_170 = arith.constant 0.353553385 : f32
    %569 = vector.broadcast %cst_170 : f32 to vector<2x8x8xf32>
    %570 = arith.mulf %568, %569 : vector<2x8x8xf32>
    %cst_171 = arith.constant dense<0xFF800000> : vector<2x8xf32>
    %571 = vector.multi_reduction <maximumf>, %570, %cst_171 [2] : vector<2x8x8xf32> to vector<2x8xf32>
    %572 = vector.shape_cast %571 : vector<2x8xf32> to vector<2x8x1xf32>
    %573 = vector.broadcast %572 : vector<2x8x1xf32> to vector<2x8x8xf32>
    %574 = arith.subf %570, %573 : vector<2x8x8xf32>
    %575 = math.exp %574 : vector<2x8x8xf32>
    %cst_172 = arith.constant dense<0.000000e+00> : vector<2x8xf32>
    %576 = vector.multi_reduction <add>, %575, %cst_172 [2] : vector<2x8x8xf32> to vector<2x8xf32>
    %577 = vector.shape_cast %576 : vector<2x8xf32> to vector<2x8x1xf32>
    %578 = tpu.reciprocal %577 {approx = true} : vector<2x8x1xf32> -> vector<2x8x1xf32>
    %579 = vector.broadcast %578 : vector<2x8x1xf32> to vector<2x8x8xf32>
    %580 = arith.mulf %575, %579 : vector<2x8x8xf32>
    "tpu.trace_start"() <{level = 10 : i32, message = "bqk,bkd->bqd"}> : () -> ()
    %cst_173 = arith.constant dense<0.000000e+00> : vector<2x8x8xf32>
    %581 = tpu.matmul %580, %567, %cst_173 {dimension_numbers = #tpu.dot_dimension_numbers<[2], [1], [1], [2], [0, 0, 0, 1, 1, 2], [0], [0]>} : vector<2x8x8xf32>, vector<2x8x8xf32>, vector<2x8x8xf32> -> vector<2x8x8xf32>
    "tpu.trace_stop"() : () -> ()
    %582 = vector.shape_cast %581 : vector<2x8x8xf32> to vector<16x8xf32>
    %583 = vector.extract_strided_slice %515 {offsets = [0, 24], sizes = [16, 8], strides = [1, 1]} : vector<16x32xf32> to vector<16x8xf32>
    %584 = vector.shape_cast %583 : vector<16x8xf32> to vector<2x8x8xf32>
    %585 = vector.extract_strided_slice %516 {offsets = [0, 24], sizes = [16, 8], strides = [1, 1]} : vector<16x32xf32> to vector<16x8xf32>
    %586 = vector.shape_cast %585 : vector<16x8xf32> to vector<2x8x8xf32>
    %587 = vector.extract_strided_slice %517 {offsets = [0, 24], sizes = [16, 8], strides = [1, 1]} : vector<16x32xf32> to vector<16x8xf32>
    %588 = vector.shape_cast %587 : vector<16x8xf32> to vector<2x8x8xf32>
    "tpu.trace_start"() <{level = 10 : i32, message = "bqd,bkd->bqk"}> : () -> ()
    %cst_174 = arith.constant dense<0.000000e+00> : vector<2x8x8xf32>
    %589 = tpu.matmul %584, %586, %cst_174 {dimension_numbers = #tpu.dot_dimension_numbers<[2], [2], [1], [1], [0, 0, 0, 1, 1, 1], [0], [0]>} : vector<2x8x8xf32>, vector<2x8x8xf32>, vector<2x8x8xf32> -> vector<2x8x8xf32>
    "tpu.trace_stop"() : () -> ()
    %cst_175 = arith.constant 0.353553385 : f32
    %590 = vector.broadcast %cst_175 : f32 to vector<2x8x8xf32>
    %591 = arith.mulf %589, %590 : vector<2x8x8xf32>
    %cst_176 = arith.constant dense<0xFF800000> : vector<2x8xf32>
    %592 = vector.multi_reduction <maximumf>, %591, %cst_176 [2] : vector<2x8x8xf32> to vector<2x8xf32>
    %593 = vector.shape_cast %592 : vector<2x8xf32> to vector<2x8x1xf32>
    %594 = vector.broadcast %593 : vector<2x8x1xf32> to vector<2x8x8xf32>
    %595 = arith.subf %591, %594 : vector<2x8x8xf32>
    %596 = math.exp %595 : vector<2x8x8xf32>
    %cst_177 = arith.constant dense<0.000000e+00> : vector<2x8xf32>
    %597 = vector.multi_reduction <add>, %596, %cst_177 [2] : vector<2x8x8xf32> to vector<2x8xf32>
    %598 = vector.shape_cast %597 : vector<2x8xf32> to vector<2x8x1xf32>
    %599 = tpu.reciprocal %598 {approx = true} : vector<2x8x1xf32> -> vector<2x8x1xf32>
    %600 = vector.broadcast %599 : vector<2x8x1xf32> to vector<2x8x8xf32>
    %601 = arith.mulf %596, %600 : vector<2x8x8xf32>
    "tpu.trace_start"() <{level = 10 : i32, message = "bqk,bkd->bqd"}> : () -> ()
    %cst_178 = arith.constant dense<0.000000e+00> : vector<2x8x8xf32>
    %602 = tpu.matmul %601, %588, %cst_178 {dimension_numbers = #tpu.dot_dimension_numbers<[2], [1], [1], [2], [0, 0, 0, 1, 1, 2], [0], [0]>} : vector<2x8x8xf32>, vector<2x8x8xf32>, vector<2x8x8xf32> -> vector<2x8x8xf32>
    "tpu.trace_stop"() : () -> ()
    %603 = vector.shape_cast %602 : vector<2x8x8xf32> to vector<16x8xf32>
    %604 = tpu.concatenate %540, %561, %582, %603 in 1 : vector<16x8xf32>, vector<16x8xf32>, vector<16x8xf32>, vector<16x8xf32> -> vector<16x32xf32>
    %cst_179 = arith.constant dense<0.000000e+00> : vector<16x32xf32>
    %605 = tpu.matmul %604, %518, %cst_179 {dimension_numbers = #tpu.dot_dimension_numbers<[1], [0], [0], [1], [0, 0, 1, 1], [], []>} : vector<16x32xf32>, vector<32x32xf32>, vector<16x32xf32> -> vector<16x32xf32>
    %606 = vector.broadcast %519 : vector<1x32xf32> to vector<16x32xf32>
    %607 = arith.addf %605, %606 : vector<16x32xf32>
    %608 = arith.addf %607, %510 : vector<16x32xf32>
    %c23 = arith.constant 23 : index
    %c0_180 = arith.constant 0 : index
    %609 = vector.load %arg5[%c23, %c0_180] : memref<56x128xf32, #tpu.memory_space<vmem>>, vector<1x32xf32>
    %c24 = arith.constant 24 : index
    %c0_181 = arith.constant 0 : index
    %610 = vector.load %arg5[%c24, %c0_181] : memref<56x128xf32, #tpu.memory_space<vmem>>, vector<1x32xf32>
    %cst_182 = arith.constant dense<0.000000e+00> : vector<16xf32>
    %611 = vector.multi_reduction <add>, %608, %cst_182 [1] : vector<16x32xf32> to vector<16xf32>
    %612 = vector.shape_cast %611 : vector<16xf32> to vector<16x1xf32>
    %cst_183 = arith.constant 3.200000e+01 : f32
    %613 = vector.broadcast %cst_183 : f32 to vector<16x1xf32>
    %614 = arith.divf %612, %613 : vector<16x1xf32>
    %615 = vector.broadcast %614 : vector<16x1xf32> to vector<16x32xf32>
    %616 = arith.subf %608, %615 : vector<16x32xf32>
    %617 = arith.mulf %616, %616 : vector<16x32xf32>
    %cst_184 = arith.constant dense<0.000000e+00> : vector<16xf32>
    %618 = vector.multi_reduction <add>, %617, %cst_184 [1] : vector<16x32xf32> to vector<16xf32>
    %619 = vector.shape_cast %618 : vector<16xf32> to vector<16x1xf32>
    %cst_185 = arith.constant 3.200000e+01 : f32
    %620 = vector.broadcast %cst_185 : f32 to vector<16x1xf32>
    %621 = arith.divf %619, %620 : vector<16x1xf32>
    %cst_186 = arith.constant 9.99999996E-13 : f32
    %622 = vector.broadcast %cst_186 : f32 to vector<16x1xf32>
    %623 = arith.addf %621, %622 : vector<16x1xf32>
    %624 = math.rsqrt %623 : vector<16x1xf32>
    %625 = vector.broadcast %624 : vector<16x1xf32> to vector<16x32xf32>
    %626 = arith.mulf %616, %625 : vector<16x32xf32>
    %627 = vector.broadcast %609 : vector<1x32xf32> to vector<16x32xf32>
    %628 = arith.mulf %626, %627 : vector<16x32xf32>
    %629 = vector.broadcast %610 : vector<1x32xf32> to vector<16x32xf32>
    %630 = arith.addf %628, %629 : vector<16x32xf32>
    %c480 = arith.constant 480 : index
    %c0_187 = arith.constant 0 : index
    %631 = vector.load %arg4[%c480, %c0_187] : memref<1024x128xf32, #tpu.memory_space<vmem>>, vector<32x64xf32>
    %cst_188 = arith.constant dense<0.000000e+00> : vector<16x64xf32>
    %632 = tpu.matmul %630, %631, %cst_188 {dimension_numbers = #tpu.dot_dimension_numbers<[1], [0], [0], [1], [0, 0, 1, 1], [], []>} : vector<16x32xf32>, vector<32x64xf32>, vector<16x64xf32> -> vector<16x64xf32>
    %c25 = arith.constant 25 : index
    %c0_189 = arith.constant 0 : index
    %633 = vector.load %arg5[%c25, %c0_189] : memref<56x128xf32, #tpu.memory_space<vmem>>, vector<1x64xf32>
    %634 = vector.broadcast %633 : vector<1x64xf32> to vector<16x64xf32>
    %635 = arith.addf %632, %634 : vector<16x64xf32>
    %cst_190 = arith.constant 5.000000e-01 : f32
    %636 = vector.broadcast %cst_190 : f32 to vector<16x64xf32>
    %637 = arith.mulf %636, %635 : vector<16x64xf32>
    %cst_191 = arith.constant 4.471500e-02 : f32
    %638 = vector.broadcast %cst_191 : f32 to vector<16x64xf32>
    %639 = arith.mulf %638, %635 : vector<16x64xf32>
    %640 = arith.mulf %639, %635 : vector<16x64xf32>
    %641 = arith.mulf %640, %635 : vector<16x64xf32>
    %642 = arith.addf %635, %641 : vector<16x64xf32>
    %cst_192 = arith.constant 0.797884583 : f32
    %643 = vector.broadcast %cst_192 : f32 to vector<16x64xf32>
    %644 = arith.mulf %643, %642 : vector<16x64xf32>
    %645 = math.tanh %644 : vector<16x64xf32>
    %cst_193 = arith.constant 1.000000e+00 : f32
    %646 = vector.broadcast %cst_193 : f32 to vector<16x64xf32>
    %647 = arith.addf %646, %645 : vector<16x64xf32>
    %648 = arith.mulf %637, %647 : vector<16x64xf32>
    %c512 = arith.constant 512 : index
    %c0_194 = arith.constant 0 : index
    %649 = vector.load %arg4[%c512, %c0_194] : memref<1024x128xf32, #tpu.memory_space<vmem>>, vector<64x32xf32>
    %cst_195 = arith.constant dense<0.000000e+00> : vector<16x32xf32>
    %650 = tpu.matmul %648, %649, %cst_195 {dimension_numbers = #tpu.dot_dimension_numbers<[1], [0], [0], [1], [0, 0, 1, 1], [], []>} : vector<16x64xf32>, vector<64x32xf32>, vector<16x32xf32> -> vector<16x32xf32>
    %c26 = arith.constant 26 : index
    %c0_196 = arith.constant 0 : index
    %651 = vector.load %arg5[%c26, %c0_196] : memref<56x128xf32, #tpu.memory_space<vmem>>, vector<1x32xf32>
    %652 = vector.broadcast %651 : vector<1x32xf32> to vector<16x32xf32>
    %653 = arith.addf %650, %652 : vector<16x32xf32>
    %654 = arith.addf %653, %630 : vector<16x32xf32>
    %c27 = arith.constant 27 : index
    %c0_197 = arith.constant 0 : index
    %655 = vector.load %arg5[%c27, %c0_197] : memref<56x128xf32, #tpu.memory_space<vmem>>, vector<1x32xf32>
    %c28 = arith.constant 28 : index
    %c0_198 = arith.constant 0 : index
    %656 = vector.load %arg5[%c28, %c0_198] : memref<56x128xf32, #tpu.memory_space<vmem>>, vector<1x32xf32>
    %cst_199 = arith.constant dense<0.000000e+00> : vector<16xf32>
    %657 = vector.multi_reduction <add>, %654, %cst_199 [1] : vector<16x32xf32> to vector<16xf32>
    %658 = vector.shape_cast %657 : vector<16xf32> to vector<16x1xf32>
    %cst_200 = arith.constant 3.200000e+01 : f32
    %659 = vector.broadcast %cst_200 : f32 to vector<16x1xf32>
    %660 = arith.divf %658, %659 : vector<16x1xf32>
    %661 = vector.broadcast %660 : vector<16x1xf32> to vector<16x32xf32>
    %662 = arith.subf %654, %661 : vector<16x32xf32>
    %663 = arith.mulf %662, %662 : vector<16x32xf32>
    %cst_201 = arith.constant dense<0.000000e+00> : vector<16xf32>
    %664 = vector.multi_reduction <add>, %663, %cst_201 [1] : vector<16x32xf32> to vector<16xf32>
    %665 = vector.shape_cast %664 : vector<16xf32> to vector<16x1xf32>
    %cst_202 = arith.constant 3.200000e+01 : f32
    %666 = vector.broadcast %cst_202 : f32 to vector<16x1xf32>
    %667 = arith.divf %665, %666 : vector<16x1xf32>
    %cst_203 = arith.constant 9.99999996E-13 : f32
    %668 = vector.broadcast %cst_203 : f32 to vector<16x1xf32>
    %669 = arith.addf %667, %668 : vector<16x1xf32>
    %670 = math.rsqrt %669 : vector<16x1xf32>
    %671 = vector.broadcast %670 : vector<16x1xf32> to vector<16x32xf32>
    %672 = arith.mulf %662, %671 : vector<16x32xf32>
    %673 = vector.broadcast %655 : vector<1x32xf32> to vector<16x32xf32>
    %674 = arith.mulf %672, %673 : vector<16x32xf32>
    %675 = vector.broadcast %656 : vector<1x32xf32> to vector<16x32xf32>
    %676 = arith.addf %674, %675 : vector<16x32xf32>
    %c672 = arith.constant 672 : index
    %c0_204 = arith.constant 0 : index
    %677 = vector.load %arg4[%c672, %c0_204] : memref<1024x128xf32, #tpu.memory_space<vmem>>, vector<32x64xf32>
    %cst_205 = arith.constant dense<0.000000e+00> : vector<16x64xf32>
    %678 = tpu.matmul %341, %677, %cst_205 {dimension_numbers = #tpu.dot_dimension_numbers<[1], [0], [0], [1], [0, 0, 1, 1], [], []>} : vector<16x32xf32>, vector<32x64xf32>, vector<16x64xf32> -> vector<16x64xf32>
    %c34 = arith.constant 34 : index
    %c0_206 = arith.constant 0 : index
    %679 = vector.load %arg5[%c34, %c0_206] : memref<56x128xf32, #tpu.memory_space<vmem>>, vector<1x64xf32>
    %680 = vector.broadcast %679 : vector<1x64xf32> to vector<16x64xf32>
    %681 = arith.addf %678, %680 : vector<16x64xf32>
    %c576 = arith.constant 576 : index
    %c0_207 = arith.constant 0 : index
    %682 = vector.load %arg4[%c576, %c0_207] : memref<1024x128xf32, #tpu.memory_space<vmem>>, vector<32x96xf32>
    %cst_208 = arith.constant dense<0.000000e+00> : vector<16x96xf32>
    %683 = tpu.matmul %676, %682, %cst_208 {dimension_numbers = #tpu.dot_dimension_numbers<[1], [0], [0], [1], [0, 0, 1, 1], [], []>} : vector<16x32xf32>, vector<32x96xf32>, vector<16x96xf32> -> vector<16x96xf32>
    %c29 = arith.constant 29 : index
    %c0_209 = arith.constant 0 : index
    %684 = vector.load %arg5[%c29, %c0_209] : memref<56x128xf32, #tpu.memory_space<vmem>>, vector<1x96xf32>
    %685 = vector.broadcast %684 : vector<1x96xf32> to vector<16x96xf32>
    %686 = arith.addf %683, %685 : vector<16x96xf32>
    %687 = vector.extract_strided_slice %686 {offsets = [0, 0], sizes = [16, 32], strides = [1, 1]} : vector<16x96xf32> to vector<16x32xf32>
    %688 = vector.extract_strided_slice %686 {offsets = [0, 32], sizes = [16, 32], strides = [1, 1]} : vector<16x96xf32> to vector<16x32xf32>
    %689 = vector.extract_strided_slice %686 {offsets = [0, 64], sizes = [16, 32], strides = [1, 1]} : vector<16x96xf32> to vector<16x32xf32>
    %c608 = arith.constant 608 : index
    %c0_210 = arith.constant 0 : index
    %690 = vector.load %arg4[%c608, %c0_210] : memref<1024x128xf32, #tpu.memory_space<vmem>>, vector<32x32xf32>
    %c30 = arith.constant 30 : index
    %c0_211 = arith.constant 0 : index
    %691 = vector.load %arg5[%c30, %c0_211] : memref<56x128xf32, #tpu.memory_space<vmem>>, vector<1x32xf32>
    %692 = vector.extract_strided_slice %687 {offsets = [0, 0], sizes = [16, 8], strides = [1, 1]} : vector<16x32xf32> to vector<16x8xf32>
    %693 = vector.shape_cast %692 : vector<16x8xf32> to vector<2x8x8xf32>
    %694 = vector.extract_strided_slice %688 {offsets = [0, 0], sizes = [16, 8], strides = [1, 1]} : vector<16x32xf32> to vector<16x8xf32>
    %695 = vector.shape_cast %694 : vector<16x8xf32> to vector<2x8x8xf32>
    %696 = vector.extract_strided_slice %689 {offsets = [0, 0], sizes = [16, 8], strides = [1, 1]} : vector<16x32xf32> to vector<16x8xf32>
    %697 = vector.shape_cast %696 : vector<16x8xf32> to vector<2x8x8xf32>
    "tpu.trace_start"() <{level = 10 : i32, message = "bqd,bkd->bqk"}> : () -> ()
    %cst_212 = arith.constant dense<0.000000e+00> : vector<2x8x8xf32>
    %698 = tpu.matmul %693, %695, %cst_212 {dimension_numbers = #tpu.dot_dimension_numbers<[2], [2], [1], [1], [0, 0, 0, 1, 1, 1], [0], [0]>} : vector<2x8x8xf32>, vector<2x8x8xf32>, vector<2x8x8xf32> -> vector<2x8x8xf32>
    "tpu.trace_stop"() : () -> ()
    %cst_213 = arith.constant 0.353553385 : f32
    %699 = vector.broadcast %cst_213 : f32 to vector<2x8x8xf32>
    %700 = arith.mulf %698, %699 : vector<2x8x8xf32>
    %701 = vector.broadcast %6 : vector<1x8x8xf32> to vector<2x8x8xf32>
    %702 = arith.addf %700, %701 : vector<2x8x8xf32>
    %cst_214 = arith.constant dense<0xFF800000> : vector<2x8xf32>
    %703 = vector.multi_reduction <maximumf>, %702, %cst_214 [2] : vector<2x8x8xf32> to vector<2x8xf32>
    %704 = vector.shape_cast %703 : vector<2x8xf32> to vector<2x8x1xf32>
    %705 = vector.broadcast %704 : vector<2x8x1xf32> to vector<2x8x8xf32>
    %706 = arith.subf %702, %705 : vector<2x8x8xf32>
    %707 = math.exp %706 : vector<2x8x8xf32>
    %cst_215 = arith.constant dense<0.000000e+00> : vector<2x8xf32>
    %708 = vector.multi_reduction <add>, %707, %cst_215 [2] : vector<2x8x8xf32> to vector<2x8xf32>
    %709 = vector.shape_cast %708 : vector<2x8xf32> to vector<2x8x1xf32>
    %710 = tpu.reciprocal %709 {approx = true} : vector<2x8x1xf32> -> vector<2x8x1xf32>
    %711 = vector.broadcast %710 : vector<2x8x1xf32> to vector<2x8x8xf32>
    %712 = arith.mulf %707, %711 : vector<2x8x8xf32>
    "tpu.trace_start"() <{level = 10 : i32, message = "bqk,bkd->bqd"}> : () -> ()
    %cst_216 = arith.constant dense<0.000000e+00> : vector<2x8x8xf32>
    %713 = tpu.matmul %712, %697, %cst_216 {dimension_numbers = #tpu.dot_dimension_numbers<[2], [1], [1], [2], [0, 0, 0, 1, 1, 2], [0], [0]>} : vector<2x8x8xf32>, vector<2x8x8xf32>, vector<2x8x8xf32> -> vector<2x8x8xf32>
    "tpu.trace_stop"() : () -> ()
    %714 = vector.shape_cast %713 : vector<2x8x8xf32> to vector<16x8xf32>
    %715 = vector.extract_strided_slice %687 {offsets = [0, 8], sizes = [16, 8], strides = [1, 1]} : vector<16x32xf32> to vector<16x8xf32>
    %716 = vector.shape_cast %715 : vector<16x8xf32> to vector<2x8x8xf32>
    %717 = vector.extract_strided_slice %688 {offsets = [0, 8], sizes = [16, 8], strides = [1, 1]} : vector<16x32xf32> to vector<16x8xf32>
    %718 = vector.shape_cast %717 : vector<16x8xf32> to vector<2x8x8xf32>
    %719 = vector.extract_strided_slice %689 {offsets = [0, 8], sizes = [16, 8], strides = [1, 1]} : vector<16x32xf32> to vector<16x8xf32>
    %720 = vector.shape_cast %719 : vector<16x8xf32> to vector<2x8x8xf32>
    "tpu.trace_start"() <{level = 10 : i32, message = "bqd,bkd->bqk"}> : () -> ()
    %cst_217 = arith.constant dense<0.000000e+00> : vector<2x8x8xf32>
    %721 = tpu.matmul %716, %718, %cst_217 {dimension_numbers = #tpu.dot_dimension_numbers<[2], [2], [1], [1], [0, 0, 0, 1, 1, 1], [0], [0]>} : vector<2x8x8xf32>, vector<2x8x8xf32>, vector<2x8x8xf32> -> vector<2x8x8xf32>
    "tpu.trace_stop"() : () -> ()
    %cst_218 = arith.constant 0.353553385 : f32
    %722 = vector.broadcast %cst_218 : f32 to vector<2x8x8xf32>
    %723 = arith.mulf %721, %722 : vector<2x8x8xf32>
    %724 = vector.broadcast %6 : vector<1x8x8xf32> to vector<2x8x8xf32>
    %725 = arith.addf %723, %724 : vector<2x8x8xf32>
    %cst_219 = arith.constant dense<0xFF800000> : vector<2x8xf32>
    %726 = vector.multi_reduction <maximumf>, %725, %cst_219 [2] : vector<2x8x8xf32> to vector<2x8xf32>
    %727 = vector.shape_cast %726 : vector<2x8xf32> to vector<2x8x1xf32>
    %728 = vector.broadcast %727 : vector<2x8x1xf32> to vector<2x8x8xf32>
    %729 = arith.subf %725, %728 : vector<2x8x8xf32>
    %730 = math.exp %729 : vector<2x8x8xf32>
    %cst_220 = arith.constant dense<0.000000e+00> : vector<2x8xf32>
    %731 = vector.multi_reduction <add>, %730, %cst_220 [2] : vector<2x8x8xf32> to vector<2x8xf32>
    %732 = vector.shape_cast %731 : vector<2x8xf32> to vector<2x8x1xf32>
    %733 = tpu.reciprocal %732 {approx = true} : vector<2x8x1xf32> -> vector<2x8x1xf32>
    %734 = vector.broadcast %733 : vector<2x8x1xf32> to vector<2x8x8xf32>
    %735 = arith.mulf %730, %734 : vector<2x8x8xf32>
    "tpu.trace_start"() <{level = 10 : i32, message = "bqk,bkd->bqd"}> : () -> ()
    %cst_221 = arith.constant dense<0.000000e+00> : vector<2x8x8xf32>
    %736 = tpu.matmul %735, %720, %cst_221 {dimension_numbers = #tpu.dot_dimension_numbers<[2], [1], [1], [2], [0, 0, 0, 1, 1, 2], [0], [0]>} : vector<2x8x8xf32>, vector<2x8x8xf32>, vector<2x8x8xf32> -> vector<2x8x8xf32>
    "tpu.trace_stop"() : () -> ()
    %737 = vector.shape_cast %736 : vector<2x8x8xf32> to vector<16x8xf32>
    %738 = vector.extract_strided_slice %687 {offsets = [0, 16], sizes = [16, 8], strides = [1, 1]} : vector<16x32xf32> to vector<16x8xf32>
    %739 = vector.shape_cast %738 : vector<16x8xf32> to vector<2x8x8xf32>
    %740 = vector.extract_strided_slice %688 {offsets = [0, 16], sizes = [16, 8], strides = [1, 1]} : vector<16x32xf32> to vector<16x8xf32>
    %741 = vector.shape_cast %740 : vector<16x8xf32> to vector<2x8x8xf32>
    %742 = vector.extract_strided_slice %689 {offsets = [0, 16], sizes = [16, 8], strides = [1, 1]} : vector<16x32xf32> to vector<16x8xf32>
    %743 = vector.shape_cast %742 : vector<16x8xf32> to vector<2x8x8xf32>
    "tpu.trace_start"() <{level = 10 : i32, message = "bqd,bkd->bqk"}> : () -> ()
    %cst_222 = arith.constant dense<0.000000e+00> : vector<2x8x8xf32>
    %744 = tpu.matmul %739, %741, %cst_222 {dimension_numbers = #tpu.dot_dimension_numbers<[2], [2], [1], [1], [0, 0, 0, 1, 1, 1], [0], [0]>} : vector<2x8x8xf32>, vector<2x8x8xf32>, vector<2x8x8xf32> -> vector<2x8x8xf32>
    "tpu.trace_stop"() : () -> ()
    %cst_223 = arith.constant 0.353553385 : f32
    %745 = vector.broadcast %cst_223 : f32 to vector<2x8x8xf32>
    %746 = arith.mulf %744, %745 : vector<2x8x8xf32>
    %747 = vector.broadcast %6 : vector<1x8x8xf32> to vector<2x8x8xf32>
    %748 = arith.addf %746, %747 : vector<2x8x8xf32>
    %cst_224 = arith.constant dense<0xFF800000> : vector<2x8xf32>
    %749 = vector.multi_reduction <maximumf>, %748, %cst_224 [2] : vector<2x8x8xf32> to vector<2x8xf32>
    %750 = vector.shape_cast %749 : vector<2x8xf32> to vector<2x8x1xf32>
    %751 = vector.broadcast %750 : vector<2x8x1xf32> to vector<2x8x8xf32>
    %752 = arith.subf %748, %751 : vector<2x8x8xf32>
    %753 = math.exp %752 : vector<2x8x8xf32>
    %cst_225 = arith.constant dense<0.000000e+00> : vector<2x8xf32>
    %754 = vector.multi_reduction <add>, %753, %cst_225 [2] : vector<2x8x8xf32> to vector<2x8xf32>
    %755 = vector.shape_cast %754 : vector<2x8xf32> to vector<2x8x1xf32>
    %756 = tpu.reciprocal %755 {approx = true} : vector<2x8x1xf32> -> vector<2x8x1xf32>
    %757 = vector.broadcast %756 : vector<2x8x1xf32> to vector<2x8x8xf32>
    %758 = arith.mulf %753, %757 : vector<2x8x8xf32>
    "tpu.trace_start"() <{level = 10 : i32, message = "bqk,bkd->bqd"}> : () -> ()
    %cst_226 = arith.constant dense<0.000000e+00> : vector<2x8x8xf32>
    %759 = tpu.matmul %758, %743, %cst_226 {dimension_numbers = #tpu.dot_dimension_numbers<[2], [1], [1], [2], [0, 0, 0, 1, 1, 2], [0], [0]>} : vector<2x8x8xf32>, vector<2x8x8xf32>, vector<2x8x8xf32> -> vector<2x8x8xf32>
    "tpu.trace_stop"() : () -> ()
    %760 = vector.shape_cast %759 : vector<2x8x8xf32> to vector<16x8xf32>
    %761 = vector.extract_strided_slice %687 {offsets = [0, 24], sizes = [16, 8], strides = [1, 1]} : vector<16x32xf32> to vector<16x8xf32>
    %762 = vector.shape_cast %761 : vector<16x8xf32> to vector<2x8x8xf32>
    %763 = vector.extract_strided_slice %688 {offsets = [0, 24], sizes = [16, 8], strides = [1, 1]} : vector<16x32xf32> to vector<16x8xf32>
    %764 = vector.shape_cast %763 : vector<16x8xf32> to vector<2x8x8xf32>
    %765 = vector.extract_strided_slice %689 {offsets = [0, 24], sizes = [16, 8], strides = [1, 1]} : vector<16x32xf32> to vector<16x8xf32>
    %766 = vector.shape_cast %765 : vector<16x8xf32> to vector<2x8x8xf32>
    "tpu.trace_start"() <{level = 10 : i32, message = "bqd,bkd->bqk"}> : () -> ()
    %cst_227 = arith.constant dense<0.000000e+00> : vector<2x8x8xf32>
    %767 = tpu.matmul %762, %764, %cst_227 {dimension_numbers = #tpu.dot_dimension_numbers<[2], [2], [1], [1], [0, 0, 0, 1, 1, 1], [0], [0]>} : vector<2x8x8xf32>, vector<2x8x8xf32>, vector<2x8x8xf32> -> vector<2x8x8xf32>
    "tpu.trace_stop"() : () -> ()
    %cst_228 = arith.constant 0.353553385 : f32
    %768 = vector.broadcast %cst_228 : f32 to vector<2x8x8xf32>
    %769 = arith.mulf %767, %768 : vector<2x8x8xf32>
    %770 = vector.broadcast %6 : vector<1x8x8xf32> to vector<2x8x8xf32>
    %771 = arith.addf %769, %770 : vector<2x8x8xf32>
    %cst_229 = arith.constant dense<0xFF800000> : vector<2x8xf32>
    %772 = vector.multi_reduction <maximumf>, %771, %cst_229 [2] : vector<2x8x8xf32> to vector<2x8xf32>
    %773 = vector.shape_cast %772 : vector<2x8xf32> to vector<2x8x1xf32>
    %774 = vector.broadcast %773 : vector<2x8x1xf32> to vector<2x8x8xf32>
    %775 = arith.subf %771, %774 : vector<2x8x8xf32>
    %776 = math.exp %775 : vector<2x8x8xf32>
    %cst_230 = arith.constant dense<0.000000e+00> : vector<2x8xf32>
    %777 = vector.multi_reduction <add>, %776, %cst_230 [2] : vector<2x8x8xf32> to vector<2x8xf32>
    %778 = vector.shape_cast %777 : vector<2x8xf32> to vector<2x8x1xf32>
    %779 = tpu.reciprocal %778 {approx = true} : vector<2x8x1xf32> -> vector<2x8x1xf32>
    %780 = vector.broadcast %779 : vector<2x8x1xf32> to vector<2x8x8xf32>
    %781 = arith.mulf %776, %780 : vector<2x8x8xf32>
    "tpu.trace_start"() <{level = 10 : i32, message = "bqk,bkd->bqd"}> : () -> ()
    %cst_231 = arith.constant dense<0.000000e+00> : vector<2x8x8xf32>
    %782 = tpu.matmul %781, %766, %cst_231 {dimension_numbers = #tpu.dot_dimension_numbers<[2], [1], [1], [2], [0, 0, 0, 1, 1, 2], [0], [0]>} : vector<2x8x8xf32>, vector<2x8x8xf32>, vector<2x8x8xf32> -> vector<2x8x8xf32>
    "tpu.trace_stop"() : () -> ()
    %783 = vector.shape_cast %782 : vector<2x8x8xf32> to vector<16x8xf32>
    %784 = tpu.concatenate %714, %737, %760, %783 in 1 : vector<16x8xf32>, vector<16x8xf32>, vector<16x8xf32>, vector<16x8xf32> -> vector<16x32xf32>
    %cst_232 = arith.constant dense<0.000000e+00> : vector<16x32xf32>
    %785 = tpu.matmul %784, %690, %cst_232 {dimension_numbers = #tpu.dot_dimension_numbers<[1], [0], [0], [1], [0, 0, 1, 1], [], []>} : vector<16x32xf32>, vector<32x32xf32>, vector<16x32xf32> -> vector<16x32xf32>
    %786 = vector.broadcast %691 : vector<1x32xf32> to vector<16x32xf32>
    %787 = arith.addf %785, %786 : vector<16x32xf32>
    %788 = arith.addf %787, %676 : vector<16x32xf32>
    %c31 = arith.constant 31 : index
    %c0_233 = arith.constant 0 : index
    %789 = vector.load %arg5[%c31, %c0_233] : memref<56x128xf32, #tpu.memory_space<vmem>>, vector<1x32xf32>
    %c32_234 = arith.constant 32 : index
    %c0_235 = arith.constant 0 : index
    %790 = vector.load %arg5[%c32_234, %c0_235] : memref<56x128xf32, #tpu.memory_space<vmem>>, vector<1x32xf32>
    %cst_236 = arith.constant dense<0.000000e+00> : vector<16xf32>
    %791 = vector.multi_reduction <add>, %788, %cst_236 [1] : vector<16x32xf32> to vector<16xf32>
    %792 = vector.shape_cast %791 : vector<16xf32> to vector<16x1xf32>
    %cst_237 = arith.constant 3.200000e+01 : f32
    %793 = vector.broadcast %cst_237 : f32 to vector<16x1xf32>
    %794 = arith.divf %792, %793 : vector<16x1xf32>
    %795 = vector.broadcast %794 : vector<16x1xf32> to vector<16x32xf32>
    %796 = arith.subf %788, %795 : vector<16x32xf32>
    %797 = arith.mulf %796, %796 : vector<16x32xf32>
    %cst_238 = arith.constant dense<0.000000e+00> : vector<16xf32>
    %798 = vector.multi_reduction <add>, %797, %cst_238 [1] : vector<16x32xf32> to vector<16xf32>
    %799 = vector.shape_cast %798 : vector<16xf32> to vector<16x1xf32>
    %cst_239 = arith.constant 3.200000e+01 : f32
    %800 = vector.broadcast %cst_239 : f32 to vector<16x1xf32>
    %801 = arith.divf %799, %800 : vector<16x1xf32>
    %cst_240 = arith.constant 9.99999996E-13 : f32
    %802 = vector.broadcast %cst_240 : f32 to vector<16x1xf32>
    %803 = arith.addf %801, %802 : vector<16x1xf32>
    %804 = math.rsqrt %803 : vector<16x1xf32>
    %805 = vector.broadcast %804 : vector<16x1xf32> to vector<16x32xf32>
    %806 = arith.mulf %796, %805 : vector<16x32xf32>
    %807 = vector.broadcast %789 : vector<1x32xf32> to vector<16x32xf32>
    %808 = arith.mulf %806, %807 : vector<16x32xf32>
    %809 = vector.broadcast %790 : vector<1x32xf32> to vector<16x32xf32>
    %810 = arith.addf %808, %809 : vector<16x32xf32>
    %c640 = arith.constant 640 : index
    %c0_241 = arith.constant 0 : index
    %811 = vector.load %arg4[%c640, %c0_241] : memref<1024x128xf32, #tpu.memory_space<vmem>>, vector<32x32xf32>
    %cst_242 = arith.constant dense<0.000000e+00> : vector<16x32xf32>
    %812 = tpu.matmul %810, %811, %cst_242 {dimension_numbers = #tpu.dot_dimension_numbers<[1], [0], [0], [1], [0, 0, 1, 1], [], []>} : vector<16x32xf32>, vector<32x32xf32>, vector<16x32xf32> -> vector<16x32xf32>
    %c33 = arith.constant 33 : index
    %c0_243 = arith.constant 0 : index
    %813 = vector.load %arg5[%c33, %c0_243] : memref<56x128xf32, #tpu.memory_space<vmem>>, vector<1x32xf32>
    %814 = vector.broadcast %813 : vector<1x32xf32> to vector<16x32xf32>
    %815 = arith.addf %812, %814 : vector<16x32xf32>
    %816 = vector.extract_strided_slice %681 {offsets = [0, 0], sizes = [16, 32], strides = [1, 1]} : vector<16x64xf32> to vector<16x32xf32>
    %817 = vector.extract_strided_slice %681 {offsets = [0, 32], sizes = [16, 32], strides = [1, 1]} : vector<16x64xf32> to vector<16x32xf32>
    %c704 = arith.constant 704 : index
    %c0_244 = arith.constant 0 : index
    %818 = vector.load %arg4[%c704, %c0_244] : memref<1024x128xf32, #tpu.memory_space<vmem>>, vector<32x32xf32>
    %c35 = arith.constant 35 : index
    %c0_245 = arith.constant 0 : index
    %819 = vector.load %arg5[%c35, %c0_245] : memref<56x128xf32, #tpu.memory_space<vmem>>, vector<1x32xf32>
    %820 = vector.extract_strided_slice %815 {offsets = [0, 0], sizes = [16, 8], strides = [1, 1]} : vector<16x32xf32> to vector<16x8xf32>
    %821 = vector.shape_cast %820 : vector<16x8xf32> to vector<2x8x8xf32>
    %822 = vector.extract_strided_slice %816 {offsets = [0, 0], sizes = [16, 8], strides = [1, 1]} : vector<16x32xf32> to vector<16x8xf32>
    %823 = vector.shape_cast %822 : vector<16x8xf32> to vector<2x8x8xf32>
    %824 = vector.extract_strided_slice %817 {offsets = [0, 0], sizes = [16, 8], strides = [1, 1]} : vector<16x32xf32> to vector<16x8xf32>
    %825 = vector.shape_cast %824 : vector<16x8xf32> to vector<2x8x8xf32>
    "tpu.trace_start"() <{level = 10 : i32, message = "bqd,bkd->bqk"}> : () -> ()
    %cst_246 = arith.constant dense<0.000000e+00> : vector<2x8x8xf32>
    %826 = tpu.matmul %821, %823, %cst_246 {dimension_numbers = #tpu.dot_dimension_numbers<[2], [2], [1], [1], [0, 0, 0, 1, 1, 1], [0], [0]>} : vector<2x8x8xf32>, vector<2x8x8xf32>, vector<2x8x8xf32> -> vector<2x8x8xf32>
    "tpu.trace_stop"() : () -> ()
    %cst_247 = arith.constant 0.353553385 : f32
    %827 = vector.broadcast %cst_247 : f32 to vector<2x8x8xf32>
    %828 = arith.mulf %826, %827 : vector<2x8x8xf32>
    %cst_248 = arith.constant dense<0xFF800000> : vector<2x8xf32>
    %829 = vector.multi_reduction <maximumf>, %828, %cst_248 [2] : vector<2x8x8xf32> to vector<2x8xf32>
    %830 = vector.shape_cast %829 : vector<2x8xf32> to vector<2x8x1xf32>
    %831 = vector.broadcast %830 : vector<2x8x1xf32> to vector<2x8x8xf32>
    %832 = arith.subf %828, %831 : vector<2x8x8xf32>
    %833 = math.exp %832 : vector<2x8x8xf32>
    %cst_249 = arith.constant dense<0.000000e+00> : vector<2x8xf32>
    %834 = vector.multi_reduction <add>, %833, %cst_249 [2] : vector<2x8x8xf32> to vector<2x8xf32>
    %835 = vector.shape_cast %834 : vector<2x8xf32> to vector<2x8x1xf32>
    %836 = tpu.reciprocal %835 {approx = true} : vector<2x8x1xf32> -> vector<2x8x1xf32>
    %837 = vector.broadcast %836 : vector<2x8x1xf32> to vector<2x8x8xf32>
    %838 = arith.mulf %833, %837 : vector<2x8x8xf32>
    "tpu.trace_start"() <{level = 10 : i32, message = "bqk,bkd->bqd"}> : () -> ()
    %cst_250 = arith.constant dense<0.000000e+00> : vector<2x8x8xf32>
    %839 = tpu.matmul %838, %825, %cst_250 {dimension_numbers = #tpu.dot_dimension_numbers<[2], [1], [1], [2], [0, 0, 0, 1, 1, 2], [0], [0]>} : vector<2x8x8xf32>, vector<2x8x8xf32>, vector<2x8x8xf32> -> vector<2x8x8xf32>
    "tpu.trace_stop"() : () -> ()
    %840 = vector.shape_cast %839 : vector<2x8x8xf32> to vector<16x8xf32>
    %841 = vector.extract_strided_slice %815 {offsets = [0, 8], sizes = [16, 8], strides = [1, 1]} : vector<16x32xf32> to vector<16x8xf32>
    %842 = vector.shape_cast %841 : vector<16x8xf32> to vector<2x8x8xf32>
    %843 = vector.extract_strided_slice %816 {offsets = [0, 8], sizes = [16, 8], strides = [1, 1]} : vector<16x32xf32> to vector<16x8xf32>
    %844 = vector.shape_cast %843 : vector<16x8xf32> to vector<2x8x8xf32>
    %845 = vector.extract_strided_slice %817 {offsets = [0, 8], sizes = [16, 8], strides = [1, 1]} : vector<16x32xf32> to vector<16x8xf32>
    %846 = vector.shape_cast %845 : vector<16x8xf32> to vector<2x8x8xf32>
    "tpu.trace_start"() <{level = 10 : i32, message = "bqd,bkd->bqk"}> : () -> ()
    %cst_251 = arith.constant dense<0.000000e+00> : vector<2x8x8xf32>
    %847 = tpu.matmul %842, %844, %cst_251 {dimension_numbers = #tpu.dot_dimension_numbers<[2], [2], [1], [1], [0, 0, 0, 1, 1, 1], [0], [0]>} : vector<2x8x8xf32>, vector<2x8x8xf32>, vector<2x8x8xf32> -> vector<2x8x8xf32>
    "tpu.trace_stop"() : () -> ()
    %cst_252 = arith.constant 0.353553385 : f32
    %848 = vector.broadcast %cst_252 : f32 to vector<2x8x8xf32>
    %849 = arith.mulf %847, %848 : vector<2x8x8xf32>
    %cst_253 = arith.constant dense<0xFF800000> : vector<2x8xf32>
    %850 = vector.multi_reduction <maximumf>, %849, %cst_253 [2] : vector<2x8x8xf32> to vector<2x8xf32>
    %851 = vector.shape_cast %850 : vector<2x8xf32> to vector<2x8x1xf32>
    %852 = vector.broadcast %851 : vector<2x8x1xf32> to vector<2x8x8xf32>
    %853 = arith.subf %849, %852 : vector<2x8x8xf32>
    %854 = math.exp %853 : vector<2x8x8xf32>
    %cst_254 = arith.constant dense<0.000000e+00> : vector<2x8xf32>
    %855 = vector.multi_reduction <add>, %854, %cst_254 [2] : vector<2x8x8xf32> to vector<2x8xf32>
    %856 = vector.shape_cast %855 : vector<2x8xf32> to vector<2x8x1xf32>
    %857 = tpu.reciprocal %856 {approx = true} : vector<2x8x1xf32> -> vector<2x8x1xf32>
    %858 = vector.broadcast %857 : vector<2x8x1xf32> to vector<2x8x8xf32>
    %859 = arith.mulf %854, %858 : vector<2x8x8xf32>
    "tpu.trace_start"() <{level = 10 : i32, message = "bqk,bkd->bqd"}> : () -> ()
    %cst_255 = arith.constant dense<0.000000e+00> : vector<2x8x8xf32>
    %860 = tpu.matmul %859, %846, %cst_255 {dimension_numbers = #tpu.dot_dimension_numbers<[2], [1], [1], [2], [0, 0, 0, 1, 1, 2], [0], [0]>} : vector<2x8x8xf32>, vector<2x8x8xf32>, vector<2x8x8xf32> -> vector<2x8x8xf32>
    "tpu.trace_stop"() : () -> ()
    %861 = vector.shape_cast %860 : vector<2x8x8xf32> to vector<16x8xf32>
    %862 = vector.extract_strided_slice %815 {offsets = [0, 16], sizes = [16, 8], strides = [1, 1]} : vector<16x32xf32> to vector<16x8xf32>
    %863 = vector.shape_cast %862 : vector<16x8xf32> to vector<2x8x8xf32>
    %864 = vector.extract_strided_slice %816 {offsets = [0, 16], sizes = [16, 8], strides = [1, 1]} : vector<16x32xf32> to vector<16x8xf32>
    %865 = vector.shape_cast %864 : vector<16x8xf32> to vector<2x8x8xf32>
    %866 = vector.extract_strided_slice %817 {offsets = [0, 16], sizes = [16, 8], strides = [1, 1]} : vector<16x32xf32> to vector<16x8xf32>
    %867 = vector.shape_cast %866 : vector<16x8xf32> to vector<2x8x8xf32>
    "tpu.trace_start"() <{level = 10 : i32, message = "bqd,bkd->bqk"}> : () -> ()
    %cst_256 = arith.constant dense<0.000000e+00> : vector<2x8x8xf32>
    %868 = tpu.matmul %863, %865, %cst_256 {dimension_numbers = #tpu.dot_dimension_numbers<[2], [2], [1], [1], [0, 0, 0, 1, 1, 1], [0], [0]>} : vector<2x8x8xf32>, vector<2x8x8xf32>, vector<2x8x8xf32> -> vector<2x8x8xf32>
    "tpu.trace_stop"() : () -> ()
    %cst_257 = arith.constant 0.353553385 : f32
    %869 = vector.broadcast %cst_257 : f32 to vector<2x8x8xf32>
    %870 = arith.mulf %868, %869 : vector<2x8x8xf32>
    %cst_258 = arith.constant dense<0xFF800000> : vector<2x8xf32>
    %871 = vector.multi_reduction <maximumf>, %870, %cst_258 [2] : vector<2x8x8xf32> to vector<2x8xf32>
    %872 = vector.shape_cast %871 : vector<2x8xf32> to vector<2x8x1xf32>
    %873 = vector.broadcast %872 : vector<2x8x1xf32> to vector<2x8x8xf32>
    %874 = arith.subf %870, %873 : vector<2x8x8xf32>
    %875 = math.exp %874 : vector<2x8x8xf32>
    %cst_259 = arith.constant dense<0.000000e+00> : vector<2x8xf32>
    %876 = vector.multi_reduction <add>, %875, %cst_259 [2] : vector<2x8x8xf32> to vector<2x8xf32>
    %877 = vector.shape_cast %876 : vector<2x8xf32> to vector<2x8x1xf32>
    %878 = tpu.reciprocal %877 {approx = true} : vector<2x8x1xf32> -> vector<2x8x1xf32>
    %879 = vector.broadcast %878 : vector<2x8x1xf32> to vector<2x8x8xf32>
    %880 = arith.mulf %875, %879 : vector<2x8x8xf32>
    "tpu.trace_start"() <{level = 10 : i32, message = "bqk,bkd->bqd"}> : () -> ()
    %cst_260 = arith.constant dense<0.000000e+00> : vector<2x8x8xf32>
    %881 = tpu.matmul %880, %867, %cst_260 {dimension_numbers = #tpu.dot_dimension_numbers<[2], [1], [1], [2], [0, 0, 0, 1, 1, 2], [0], [0]>} : vector<2x8x8xf32>, vector<2x8x8xf32>, vector<2x8x8xf32> -> vector<2x8x8xf32>
    "tpu.trace_stop"() : () -> ()
    %882 = vector.shape_cast %881 : vector<2x8x8xf32> to vector<16x8xf32>
    %883 = vector.extract_strided_slice %815 {offsets = [0, 24], sizes = [16, 8], strides = [1, 1]} : vector<16x32xf32> to vector<16x8xf32>
    %884 = vector.shape_cast %883 : vector<16x8xf32> to vector<2x8x8xf32>
    %885 = vector.extract_strided_slice %816 {offsets = [0, 24], sizes = [16, 8], strides = [1, 1]} : vector<16x32xf32> to vector<16x8xf32>
    %886 = vector.shape_cast %885 : vector<16x8xf32> to vector<2x8x8xf32>
    %887 = vector.extract_strided_slice %817 {offsets = [0, 24], sizes = [16, 8], strides = [1, 1]} : vector<16x32xf32> to vector<16x8xf32>
    %888 = vector.shape_cast %887 : vector<16x8xf32> to vector<2x8x8xf32>
    "tpu.trace_start"() <{level = 10 : i32, message = "bqd,bkd->bqk"}> : () -> ()
    %cst_261 = arith.constant dense<0.000000e+00> : vector<2x8x8xf32>
    %889 = tpu.matmul %884, %886, %cst_261 {dimension_numbers = #tpu.dot_dimension_numbers<[2], [2], [1], [1], [0, 0, 0, 1, 1, 1], [0], [0]>} : vector<2x8x8xf32>, vector<2x8x8xf32>, vector<2x8x8xf32> -> vector<2x8x8xf32>
    "tpu.trace_stop"() : () -> ()
    %cst_262 = arith.constant 0.353553385 : f32
    %890 = vector.broadcast %cst_262 : f32 to vector<2x8x8xf32>
    %891 = arith.mulf %889, %890 : vector<2x8x8xf32>
    %cst_263 = arith.constant dense<0xFF800000> : vector<2x8xf32>
    %892 = vector.multi_reduction <maximumf>, %891, %cst_263 [2] : vector<2x8x8xf32> to vector<2x8xf32>
    %893 = vector.shape_cast %892 : vector<2x8xf32> to vector<2x8x1xf32>
    %894 = vector.broadcast %893 : vector<2x8x1xf32> to vector<2x8x8xf32>
    %895 = arith.subf %891, %894 : vector<2x8x8xf32>
    %896 = math.exp %895 : vector<2x8x8xf32>
    %cst_264 = arith.constant dense<0.000000e+00> : vector<2x8xf32>
    %897 = vector.multi_reduction <add>, %896, %cst_264 [2] : vector<2x8x8xf32> to vector<2x8xf32>
    %898 = vector.shape_cast %897 : vector<2x8xf32> to vector<2x8x1xf32>
    %899 = tpu.reciprocal %898 {approx = true} : vector<2x8x1xf32> -> vector<2x8x1xf32>
    %900 = vector.broadcast %899 : vector<2x8x1xf32> to vector<2x8x8xf32>
    %901 = arith.mulf %896, %900 : vector<2x8x8xf32>
    "tpu.trace_start"() <{level = 10 : i32, message = "bqk,bkd->bqd"}> : () -> ()
    %cst_265 = arith.constant dense<0.000000e+00> : vector<2x8x8xf32>
    %902 = tpu.matmul %901, %888, %cst_265 {dimension_numbers = #tpu.dot_dimension_numbers<[2], [1], [1], [2], [0, 0, 0, 1, 1, 2], [0], [0]>} : vector<2x8x8xf32>, vector<2x8x8xf32>, vector<2x8x8xf32> -> vector<2x8x8xf32>
    "tpu.trace_stop"() : () -> ()
    %903 = vector.shape_cast %902 : vector<2x8x8xf32> to vector<16x8xf32>
    %904 = tpu.concatenate %840, %861, %882, %903 in 1 : vector<16x8xf32>, vector<16x8xf32>, vector<16x8xf32>, vector<16x8xf32> -> vector<16x32xf32>
    %cst_266 = arith.constant dense<0.000000e+00> : vector<16x32xf32>
    %905 = tpu.matmul %904, %818, %cst_266 {dimension_numbers = #tpu.dot_dimension_numbers<[1], [0], [0], [1], [0, 0, 1, 1], [], []>} : vector<16x32xf32>, vector<32x32xf32>, vector<16x32xf32> -> vector<16x32xf32>
    %906 = vector.broadcast %819 : vector<1x32xf32> to vector<16x32xf32>
    %907 = arith.addf %905, %906 : vector<16x32xf32>
    %908 = arith.addf %907, %810 : vector<16x32xf32>
    %c36 = arith.constant 36 : index
    %c0_267 = arith.constant 0 : index
    %909 = vector.load %arg5[%c36, %c0_267] : memref<56x128xf32, #tpu.memory_space<vmem>>, vector<1x32xf32>
    %c37 = arith.constant 37 : index
    %c0_268 = arith.constant 0 : index
    %910 = vector.load %arg5[%c37, %c0_268] : memref<56x128xf32, #tpu.memory_space<vmem>>, vector<1x32xf32>
    %cst_269 = arith.constant dense<0.000000e+00> : vector<16xf32>
    %911 = vector.multi_reduction <add>, %908, %cst_269 [1] : vector<16x32xf32> to vector<16xf32>
    %912 = vector.shape_cast %911 : vector<16xf32> to vector<16x1xf32>
    %cst_270 = arith.constant 3.200000e+01 : f32
    %913 = vector.broadcast %cst_270 : f32 to vector<16x1xf32>
    %914 = arith.divf %912, %913 : vector<16x1xf32>
    %915 = vector.broadcast %914 : vector<16x1xf32> to vector<16x32xf32>
    %916 = arith.subf %908, %915 : vector<16x32xf32>
    %917 = arith.mulf %916, %916 : vector<16x32xf32>
    %cst_271 = arith.constant dense<0.000000e+00> : vector<16xf32>
    %918 = vector.multi_reduction <add>, %917, %cst_271 [1] : vector<16x32xf32> to vector<16xf32>
    %919 = vector.shape_cast %918 : vector<16xf32> to vector<16x1xf32>
    %cst_272 = arith.constant 3.200000e+01 : f32
    %920 = vector.broadcast %cst_272 : f32 to vector<16x1xf32>
    %921 = arith.divf %919, %920 : vector<16x1xf32>
    %cst_273 = arith.constant 9.99999996E-13 : f32
    %922 = vector.broadcast %cst_273 : f32 to vector<16x1xf32>
    %923 = arith.addf %921, %922 : vector<16x1xf32>
    %924 = math.rsqrt %923 : vector<16x1xf32>
    %925 = vector.broadcast %924 : vector<16x1xf32> to vector<16x32xf32>
    %926 = arith.mulf %916, %925 : vector<16x32xf32>
    %927 = vector.broadcast %909 : vector<1x32xf32> to vector<16x32xf32>
    %928 = arith.mulf %926, %927 : vector<16x32xf32>
    %929 = vector.broadcast %910 : vector<1x32xf32> to vector<16x32xf32>
    %930 = arith.addf %928, %929 : vector<16x32xf32>
    %c736 = arith.constant 736 : index
    %c0_274 = arith.constant 0 : index
    %931 = vector.load %arg4[%c736, %c0_274] : memref<1024x128xf32, #tpu.memory_space<vmem>>, vector<32x64xf32>
    %cst_275 = arith.constant dense<0.000000e+00> : vector<16x64xf32>
    %932 = tpu.matmul %930, %931, %cst_275 {dimension_numbers = #tpu.dot_dimension_numbers<[1], [0], [0], [1], [0, 0, 1, 1], [], []>} : vector<16x32xf32>, vector<32x64xf32>, vector<16x64xf32> -> vector<16x64xf32>
    %c38 = arith.constant 38 : index
    %c0_276 = arith.constant 0 : index
    %933 = vector.load %arg5[%c38, %c0_276] : memref<56x128xf32, #tpu.memory_space<vmem>>, vector<1x64xf32>
    %934 = vector.broadcast %933 : vector<1x64xf32> to vector<16x64xf32>
    %935 = arith.addf %932, %934 : vector<16x64xf32>
    %cst_277 = arith.constant 5.000000e-01 : f32
    %936 = vector.broadcast %cst_277 : f32 to vector<16x64xf32>
    %937 = arith.mulf %936, %935 : vector<16x64xf32>
    %cst_278 = arith.constant 4.471500e-02 : f32
    %938 = vector.broadcast %cst_278 : f32 to vector<16x64xf32>
    %939 = arith.mulf %938, %935 : vector<16x64xf32>
    %940 = arith.mulf %939, %935 : vector<16x64xf32>
    %941 = arith.mulf %940, %935 : vector<16x64xf32>
    %942 = arith.addf %935, %941 : vector<16x64xf32>
    %cst_279 = arith.constant 0.797884583 : f32
    %943 = vector.broadcast %cst_279 : f32 to vector<16x64xf32>
    %944 = arith.mulf %943, %942 : vector<16x64xf32>
    %945 = math.tanh %944 : vector<16x64xf32>
    %cst_280 = arith.constant 1.000000e+00 : f32
    %946 = vector.broadcast %cst_280 : f32 to vector<16x64xf32>
    %947 = arith.addf %946, %945 : vector<16x64xf32>
    %948 = arith.mulf %937, %947 : vector<16x64xf32>
    %c768 = arith.constant 768 : index
    %c0_281 = arith.constant 0 : index
    %949 = vector.load %arg4[%c768, %c0_281] : memref<1024x128xf32, #tpu.memory_space<vmem>>, vector<64x32xf32>
    %cst_282 = arith.constant dense<0.000000e+00> : vector<16x32xf32>
    %950 = tpu.matmul %948, %949, %cst_282 {dimension_numbers = #tpu.dot_dimension_numbers<[1], [0], [0], [1], [0, 0, 1, 1], [], []>} : vector<16x64xf32>, vector<64x32xf32>, vector<16x32xf32> -> vector<16x32xf32>
    %c39 = arith.constant 39 : index
    %c0_283 = arith.constant 0 : index
    %951 = vector.load %arg5[%c39, %c0_283] : memref<56x128xf32, #tpu.memory_space<vmem>>, vector<1x32xf32>
    %952 = vector.broadcast %951 : vector<1x32xf32> to vector<16x32xf32>
    %953 = arith.addf %950, %952 : vector<16x32xf32>
    %954 = arith.addf %953, %930 : vector<16x32xf32>
    %c40 = arith.constant 40 : index
    %c0_284 = arith.constant 0 : index
    %955 = vector.load %arg5[%c40, %c0_284] : memref<56x128xf32, #tpu.memory_space<vmem>>, vector<1x32xf32>
    %c41 = arith.constant 41 : index
    %c0_285 = arith.constant 0 : index
    %956 = vector.load %arg5[%c41, %c0_285] : memref<56x128xf32, #tpu.memory_space<vmem>>, vector<1x32xf32>
    %cst_286 = arith.constant dense<0.000000e+00> : vector<16xf32>
    %957 = vector.multi_reduction <add>, %954, %cst_286 [1] : vector<16x32xf32> to vector<16xf32>
    %958 = vector.shape_cast %957 : vector<16xf32> to vector<16x1xf32>
    %cst_287 = arith.constant 3.200000e+01 : f32
    %959 = vector.broadcast %cst_287 : f32 to vector<16x1xf32>
    %960 = arith.divf %958, %959 : vector<16x1xf32>
    %961 = vector.broadcast %960 : vector<16x1xf32> to vector<16x32xf32>
    %962 = arith.subf %954, %961 : vector<16x32xf32>
    %963 = arith.mulf %962, %962 : vector<16x32xf32>
    %cst_288 = arith.constant dense<0.000000e+00> : vector<16xf32>
    %964 = vector.multi_reduction <add>, %963, %cst_288 [1] : vector<16x32xf32> to vector<16xf32>
    %965 = vector.shape_cast %964 : vector<16xf32> to vector<16x1xf32>
    %cst_289 = arith.constant 3.200000e+01 : f32
    %966 = vector.broadcast %cst_289 : f32 to vector<16x1xf32>
    %967 = arith.divf %965, %966 : vector<16x1xf32>
    %cst_290 = arith.constant 9.99999996E-13 : f32
    %968 = vector.broadcast %cst_290 : f32 to vector<16x1xf32>
    %969 = arith.addf %967, %968 : vector<16x1xf32>
    %970 = math.rsqrt %969 : vector<16x1xf32>
    %971 = vector.broadcast %970 : vector<16x1xf32> to vector<16x32xf32>
    %972 = arith.mulf %962, %971 : vector<16x32xf32>
    %973 = vector.broadcast %955 : vector<1x32xf32> to vector<16x32xf32>
    %974 = arith.mulf %972, %973 : vector<16x32xf32>
    %975 = vector.broadcast %956 : vector<1x32xf32> to vector<16x32xf32>
    %976 = arith.addf %974, %975 : vector<16x32xf32>
    %c992 = arith.constant 992 : index
    %c0_291 = arith.constant 0 : index
    %977 = vector.load %arg4[%c992, %c0_291] : memref<1024x128xf32, #tpu.memory_space<vmem>>, vector<32x32xf32>
    %cst_292 = arith.constant dense<0.000000e+00> : vector<16x32xf32>
    %978 = tpu.matmul %976, %977, %cst_292 {dimension_numbers = #tpu.dot_dimension_numbers<[1], [0], [0], [1], [0, 0, 1, 1], [], []>} : vector<16x32xf32>, vector<32x32xf32>, vector<16x32xf32> -> vector<16x32xf32>
    %c45 = arith.constant 45 : index
    %c0_293 = arith.constant 0 : index
    %979 = vector.load %arg5[%c45, %c0_293] : memref<56x128xf32, #tpu.memory_space<vmem>>, vector<1x32xf32>
    %980 = vector.broadcast %979 : vector<1x32xf32> to vector<16x32xf32>
    %981 = arith.addf %978, %980 : vector<16x32xf32>
    %cst_294 = arith.constant 5.000000e-01 : f32
    %982 = vector.broadcast %cst_294 : f32 to vector<16x32xf32>
    %983 = arith.mulf %982, %981 : vector<16x32xf32>
    %cst_295 = arith.constant 4.471500e-02 : f32
    %984 = vector.broadcast %cst_295 : f32 to vector<16x32xf32>
    %985 = arith.mulf %984, %981 : vector<16x32xf32>
    %986 = arith.mulf %985, %981 : vector<16x32xf32>
    %987 = arith.mulf %986, %981 : vector<16x32xf32>
    %988 = arith.addf %981, %987 : vector<16x32xf32>
    %cst_296 = arith.constant 0.797884583 : f32
    %989 = vector.broadcast %cst_296 : f32 to vector<16x32xf32>
    %990 = arith.mulf %989, %988 : vector<16x32xf32>
    %991 = math.tanh %990 : vector<16x32xf32>
    %cst_297 = arith.constant 1.000000e+00 : f32
    %992 = vector.broadcast %cst_297 : f32 to vector<16x32xf32>
    %993 = arith.addf %992, %991 : vector<16x32xf32>
    %994 = arith.mulf %983, %993 : vector<16x32xf32>
    %c46 = arith.constant 46 : index
    %c0_298 = arith.constant 0 : index
    %995 = vector.load %arg5[%c46, %c0_298] : memref<56x128xf32, #tpu.memory_space<vmem>>, vector<1x32xf32>
    %c47 = arith.constant 47 : index
    %c0_299 = arith.constant 0 : index
    %996 = vector.load %arg5[%c47, %c0_299] : memref<56x128xf32, #tpu.memory_space<vmem>>, vector<1x32xf32>
    %cst_300 = arith.constant dense<0.000000e+00> : vector<16xf32>
    %997 = vector.multi_reduction <add>, %994, %cst_300 [1] : vector<16x32xf32> to vector<16xf32>
    %998 = vector.shape_cast %997 : vector<16xf32> to vector<16x1xf32>
    %cst_301 = arith.constant 3.200000e+01 : f32
    %999 = vector.broadcast %cst_301 : f32 to vector<16x1xf32>
    %1000 = arith.divf %998, %999 : vector<16x1xf32>
    %1001 = vector.broadcast %1000 : vector<16x1xf32> to vector<16x32xf32>
    %1002 = arith.subf %994, %1001 : vector<16x32xf32>
    %1003 = arith.mulf %1002, %1002 : vector<16x32xf32>
    %cst_302 = arith.constant dense<0.000000e+00> : vector<16xf32>
    %1004 = vector.multi_reduction <add>, %1003, %cst_302 [1] : vector<16x32xf32> to vector<16xf32>
    %1005 = vector.shape_cast %1004 : vector<16xf32> to vector<16x1xf32>
    %cst_303 = arith.constant 3.200000e+01 : f32
    %1006 = vector.broadcast %cst_303 : f32 to vector<16x1xf32>
    %1007 = arith.divf %1005, %1006 : vector<16x1xf32>
    %cst_304 = arith.constant 9.99999996E-13 : f32
    %1008 = vector.broadcast %cst_304 : f32 to vector<16x1xf32>
    %1009 = arith.addf %1007, %1008 : vector<16x1xf32>
    %1010 = math.rsqrt %1009 : vector<16x1xf32>
    %1011 = vector.broadcast %1010 : vector<16x1xf32> to vector<16x32xf32>
    %1012 = arith.mulf %1002, %1011 : vector<16x32xf32>
    %1013 = vector.broadcast %995 : vector<1x32xf32> to vector<16x32xf32>
    %1014 = arith.mulf %1012, %1013 : vector<16x32xf32>
    %1015 = vector.broadcast %996 : vector<1x32xf32> to vector<16x32xf32>
    %1016 = arith.addf %1014, %1015 : vector<16x32xf32>
    %c960 = arith.constant 960 : index
    %c0_305 = arith.constant 0 : index
    %1017 = vector.load %arg4[%c960, %c0_305] : memref<1024x128xf32, #tpu.memory_space<vmem>>, vector<32x128xf32>
    %cst_306 = arith.constant dense<0.000000e+00> : vector<16x128xf32>
    %1018 = tpu.matmul %1016, %1017, %cst_306 {dimension_numbers = #tpu.dot_dimension_numbers<[1], [0], [0], [1], [0, 0, 1, 1], [], []>} : vector<16x32xf32>, vector<32x128xf32>, vector<16x128xf32> -> vector<16x128xf32>
    %c48 = arith.constant 48 : index
    %c0_307 = arith.constant 0 : index
    %1019 = vector.load %arg5[%c48, %c0_307] : memref<56x128xf32, #tpu.memory_space<vmem>>, vector<1x128xf32>
    %1020 = vector.broadcast %1019 : vector<1x128xf32> to vector<16x128xf32>
    %1021 = arith.addf %1018, %1020 : vector<16x128xf32>
    %c0_308 = arith.constant 0 : index
    %c0_309 = arith.constant 0 : index
    %1022 = vector.load %arg6[%c0_308, %c0_309] : memref<16x128xf32, #tpu.memory_space<vmem>>, vector<16x128xf32>
    tpu.vector_store %arg6[%c0_308, %c0_309], %1021 {strides = array<i32>} : memref<16x128xf32, #tpu.memory_space<vmem>>, vector<16x128xf32>,
    return
  }
  func.func @transform_0(%arg0: i32) -> (i32, i32) {
    %c0_i32 = arith.constant 0 : i32
    %c0_i32_0 = arith.constant 0 : i32
    %c0_i32_1 = arith.constant 0 : i32
    return %c0_i32, %c0_i32_0 : i32, i32
  }
  func.func @transform_1(%arg0: i32) -> (i32, i32) {
    %c0_i32 = arith.constant 0 : i32
    %c0_i32_0 = arith.constant 0 : i32
    %c0_i32_1 = arith.constant 0 : i32
    return %c0_i32, %c0_i32_0 : i32, i32
  }
  func.func @transform_2(%arg0: i32) -> (i32, i32) {
    %c0_i32 = arith.constant 0 : i32
    %c0_i32_0 = arith.constant 0 : i32
    %c0_i32_1 = arith.constant 0 : i32
    return %c0_i32, %c0_i32_0 : i32, i32
  }
  func.func @transform_3(%arg0: i32) -> (i32, i32) {
    %c0_i32 = arith.constant 0 : i32
    %c0_i32_0 = arith.constant 0 : i32
    %c0_i32_1 = arith.constant 0 : i32
    return %c0_i32, %c0_i32_0 : i32, i32
  }
  func.func @transform_4(%arg0: i32) -> (i32, i32) {
    %c0_i32 = arith.constant 0 : i32
    %c0_i32_0 = arith.constant 0 : i32
    %c0_i32_1 = arith.constant 0 : i32
    return %c0_i32, %c0_i32_0 : i32, i32
  }
  func.func @transform_5(%arg0: i32) -> (i32, i32) {
    %c0_i32 = arith.constant 0 : i32
    %c0_i32_0 = arith.constant 0 : i32
    %c0_i32_1 = arith.constant 0 : i32
    return %c0_i32, %c0_i32_0 : i32, i32
  }
}

</mosaic_0001>

<bundles_post_ra>
// kernel: _lambda_.1
= control target key start
LH: loop header
LB: loop body
LE: loop exit
PB: predicated region body
PF: predicated region fallthrough
CT: control target
= control target key end

     0   :  { %10 = vsyncpa [#allocation3], 0  ;;  %s13066_s18 = smov [#allocation2]   ;;  %s14488_s0 = inlined_call_operand.vmem [shape: f32[16,32], index: 0, kind: input, shape index: {}]   ;;  %s14489_s1 = inlined_call_operand.vmem [shape: s32[16,1], index: 1, kind: input, shape index: {}]   ;;  %s14490_s2 = inlined_call_operand.vmem [shape: f32[16,32], index: 2, kind: input, shape index: {}]   ;;  %s14491_s3 = inlined_call_operand.hbm [shape: f32[1024,128], index: 3, kind: input, shape index: {}]   ;;  %s14492_s4 = inlined_call_operand.vmem [shape: f32[56,128], index: 4, kind: input, shape index: {}]   ;;  %s14493_s5 = inlined_call_operand.vmem [shape: f32[16,128], index: 5, kind: output, shape index: {}]  }
   0x1   :  { %s22_s19 = sshll.u32 %s13066_s18, 4  ;;  %s13042_s22 = scalar_lea.hbm %s14491_s3, 16384  ;;  %s23_s19 = int_to_ptr.vmem [resolvable:$true] %s22_s19 }
   0x2   :  { %p13043_p0 = scmp.ne.s32.totalorder %s14491_s3, %s13042_s22  ;;  %p13046_p1 = scmp.lt.u32.totalorder %s13042_s22, %s14491_s3 }
   0x4   :  { %p13048_p2 = pnand %p13046_p1, %p13043_p0 }
   0x6   :  { %13051 = shalt.err (!%p13048_p2)
}
   0x7   :  { %s13052_s27 = scalar_lea.vmem %s23_s19, 16384  ;;  %p13057_p4 = scmp.lt.s32.totalorder %s23_s19, %s23_s19 }
   0x8   :  { %p13053_p3 = scmp.ne.s32.totalorder %s23_s19, %s13052_s27  ;;  %p13058_p5 = scmp.lt.s32.totalorder %s13052_s27, %s13052_s27 }
   0xa   :  { %p13059_p6 = por %p13058_p5, %p13057_p4 }
   0xc   :  { %p13060_p7 = pnand %p13059_p6, %p13053_p3 }
   0xe   :  { %13063 = shalt.err (!%p13060_p7)
}
   0xf   :  { %s13067_s28 = smov 128   ;;  %s13068_s29 = smov 8  }
  0x10   :  { %28 = dma.hbm_to_vmem [thread:$0]  %s14491_s3, 16384, %s23_s19, [#allocation3], %s13067_s28, %s13067_s28, %s13068_s29  }
  0x11   :  { %13064 = dma.done.wait [#allocation3], 16384  }
  0x12   :  { %13065 = vsyncadd [#allocation3], 4294950912  ;;  %vm51_vm0 = vcmask 261120   ;;  %v42_v0 = vld [vmem:[#allocation2] sm:$0xff]  ;;  %v43_v1 = vld [vmem:[#allocation2 + $0x8] sm:$0xff]  ;;  %v13069_v8 = vmov 0.0  }
  0x13   :  { %v44_v2 = vld [vmem:[#allocation2 + $0x10] sm:$0xff]  ;;  %v12503_v3 = vpack.c.bf16 %v43_v1, %v42_v0  ;;  %v45_v4 = vld [vmem:[#allocation2 + $0x18] sm:$0xff]  ;;  %v13133_v5 = vld [vmem:[%s14488_s0] sm:$0xff]  ;;  %11703 = vmatprep.subr.mxu1 %v13069_v8  ;;  %vm13070_vm1 = vmmov 0   ;;  %vm141_vm2 = vcmask 64512   ;;  %s13072_s12 = smov 64  }
  0x14   :  { %v12507_v6 = vpack.c.bf16 %v45_v4, %v44_v2  ;;  %11700 = vmatprep.mubr.msk.f32.mxu0 %vm51_vm0, %v13133_v5  ;;  %v13140_v7 = vld [vmem:[%s14488_s0 + $0x8] sm:$0xff]  ;;  %11705 = vmatprep.mubr.msk.f32.mxu1 %vm13070_vm1, %v13069_v8  ;;  %v11077_v9 = vld [vmem:[%s14492_s4] ss:$0 sm:$0xff]  ;;  %s13071_s0 = smov 96   ;;  %s13073_s13 = smov 88   ;;  %vm1494_vm3 = vcmask 195584  }
  0x15   :  { %12504 = vmatprep.subr.bf16.mxu0 %v12503_v3  ;;  %s13074_s14 = smov 120   ;;  %s13075_s15 = smov 56   ;;  %vm1491_vm4 = vcmask 130048   ;;  %vm1746_vm5 = vcmask 523264  }
  0x16   :  { %12506 = vmatpush3.bf16.msra.mxu0 %v12503_v3  ;;  %s13076_s16 = smov 80   ;;  %s13077_s17 = smov 112  }
  0x17   :  { %12508 = vmatprep.subr.bf16.mxu0 %v12507_v6  ;;  %s13078_s18 = smov 48   ;;  %s13079_s19 = smov 72  }
  0x18   :  { %s13080_s20 = smov 104   ;;  %s13081_s21 = smov 40  }
  0x19   :  { %s13082_s22 = smov 16   ;;  %s13083_s23 = smov 24  }
  0x1a   :  { %12510 = vmatpush3.bf16.msra.mxu0 %v12507_v6 }
  0x1b   :  { %11713 = vmatprep.subr.mxu0 %v13069_v8 }
  0x1d   :  { %11701 = vmatmul.mubr.msk.f32.vlgmr.msra.gmra.mrb[0].mxu0 %vm51_vm0, %v13140_v7 }
  0x1e   :  { %11715 = vmatprep.mubr.msk.f32.mxu0 %vm13070_vm1, %v13069_v8 }
  0xf0   :  { %v11702_v10 = vpop.f32.mrb[0].mxu0 }
  0xf1   :  { %v124_v11 = vpop.f32.mrb[1].mxu0  ;;  %v13157_v13 = vadd.f32 %v11702_v10, %v11077_v9 }
  0xf2   :  { %v13153_v12 = vadd.f32 %v11077_v9, %v124_v11 }
  0xf4   :  { %139 = vrot.lane.b32.xlu0 %v13153_v12, %s13071_s0 }
  0xf8   :  { %217 = vrot.lane.b32.xlu0 %v13157_v13, %s13071_s0 }
 0x166   :  { %v140_v14 = vpop.permute.xlu0 %139 }
 0x167   :  { %11704 = vmatpush3.xpose.msk.msra.mxu1 %vm141_vm2, %v140_v14 }
 0x168   :  { %11708 = vmatprep.subr.mxu1 %v13069_v8 }
 0x16a   :  { %11706 = vmatmul.mubr.msk.f32.vlgmr.msra.gmra.mrb[0].mxu1 %vm141_vm2, %v13153_v12  ;;  %v218_v15 = vpop.permute.xlu0 %217 }
 0x16b   :  { %11709 = vmatpush3.xpose.msk.msra.mxu1 %vm141_vm2, %v218_v15  ;;  %11710 = vmatprep.mubr.msk.f32.mxu1 %vm13070_vm1, %v13069_v8 }
 0x16c   :  { %11718 = vmatprep.subr.mxu1 %v13069_v8 }
 0x16e   :  { %11711 = vmatmul.mubr.msk.f32.vlgmr.msra.gmra.mrb[2].mxu1 %vm141_vm2, %v13157_v13 }
 0x16f   :  { %11720 = vmatprep.mubr.msk.f32.mxu1 %vm13070_vm1, %v13069_v8 }
 0x23d   :  { %v212_v16 = vpop.f32.mrb[0].mxu1 }
 0x23e   :  { %v293_v17 = vmul.f32 0.35355338, %v212_v16  ;;  %v11707_v18 = vpop.f32.mrb[1].mxu1 }
 0x240   :  { %v295_v19 = vsel %vm141_vm2, %v293_v17, -inf }
 0x241   :  { %296 = vmax.xlane.f32.xlu1 %v295_v19  ;;  %v289_v20 = vpop.f32.mrb[2].mxu1 }
 0x242   :  { %v294_v21 = vmul.f32 0.35355338, %v289_v20  ;;  %v11712_v22 = vpop.f32.mrb[3].mxu1 }
 0x244   :  { %v298_v23 = vsel %vm141_vm2, %v294_v21, -inf }
 0x245   :  { %299 = vmax.xlane.f32.xlu1 %v298_v23 }
 0x256   :  { %317 = vrot.lane.b32.xlu1 %v13153_v12, %s13072_s12 }
 0x25a   :  { %393 = vrot.lane.b32.xlu1 %v13157_v13, %s13072_s12 }
 0x25e   :  { %471 = vrot.lane.b32.xlu1 %v13153_v12, %s13073_s13 }
 0x262   :  { %549 = vrot.lane.b32.xlu1 %v13157_v13, %s13073_s13 }
 0x2ce   :  { %v297_v24 = vpop.xlane.xlu1 %296 }
 0x2cf   :  { %v301_v25 = vsub.f32 %v293_v17, %v297_v24 }
 0x2d1   :  { %v303_v26 = vmul.f32 1.442695, %v301_v25 }
 0x2d2   :  { %v300_v27 = vpop.xlane.xlu1 %299 }
 0x2d3   :  { %12782 = vpow2.f32 %v303_v26  ;;  %v302_v28 = vsub.f32 %v294_v21, %v300_v27 }
 0x2d5   :  { %v305_v29 = vmul.f32 1.442695, %v302_v28 }
 0x2d6   :  { %v318_v30 = vpop.permute.xlu1 %317 }
 0x2d7   :  { %12784 = vpow2.f32 %v305_v29  ;;  %11714 = vmatpush3.msra.mxu0 %v318_v30 }
 0x2d8   :  { %11723 = vmatprep.subr.mxu0 %v13069_v8 }
 0x2da   :  { %v394_v31 = vpop.permute.xlu1 %393 }
 0x2db   :  { %11719 = vmatpush3.msra.mxu1 %v394_v31 }
 0x2dc   :  { %11728 = vmatprep.subr.mxu1 %v13069_v8 }
 0x2dd   :  { %v12783_v32 = vpop.eup %12782 }
 0x2de   :  { %v307_v33 = vsel %vm141_vm2, %v12783_v32, 0.0  ;;  %v472_v36 = vpop.permute.xlu1 %471 }
 0x2df   :  { %308 = vadd.xlane.f32.xlu0 %v307_v33 }
 0x2e1   :  { %v12785_v34 = vpop.eup %12784 }
 0x2e2   :  { %v310_v35 = vsel %vm141_vm2, %v12785_v34, 0.0  ;;  %v550_v37 = vpop.permute.xlu1 %549 }
 0x2e3   :  { %311 = vadd.xlane.f32.xlu1 %v310_v35 }
 0x2f4   :  { %547 = vrot.lane.b32.xlu1 %v13157_v13, %s13074_s14 }
 0x2f5   :  { %469 = vrot.lane.b32.xlu0 %v13153_v12, %s13074_s14 }
 0x36c   :  { %v309_v38 = vpop.xlane.xlu0 %308 }
 0x36d   :  { %12786 = vrcp.f32 %v309_v38 }
 0x370   :  { %v312_v39 = vpop.xlane.xlu1 %311  ;;  %v470_v44 = vpop.permute.xlu0 %469 }
 0x371   :  { %12788 = vrcp.f32 %v312_v39 }
 0x374   :  { %v548_v45 = vpop.permute.xlu1 %547 }
 0x377   :  { %v12787_v40 = vpop.eup %12786 }
 0x378   :  { %v315_v41 = vmul.f32 %v12787_v40, %v12783_v32 }
 0x37a   :  { %11716 = vmatmul.mubr.msk.f32.vlgmr.msra.gmra.mrb[2].mxu0 %vm141_vm2, %v315_v41 }
 0x37b   :  { %v12789_v42 = vpop.eup %12788  ;;  %11724 = vmatpush3.xpose.msk.msra.mxu0 %vm141_vm2, %v472_v36  ;;  %11725 = vmatprep.mubr.msk.f32.mxu0 %vm13070_vm1, %v13069_v8 }
 0x37c   :  { %v316_v43 = vmul.f32 %v12789_v42, %v12785_v34  ;;  %11733 = vmatprep.subr.mxu0 %v13069_v8 }
 0x37e   :  { %11721 = vmatmul.mubr.msk.f32.vlgmr.msra.gmra.mrb[4].mxu1 %vm141_vm2, %v316_v43  ;;  %11726 = vmatmul.mubr.msk.f32.vlgmr.msra.gmra.mrb[4].mxu0 %vm141_vm2, %v470_v44 }
 0x37f   :  { %11729 = vmatpush3.xpose.msk.msra.mxu1 %vm141_vm2, %v550_v37  ;;  %11730 = vmatprep.mubr.msk.f32.mxu1 %vm13070_vm1, %v13069_v8 }
 0x380   :  { %11738 = vmatprep.subr.mxu1 %v13069_v8  ;;  %11735 = vmatprep.mubr.msk.f32.mxu0 %vm13070_vm1, %v13069_v8 }
 0x382   :  { %11731 = vmatmul.mubr.msk.f32.vlgmr.msra.gmra.mrb[6].mxu1 %vm141_vm2, %v548_v45 }
 0x383   :  { %11740 = vmatprep.mubr.msk.f32.mxu1 %vm13070_vm1, %v13069_v8 }
 0x44d   :  { %v13207_v46 = vpop.f32.mrb[2].mxu0 }
 0x44e   :  { %v11717_v47 = vpop.f32.mrb[3].mxu0 }
 0x451   :  { %v13209_v48 = vpop.f32.mrb[4].mxu1  ;;  %v543_v49 = vpop.f32.mrb[4].mxu0 }
 0x452   :  { %v625_v50 = vmul.f32 0.35355338, %v543_v49  ;;  %v11722_v51 = vpop.f32.mrb[5].mxu1  ;;  %v11727_v52 = vpop.f32.mrb[5].mxu0 }
 0x454   :  { %v627_v53 = vsel %vm141_vm2, %v625_v50, -inf }
 0x455   :  { %v621_v54 = vpop.f32.mrb[6].mxu1  ;;  %628 = vmax.xlane.f32.xlu1 %v627_v53 }
 0x456   :  { %v626_v55 = vmul.f32 0.35355338, %v621_v54  ;;  %v11732_v56 = vpop.f32.mrb[7].mxu1 }
 0x458   :  { %v630_v57 = vsel %vm141_vm2, %v626_v55, -inf }
 0x459   :  { %631 = vmax.xlane.f32.xlu0 %v630_v57 }
 0x466   :  { %649 = vrot.lane.b32.xlu1 %v13153_v12, %s13075_s15 }
 0x46a   :  { %803 = vrot.lane.b32.xlu1 %v13153_v12, %s13076_s16 }
 0x46e   :  { %881 = vrot.lane.b32.xlu1 %v13157_v13, %s13076_s16 }
 0x46f   :  { %725 = vrot.lane.b32.xlu0 %v13157_v13, %s13075_s15 }
 0x473   :  { %801 = vrot.lane.b32.xlu0 %v13153_v12, %s13077_s17 }
 0x4e2   :  { %v629_v58 = vpop.xlane.xlu1 %628 }
 0x4e3   :  { %v633_v59 = vsub.f32 %v625_v50, %v629_v58 }
 0x4e5   :  { %v635_v60 = vmul.f32 1.442695, %v633_v59 }
 0x4e6   :  { %v650_v61 = vpop.permute.xlu1 %649  ;;  %v632_v62 = vpop.xlane.xlu0 %631 }
 0x4e7   :  { %12790 = vpow2.f32 %v635_v60  ;;  %v634_v63 = vsub.f32 %v626_v55, %v632_v62  ;;  %11734 = vmatpush3.msra.mxu0 %v650_v61 }
 0x4e8   :  { %11743 = vmatprep.subr.mxu0 %v13069_v8 }
 0x4e9   :  { %v637_v0 = vmul.f32 1.442695, %v634_v63 }
 0x4ea   :  { %v726_v1 = vpop.permute.xlu0 %725  ;;  %v804_v9 = vpop.permute.xlu1 %803 }
 0x4eb   :  { %12792 = vpow2.f32 %v637_v0  ;;  %11739 = vmatpush3.msra.mxu1 %v726_v1 }
 0x4ec   :  { %11748 = vmatprep.subr.mxu1 %v13069_v8 }
 0x4ee   :  { %v882_v10 = vpop.permute.xlu1 %881  ;;  %v802_v19 = vpop.permute.xlu0 %801 }
 0x4f1   :  { %v12791_v2 = vpop.eup %12790 }
 0x4f2   :  { %v639_v3 = vsel %vm141_vm2, %v12791_v2, 0.0 }
 0x4f3   :  { %640 = vadd.xlane.f32.xlu1 %v639_v3 }
 0x4f5   :  { %v12793_v4 = vpop.eup %12792 }
 0x4f6   :  { %v642_v6 = vsel %vm141_vm2, %v12793_v4, 0.0 }
 0x4f7   :  { %643 = vadd.xlane.f32.xlu1 %v642_v6 }
 0x508   :  { %879 = vrot.lane.b32.xlu1 %v13157_v13, %s13077_s17 }
 0x580   :  { %v641_v11 = vpop.xlane.xlu1 %640 }
 0x581   :  { %12794 = vrcp.f32 %v641_v11 }
 0x584   :  { %v644_v14 = vpop.xlane.xlu1 %643 }
 0x585   :  { %12796 = vrcp.f32 %v644_v14 }
 0x588   :  { %v880_v20 = vpop.permute.xlu1 %879 }
 0x58b   :  { %v12795_v15 = vpop.eup %12794 }
 0x58c   :  { %v647_v16 = vmul.f32 %v12795_v15, %v12791_v2 }
 0x58e   :  { %11736 = vmatmul.mubr.msk.f32.vlgmr.msra.gmra.mrb[6].mxu0 %vm141_vm2, %v647_v16 }
 0x58f   :  { %v12797_v17 = vpop.eup %12796  ;;  %11744 = vmatpush3.xpose.msk.msra.mxu0 %vm141_vm2, %v804_v9  ;;  %11745 = vmatprep.mubr.msk.f32.mxu0 %vm13070_vm1, %v13069_v8 }
 0x590   :  { %v648_v18 = vmul.f32 %v12797_v17, %v12793_v4  ;;  %11753 = vmatprep.subr.mxu0 %v13069_v8 }
 0x592   :  { %11741 = vmatmul.mubr.msk.f32.vlgmr.msra.gmra.mrb[8].mxu1 %vm141_vm2, %v648_v18  ;;  %11746 = vmatmul.mubr.msk.f32.vlgmr.msra.gmra.mrb[8].mxu0 %vm141_vm2, %v802_v19 }
 0x593   :  { %11749 = vmatpush3.xpose.msk.msra.mxu1 %vm141_vm2, %v882_v10  ;;  %11750 = vmatprep.mubr.msk.f32.mxu1 %vm13070_vm1, %v13069_v8 }
 0x594   :  { %11758 = vmatprep.subr.mxu1 %v13069_v8  ;;  %11755 = vmatprep.mubr.msk.f32.mxu0 %vm13070_vm1, %v13069_v8 }
 0x596   :  { %11751 = vmatmul.mubr.msk.f32.vlgmr.msra.gmra.mrb[10].mxu1 %vm141_vm2, %v880_v20 }
 0x597   :  { %11760 = vmatprep.mubr.msk.f32.mxu1 %vm13070_vm1, %v13069_v8 }
 0x661   :  { %v13245_v21 = vpop.f32.mrb[6].mxu0 }
 0x662   :  { %v11737_v22 = vpop.f32.mrb[7].mxu0 }
 0x665   :  { %v13247_v23 = vpop.f32.mrb[8].mxu1  ;;  %v875_v24 = vpop.f32.mrb[8].mxu0 }
 0x666   :  { %v957_v25 = vmul.f32 0.35355338, %v875_v24  ;;  %v11742_v26 = vpop.f32.mrb[9].mxu1  ;;  %v11747_v27 = vpop.f32.mrb[9].mxu0 }
 0x667   :  { %v133_v27 = vld [vmem:[#allocation2 + $0x20] sm:$0xff] }
 0x668   :  { %v959_v28 = vsel %vm141_vm2, %v957_v25, -inf }
 0x669   :  { %v953_v29 = vpop.f32.mrb[10].mxu1  ;;  %960 = vmax.xlane.f32.xlu0 %v959_v28  ;;  %v134_v28 = vld [vmem:[#allocation2 + $0x28] sm:$0xff] }
 0x66a   :  { %v958_v30 = vmul.f32 0.35355338, %v953_v29  ;;  %v11752_v31 = vpop.f32.mrb[11].mxu1  ;;  %v12511_v29 = vpack.c.bf16 %v134_v28, %v133_v27  ;;  %v1733_v27 = vld [vmem:[#allocation2 + $0x60] sm:$0xff]  ;;  %v1734_v28 = vld [vmem:[#allocation2 + $0x68] sm:$0xff] }
 0x66c   :  { %v962_v32 = vsel %vm141_vm2, %v958_v30, -inf }
 0x66d   :  { %963 = vmax.xlane.f32.xlu1 %v962_v32 }
 0x67e   :  { %981 = vrot.lane.b32.xlu1 %v13153_v12, %s13078_s18 }
 0x67f   :  { %1057 = vrot.lane.b32.xlu0 %v13157_v13, %s13078_s18 }
 0x682   :  { %1135 = vrot.lane.b32.xlu1 %v13153_v12, %s13079_s19 }
 0x686   :  { %1213 = vrot.lane.b32.xlu1 %v13157_v13, %s13079_s19 }
 0x68a   :  { %1211 = vrot.lane.b32.xlu1 %v13157_v13, %s13080_s20 }
 0x6f6   :  { %v961_v33 = vpop.xlane.xlu0 %960 }
 0x6f7   :  { %v965_v34 = vsub.f32 %v957_v25, %v961_v33 }
 0x6f9   :  { %v967_v35 = vmul.f32 1.442695, %v965_v34 }
 0x6fa   :  { %v964_v36 = vpop.xlane.xlu1 %963  ;;  %v1058_v37 = vpop.permute.xlu0 %1057 }
 0x6fb   :  { %12798 = vpow2.f32 %v967_v35  ;;  %v966_v38 = vsub.f32 %v958_v30, %v964_v36  ;;  %11759 = vmatpush3.msra.mxu1 %v1058_v37  ;;  %v136_v30 = vld [vmem:[#allocation2 + $0x38] sm:$0xff] }
 0x6fc   :  { %11768 = vmatprep.subr.mxu1 %v13069_v8 }
 0x6fd   :  { %v969_v39 = vmul.f32 1.442695, %v966_v38 }
 0x6fe   :  { %v982_v40 = vpop.permute.xlu1 %981 }
 0x6ff   :  { %12800 = vpow2.f32 %v969_v39  ;;  %11754 = vmatpush3.msra.mxu0 %v982_v40 }
 0x700   :  { %11763 = vmatprep.subr.mxu0 %v13069_v8 }
 0x702   :  { %v1136_v49 = vpop.permute.xlu1 %1135 }
 0x705   :  { %v12799_v41 = vpop.eup %12798 }
 0x706   :  { %v971_v42 = vsel %vm141_vm2, %v12799_v41, 0.0  ;;  %v1214_v53 = vpop.permute.xlu1 %1213 }
 0x707   :  { %972 = vadd.xlane.f32.xlu0 %v971_v42 }
 0x709   :  { %v12801_v43 = vpop.eup %12800 }
 0x70a   :  { %v974_v44 = vsel %vm141_vm2, %v12801_v43, 0.0  ;;  %v1212_v56 = vpop.permute.xlu1 %1211 }
 0x70b   :  { %975 = vadd.xlane.f32.xlu0 %v974_v44 }
 0x721   :  { %1133 = vrot.lane.b32.xlu0 %v13153_v12, %s13080_s20 }
 0x794   :  { %v973_v45 = vpop.xlane.xlu0 %972 }
 0x795   :  { %12802 = vrcp.f32 %v973_v45 }
 0x798   :  { %v976_v47 = vpop.xlane.xlu0 %975 }
 0x799   :  { %12804 = vrcp.f32 %v976_v47 }
 0x79c   :  { %v1134_v55 = vpop.permute.xlu0 %1133 }
 0x79f   :  { %v12803_v50 = vpop.eup %12802 }
 0x7a0   :  { %v979_v51 = vmul.f32 %v12803_v50, %v12799_v41 }
 0x7a2   :  { %11756 = vmatmul.mubr.msk.f32.vlgmr.msra.gmra.mrb[10].mxu0 %vm141_vm2, %v979_v51 }
 0x7a3   :  { %v12805_v52 = vpop.eup %12804  ;;  %11764 = vmatpush3.xpose.msk.msra.mxu0 %vm141_vm2, %v1136_v49  ;;  %11765 = vmatprep.mubr.msk.f32.mxu0 %vm13070_vm1, %v13069_v8 }
 0x7a4   :  { %v980_v54 = vmul.f32 %v12805_v52, %v12801_v43  ;;  %11773 = vmatprep.subr.mxu0 %v13069_v8 }
 0x7a6   :  { %11761 = vmatmul.mubr.msk.f32.vlgmr.msra.gmra.mrb[12].mxu1 %vm141_vm2, %v980_v54  ;;  %11766 = vmatmul.mubr.msk.f32.vlgmr.msra.gmra.mrb[12].mxu0 %vm141_vm2, %v1134_v55 }
 0x7a7   :  { %11769 = vmatpush3.xpose.msk.msra.mxu1 %vm141_vm2, %v1214_v53  ;;  %11770 = vmatprep.mubr.msk.f32.mxu1 %vm13070_vm1, %v13069_v8 }
 0x7a8   :  { %11778 = vmatprep.subr.mxu1 %v13069_v8  ;;  %11775 = vmatprep.mubr.msk.f32.mxu0 %vm13070_vm1, %v13069_v8 }
 0x7aa   :  { %11771 = vmatmul.mubr.msk.f32.vlgmr.msra.gmra.mrb[14].mxu1 %vm141_vm2, %v1212_v56 }
 0x7ab   :  { %11780 = vmatprep.mubr.msk.f32.mxu1 %vm13070_vm1, %v13069_v8 }
 0x875   :  { %v1053_v57 = vpop.f32.mrb[10].mxu0 }
 0x876   :  { %v11757_v58 = vpop.f32.mrb[11].mxu0 }
 0x879   :  { %v1129_v59 = vpop.f32.mrb[12].mxu1  ;;  %v1207_v60 = vpop.f32.mrb[12].mxu0 }
 0x87a   :  { %v1289_v61 = vmul.f32 0.35355338, %v1207_v60  ;;  %v11762_v62 = vpop.f32.mrb[13].mxu1  ;;  %v11767_v63 = vpop.f32.mrb[13].mxu0 }
 0x87c   :  { %v1291_v0 = vsel %vm141_vm2, %v1289_v61, -inf }
 0x87d   :  { %v1285_v1 = vpop.f32.mrb[14].mxu1  ;;  %1292 = vmax.xlane.f32.xlu0 %v1291_v0 }
 0x87e   :  { %v1290_v2 = vmul.f32 0.35355338, %v1285_v1  ;;  %v11772_v3 = vpop.f32.mrb[15].mxu1 }
 0x87f   :  { %v1627_v3 = vld [vmem:[#allocation2 + $0x50] sm:$0xff] }
 0x880   :  { %v1294_v4 = vsel %vm141_vm2, %v1290_v2, -inf }
 0x881   :  { %1295 = vmax.xlane.f32.xlu1 %v1294_v4 }
 0x892   :  { %1313 = vrot.lane.b32.xlu1 %v13153_v12, %s13081_s21 }
 0x896   :  { %1467 = vrot.lane.b32.xlu1 %v13245_v21, %s13068_s29 }
 0x89a   :  { %1469 = vrot.lane.b32.xlu1 %v13247_v23, %s13068_s29 }
 0x89e   :  { %1477 = vrot.lane.b32.xlu1 %v1129_v59, %s13082_s22 }
 0x90a   :  { %v1293_v6 = vpop.xlane.xlu0 %1292 }
 0x90b   :  { %v1297_v9 = vsub.f32 %v1289_v61, %v1293_v6  ;;  %v1628_v6 = vld [vmem:[#allocation2 + $0x58] sm:$0xff] }
 0x90d   :  { %v1299_v10 = vmul.f32 1.442695, %v1297_v9  ;;  %v12523_v9 = vpack.c.bf16 %v1628_v6, %v1627_v3 }
 0x90e   :  { %v1296_v11 = vpop.xlane.xlu1 %1295 }
 0x90f   :  { %12806 = vpow2.f32 %v1299_v10  ;;  %v1298_v14 = vsub.f32 %v1290_v2, %v1296_v11  ;;  %v1626_v2 = vld [vmem:[#allocation2 + $0x48] sm:$0xff] }
 0x911   :  { %v1301_v15 = vmul.f32 1.442695, %v1298_v14 }
 0x912   :  { %v1314_v16 = vpop.permute.xlu1 %1313 }
 0x913   :  { %12808 = vpow2.f32 %v1301_v15  ;;  %11774 = vmatpush3.msra.mxu0 %v1314_v16 }
 0x914   :  { %12512 = vmatprep.subr.bf16.mxu0 %v12511_v29 }
 0x916   :  { %v1468_v36 = vpop.permute.xlu1 %1467 }
 0x917   :  { %v1489_v39 = vsel %vm141_vm2, %v13207_v46, %v1468_v36  ;;  %v11104_v46 = vld [vmem:[%s14492_s4 + $0x1] ss:$0 sm:$0xff]  ;;  %v1740_v36 = vld [vmem:[#allocation2 + $0x98] sm:$0xff] }
 0x919   :  { %v12807_v12 = vpop.eup %12806 }
 0x91a   :  { %v1303_v17 = vsel %vm141_vm2, %v12807_v12, 0.0  ;;  %v1470_v37 = vpop.permute.xlu1 %1469 }
 0x91b   :  { %1304 = vadd.xlane.f32.xlu0 %v1303_v17  ;;  %v1490_v44 = vsel %vm141_vm2, %v13209_v48, %v1470_v37 }
 0x91d   :  { %v12809_v18 = vpop.eup %12808 }
 0x91e   :  { %v1306_v19 = vsel %vm141_vm2, %v12809_v18, 0.0  ;;  %v1478_v40 = vpop.permute.xlu1 %1477 }
 0x91f   :  { %1307 = vadd.xlane.f32.xlu0 %v1306_v19  ;;  %v1493_v45 = vsel %vm1491_vm4, %v1490_v44, %v1478_v40 }
 0x935   :  { %1389 = vrot.lane.b32.xlu0 %v13157_v13, %s13081_s21  ;;  %v135_v13 = vld [vmem:[#allocation2 + $0x30] sm:$0xff] }
 0x936   :  { %v12515_v31 = vpack.c.bf16 %v136_v30, %v135_v13  ;;  %v1735_v13 = vld [vmem:[#allocation2 + $0x70] sm:$0xff]  ;;  %v1736_v30 = vld [vmem:[#allocation2 + $0x78] sm:$0xff] }
 0x939   :  { %1475 = vrot.lane.b32.xlu0 %v1053_v57, %s13082_s22 }
 0x9a8   :  { %v1305_v20 = vpop.xlane.xlu0 %1304 }
 0x9a9   :  { %12810 = vrcp.f32 %v1305_v20  ;;  %v11108_v20 = vld [vmem:[%s14492_s4 + $0x3] ss:$0 sm:$0xff] }
 0x9ac   :  { %v1308_v21 = vpop.xlane.xlu0 %1307 }
 0x9ad   :  { %12812 = vrcp.f32 %v1308_v21 }
 0x9b0   :  { %v1390_v22 = vpop.permute.xlu0 %1389 }
 0x9b1   :  { %11779 = vmatpush3.msra.mxu1 %v1390_v22 }
 0x9b3   :  { %v12811_v23 = vpop.eup %12810 }
 0x9b4   :  { %v1311_v24 = vmul.f32 %v12811_v23, %v12807_v12  ;;  %v1476_v38 = vpop.permute.xlu0 %1475 }
 0x9b5   :  { %v1492_v41 = vsel %vm1491_vm4, %v1489_v39, %v1476_v38  ;;  %v11109_v38 = vld [vmem:[%s14492_s4 + $0x4] ss:$0 sm:$0xff] }
 0x9b6   :  { %11776 = vmatmul.mubr.msk.f32.vlgmr.msra.gmra.mrb[14].mxu0 %vm141_vm2, %v1311_v24 }
 0x9b7   :  { %v12813_v25 = vpop.eup %12812  ;;  %12514 = vmatpush3.bf16.msra.mxu0 %v12511_v29  ;;  %v12527_v29 = vpack.c.bf16 %v1734_v28, %v1733_v27 }
 0x9b8   :  { %v1312_v26 = vmul.f32 %v12813_v25, %v12809_v18  ;;  %12516 = vmatprep.subr.bf16.mxu0 %v12515_v31  ;;  %v11107_v18 = vld [vmem:[%s14492_s4 + $0x2] ss:$0 sm:$0xff] }
 0x9ba   :  { %11781 = vmatmul.mubr.msk.f32.vlgmr.msra.gmra.mrb[16].mxu1 %vm141_vm2, %v1312_v26 }
 0x9bb   :  { %12518 = vmatpush3.bf16.msra.mxu0 %v12515_v31  ;;  %v12531_v31 = vpack.c.bf16 %v1736_v30, %v1735_v13  ;;  %v11115_v30 = vld [vmem:[%s14492_s4 + $0x6] ss:$0 sm:$0xff] }
 0x9bc   :  { %12528 = vmatprep.subr.bf16.mxu0 %v12527_v29 }
 0xa89   :  { %v1385_v32 = vpop.f32.mrb[14].mxu0 }
 0xa8a   :  { %1483 = vrot.lane.b32.xlu0 %v1385_v32, %s13083_s23  ;;  %v11777_v33 = vpop.f32.mrb[15].mxu0  ;;  %v1737_v32 = vld [vmem:[#allocation2 + $0x80] sm:$0xff] }
 0xa8b   :  { %v1738_v33 = vld [vmem:[#allocation2 + $0x88] sm:$0xff] }
 0xa8d   :  { %v1461_v34 = vpop.f32.mrb[16].mxu1 }
 0xa8e   :  { %1485 = vrot.lane.b32.xlu1 %v1461_v34, %s13083_s23  ;;  %v11782_v35 = vpop.f32.mrb[17].mxu1  ;;  %v12535_v34 = vpack.c.bf16 %v1738_v33, %v1737_v32 }
 0xa8f   :  { %v1739_v35 = vld [vmem:[#allocation2 + $0x90] sm:$0xff] }
 0xa90   :  { %v12539_v37 = vpack.c.bf16 %v1740_v36, %v1739_v35 }
 0xafc   :  { %v1484_v42 = vpop.permute.xlu0 %1483 }
 0xafd   :  { %v1495_v43 = vsel %vm1494_vm3, %v1492_v41, %v1484_v42 }
 0xafe   :  { %11791 = vmatprep.mubr.msk.f32.mxu0 %vm51_vm0, %v1495_v43 }
 0xb00   :  { %v1486_v47 = vpop.permute.xlu1 %1485 }
 0xb01   :  { %v1496_v49 = vsel %vm1494_vm3, %v1493_v45, %v1486_v47 }
 0xb02   :  { %11792 = vmatmul.mubr.msk.f32.vlgmr.msra.gmra.mrb[16].mxu0 %vm51_vm0, %v1496_v49 }
 0xb03   :  { %12530 = vmatpush3.bf16.msra.mxu0 %v12527_v29 }
 0xb04   :  { %12532 = vmatprep.subr.bf16.mxu0 %v12531_v31 }
 0xb07   :  { %12534 = vmatpush3.bf16.msra.mxu0 %v12531_v31 }
 0xb08   :  { %12536 = vmatprep.subr.bf16.mxu0 %v12535_v34 }
 0xb0b   :  { %12538 = vmatpush3.bf16.msra.mxu0 %v12535_v34  ;;  %v11116_v34 = vld [vmem:[%s14492_s4 + $0x7] ss:$0 sm:$0xff] }
 0xb0c   :  { %12540 = vmatprep.subr.bf16.mxu0 %v12539_v37 }
 0xb0f   :  { %12542 = vmatpush3.bf16.msra.mxu0 %v12539_v37 }
 0xb10   :  { %11845 = vmatprep.subr.mxu0 %v13069_v8 }
 0xbd5   :  { %v11793_v50 = vpop.f32.mrb[16].mxu0 }
 0xbd6   :  { %v1579_v51 = vadd.f32 %v11793_v50, %v11104_v46  ;;  %v1573_v52 = vpop.f32.mrb[17].mxu0 }
 0xbd7   :  { %v1574_v53 = vadd.f32 %v11104_v46, %v1573_v52 }
 0xbd8   :  { %v1583_v54 = vadd.f32 %v1579_v51, %v13140_v7 }
 0xbd9   :  { %v1582_v55 = vadd.f32 %v1574_v53, %v13133_v5  ;;  %v1625_v5 = vld [vmem:[#allocation2 + $0x40] sm:$0xff] }
 0xbda   :  { %v1589_v48 = vsel %vm51_vm0, %v1583_v54, 0.0  ;;  %v12519_v4 = vpack.c.bf16 %v1626_v2, %v1625_v5 }
 0xbdb   :  { %1590 = vadd.xlane.f32.xlu1 %v1589_v48  ;;  %v1586_v56 = vsel %vm51_vm0, %v1582_v55, 0.0 }
 0xbdc   :  { %1587 = vadd.xlane.f32.xlu0 %v1586_v56  ;;  %12520 = vmatprep.subr.bf16.mxu1 %v12519_v4 }
 0xbdd   :  { %12522 = vmatpush3.bf16.msra.mxu1 %v12519_v4 }
 0xbde   :  { %12524 = vmatprep.subr.bf16.mxu1 %v12523_v9 }
 0xbe1   :  { %12526 = vmatpush3.bf16.msra.mxu1 %v12523_v9 }
 0xc68   :  { %v1591_v57 = vpop.xlane.xlu1 %1590 }
 0xc69   :  { %v1594_v58 = vmul.f32 0.03125, %v1591_v57  ;;  %v1588_v59 = vpop.xlane.xlu0 %1587 }
 0xc6a   :  { %v1593_v60 = vmul.f32 0.03125, %v1588_v59 }
 0xc6b   :  { %v1596_v61 = vsub.f32 %v1583_v54, %v1594_v58 }
 0xc6c   :  { %v1595_v62 = vsub.f32 %v1582_v55, %v1593_v60 }
 0xc6d   :  { %v1598_v1 = vmul.f32 %v1596_v61, %v1596_v61 }
 0xc6e   :  { %v1597_v63 = vmul.f32 %v1595_v62, %v1595_v62 }
 0xc6f   :  { %v1602_v7 = vsel %vm51_vm0, %v1598_v1, 0.0 }
 0xc70   :  { %v1599_v0 = vsel %vm51_vm0, %v1597_v63, 0.0 }
 0xc71   :  { %1600 = vadd.xlane.f32.xlu0 %v1599_v0 }
 0xc75   :  { %1603 = vadd.xlane.f32.xlu0 %v1602_v7 }
 0xcfe   :  { %v1601_v10 = vpop.xlane.xlu0 %1600 }
 0xcff   :  { %v1605_v11 = vmul.f32 0.03125, %v1601_v10 }
 0xd01   :  { %v1607_v14 = vadd.f32 1e-12, %v1605_v11 }
 0xd02   :  { %v1604_v15 = vpop.xlane.xlu0 %1603 }
 0xd03   :  { %12814 = vrsqrt.f32 %v1607_v14  ;;  %v1606_v16 = vmul.f32 0.03125, %v1604_v15 }
 0xd05   :  { %v1608_v12 = vadd.f32 1e-12, %v1606_v16 }
 0xd07   :  { %12816 = vrsqrt.f32 %v1608_v12 }
 0xd0d   :  { %v12815_v17 = vpop.eup %12814 }
 0xd0e   :  { %v1611_v19 = vmul.f32 %v12815_v17, %v1595_v62 }
 0xd10   :  { %v1617_v21 = vmul.f32 %v11107_v18, %v1611_v19  ;;  %v1871_v19 = vld [vmem:[#allocation2 + $0xa8] sm:$0xff] }
 0xd11   :  { %v12817_v22 = vpop.eup %12816 }
 0xd12   :  { %v1612_v23 = vmul.f32 %v12817_v22, %v1596_v61  ;;  %v1623_v24 = vadd.f32 %v11108_v20, %v1617_v21  ;;  %v11112_v61 = vld [vmem:[%s14492_s4 + $0x5] ss:$0 sm:$0xff]  ;;  %v1873_v22 = vld [vmem:[#allocation2 + $0xb8] sm:$0xff] }
 0xd14   :  { %v1618_v25 = vmul.f32 %v11107_v18, %v1612_v23  ;;  %11802 = vmatprep.mubr.msk.f32.mxu1 %vm51_vm0, %v1623_v24  ;;  %v1870_v18 = vld [vmem:[#allocation2 + $0xa0] sm:$0xff] }
 0xd15   :  { %v12543_v21 = vpack.c.bf16 %v1871_v19, %v1870_v18 }
 0xd16   :  { %v1624_v26 = vadd.f32 %v11108_v20, %v1618_v25  ;;  %v1872_v20 = vld [vmem:[#allocation2 + $0xb0] sm:$0xff] }
 0xd17   :  { %v12547_v23 = vpack.c.bf16 %v1873_v22, %v1872_v20  ;;  %12544 = vmatprep.subr.bf16.mxu1 %v12543_v21 }
 0xd18   :  { %11803 = vmatmul.mubr.msk.f32.vlgmr.msra.gmra.mrb[18].mxu1 %vm51_vm0, %v1624_v26 }
 0xd19   :  { %12546 = vmatpush3.bf16.msra.mxu1 %v12543_v21 }
 0xd1a   :  { %12548 = vmatprep.subr.bf16.mxu1 %v12547_v23 }
 0xd1d   :  { %12550 = vmatpush3.bf16.msra.mxu1 %v12547_v23 }
 0xd1e   :  { %11835 = vmatprep.subr.mxu1 %v13069_v8 }
 0xdeb   :  { %v11804_v39 = vpop.f32.mrb[18].mxu1 }
 0xdec   :  { %v1712_v40 = vadd.f32 %v11804_v39, %v11109_v38  ;;  %v1706_v41 = vpop.f32.mrb[19].mxu1  ;;  %v11117_v39 = vld [vmem:[%s14492_s4 + $0x8] ss:$0 sm:$0xff] }
 0xded   :  { %v1707_v42 = vadd.f32 %v11109_v38, %v1706_v41 }
 0xdee   :  { %v1718_v43 = vmul.f32 0.044715, %v1712_v40  ;;  %v1716_v58 = vmul.f32 0.5, %v1712_v40 }
 0xdef   :  { %v1717_v44 = vmul.f32 0.044715, %v1707_v42  ;;  %v1715_v56 = vmul.f32 0.5, %v1707_v42 }
 0xdf0   :  { %v1720_v45 = vmul.f32 %v1718_v43, %v1712_v40 }
 0xdf1   :  { %v1719_v47 = vmul.f32 %v1717_v44, %v1707_v42 }
 0xdf2   :  { %v1722_v49 = vmul.f32 %v1720_v45, %v1712_v40 }
 0xdf3   :  { %v1721_v46 = vmul.f32 %v1719_v47, %v1707_v42 }
 0xdf4   :  { %v1724_v50 = vadd.f32 %v1722_v49, %v1712_v40 }
 0xdf5   :  { %v1723_v51 = vadd.f32 %v1721_v46, %v1707_v42 }
 0xdf6   :  { %v1726_v52 = vmul.f32 0.7978846, %v1724_v50 }
 0xdf7   :  { %v1725_v53 = vmul.f32 0.7978846, %v1723_v51 }
 0xdf8   :  { %12818 = vtanh.f32 %v1726_v52 }
 0xdf9   :  { %12820 = vtanh.f32 %v1725_v53 }
 0xe02   :  { %v12819_v54 = vpop.eup %12818 }
 0xe03   :  { %v12821_v55 = vpop.eup %12820  ;;  %v1730_v48 = vadd.f32 1.0, %v12819_v54 }
 0xe04   :  { %v1729_v57 = vadd.f32 1.0, %v12821_v55 }
 0xe05   :  { %v1732_v60 = vmul.f32 %v1730_v48, %v1716_v58 }
 0xe06   :  { %v1731_v59 = vmul.f32 %v1729_v57, %v1715_v56 }
 0xe08   :  { %11821 = vmatprep.mubr.msk.f32.mxu0 %vm1746_vm5, %v1731_v59 }
 0xe09   :  { %11822 = vmatmul.mubr.msk.f32.vlgmr.msra.gmra.mrb[18].mxu0 %vm1746_vm5, %v1732_v60 }
 0xe0a   :  { %11847 = vmatprep.mubr.msk.f32.mxu0 %vm13070_vm1, %v13069_v8 }
 0xedc   :  { %v11823_v62 = vpop.f32.mrb[18].mxu0 }
 0xedd   :  { %v1825_v63 = vadd.f32 %v11823_v62, %v11112_v61  ;;  %v1819_v0 = vpop.f32.mrb[19].mxu0 }
 0xede   :  { %v1820_v1 = vadd.f32 %v11112_v61, %v1819_v0 }
 0xedf   :  { %v1829_v7 = vadd.f32 %v1825_v63, %v1624_v26 }
 0xee0   :  { %v1828_v5 = vadd.f32 %v1820_v1, %v1623_v24 }
 0xee1   :  { %v1835_v2 = vsel %vm51_vm0, %v1829_v7, 0.0 }
 0xee2   :  { %1836 = vadd.xlane.f32.xlu0 %v1835_v2  ;;  %v1832_v3 = vsel %vm51_vm0, %v1828_v5, 0.0 }
 0xee3   :  { %1833 = vadd.xlane.f32.xlu1 %v1832_v3 }
 0xf6f   :  { %v1837_v4 = vpop.xlane.xlu0 %1836 }
 0xf70   :  { %v1839_v6 = vmul.f32 0.03125, %v1837_v4  ;;  %v1834_v9 = vpop.xlane.xlu1 %1833 }
 0xf71   :  { %v1838_v10 = vmul.f32 0.03125, %v1834_v9 }
 0xf72   :  { %v1841_v11 = vsub.f32 %v1829_v7, %v1839_v6 }
 0xf73   :  { %v1840_v14 = vsub.f32 %v1828_v5, %v1838_v10 }
 0xf74   :  { %v1843_v15 = vmul.f32 %v1841_v11, %v1841_v11 }
 0xf75   :  { %v1842_v16 = vmul.f32 %v1840_v14, %v1840_v14 }
 0xf76   :  { %v1847_v12 = vsel %vm51_vm0, %v1843_v15, 0.0 }
 0xf77   :  { %1848 = vadd.xlane.f32.xlu0 %v1847_v12  ;;  %v1844_v17 = vsel %vm51_vm0, %v1842_v16, 0.0 }
 0xf78   :  { %1845 = vadd.xlane.f32.xlu1 %v1844_v17 }
0x1004   :  { %v1849_v24 = vpop.xlane.xlu0 %1848 }
0x1005   :  { %v1851_v25 = vmul.f32 0.03125, %v1849_v24  ;;  %v1846_v26 = vpop.xlane.xlu1 %1845 }
0x1006   :  { %v1850_v27 = vmul.f32 0.03125, %v1846_v26 }
0x1007   :  { %v1853_v28 = vadd.f32 1e-12, %v1851_v25 }
0x1008   :  { %v1852_v29 = vadd.f32 1e-12, %v1850_v27 }
0x1009   :  { %12822 = vrsqrt.f32 %v1853_v28 }
0x100a   :  { %12824 = vrsqrt.f32 %v1852_v29 }
0x1013   :  { %v12823_v13 = vpop.eup %12822 }
0x1014   :  { %v12825_v31 = vpop.eup %12824  ;;  %v1857_v32 = vmul.f32 %v12823_v13, %v1841_v11 }
0x1015   :  { %v1856_v33 = vmul.f32 %v12825_v31, %v1840_v14 }
0x1016   :  { %v1863_v35 = vmul.f32 %v11115_v30, %v1857_v32 }
0x1017   :  { %v1862_v36 = vmul.f32 %v11115_v30, %v1856_v33 }
0x1018   :  { %v13352_v38 = vadd.f32 %v11116_v34, %v1863_v35 }
0x1019   :  { %v13350_v37 = vadd.f32 %v11116_v34, %v1862_v36 }
0x101b   :  { %11832 = vmatprep.mubr.msk.f32.mxu1 %vm51_vm0, %v13350_v37 }
0x101c   :  { %11833 = vmatmul.mubr.msk.f32.vlgmr.msra.gmra.mrb[20].mxu1 %vm51_vm0, %v13352_v38 }
0x101d   :  { %11837 = vmatprep.mubr.msk.f32.mxu1 %vm13070_vm1, %v13069_v8 }
0x10ef   :  { %v11834_v40 = vpop.f32.mrb[20].mxu1 }
0x10f0   :  { %v13363_v41 = vadd.f32 %v11834_v40, %v11117_v39  ;;  %v1951_v42 = vpop.f32.mrb[21].mxu1 }
0x10f1   :  { %v13365_v43 = vadd.f32 %v11117_v39, %v1951_v42 }
0x10f2   :  { %2043 = vrot.lane.b32.xlu0 %v13363_v41, %s13071_s0 }
0x10f3   :  { %1966 = vrot.lane.b32.xlu1 %v13365_v43, %s13071_s0 }
0x1164   :  { %v2044_v45 = vpop.permute.xlu0 %2043 }
0x1165   :  { %v1967_v44 = vpop.permute.xlu1 %1966 }
0x1166   :  { %11836 = vmatpush3.xpose.msk.msra.mxu1 %vm141_vm2, %v1967_v44 }
0x1167   :  { %11840 = vmatprep.subr.mxu1 %v13069_v8 }
0x1169   :  { %11838 = vmatmul.mubr.msk.f32.vlgmr.msra.gmra.mrb[22].mxu1 %vm141_vm2, %v13365_v43 }
0x116a   :  { %11841 = vmatpush3.xpose.msk.msra.mxu1 %vm141_vm2, %v2044_v45  ;;  %11842 = vmatprep.mubr.msk.f32.mxu1 %vm13070_vm1, %v13069_v8 }
0x116b   :  { %11850 = vmatprep.subr.mxu1 %v13069_v8 }
0x116d   :  { %11843 = vmatmul.mubr.msk.f32.vlgmr.msra.gmra.mrb[24].mxu1 %vm141_vm2, %v13363_v41 }
0x116e   :  { %11852 = vmatprep.mubr.msk.f32.mxu1 %vm13070_vm1, %v13069_v8 }
0x123c   :  { %v2038_v47 = vpop.f32.mrb[22].mxu1 }
0x123d   :  { %v2119_v49 = vmul.f32 0.35355338, %v2038_v47  ;;  %v11839_v46 = vpop.f32.mrb[23].mxu1 }
0x123f   :  { %v2121_v50 = vsel %vm141_vm2, %v2119_v49, -inf }
0x1240   :  { %2122 = vmax.xlane.f32.xlu1 %v2121_v50  ;;  %v2115_v51 = vpop.f32.mrb[24].mxu1 }
0x1241   :  { %v2120_v52 = vmul.f32 0.35355338, %v2115_v51  ;;  %v11844_v53 = vpop.f32.mrb[25].mxu1 }
0x1243   :  { %v2124_v54 = vsel %vm141_vm2, %v2120_v52, -inf }
0x1244   :  { %2125 = vmax.xlane.f32.xlu0 %v2124_v54 }
0x1251   :  { %2143 = vrot.lane.b32.xlu1 %v13365_v43, %s13072_s12 }
0x1255   :  { %2297 = vrot.lane.b32.xlu1 %v13365_v43, %s13073_s13 }
0x1259   :  { %2375 = vrot.lane.b32.xlu1 %v13363_v41, %s13073_s13 }
0x125a   :  { %2219 = vrot.lane.b32.xlu0 %v13363_v41, %s13072_s12 }
0x12cd   :  { %v2123_v55 = vpop.xlane.xlu1 %2122 }
0x12ce   :  { %v2127_v48 = vsub.f32 %v2119_v49, %v2123_v55 }
0x12d0   :  { %v2129_v56 = vmul.f32 1.442695, %v2127_v48 }
0x12d1   :  { %v2144_v57 = vpop.permute.xlu1 %2143  ;;  %v2126_v58 = vpop.xlane.xlu0 %2125 }
0x12d2   :  { %12826 = vpow2.f32 %v2129_v56  ;;  %v2128_v59 = vsub.f32 %v2120_v52, %v2126_v58  ;;  %11846 = vmatpush3.msra.mxu0 %v2144_v57 }
0x12d3   :  { %11855 = vmatprep.subr.mxu0 %v13069_v8 }
0x12d4   :  { %v2131_v60 = vmul.f32 1.442695, %v2128_v59 }
0x12d5   :  { %v2220_v61 = vpop.permute.xlu0 %2219  ;;  %v2298_v7 = vpop.permute.xlu1 %2297 }
0x12d6   :  { %12828 = vpow2.f32 %v2131_v60  ;;  %11851 = vmatpush3.msra.mxu1 %v2220_v61 }
0x12d7   :  { %11860 = vmatprep.subr.mxu1 %v13069_v8 }
0x12d9   :  { %v2376_v5 = vpop.permute.xlu1 %2375 }
0x12dc   :  { %v12827_v62 = vpop.eup %12826 }
0x12dd   :  { %v2133_v63 = vsel %vm141_vm2, %v12827_v62, 0.0 }
0x12de   :  { %2134 = vadd.xlane.f32.xlu1 %v2133_v63 }
0x12e0   :  { %v12829_v0 = vpop.eup %12828 }
0x12e1   :  { %v2136_v1 = vsel %vm141_vm2, %v12829_v0, 0.0 }
0x12e2   :  { %2137 = vadd.xlane.f32.xlu0 %v2136_v1 }
0x12ef   :  { %2373 = vrot.lane.b32.xlu1 %v13363_v41, %s13074_s14 }
0x12f8   :  { %2295 = vrot.lane.b32.xlu0 %v13365_v43, %s13074_s14 }
0x136b   :  { %v2135_v2 = vpop.xlane.xlu1 %2134 }
0x136c   :  { %12830 = vrcp.f32 %v2135_v2 }
0x136f   :  { %v2138_v3 = vpop.xlane.xlu0 %2137  ;;  %v2374_v14 = vpop.permute.xlu1 %2373 }
0x1370   :  { %12832 = vrcp.f32 %v2138_v3 }
0x1373   :  { %v2296_v11 = vpop.permute.xlu0 %2295 }
0x1376   :  { %v12831_v4 = vpop.eup %12830 }
0x1377   :  { %v2141_v6 = vmul.f32 %v12831_v4, %v12827_v62 }
0x1379   :  { %11848 = vmatmul.mubr.msk.f32.vlgmr.msra.gmra.mrb[20].mxu0 %vm141_vm2, %v2141_v6 }
0x137a   :  { %v12833_v9 = vpop.eup %12832  ;;  %11856 = vmatpush3.xpose.msk.msra.mxu0 %vm141_vm2, %v2298_v7  ;;  %11857 = vmatprep.mubr.msk.f32.mxu0 %vm13070_vm1, %v13069_v8 }
0x137b   :  { %v2142_v10 = vmul.f32 %v12833_v9, %v12829_v0  ;;  %11865 = vmatprep.subr.mxu0 %v13069_v8 }
0x137d   :  { %11853 = vmatmul.mubr.msk.f32.vlgmr.msra.gmra.mrb[26].mxu1 %vm141_vm2, %v2142_v10  ;;  %11858 = vmatmul.mubr.msk.f32.vlgmr.msra.gmra.mrb[22].mxu0 %vm141_vm2, %v2296_v11 }
0x137e   :  { %11861 = vmatpush3.xpose.msk.msra.mxu1 %vm141_vm2, %v2376_v5  ;;  %11862 = vmatprep.mubr.msk.f32.mxu1 %vm13070_vm1, %v13069_v8 }
0x137f   :  { %11870 = vmatprep.subr.mxu1 %v13069_v8  ;;  %11867 = vmatprep.mubr.msk.f32.mxu0 %vm13070_vm1, %v13069_v8 }
0x1381   :  { %11863 = vmatmul.mubr.msk.f32.vlgmr.msra.gmra.mrb[28].mxu1 %vm141_vm2, %v2374_v14 }
0x1382   :  { %11872 = vmatprep.mubr.msk.f32.mxu1 %vm13070_vm1, %v13069_v8 }
0x144c   :  { %v13417_v15 = vpop.f32.mrb[20].mxu0 }
0x144d   :  { %v11849_v16 = vpop.f32.mrb[21].mxu0 }
0x1450   :  { %v13419_v12 = vpop.f32.mrb[26].mxu1  ;;  %v2369_v17 = vpop.f32.mrb[22].mxu0 }
0x1451   :  { %v2451_v18 = vmul.f32 0.35355338, %v2369_v17  ;;  %v11854_v19 = vpop.f32.mrb[27].mxu1  ;;  %v11859_v20 = vpop.f32.mrb[23].mxu0 }
0x1453   :  { %v2453_v21 = vsel %vm141_vm2, %v2451_v18, -inf }
0x1454   :  { %2454 = vmax.xlane.f32.xlu0 %v2453_v21  ;;  %v2447_v22 = vpop.f32.mrb[28].mxu1 }
0x1455   :  { %v2452_v23 = vmul.f32 0.35355338, %v2447_v22  ;;  %v11864_v24 = vpop.f32.mrb[29].mxu1 }
0x1457   :  { %v2456_v25 = vsel %vm141_vm2, %v2452_v23, -inf }
0x1458   :  { %2457 = vmax.xlane.f32.xlu1 %v2456_v25 }
0x1469   :  { %2475 = vrot.lane.b32.xlu1 %v13365_v43, %s13075_s15 }
0x146a   :  { %2551 = vrot.lane.b32.xlu0 %v13363_v41, %s13075_s15 }
0x146d   :  { %2629 = vrot.lane.b32.xlu1 %v13365_v43, %s13076_s16 }
0x1471   :  { %2707 = vrot.lane.b32.xlu1 %v13363_v41, %s13076_s16 }
0x1475   :  { %2705 = vrot.lane.b32.xlu1 %v13363_v41, %s13077_s17 }
0x14e1   :  { %v2455_v26 = vpop.xlane.xlu0 %2454 }
0x14e2   :  { %v2459_v27 = vsub.f32 %v2451_v18, %v2455_v26 }
0x14e4   :  { %v2461_v28 = vmul.f32 1.442695, %v2459_v27 }
0x14e5   :  { %v2552_v29 = vpop.permute.xlu0 %2551  ;;  %v2458_v13 = vpop.xlane.xlu1 %2457 }
0x14e6   :  { %12834 = vpow2.f32 %v2461_v28  ;;  %v2460_v30 = vsub.f32 %v2452_v23, %v2458_v13  ;;  %11871 = vmatpush3.msra.mxu1 %v2552_v29 }
0x14e7   :  { %11880 = vmatprep.subr.mxu1 %v13069_v8 }
0x14e8   :  { %v2463_v31 = vmul.f32 1.442695, %v2460_v30 }
0x14e9   :  { %v2476_v32 = vpop.permute.xlu1 %2475 }
0x14ea   :  { %12836 = vpow2.f32 %v2463_v31  ;;  %11866 = vmatpush3.msra.mxu0 %v2476_v32 }
0x14eb   :  { %11875 = vmatprep.subr.mxu0 %v13069_v8 }
0x14ed   :  { %v2630_v42 = vpop.permute.xlu1 %2629 }
0x14f0   :  { %v12835_v33 = vpop.eup %12834 }
0x14f1   :  { %v2465_v34 = vsel %vm141_vm2, %v12835_v33, 0.0  ;;  %v2708_v49 = vpop.permute.xlu1 %2707 }
0x14f2   :  { %2466 = vadd.xlane.f32.xlu0 %v2465_v34 }
0x14f4   :  { %v12837_v35 = vpop.eup %12836 }
0x14f5   :  { %v2468_v36 = vsel %vm141_vm2, %v12837_v35, 0.0  ;;  %v2706_v51 = vpop.permute.xlu1 %2705 }
0x14f6   :  { %2469 = vadd.xlane.f32.xlu0 %v2468_v36 }
0x150c   :  { %2627 = vrot.lane.b32.xlu0 %v13365_v43, %s13077_s17 }
0x157f   :  { %v2467_v39 = vpop.xlane.xlu0 %2466 }
0x1580   :  { %12838 = vrcp.f32 %v2467_v39 }
0x1583   :  { %v2470_v40 = vpop.xlane.xlu0 %2469 }
0x1584   :  { %12840 = vrcp.f32 %v2470_v40 }
0x1587   :  { %v2628_v50 = vpop.permute.xlu0 %2627 }
0x158a   :  { %v12839_v44 = vpop.eup %12838 }
0x158b   :  { %v2473_v45 = vmul.f32 %v12839_v44, %v12835_v33 }
0x158d   :  { %11868 = vmatmul.mubr.msk.f32.vlgmr.msra.gmra.mrb[24].mxu0 %vm141_vm2, %v2473_v45 }
0x158e   :  { %v12841_v47 = vpop.eup %12840  ;;  %11876 = vmatpush3.xpose.msk.msra.mxu0 %vm141_vm2, %v2630_v42  ;;  %11877 = vmatprep.mubr.msk.f32.mxu0 %vm13070_vm1, %v13069_v8 }
0x158f   :  { %v2474_v46 = vmul.f32 %v12841_v47, %v12837_v35  ;;  %11885 = vmatprep.subr.mxu0 %v13069_v8 }
0x1591   :  { %11873 = vmatmul.mubr.msk.f32.vlgmr.msra.gmra.mrb[30].mxu1 %vm141_vm2, %v2474_v46  ;;  %11878 = vmatmul.mubr.msk.f32.vlgmr.msra.gmra.mrb[26].mxu0 %vm141_vm2, %v2628_v50 }
0x1592   :  { %11881 = vmatpush3.xpose.msk.msra.mxu1 %vm141_vm2, %v2708_v49  ;;  %11882 = vmatprep.mubr.msk.f32.mxu1 %vm13070_vm1, %v13069_v8 }
0x1593   :  { %11890 = vmatprep.subr.mxu1 %v13069_v8  ;;  %11887 = vmatprep.mubr.msk.f32.mxu0 %vm13070_vm1, %v13069_v8 }
0x1595   :  { %11883 = vmatmul.mubr.msk.f32.vlgmr.msra.gmra.mrb[32].mxu1 %vm141_vm2, %v2706_v51 }
0x1596   :  { %11892 = vmatprep.mubr.msk.f32.mxu1 %vm13070_vm1, %v13069_v8 }
0x1660   :  { %v13455_v52 = vpop.f32.mrb[24].mxu0 }
0x1661   :  { %v11869_v53 = vpop.f32.mrb[25].mxu0 }
0x1664   :  { %v13457_v54 = vpop.f32.mrb[30].mxu1  ;;  %v2701_v55 = vpop.f32.mrb[26].mxu0 }
0x1665   :  { %v2783_v48 = vmul.f32 0.35355338, %v2701_v55  ;;  %v11874_v56 = vpop.f32.mrb[31].mxu1  ;;  %v11879_v57 = vpop.f32.mrb[27].mxu0 }
0x1666   :  { %v1960_v57 = vld [vmem:[#allocation2 + $0xc0] sm:$0xff] }
0x1667   :  { %v2785_v58 = vsel %vm141_vm2, %v2783_v48, -inf }
0x1668   :  { %2786 = vmax.xlane.f32.xlu0 %v2785_v58  ;;  %v2779_v59 = vpop.f32.mrb[32].mxu1  ;;  %v1961_v58 = vld [vmem:[#allocation2 + $0xc8] sm:$0xff] }
0x1669   :  { %v2784_v60 = vmul.f32 0.35355338, %v2779_v59  ;;  %v11884_v61 = vpop.f32.mrb[33].mxu1  ;;  %v12551_v59 = vpack.c.bf16 %v1961_v58, %v1960_v57 }
0x166b   :  { %v2788_v62 = vsel %vm141_vm2, %v2784_v60, -inf }
0x166c   :  { %2789 = vmax.xlane.f32.xlu1 %v2788_v62 }
0x167d   :  { %2807 = vrot.lane.b32.xlu1 %v13365_v43, %s13078_s18 }
0x167e   :  { %2883 = vrot.lane.b32.xlu0 %v13363_v41, %s13078_s18 }
0x1681   :  { %2961 = vrot.lane.b32.xlu1 %v13365_v43, %s13079_s19 }
0x1685   :  { %3039 = vrot.lane.b32.xlu1 %v13363_v41, %s13079_s19 }
0x1689   :  { %3037 = vrot.lane.b32.xlu1 %v13363_v41, %s13080_s20 }
0x16f5   :  { %v2787_v63 = vpop.xlane.xlu0 %2786 }
0x16f6   :  { %v2791_v0 = vsub.f32 %v2783_v48, %v2787_v63 }
0x16f8   :  { %v2793_v1 = vmul.f32 1.442695, %v2791_v0 }
0x16f9   :  { %v2884_v7 = vpop.permute.xlu0 %2883  ;;  %v2790_v5 = vpop.xlane.xlu1 %2789 }
0x16fa   :  { %12842 = vpow2.f32 %v2793_v1  ;;  %v2792_v2 = vsub.f32 %v2784_v60, %v2790_v5  ;;  %11891 = vmatpush3.msra.mxu1 %v2884_v7  ;;  %v1963_v60 = vld [vmem:[#allocation2 + $0xd8] sm:$0xff] }
0x16fb   :  { %11900 = vmatprep.subr.mxu1 %v13069_v8 }
0x16fc   :  { %v2795_v3 = vmul.f32 1.442695, %v2792_v2 }
0x16fd   :  { %v2808_v4 = vpop.permute.xlu1 %2807 }
0x16fe   :  { %12844 = vpow2.f32 %v2795_v3  ;;  %11886 = vmatpush3.msra.mxu0 %v2808_v4 }
0x16ff   :  { %11895 = vmatprep.subr.mxu0 %v13069_v8 }
0x1701   :  { %v2962_v17 = vpop.permute.xlu1 %2961 }
0x1704   :  { %v12843_v6 = vpop.eup %12842 }
0x1705   :  { %v2797_v9 = vsel %vm141_vm2, %v12843_v6, 0.0  ;;  %v3040_v21 = vpop.permute.xlu1 %3039 }
0x1706   :  { %2798 = vadd.xlane.f32.xlu0 %v2797_v9 }
0x1708   :  { %v12845_v10 = vpop.eup %12844 }
0x1709   :  { %v2800_v11 = vsel %vm141_vm2, %v12845_v10, 0.0  ;;  %v3038_v24 = vpop.permute.xlu1 %3037 }
0x170a   :  { %2801 = vadd.xlane.f32.xlu0 %v2800_v11 }
0x1720   :  { %2959 = vrot.lane.b32.xlu0 %v13365_v43, %s13080_s20 }
0x1793   :  { %v2799_v14 = vpop.xlane.xlu0 %2798 }
0x1794   :  { %12846 = vrcp.f32 %v2799_v14 }
0x1797   :  { %v2802_v16 = vpop.xlane.xlu0 %2801 }
0x1798   :  { %12848 = vrcp.f32 %v2802_v16 }
0x179b   :  { %v2960_v23 = vpop.permute.xlu0 %2959 }
0x179e   :  { %v12847_v18 = vpop.eup %12846 }
0x179f   :  { %v2805_v19 = vmul.f32 %v12847_v18, %v12843_v6 }
0x17a1   :  { %11888 = vmatmul.mubr.msk.f32.vlgmr.msra.gmra.mrb[28].mxu0 %vm141_vm2, %v2805_v19 }
0x17a2   :  { %v12849_v20 = vpop.eup %12848  ;;  %11896 = vmatpush3.xpose.msk.msra.mxu0 %vm141_vm2, %v2962_v17  ;;  %11897 = vmatprep.mubr.msk.f32.mxu0 %vm13070_vm1, %v13069_v8 }
0x17a3   :  { %v2806_v22 = vmul.f32 %v12849_v20, %v12845_v10  ;;  %11905 = vmatprep.subr.mxu0 %v13069_v8 }
0x17a5   :  { %11893 = vmatmul.mubr.msk.f32.vlgmr.msra.gmra.mrb[34].mxu1 %vm141_vm2, %v2806_v22  ;;  %11898 = vmatmul.mubr.msk.f32.vlgmr.msra.gmra.mrb[30].mxu0 %vm141_vm2, %v2960_v23 }
0x17a6   :  { %11901 = vmatpush3.xpose.msk.msra.mxu1 %vm141_vm2, %v3040_v21  ;;  %11902 = vmatprep.mubr.msk.f32.mxu1 %vm13070_vm1, %v13069_v8 }
0x17a7   :  { %11910 = vmatprep.subr.mxu1 %v13069_v8  ;;  %11907 = vmatprep.mubr.msk.f32.mxu0 %vm13070_vm1, %v13069_v8 }
0x17a9   :  { %11903 = vmatmul.mubr.msk.f32.vlgmr.msra.gmra.mrb[36].mxu1 %vm141_vm2, %v3038_v24 }
0x17aa   :  { %11912 = vmatprep.mubr.msk.f32.mxu1 %vm13070_vm1, %v13069_v8 }
0x1874   :  { %v2879_v25 = vpop.f32.mrb[28].mxu0 }
0x1875   :  { %v11889_v26 = vpop.f32.mrb[29].mxu0 }
0x1878   :  { %v2955_v27 = vpop.f32.mrb[34].mxu1  ;;  %v3033_v28 = vpop.f32.mrb[30].mxu0 }
0x1879   :  { %v3115_v29 = vmul.f32 0.35355338, %v3033_v28  ;;  %v11894_v13 = vpop.f32.mrb[35].mxu1  ;;  %v11899_v30 = vpop.f32.mrb[31].mxu0 }
0x187b   :  { %v3117_v31 = vsel %vm141_vm2, %v3115_v29, -inf }
0x187c   :  { %3118 = vmax.xlane.f32.xlu0 %v3117_v31  ;;  %v3111_v32 = vpop.f32.mrb[36].mxu1 }
0x187d   :  { %v3116_v33 = vmul.f32 0.35355338, %v3111_v32  ;;  %v11904_v34 = vpop.f32.mrb[37].mxu1 }
0x187e   :  { %v3450_v34 = vld [vmem:[#allocation2 + $0xf0] sm:$0xff] }
0x187f   :  { %v3120_v35 = vsel %vm141_vm2, %v3116_v33, -inf }
0x1880   :  { %3121 = vmax.xlane.f32.xlu1 %v3120_v35 }
0x1891   :  { %3139 = vrot.lane.b32.xlu1 %v13365_v43, %s13081_s21 }
0x1895   :  { %3293 = vrot.lane.b32.xlu1 %v13455_v52, %s13068_s29 }
0x1899   :  { %3295 = vrot.lane.b32.xlu1 %v13457_v54, %s13068_s29 }
0x189d   :  { %3303 = vrot.lane.b32.xlu1 %v2955_v27, %s13082_s22 }
0x1909   :  { %v3119_v36 = vpop.xlane.xlu0 %3118 }
0x190a   :  { %v3123_v39 = vsub.f32 %v3115_v29, %v3119_v36  ;;  %v3451_v36 = vld [vmem:[#allocation2 + $0xf8] sm:$0xff] }
0x190c   :  { %v3125_v40 = vmul.f32 1.442695, %v3123_v39  ;;  %v12563_v39 = vpack.c.bf16 %v3451_v36, %v3450_v34  ;;  %v11149_v36 = vld [vmem:[%s14492_s4 + $0xc] ss:$0 sm:$0xff] }
0x190d   :  { %v3122_v42 = vpop.xlane.xlu1 %3121 }
0x190e   :  { %12850 = vpow2.f32 %v3125_v40  ;;  %v3124_v44 = vsub.f32 %v3116_v33, %v3122_v42  ;;  %v3449_v33 = vld [vmem:[#allocation2 + $0xe8] sm:$0xff]  ;;  %v3692_v40 = vld [vmem:[%s14489_s1] sm:$0xff] }
0x190f   :  { %v3693_v42 = vld [vmem:[%s14489_s1 + $0x8] sm:$0xff] }
0x1910   :  { %v3127_v45 = vmul.f32 1.442695, %v3124_v44  ;;  %v13084_v44 = vmov 0  }
0x1911   :  { %v3140_v47 = vpop.permute.xlu1 %3139  ;;  %12780 = vset.pattern.permute.xlu1 %v13084_v44  ;;  %12781 = vset.pattern.permute.xlu0 %v13084_v44 }
0x1912   :  { %12852 = vpow2.f32 %v3127_v45  ;;  %11906 = vmatpush3.msra.mxu0 %v3140_v47 }
0x1913   :  { %12552 = vmatprep.subr.bf16.mxu0 %v12551_v59 }
0x1915   :  { %v3294_v7 = vpop.permute.xlu1 %3293 }
0x1916   :  { %v3315_v3 = vsel %vm141_vm2, %v13417_v15, %v3294_v7  ;;  %v11144_v15 = vld [vmem:[%s14492_s4 + $0x9] ss:$0 sm:$0xff] }
0x1917   :  { %v3711_v7 = vld [vmem:[#allocation2 + $0x368] sm:$0xff] }
0x1918   :  { %v12851_v49 = vpop.eup %12850 }
0x1919   :  { %v3129_v43 = vsel %vm141_vm2, %v12851_v49, 0.0  ;;  %v3296_v5 = vpop.permute.xlu1 %3295 }
0x191a   :  { %3130 = vadd.xlane.f32.xlu0 %v3129_v43  ;;  %v3316_v11 = vsel %vm141_vm2, %v13419_v12, %v3296_v5 }
0x191c   :  { %v12853_v46 = vpop.eup %12852 }
0x191d   :  { %v3132_v50 = vsel %vm141_vm2, %v12853_v46, 0.0  ;;  %v3304_v4 = vpop.permute.xlu1 %3303 }
0x191e   :  { %3133 = vadd.xlane.f32.xlu0 %v3132_v50  ;;  %v3318_v14 = vsel %vm1491_vm4, %v3316_v11, %v3304_v4  ;;  %v3712_v4 = vld [vmem:[#allocation2 + $0x370] sm:$0xff]  ;;  %v3559_v11 = vld [vmem:[#allocation2 + $0x118] sm:$0xff] }
0x1934   :  { %3215 = vrot.lane.b32.xlu0 %v13363_v41, %s13081_s21  ;;  %v1962_v41 = vld [vmem:[#allocation2 + $0xd0] sm:$0xff] }
0x1935   :  { %v12555_v61 = vpack.c.bf16 %v1963_v60, %v1962_v41  ;;  %v3706_v41 = vld [vmem:[#allocation2 + $0x340] sm:$0xff]  ;;  %v3707_v60 = vld [vmem:[#allocation2 + $0x348] sm:$0xff] }
0x1938   :  { %3301 = vrot.lane.b32.xlu0 %v2879_v25, %s13082_s22 }
0x19a7   :  { %v3131_v51 = vpop.xlane.xlu0 %3130 }
0x19a8   :  { %12854 = vrcp.f32 %v3131_v51 }
0x19ab   :  { %v3134_v52 = vpop.xlane.xlu0 %3133 }
0x19ac   :  { %12856 = vrcp.f32 %v3134_v52  ;;  %v11147_v52 = vld [vmem:[%s14492_s4 + $0xa] ss:$0 sm:$0xff] }
0x19af   :  { %v3216_v53 = vpop.permute.xlu0 %3215 }
0x19b0   :  { %11911 = vmatpush3.msra.mxu1 %v3216_v53 }
0x19b2   :  { %v12855_v54 = vpop.eup %12854 }
0x19b3   :  { %v3137_v55 = vmul.f32 %v12855_v54, %v12851_v49  ;;  %v3302_v2 = vpop.permute.xlu0 %3301  ;;  %v11148_v54 = vld [vmem:[%s14492_s4 + $0xb] ss:$0 sm:$0xff] }
0x19b4   :  { %v3317_v6 = vsel %vm1491_vm4, %v3315_v3, %v3302_v2  ;;  %v3556_v2 = vld [vmem:[#allocation2 + $0x100] sm:$0xff]  ;;  %v3557_v3 = vld [vmem:[#allocation2 + $0x108] sm:$0xff] }
0x19b5   :  { %11908 = vmatmul.mubr.msk.f32.vlgmr.msra.gmra.mrb[32].mxu0 %vm141_vm2, %v3137_v55 }
0x19b6   :  { %v12857_v48 = vpop.eup %12856  ;;  %12554 = vmatpush3.bf16.msra.mxu0 %v12551_v59 }
0x19b7   :  { %v3138_v56 = vmul.f32 %v12857_v48, %v12853_v46  ;;  %12556 = vmatprep.subr.bf16.mxu0 %v12555_v61 }
0x19b9   :  { %11913 = vmatmul.mubr.msk.f32.vlgmr.msra.gmra.mrb[38].mxu1 %vm141_vm2, %v3138_v56 }
0x19ba   :  { %12558 = vmatpush3.bf16.msra.mxu0 %v12555_v61  ;;  %v12583_v61 = vpack.c.bf16 %v3707_v60, %v3706_v41 }
0x1a88   :  { %v3211_v62 = vpop.f32.mrb[32].mxu0 }
0x1a89   :  { %3309 = vrot.lane.b32.xlu0 %v3211_v62, %s13083_s23  ;;  %v11909_v63 = vpop.f32.mrb[33].mxu0  ;;  %v3708_v62 = vld [vmem:[#allocation2 + $0x350] sm:$0xff] }
0x1a8a   :  { %v3709_v63 = vld [vmem:[#allocation2 + $0x358] sm:$0xff] }
0x1a8c   :  { %v3287_v0 = vpop.f32.mrb[38].mxu1 }
0x1a8d   :  { %3311 = vrot.lane.b32.xlu1 %v3287_v0, %s13083_s23  ;;  %v11914_v1 = vpop.f32.mrb[39].mxu1  ;;  %v12587_v0 = vpack.c.bf16 %v3709_v63, %v3708_v62 }
0x1a8e   :  { %v3710_v1 = vld [vmem:[#allocation2 + $0x360] sm:$0xff] }
0x1a8f   :  { %v12591_v5 = vpack.c.bf16 %v3711_v7, %v3710_v1  ;;  %v3722_v1 = vld [vmem:[%s14490_s2] sm:$0xff]  ;;  %v11152_v7 = vld [vmem:[%s14492_s4 + $0xd] ss:$0 sm:$0xff] }
0x1afb   :  { %v3310_v9 = vpop.permute.xlu0 %3309 }
0x1afc   :  { %v3319_v10 = vsel %vm1494_vm3, %v3317_v6, %v3310_v9  ;;  %v12567_v6 = vpack.c.bf16 %v3557_v3, %v3556_v2  ;;  %v3713_v9 = vld [vmem:[#allocation2 + $0x378] sm:$0xff] }
0x1afd   :  { %11923 = vmatprep.mubr.msk.f32.mxu0 %vm51_vm0, %v3319_v10  ;;  %v3558_v10 = vld [vmem:[#allocation2 + $0x110] sm:$0xff] }
0x1afe   :  { %12568 = vmatprep.subr.bf16.mxu0 %v12567_v6 }
0x1aff   :  { %v3312_v16 = vpop.permute.xlu1 %3311 }
0x1b00   :  { %v3320_v17 = vsel %vm1494_vm3, %v3318_v14, %v3312_v16  ;;  %v12595_v14 = vpack.c.bf16 %v3713_v9, %v3712_v4  ;;  %v12571_v16 = vpack.c.bf16 %v3559_v11, %v3558_v10  ;;  %v3723_v10 = vld [vmem:[%s14490_s2 + $0x8] sm:$0xff] }
0x1b01   :  { %11924 = vmatmul.mubr.msk.f32.vlgmr.msra.gmra.mrb[34].mxu0 %vm51_vm0, %v3320_v17  ;;  %v3714_v17 = vld [vmem:[#allocation2 + $0x380] sm:$0xff] }
0x1b02   :  { %12570 = vmatpush3.bf16.msra.mxu0 %v12567_v6  ;;  %v11161_v6 = vld [vmem:[%s14492_s4 + $0x2a] ss:$0 sm:$0xff] }
0x1b03   :  { %12572 = vmatprep.subr.bf16.mxu0 %v12571_v16 }
0x1b06   :  { %12574 = vmatpush3.bf16.msra.mxu0 %v12571_v16 }
0x1bd4   :  { %v11925_v18 = vpop.f32.mrb[34].mxu0 }
0x1bd5   :  { %v3403_v19 = vadd.f32 %v11925_v18, %v11144_v15  ;;  %v3397_v20 = vpop.f32.mrb[35].mxu0  ;;  %v3560_v18 = vld [vmem:[#allocation2 + $0x120] sm:$0xff] }
0x1bd6   :  { %v3398_v21 = vadd.f32 %v11144_v15, %v3397_v20  ;;  %v3715_v15 = vld [vmem:[#allocation2 + $0x388] sm:$0xff] }
0x1bd7   :  { %v3407_v22 = vadd.f32 %v3403_v19, %v13352_v38  ;;  %v12599_v19 = vpack.c.bf16 %v3715_v15, %v3714_v17  ;;  %v3561_v20 = vld [vmem:[#allocation2 + $0x128] sm:$0xff] }
0x1bd8   :  { %v3406_v23 = vadd.f32 %v3398_v21, %v13350_v37  ;;  %v3448_v37 = vld [vmem:[#allocation2 + $0xe0] sm:$0xff]  ;;  %v3716_v21 = vld [vmem:[#allocation2 + $0x390] sm:$0xff] }
0x1bd9   :  { %v3413_v12 = vsel %vm51_vm0, %v3407_v22, 0.0  ;;  %v12559_v35 = vpack.c.bf16 %v3449_v33, %v3448_v37 }
0x1bda   :  { %3414 = vadd.xlane.f32.xlu1 %v3413_v12  ;;  %v3410_v24 = vsel %vm51_vm0, %v3406_v23, 0.0 }
0x1bdb   :  { %3411 = vadd.xlane.f32.xlu0 %v3410_v24  ;;  %12560 = vmatprep.subr.bf16.mxu1 %v12559_v35  ;;  %v3562_v24 = vld [vmem:[#allocation2 + $0x130] sm:$0xff] }
0x1bdc   :  { %12562 = vmatpush3.bf16.msra.mxu1 %v12559_v35  ;;  %v13085_v35 = vmov 1.0  }
0x1bdd   :  { %12564 = vmatprep.subr.bf16.mxu1 %v12563_v39 }
0x1be0   :  { %12566 = vmatpush3.bf16.msra.mxu1 %v12563_v39 }
0x1be1   :  { %12584 = vmatprep.subr.bf16.mxu1 %v12583_v61 }
0x1beb   :  { %3695 = vperm.xlu1 %12780, %v3692_v40  }
0x1c67   :  { %v3415_v25 = vpop.xlane.xlu1 %3414 }
0x1c68   :  { %v3417_v26 = vmul.f32 0.03125, %v3415_v25  ;;  %v3412_v27 = vpop.xlane.xlu0 %3411  ;;  %v3563_v25 = vld [vmem:[#allocation2 + $0x138] sm:$0xff] }
0x1c69   :  { %v3416_v28 = vmul.f32 0.03125, %v3412_v27  ;;  %v3719_v27 = vld [vmem:[#allocation2 + $0x3a8] sm:$0xff] }
0x1c6a   :  { %v3419_v29 = vsub.f32 %v3407_v22, %v3417_v26  ;;  %v3717_v22 = vld [vmem:[#allocation2 + $0x398] sm:$0xff]  ;;  %v3718_v26 = vld [vmem:[#allocation2 + $0x3a0] sm:$0xff] }
0x1c6b   :  { %v3418_v13 = vsub.f32 %v3406_v23, %v3416_v28  ;;  %v12575_v23 = vpack.c.bf16 %v3561_v20, %v3560_v18  ;;  %v12603_v12 = vpack.c.bf16 %v3717_v22, %v3716_v21  ;;  %v12579_v28 = vpack.c.bf16 %v3563_v25, %v3562_v24 }
0x1c6c   :  { %v3421_v32 = vmul.f32 %v3419_v29, %v3419_v29 }
0x1c6d   :  { %v3420_v30 = vmul.f32 %v3418_v13, %v3418_v13  ;;  %12576 = vmatprep.subr.bf16.mxu0 %v12575_v23 }
0x1c6e   :  { %v3425_v38 = vsel %vm51_vm0, %v3421_v32, 0.0  ;;  %12578 = vmatpush3.bf16.msra.mxu0 %v12575_v23  ;;  %v34_v32 = vlaneseq }
0x1c6f   :  { %v3422_v31 = vsel %vm51_vm0, %v3420_v30, 0.0  ;;  %12580 = vmatprep.subr.bf16.mxu0 %v12579_v28  ;;  %v3721_v30 = vld [vmem:[#allocation2 + $0x3b8] sm:$0xff] }
0x1c70   :  { %3423 = vadd.xlane.f32.xlu0 %v3422_v31  ;;  %v13550_v33 = vshrl.u32 %v34_v32, 7  ;;  %v13552_v34 = vand.u32 127, %v34_v32 }
0x1c72   :  { %12582 = vmatpush3.bf16.msra.mxu0 %v12579_v28  ;;  %vm38_vm6 = vcmp.ge.s32.totalorder %v13550_v33, %v13552_v34 }
0x1c74   :  { %3426 = vadd.xlane.f32.xlu0 %v3425_v38  ;;  %v3696_v38 = vpop.permute.xlu1 %3695 }
0x1c75   :  { %vm3700_vm7 = vcmp.eq.s32.totalorder %v3696_v38, %v13552_v34 }
0x1c8a   :  { %3698 = vperm.xlu0 %12781, %v3693_v42  }
0x1cfd   :  { %v3424_v45 = vpop.xlane.xlu0 %3423 }
0x1cfe   :  { %v3428_v47 = vmul.f32 0.03125, %v3424_v45 }
0x1d00   :  { %v3430_v49 = vadd.f32 1e-12, %v3428_v47 }
0x1d01   :  { %v3427_v43 = vpop.xlane.xlu0 %3426 }
0x1d02   :  { %12858 = vrsqrt.f32 %v3430_v49  ;;  %v3429_v46 = vmul.f32 0.03125, %v3427_v43 }
0x1d04   :  { %v3431_v50 = vadd.f32 1e-12, %v3429_v46 }
0x1d06   :  { %12860 = vrsqrt.f32 %v3431_v50 }
0x1d09   :  { %v3699_v37 = vpop.permute.xlu0 %3698 }
0x1d0a   :  { %vm3701_vm8 = vcmp.eq.s32.totalorder %v3699_v37, %v13552_v34 }
0x1d0c   :  { %v12859_v51 = vpop.eup %12858 }
0x1d0d   :  { %v3434_v53 = vmul.f32 %v12859_v51, %v3418_v13  ;;  %v3720_v13 = vld [vmem:[#allocation2 + $0x3b0] sm:$0xff] }
0x1d0e   :  { %v12611_v31 = vpack.c.bf16 %v3721_v30, %v3720_v13 }
0x1d0f   :  { %v3440_v55 = vmul.f32 %v11147_v52, %v3434_v53 }
0x1d10   :  { %v12861_v48 = vpop.eup %12860 }
0x1d11   :  { %v3435_v56 = vmul.f32 %v12861_v48, %v3419_v29  ;;  %v13542_v57 = vadd.f32 %v11148_v54, %v3440_v55  ;;  %v12607_v29 = vpack.c.bf16 %v3719_v27, %v3718_v26 }
0x1d13   :  { %v3441_v58 = vmul.f32 %v11147_v52, %v3435_v56  ;;  %11934 = vmatprep.mubr.msk.f32.mxu1 %vm51_vm0, %v13542_v57 }
0x1d15   :  { %v13546_v59 = vadd.f32 %v11148_v54, %v3441_v58 }
0x1d17   :  { %11935 = vmatmul.mubr.msk.f32.vlgmr.msra.gmra.mrb[40].mxu1 %vm51_vm0, %v13546_v59 }
0x1d18   :  { %12586 = vmatpush3.bf16.msra.mxu1 %v12583_v61  ;;  %11988 = vmatprep.mubr.msk.f32.mxu1 %vm3700_vm7, %v13085_v35 }
0x1d19   :  { %12588 = vmatprep.subr.bf16.mxu1 %v12587_v0 }
0x1d1c   :  { %12590 = vmatpush3.bf16.msra.mxu1 %v12587_v0 }
0x1d1d   :  { %12592 = vmatprep.subr.bf16.mxu1 %v12591_v5 }
0x1d20   :  { %12594 = vmatpush3.bf16.msra.mxu1 %v12591_v5 }
0x1d21   :  { %12596 = vmatprep.subr.bf16.mxu1 %v12595_v14 }
0x1d24   :  { %12598 = vmatpush3.bf16.msra.mxu1 %v12595_v14 }
0x1d25   :  { %12600 = vmatprep.subr.bf16.mxu1 %v12599_v19 }
0x1d28   :  { %12602 = vmatpush3.bf16.msra.mxu1 %v12599_v19 }
0x1d29   :  { %12604 = vmatprep.subr.bf16.mxu1 %v12603_v12 }
0x1d2c   :  { %12606 = vmatpush3.bf16.msra.mxu1 %v12603_v12 }
0x1d2d   :  { %12608 = vmatprep.subr.bf16.mxu1 %v12607_v29 }
0x1d30   :  { %12610 = vmatpush3.bf16.msra.mxu1 %v12607_v29 }
0x1d31   :  { %12612 = vmatprep.subr.bf16.mxu1 %v12611_v31 }
0x1d34   :  { %12614 = vmatpush3.bf16.msra.mxu1 %v12611_v31 }
0x1d35   :  { %12018 = vmatprep.subr.mxu1 %v13069_v8 }
0x1d37   :  { %11989 = vmatmul.mubr.msk.f32.vlgmr.msra.gmra.mrb[42].mxu1 %vm3701_vm8, %v13085_v35 }
0x1d38   :  { %12020 = vmatprep.mubr.msk.f32.mxu1 %vm13070_vm1, %v13069_v8 }
0x1dea   :  { %v11936_v39 = vpop.f32.mrb[40].mxu1 }
0x1deb   :  { %v3535_v40 = vadd.f32 %v11936_v39, %v11149_v36  ;;  %v3529_v42 = vpop.f32.mrb[41].mxu1 }
0x1dec   :  { %v3530_v44 = vadd.f32 %v11149_v36, %v3529_v42  ;;  %v3847_v42 = vld [vmem:[#allocation2 + $0x1a8] sm:$0xff] }
0x1ded   :  { %v3541_v45 = vmul.f32 0.044715, %v3535_v40  ;;  %v3539_v60 = vmul.f32 0.5, %v3535_v40 }
0x1dee   :  { %v3540_v47 = vmul.f32 0.044715, %v3530_v44  ;;  %v3538_v58 = vmul.f32 0.5, %v3530_v44 }
0x1def   :  { %v3543_v49 = vmul.f32 %v3541_v45, %v3535_v40  ;;  %v3848_v45 = vld [vmem:[#allocation2 + $0x1b0] sm:$0xff] }
0x1df0   :  { %v3542_v43 = vmul.f32 %v3540_v47, %v3530_v44  ;;  %v3849_v47 = vld [vmem:[#allocation2 + $0x1b8] sm:$0xff] }
0x1df1   :  { %v3545_v46 = vmul.f32 %v3543_v49, %v3535_v40  ;;  %v12619_v49 = vpack.c.bf16 %v3849_v47, %v3848_v45 }
0x1df2   :  { %v3544_v50 = vmul.f32 %v3542_v43, %v3530_v44  ;;  %v3936_v43 = vld [vmem:[#allocation2 + $0x140] sm:$0xff] }
0x1df3   :  { %v3547_v51 = vadd.f32 %v3545_v46, %v3535_v40  ;;  %v3846_v40 = vld [vmem:[#allocation2 + $0x1a0] sm:$0xff]  ;;  %v3937_v46 = vld [vmem:[#allocation2 + $0x148] sm:$0xff] }
0x1df4   :  { %v3546_v52 = vadd.f32 %v3544_v50, %v3530_v44  ;;  %v12615_v44 = vpack.c.bf16 %v3847_v42, %v3846_v40  ;;  %v12623_v50 = vpack.c.bf16 %v3937_v46, %v3936_v43 }
0x1df5   :  { %v3549_v53 = vmul.f32 0.7978846, %v3547_v51 }
0x1df6   :  { %v3548_v54 = vmul.f32 0.7978846, %v3546_v52  ;;  %12616 = vmatprep.subr.bf16.mxu0 %v12615_v44 }
0x1df7   :  { %12862 = vtanh.f32 %v3549_v53 }
0x1df8   :  { %12864 = vtanh.f32 %v3548_v54 }
0x1e01   :  { %v12863_v55 = vpop.eup %12862 }
0x1e02   :  { %v12865_v48 = vpop.eup %12864  ;;  %v3553_v56 = vadd.f32 1.0, %v12863_v55 }
0x1e03   :  { %v3552_v41 = vadd.f32 1.0, %v12865_v48 }
0x1e04   :  { %v3555_v62 = vmul.f32 %v3553_v56, %v3539_v60 }
0x1e05   :  { %v3554_v61 = vmul.f32 %v3552_v41, %v3538_v58 }
0x1e07   :  { %11953 = vmatprep.mubr.msk.f32.mxu0 %vm1746_vm5, %v3554_v61 }
0x1e08   :  { %11954 = vmatmul.mubr.msk.f32.vlgmr.msra.gmra.mrb[36].mxu0 %vm1746_vm5, %v3555_v62 }
0x1e09   :  { %12618 = vmatpush3.bf16.msra.mxu0 %v12615_v44 }
0x1e0a   :  { %v11990_v63 = vpop.f32.mrb[42].mxu1  ;;  %12620 = vmatprep.subr.bf16.mxu0 %v12619_v49 }
0x1e0b   :  { %v3790_v0 = vpop.f32.mrb[43].mxu1  ;;  %v3796_v15 = vadd.f32 %v11990_v63, %v3723_v10 }
0x1e0c   :  { %v3791_v2 = vadd.f32 %v3790_v0, %v3722_v1  ;;  %v11155_v1 = vld [vmem:[%s14492_s4 + $0xe] ss:$0 sm:$0xff] }
0x1e0d   :  { %v3805_v20 = vadd.f32 %v11161_v6, %v3796_v15  ;;  %12622 = vmatpush3.bf16.msra.mxu0 %v12619_v49 }
0x1e0e   :  { %v3804_v16 = vadd.f32 %v11161_v6, %v3791_v2  ;;  %12624 = vmatprep.subr.bf16.mxu0 %v12623_v50  ;;  %v3938_v6 = vld [vmem:[#allocation2 + $0x150] sm:$0xff] }
0x1e0f   :  { %v3811_v21 = vsel %vm51_vm0, %v3805_v20, 0.0 }
0x1e10   :  { %v3808_v19 = vsel %vm51_vm0, %v3804_v16, 0.0 }
0x1edb   :  { %v11955_v5 = vpop.f32.mrb[36].mxu0 }
0x1edc   :  { %v3647_v3 = vadd.f32 %v11955_v5, %v11152_v7  ;;  %v3641_v4 = vpop.f32.mrb[37].mxu0 }
0x1edd   :  { %v3642_v9 = vadd.f32 %v11152_v7, %v3641_v4 }
0x1ede   :  { %v3651_v11 = vadd.f32 %v3647_v3, %v13546_v59  ;;  %v11156_v3 = vld [vmem:[%s14492_s4 + $0xf] ss:$0 sm:$0xff] }
0x1edf   :  { %v3650_v14 = vadd.f32 %v3642_v9, %v13542_v57  ;;  %v3939_v9 = vld [vmem:[#allocation2 + $0x158] sm:$0xff] }
0x1ee0   :  { %v3657_v17 = vsel %vm51_vm0, %v3651_v11, 0.0  ;;  %v12627_v15 = vpack.c.bf16 %v3939_v9, %v3938_v6 }
0x1ee1   :  { %3658 = vadd.xlane.f32.xlu0 %v3657_v17  ;;  %v3654_v18 = vsel %vm51_vm0, %v3650_v14, 0.0 }
0x1ee2   :  { %3655 = vadd.xlane.f32.xlu1 %v3654_v18  ;;  %v11163_v18 = vld [vmem:[%s14492_s4 + $0x2c] ss:$0 sm:$0xff] }
0x1ee6   :  { %3809 = vadd.xlane.f32.xlu1 %v3808_v19 }
0x1eea   :  { %3812 = vadd.xlane.f32.xlu1 %v3811_v21 }
0x1f6e   :  { %v3659_v22 = vpop.xlane.xlu0 %3658 }
0x1f6f   :  { %v3661_v23 = vmul.f32 0.03125, %v3659_v22  ;;  %v3656_v59 = vpop.xlane.xlu1 %3655 }
0x1f70   :  { %v3660_v12 = vmul.f32 0.03125, %v3656_v59 }
0x1f71   :  { %v3663_v57 = vsub.f32 %v3651_v11, %v3661_v23  ;;  %v11162_v11 = vld [vmem:[%s14492_s4 + $0x2b] ss:$0 sm:$0xff] }
0x1f72   :  { %v3662_v24 = vsub.f32 %v3650_v14, %v3660_v12  ;;  %v13622_v12 = vld [vmem:[%s14492_s4 + $0x15] ss:$0 sm:$0xff] }
0x1f73   :  { %v3810_v25 = vpop.xlane.xlu1 %3809  ;;  %v3665_v26 = vmul.f32 %v3663_v57, %v3663_v57 }
0x1f74   :  { %v3814_v27 = vmul.f32 0.03125, %v3810_v25  ;;  %v3664_v29 = vmul.f32 %v3662_v24, %v3662_v24 }
0x1f75   :  { %v3669_v28 = vsel %vm51_vm0, %v3665_v26, 0.0  ;;  %v11167_v26 = vld [vmem:[%s14492_s4 + $0x10] ss:$0 sm:$0xff] }
0x1f76   :  { %v3816_v13 = vsub.f32 %v3804_v16, %v3814_v27  ;;  %3670 = vadd.xlane.f32.xlu1 %v3669_v28  ;;  %v3666_v32 = vsel %vm51_vm0, %v3664_v29, 0.0 }
0x1f77   :  { %v3813_v30 = vpop.xlane.xlu1 %3812 }
0x1f78   :  { %v3815_v31 = vmul.f32 0.03125, %v3813_v30  ;;  %v3818_v38 = vmul.f32 %v3816_v13, %v3816_v13 }
0x1f7a   :  { %v3817_v37 = vsub.f32 %v3805_v20, %v3815_v31  ;;  %3667 = vadd.xlane.f32.xlu1 %v3666_v32  ;;  %v3820_v35 = vsel %vm51_vm0, %v3818_v38, 0.0  ;;  %v13086_v32 = vmov -10000.0  }
0x1f7b   :  { %v13655_v38 = vsel %vm38_vm6, 0.0, %v13086_v32 }
0x1f7c   :  { %v3819_v36 = vmul.f32 %v3817_v37, %v3817_v37 }
0x1f7e   :  { %3821 = vadd.xlane.f32.xlu1 %v3820_v35  ;;  %v3823_v39 = vsel %vm51_vm0, %v3819_v36, 0.0 }
0x1f82   :  { %3824 = vadd.xlane.f32.xlu1 %v3823_v39 }
0x2003   :  { %v3671_v51 = vpop.xlane.xlu1 %3670 }
0x2004   :  { %v3673_v52 = vmul.f32 0.03125, %v3671_v51 }
0x2006   :  { %v3675_v53 = vadd.f32 1e-12, %v3673_v52 }
0x2007   :  { %v3668_v54 = vpop.xlane.xlu1 %3667 }
0x2008   :  { %12866 = vrsqrt.f32 %v3675_v53  ;;  %v3672_v55 = vmul.f32 0.03125, %v3668_v54 }
0x200a   :  { %v3674_v48 = vadd.f32 1e-12, %v3672_v55 }
0x200b   :  { %v3822_v56 = vpop.xlane.xlu1 %3821 }
0x200c   :  { %12868 = vrsqrt.f32 %v3674_v48  ;;  %v3826_v58 = vmul.f32 0.03125, %v3822_v56 }
0x200e   :  { %v3828_v41 = vadd.f32 1e-12, %v3826_v58 }
0x200f   :  { %v3825_v60 = vpop.xlane.xlu1 %3824 }
0x2010   :  { %12870 = vrsqrt.f32 %v3828_v41  ;;  %v3827_v61 = vmul.f32 0.03125, %v3825_v60 }
0x2012   :  { %v12867_v62 = vpop.eup %12866  ;;  %v3829_v63 = vadd.f32 1e-12, %v3827_v61 }
0x2013   :  { %v3679_v0 = vmul.f32 %v12867_v62, %v3663_v57 }
0x2014   :  { %12872 = vrsqrt.f32 %v3829_v63 }
0x2015   :  { %v3685_v2 = vmul.f32 %v11155_v1, %v3679_v0 }
0x2016   :  { %v12869_v7 = vpop.eup %12868 }
0x2017   :  { %v3678_v5 = vmul.f32 %v12869_v7, %v3662_v24  ;;  %v13599_v17 = vadd.f32 %v11156_v3, %v3685_v2 }
0x2019   :  { %v3684_v4 = vmul.f32 %v11155_v1, %v3678_v5 }
0x201a   :  { %v12871_v10 = vpop.eup %12870 }
0x201b   :  { %v13597_v14 = vadd.f32 %v11156_v3, %v3684_v4  ;;  %v3832_v16 = vmul.f32 %v12871_v10, %v3816_v13 }
0x201d   :  { %11999 = vmatprep.mubr.msk.f32.mxu0 %vm51_vm0, %v13597_v14  ;;  %v3838_v19 = vmul.f32 %v11162_v11, %v3832_v16 }
0x201e   :  { %v12873_v20 = vpop.eup %12872  ;;  %12000 = vmatmul.mubr.msk.f32.vlgmr.msra.gmra.mrb[38].mxu0 %vm51_vm0, %v13599_v17 }
0x201f   :  { %12626 = vmatpush3.bf16.msra.mxu0 %v12623_v50  ;;  %v3833_v21 = vmul.f32 %v12873_v20, %v3817_v37  ;;  %v13608_v22 = vadd.f32 %v11163_v18, %v3838_v19 }
0x2020   :  { %12628 = vmatprep.subr.bf16.mxu0 %v12627_v15 }
0x2021   :  { %v3839_v23 = vmul.f32 %v11162_v11, %v3833_v21  ;;  %12010 = vmatprep.mubr.msk.f32.mxu0 %vm51_vm0, %v13608_v22 }
0x2023   :  { %v13612_v59 = vadd.f32 %v11163_v18, %v3839_v23  ;;  %12630 = vmatpush3.bf16.msra.mxu0 %v12627_v15 }
0x2024   :  { %12013 = vmatprep.subr.mxu0 %v13069_v8 }
0x2026   :  { %12011 = vmatmul.mubr.msk.f32.vlgmr.msra.gmra.mrb[40].mxu0 %vm51_vm0, %v13612_v59 }
0x2027   :  { %12015 = vmatprep.mubr.msk.f32.mxu0 %vm13070_vm1, %v13069_v8 }
0x20f1   :  { %v12001_v57 = vpop.f32.mrb[38].mxu0 }
0x20f2   :  { %v13625_v24 = vadd.f32 %v12001_v57, %v13622_v12  ;;  %v13627_v25 = vpop.f32.mrb[39].mxu0 }
0x20f9   :  { %v12012_v27 = vpop.f32.mrb[40].mxu0 }
0x20fa   :  { %v13632_v28 = vadd.f32 %v12012_v27, %v11167_v26  ;;  %v4017_v29 = vpop.f32.mrb[41].mxu0 }
0x20fb   :  { %v13634_v13 = vadd.f32 %v11167_v26, %v4017_v29 }
0x20fc   :  { %4109 = vrot.lane.b32.xlu0 %v13632_v28, %s13071_s0 }
0x20fd   :  { %4032 = vrot.lane.b32.xlu1 %v13634_v13, %s13071_s0 }
0x216e   :  { %v4110_v30 = vpop.permute.xlu0 %4109 }
0x216f   :  { %12019 = vmatpush3.xpose.msk.msra.mxu1 %vm141_vm2, %v4110_v30  ;;  %v4033_v31 = vpop.permute.xlu1 %4032 }
0x2170   :  { %12014 = vmatpush3.xpose.msk.msra.mxu0 %vm141_vm2, %v4033_v31  ;;  %12028 = vmatprep.subr.mxu1 %v13069_v8 }
0x2171   :  { %12023 = vmatprep.subr.mxu0 %v13069_v8 }
0x2172   :  { %12021 = vmatmul.mubr.msk.f32.vlgmr.msra.gmra.mrb[44].mxu1 %vm141_vm2, %v13632_v28 }
0x2173   :  { %12016 = vmatmul.mubr.msk.f32.vlgmr.msra.gmra.mrb[42].mxu0 %vm141_vm2, %v13634_v13  ;;  %12030 = vmatprep.mubr.msk.f32.mxu1 %vm13070_vm1, %v13069_v8 }
0x2174   :  { %12025 = vmatprep.mubr.msk.f32.mxu0 %vm13070_vm1, %v13069_v8 }
0x2245   :  { %v4181_v37 = vpop.f32.mrb[44].mxu1 }
0x2246   :  { %v4186_v35 = vmul.f32 0.35355338, %v4181_v37  ;;  %v4104_v36 = vpop.f32.mrb[42].mxu0  ;;  %v12022_v39 = vpop.f32.mrb[45].mxu1 }
0x2247   :  { %v4185_v40 = vmul.f32 0.35355338, %v4104_v36  ;;  %v12017_v42 = vpop.f32.mrb[43].mxu0 }
0x2248   :  { %v4188_v44 = vadd.f32 %v4186_v35, %v13655_v38 }
0x2249   :  { %v4187_v45 = vadd.f32 %v4185_v40, %v13655_v38 }
0x224a   :  { %v4192_v47 = vsel %vm141_vm2, %v4188_v44, -inf }
0x224b   :  { %4193 = vmax.xlane.f32.xlu0 %v4192_v47  ;;  %v4189_v49 = vsel %vm141_vm2, %v4187_v45, -inf }
0x224c   :  { %4190 = vmax.xlane.f32.xlu1 %v4189_v49 }
0x225d   :  { %4211 = vrot.lane.b32.xlu1 %v13634_v13, %s13072_s12 }
0x2261   :  { %4287 = vrot.lane.b32.xlu0 %v13632_v28, %s13072_s12  ;;  %4365 = vrot.lane.b32.xlu1 %v13634_v13, %s13073_s13 }
0x2265   :  { %4443 = vrot.lane.b32.xlu1 %v13632_v28, %s13073_s13 }
0x22d8   :  { %v4194_v33 = vpop.xlane.xlu0 %4193 }
0x22d9   :  { %v4196_v34 = vsub.f32 %v4188_v44, %v4194_v33  ;;  %v4191_v43 = vpop.xlane.xlu1 %4190 }
0x22da   :  { %v4195_v46 = vsub.f32 %v4187_v45, %v4191_v43 }
0x22db   :  { %v4199_v50 = vmul.f32 1.442695, %v4196_v34 }
0x22dc   :  { %v4197_v51 = vmul.f32 1.442695, %v4195_v46  ;;  %v4288_v52 = vpop.permute.xlu0 %4287 }
0x22dd   :  { %12874 = vpow2.f32 %v4199_v50  ;;  %12029 = vmatpush3.msra.mxu1 %v4288_v52  ;;  %v4212_v53 = vpop.permute.xlu1 %4211 }
0x22de   :  { %12876 = vpow2.f32 %v4197_v51  ;;  %12024 = vmatpush3.msra.mxu0 %v4212_v53  ;;  %12038 = vmatprep.subr.mxu1 %v13069_v8 }
0x22df   :  { %12033 = vmatprep.subr.mxu0 %v13069_v8 }
0x22e1   :  { %v4366_v58 = vpop.permute.xlu1 %4365 }
0x22e5   :  { %v4444_v41 = vpop.permute.xlu1 %4443 }
0x22e7   :  { %v12875_v54 = vpop.eup %12874 }
0x22e8   :  { %v12877_v55 = vpop.eup %12876  ;;  %v4204_v48 = vsel %vm141_vm2, %v12875_v54, 0.0 }
0x22e9   :  { %4205 = vadd.xlane.f32.xlu0 %v4204_v48  ;;  %v4201_v56 = vsel %vm141_vm2, %v12877_v55, 0.0 }
0x22ea   :  { %4202 = vadd.xlane.f32.xlu1 %v4201_v56 }
0x22fb   :  { %4441 = vrot.lane.b32.xlu1 %v13632_v28, %s13074_s14 }
0x22ff   :  { %4363 = vrot.lane.b32.xlu0 %v13634_v13, %s13074_s14 }
0x2376   :  { %v4206_v60 = vpop.xlane.xlu0 %4205 }
0x2377   :  { %12878 = vrcp.f32 %v4206_v60  ;;  %v4203_v61 = vpop.xlane.xlu1 %4202 }
0x2378   :  { %12880 = vrcp.f32 %v4203_v61 }
0x237a   :  { %v4364_v5 = vpop.permute.xlu0 %4363 }
0x237b   :  { %v4442_v7 = vpop.permute.xlu1 %4441 }
0x2381   :  { %v12879_v62 = vpop.eup %12878 }
0x2382   :  { %v12881_v63 = vpop.eup %12880  ;;  %v4210_v0 = vmul.f32 %v12879_v62, %v12875_v54 }
0x2383   :  { %v4209_v1 = vmul.f32 %v12881_v63, %v12877_v55 }
0x2384   :  { %12031 = vmatmul.mubr.msk.f32.vlgmr.msra.gmra.mrb[46].mxu1 %vm141_vm2, %v4210_v0 }
0x2385   :  { %12039 = vmatpush3.xpose.msk.msra.mxu1 %vm141_vm2, %v4444_v41  ;;  %12026 = vmatmul.mubr.msk.f32.vlgmr.msra.gmra.mrb[44].mxu0 %vm141_vm2, %v4209_v1 }
0x2386   :  { %12034 = vmatpush3.xpose.msk.msra.mxu0 %vm141_vm2, %v4366_v58  ;;  %12040 = vmatprep.mubr.msk.f32.mxu1 %vm13070_vm1, %v13069_v8 }
0x2387   :  { %12035 = vmatprep.mubr.msk.f32.mxu0 %vm13070_vm1, %v13069_v8  ;;  %12043 = vmatprep.subr.mxu0 %v13069_v8 }
0x2388   :  { %12041 = vmatmul.mubr.msk.f32.vlgmr.msra.gmra.mrb[48].mxu1 %vm141_vm2, %v4442_v7  ;;  %12048 = vmatprep.subr.mxu1 %v13069_v8 }
0x2389   :  { %12036 = vmatmul.mubr.msk.f32.vlgmr.msra.gmra.mrb[46].mxu0 %vm141_vm2, %v4364_v5  ;;  %12050 = vmatprep.mubr.msk.f32.mxu1 %vm13070_vm1, %v13069_v8 }
0x238a   :  { %12045 = vmatprep.mubr.msk.f32.mxu0 %vm13070_vm1, %v13069_v8 }
0x2457   :  { %v13693_v2 = vpop.f32.mrb[46].mxu1 }
0x2458   :  { %v13695_v3 = vpop.f32.mrb[44].mxu0  ;;  %v12032_v4 = vpop.f32.mrb[47].mxu1 }
0x2459   :  { %v12027_v6 = vpop.f32.mrb[45].mxu0 }
0x245b   :  { %v4515_v9 = vpop.f32.mrb[48].mxu1 }
0x245c   :  { %v4520_v10 = vmul.f32 0.35355338, %v4515_v9  ;;  %v4437_v11 = vpop.f32.mrb[46].mxu0  ;;  %v12042_v16 = vpop.f32.mrb[49].mxu1 }
0x245d   :  { %v4519_v15 = vmul.f32 0.35355338, %v4437_v11  ;;  %v12037_v18 = vpop.f32.mrb[47].mxu0 }
0x245e   :  { %v4522_v19 = vadd.f32 %v4520_v10, %v13655_v38 }
0x245f   :  { %v4521_v20 = vadd.f32 %v4519_v15, %v13655_v38 }
0x2460   :  { %v4526_v21 = vsel %vm141_vm2, %v4522_v19, -inf }
0x2461   :  { %4527 = vmax.xlane.f32.xlu1 %v4526_v21  ;;  %v4523_v23 = vsel %vm141_vm2, %v4521_v20, -inf }
0x2462   :  { %4524 = vmax.xlane.f32.xlu0 %v4523_v23 }
0x2472   :  { %4545 = vrot.lane.b32.xlu1 %v13634_v13, %s13075_s15 }
0x2476   :  { %4699 = vrot.lane.b32.xlu1 %v13634_v13, %s13076_s16 }
0x2478   :  { %4621 = vrot.lane.b32.xlu0 %v13632_v28, %s13075_s15 }
0x247a   :  { %4777 = vrot.lane.b32.xlu1 %v13632_v28, %s13076_s16 }
0x247e   :  { %4775 = vrot.lane.b32.xlu1 %v13632_v28, %s13077_s17 }
0x24ee   :  { %v4528_v57 = vpop.xlane.xlu1 %4527 }
0x24ef   :  { %v4530_v26 = vsub.f32 %v4522_v19, %v4528_v57  ;;  %v4525_v27 = vpop.xlane.xlu0 %4524 }
0x24f0   :  { %v4529_v29 = vsub.f32 %v4521_v20, %v4525_v27 }
0x24f1   :  { %v4533_v30 = vmul.f32 1.442695, %v4530_v26 }
0x24f2   :  { %v4531_v31 = vmul.f32 1.442695, %v4529_v29  ;;  %v4546_v32 = vpop.permute.xlu1 %4545 }
0x24f3   :  { %12882 = vpow2.f32 %v4533_v30  ;;  %12044 = vmatpush3.msra.mxu0 %v4546_v32  ;;  %v4622_v37 = vpop.permute.xlu0 %4621 }
0x24f4   :  { %12049 = vmatpush3.msra.mxu1 %v4622_v37  ;;  %12053 = vmatprep.subr.mxu0 %v13069_v8  ;;  %12884 = vpow2.f32 %v4531_v31 }
0x24f5   :  { %12058 = vmatprep.subr.mxu1 %v13069_v8 }
0x24f6   :  { %v4700_v45 = vpop.permute.xlu1 %4699 }
0x24fa   :  { %v4778_v49 = vpop.permute.xlu1 %4777 }
0x24fd   :  { %v12883_v35 = vpop.eup %12882 }
0x24fe   :  { %v4538_v36 = vsel %vm141_vm2, %v12883_v35, 0.0  ;;  %v12885_v39 = vpop.eup %12884  ;;  %v4776_v46 = vpop.permute.xlu1 %4775 }
0x24ff   :  { %4539 = vadd.xlane.f32.xlu0 %v4538_v36  ;;  %v4535_v40 = vsel %vm141_vm2, %v12885_v39, 0.0 }
0x2503   :  { %4536 = vadd.xlane.f32.xlu0 %v4535_v40 }
0x2519   :  { %4697 = vrot.lane.b32.xlu0 %v13634_v13, %s13077_s17 }
0x258c   :  { %v4540_v42 = vpop.xlane.xlu0 %4539 }
0x258d   :  { %12886 = vrcp.f32 %v4540_v42 }
0x2590   :  { %v4537_v44 = vpop.xlane.xlu0 %4536 }
0x2591   :  { %12888 = vrcp.f32 %v4537_v44 }
0x2594   :  { %v4698_v50 = vpop.permute.xlu0 %4697 }
0x2597   :  { %v12887_v47 = vpop.eup %12886 }
0x2598   :  { %v4544_v33 = vmul.f32 %v12887_v47, %v12883_v35 }
0x259a   :  { %12051 = vmatmul.mubr.msk.f32.vlgmr.msra.gmra.mrb[50].mxu1 %vm141_vm2, %v4544_v33 }
0x259b   :  { %v12889_v34 = vpop.eup %12888  ;;  %12059 = vmatpush3.xpose.msk.msra.mxu1 %vm141_vm2, %v4778_v49  ;;  %12060 = vmatprep.mubr.msk.f32.mxu1 %vm13070_vm1, %v13069_v8 }
0x259c   :  { %v4543_v43 = vmul.f32 %v12889_v34, %v12885_v39  ;;  %12068 = vmatprep.subr.mxu1 %v13069_v8 }
0x259e   :  { %12046 = vmatmul.mubr.msk.f32.vlgmr.msra.gmra.mrb[48].mxu0 %vm141_vm2, %v4543_v43  ;;  %12061 = vmatmul.mubr.msk.f32.vlgmr.msra.gmra.mrb[52].mxu1 %vm141_vm2, %v4776_v46 }
0x259f   :  { %12054 = vmatpush3.xpose.msk.msra.mxu0 %vm141_vm2, %v4700_v45  ;;  %12055 = vmatprep.mubr.msk.f32.mxu0 %vm13070_vm1, %v13069_v8 }
0x25a0   :  { %12063 = vmatprep.subr.mxu0 %v13069_v8  ;;  %12070 = vmatprep.mubr.msk.f32.mxu1 %vm13070_vm1, %v13069_v8 }
0x25a2   :  { %12056 = vmatmul.mubr.msk.f32.vlgmr.msra.gmra.mrb[50].mxu0 %vm141_vm2, %v4698_v50 }
0x25a3   :  { %12065 = vmatprep.mubr.msk.f32.mxu0 %vm13070_vm1, %v13069_v8 }
0x266d   :  { %v13733_v51 = vpop.f32.mrb[50].mxu1 }
0x266e   :  { %v12052_v52 = vpop.f32.mrb[51].mxu1 }
0x2671   :  { %v13735_v53 = vpop.f32.mrb[48].mxu0  ;;  %v4849_v54 = vpop.f32.mrb[52].mxu1 }
0x2672   :  { %v4854_v55 = vmul.f32 0.35355338, %v4849_v54  ;;  %v12047_v48 = vpop.f32.mrb[49].mxu0  ;;  %v12062_v56 = vpop.f32.mrb[53].mxu1 }
0x2674   :  { %v4856_v58 = vadd.f32 %v4854_v55, %v13655_v38 }
0x2675   :  { %v4771_v41 = vpop.f32.mrb[50].mxu0 }
0x2676   :  { %v4853_v60 = vmul.f32 0.35355338, %v4771_v41  ;;  %v12057_v61 = vpop.f32.mrb[51].mxu0  ;;  %v4860_v62 = vsel %vm141_vm2, %v4856_v58, -inf }
0x2677   :  { %4861 = vmax.xlane.f32.xlu1 %v4860_v62 }
0x2678   :  { %v4855_v63 = vadd.f32 %v4853_v60, %v13655_v38 }
0x267a   :  { %v4857_v0 = vsel %vm141_vm2, %v4855_v63, -inf }
0x267b   :  { %4858 = vmax.xlane.f32.xlu0 %v4857_v0 }
0x2688   :  { %4879 = vrot.lane.b32.xlu1 %v13634_v13, %s13078_s18 }
0x268c   :  { %5033 = vrot.lane.b32.xlu1 %v13634_v13, %s13079_s19 }
0x2690   :  { %5111 = vrot.lane.b32.xlu1 %v13632_v28, %s13079_s19 }
0x2691   :  { %4955 = vrot.lane.b32.xlu0 %v13632_v28, %s13078_s18 }
0x2694   :  { %5109 = vrot.lane.b32.xlu1 %v13632_v28, %s13080_s20 }
0x2704   :  { %v4862_v1 = vpop.xlane.xlu1 %4861 }
0x2705   :  { %v4864_v7 = vsub.f32 %v4856_v58, %v4862_v1 }
0x2707   :  { %v4867_v5 = vmul.f32 1.442695, %v4864_v7 }
0x2708   :  { %v4880_v4 = vpop.permute.xlu1 %4879  ;;  %v4859_v6 = vpop.xlane.xlu0 %4858 }
0x2709   :  { %12890 = vpow2.f32 %v4867_v5  ;;  %v4863_v9 = vsub.f32 %v4855_v63, %v4859_v6  ;;  %12064 = vmatpush3.msra.mxu0 %v4880_v4  ;;  %v4026_v5 = vld [vmem:[#allocation2 + $0x160] sm:$0xff]  ;;  %v4027_v4 = vld [vmem:[#allocation2 + $0x168] sm:$0xff]  ;;  %v4028_v6 = vld [vmem:[#allocation2 + $0x170] sm:$0xff] }
0x270a   :  { %12073 = vmatprep.subr.mxu0 %v13069_v8 }
0x270b   :  { %v4865_v10 = vmul.f32 1.442695, %v4863_v9  ;;  %v4029_v9 = vld [vmem:[#allocation2 + $0x178] sm:$0xff] }
0x270c   :  { %v4956_v11 = vpop.permute.xlu0 %4955  ;;  %v5034_v23 = vpop.permute.xlu1 %5033 }
0x270d   :  { %12892 = vpow2.f32 %v4865_v10  ;;  %12069 = vmatpush3.msra.mxu1 %v4956_v11  ;;  %v12635_v10 = vpack.c.bf16 %v4029_v9, %v4028_v6 }
0x270e   :  { %12078 = vmatprep.subr.mxu1 %v13069_v8 }
0x2710   :  { %v5112_v26 = vpop.permute.xlu1 %5111 }
0x2713   :  { %v12891_v16 = vpop.eup %12890 }
0x2714   :  { %v4872_v15 = vsel %vm141_vm2, %v12891_v16, 0.0  ;;  %v5110_v31 = vpop.permute.xlu1 %5109 }
0x2715   :  { %4873 = vadd.xlane.f32.xlu0 %v4872_v15 }
0x2717   :  { %v12893_v18 = vpop.eup %12892 }
0x2718   :  { %v4869_v19 = vsel %vm141_vm2, %v12893_v18, 0.0 }
0x2719   :  { %4870 = vadd.xlane.f32.xlu0 %v4869_v19 }
0x272f   :  { %5031 = vrot.lane.b32.xlu0 %v13634_v13, %s13080_s20 }
0x27a2   :  { %v4874_v20 = vpop.xlane.xlu0 %4873 }
0x27a3   :  { %12894 = vrcp.f32 %v4874_v20 }
0x27a6   :  { %v4871_v21 = vpop.xlane.xlu0 %4870 }
0x27a7   :  { %12896 = vrcp.f32 %v4871_v21 }
0x27aa   :  { %v5032_v32 = vpop.permute.xlu0 %5031 }
0x27ad   :  { %v12895_v57 = vpop.eup %12894 }
0x27ae   :  { %v4878_v27 = vmul.f32 %v12895_v57, %v12891_v16 }
0x27b0   :  { %12071 = vmatmul.mubr.msk.f32.vlgmr.msra.gmra.mrb[54].mxu1 %vm141_vm2, %v4878_v27 }
0x27b1   :  { %v12897_v29 = vpop.eup %12896  ;;  %12079 = vmatpush3.xpose.msk.msra.mxu1 %vm141_vm2, %v5112_v26  ;;  %12080 = vmatprep.mubr.msk.f32.mxu1 %vm13070_vm1, %v13069_v8 }
0x27b2   :  { %v4877_v30 = vmul.f32 %v12897_v29, %v12893_v18  ;;  %12088 = vmatprep.subr.mxu1 %v13069_v8 }
0x27b4   :  { %12066 = vmatmul.mubr.msk.f32.vlgmr.msra.gmra.mrb[52].mxu0 %vm141_vm2, %v4877_v30  ;;  %12081 = vmatmul.mubr.msk.f32.vlgmr.msra.gmra.mrb[56].mxu1 %vm141_vm2, %v5110_v31 }
0x27b5   :  { %12074 = vmatpush3.xpose.msk.msra.mxu0 %vm141_vm2, %v5034_v23  ;;  %12075 = vmatprep.mubr.msk.f32.mxu0 %vm13070_vm1, %v13069_v8 }
0x27b6   :  { %12083 = vmatprep.subr.mxu0 %v13069_v8  ;;  %12090 = vmatprep.mubr.msk.f32.mxu1 %vm13070_vm1, %v13069_v8 }
0x27b8   :  { %12076 = vmatmul.mubr.msk.f32.vlgmr.msra.gmra.mrb[54].mxu0 %vm141_vm2, %v5032_v32 }
0x27b9   :  { %12085 = vmatprep.mubr.msk.f32.mxu0 %vm13070_vm1, %v13069_v8 }
0x2883   :  { %v5027_v37 = vpop.f32.mrb[54].mxu1 }
0x2884   :  { %v12072_v35 = vpop.f32.mrb[55].mxu1 }
0x2887   :  { %v4951_v36 = vpop.f32.mrb[52].mxu0  ;;  %v5183_v39 = vpop.f32.mrb[56].mxu1 }
0x2888   :  { %v5188_v40 = vmul.f32 0.35355338, %v5183_v39  ;;  %v12067_v42 = vpop.f32.mrb[53].mxu0  ;;  %v12082_v44 = vpop.f32.mrb[57].mxu1 }
0x288a   :  { %v5190_v45 = vadd.f32 %v5188_v40, %v13655_v38 }
0x288b   :  { %v5105_v47 = vpop.f32.mrb[54].mxu0 }
0x288c   :  { %v5187_v49 = vmul.f32 0.35355338, %v5105_v47  ;;  %v12077_v33 = vpop.f32.mrb[55].mxu0  ;;  %v5194_v34 = vsel %vm141_vm2, %v5190_v45, -inf }
0x288d   :  { %5195 = vmax.xlane.f32.xlu1 %v5194_v34 }
0x288e   :  { %v5189_v43 = vadd.f32 %v5187_v49, %v13655_v38 }
0x2890   :  { %v5191_v46 = vsel %vm141_vm2, %v5189_v43, -inf }
0x2891   :  { %5192 = vmax.xlane.f32.xlu0 %v5191_v46 }
0x289e   :  { %5213 = vrot.lane.b32.xlu1 %v13634_v13, %s13081_s21 }
0x28a2   :  { %5367 = vrot.lane.b32.xlu1 %v13735_v53, %s13068_s29 }
0x28a6   :  { %5369 = vrot.lane.b32.xlu1 %v13733_v51, %s13068_s29 }
0x28aa   :  { %5377 = vrot.lane.b32.xlu1 %v5027_v37, %s13082_s22  ;;  %v13803_v37 = vadd.f32 %v13622_v12, %v13627_v25 }
0x291a   :  { %v5196_v50 = vpop.xlane.xlu1 %5195 }
0x291b   :  { %v5198_v52 = vsub.f32 %v5190_v45, %v5196_v50 }
0x291d   :  { %v5201_v54 = vmul.f32 1.442695, %v5198_v52 }
0x291e   :  { %v5214_v55 = vpop.permute.xlu1 %5213  ;;  %v5193_v48 = vpop.xlane.xlu0 %5192 }
0x291f   :  { %12898 = vpow2.f32 %v5201_v54  ;;  %v5197_v56 = vsub.f32 %v5189_v43, %v5193_v48  ;;  %12084 = vmatpush3.msra.mxu0 %v5214_v55  ;;  %v5523_v54 = vld [vmem:[#allocation2 + $0x188] sm:$0xff]  ;;  %v5524_v55 = vld [vmem:[#allocation2 + $0x190] sm:$0xff] }
0x2921   :  { %v5199_v58 = vmul.f32 1.442695, %v5197_v56  ;;  %v5525_v56 = vld [vmem:[#allocation2 + $0x198] sm:$0xff] }
0x2922   :  { %v5368_v19 = vpop.permute.xlu1 %5367 }
0x2923   :  { %12900 = vpow2.f32 %v5199_v58  ;;  %v5389_v57 = vsel %vm141_vm2, %v13695_v3, %v5368_v19  ;;  %v12643_v58 = vpack.c.bf16 %v5525_v56, %v5524_v55 }
0x2926   :  { %v5370_v20 = vpop.permute.xlu1 %5369 }
0x2927   :  { %v5390_v27 = vsel %vm141_vm2, %v13693_v2, %v5370_v20  ;;  %v11194_v2 = vld [vmem:[%s14492_s4 + $0x11] ss:$0 sm:$0xff] }
0x2929   :  { %v12899_v41 = vpop.eup %12898 }
0x292a   :  { %v5206_v13 = vsel %vm141_vm2, %v12899_v41, 0.0  ;;  %v5378_v21 = vpop.permute.xlu1 %5377 }
0x292b   :  { %5207 = vadd.xlane.f32.xlu0 %v5206_v13  ;;  %v5392_v31 = vsel %vm1491_vm4, %v5390_v27, %v5378_v21 }
0x292d   :  { %v12901_v53 = vpop.eup %12900 }
0x292e   :  { %v5203_v60 = vsel %vm141_vm2, %v12901_v53, 0.0 }
0x292f   :  { %5204 = vadd.xlane.f32.xlu0 %v5203_v60 }
0x2945   :  { %5289 = vrot.lane.b32.xlu0 %v13632_v28, %s13081_s21  ;;  %v12631_v28 = vpack.c.bf16 %v4027_v4, %v4026_v5 }
0x2947   :  { %12632 = vmatprep.subr.bf16.mxu0 %v12631_v28 }
0x2949   :  { %5375 = vrot.lane.b32.xlu0 %v4951_v36, %s13082_s22 }
0x29b8   :  { %v5208_v51 = vpop.xlane.xlu0 %5207 }
0x29b9   :  { %12902 = vrcp.f32 %v5208_v51 }
0x29bc   :  { %v5205_v61 = vpop.xlane.xlu0 %5204 }
0x29bd   :  { %12904 = vrcp.f32 %v5205_v61 }
0x29c0   :  { %v5290_v62 = vpop.permute.xlu0 %5289 }
0x29c1   :  { %12089 = vmatpush3.msra.mxu1 %v5290_v62 }
0x29c3   :  { %v12903_v63 = vpop.eup %12902 }
0x29c4   :  { %v5212_v0 = vmul.f32 %v12903_v63, %v12899_v41  ;;  %v5376_v23 = vpop.permute.xlu0 %5375  ;;  %v11197_v63 = vld [vmem:[%s14492_s4 + $0x12] ss:$0 sm:$0xff] }
0x29c5   :  { %v5391_v29 = vsel %vm1491_vm4, %v5389_v57, %v5376_v23 }
0x29c6   :  { %12091 = vmatmul.mubr.msk.f32.vlgmr.msra.gmra.mrb[58].mxu1 %vm141_vm2, %v5212_v0 }
0x29c7   :  { %v12905_v1 = vpop.eup %12904 }
0x29c8   :  { %v5211_v7 = vmul.f32 %v12905_v1, %v12901_v53  ;;  %v11198_v1 = vld [vmem:[%s14492_s4 + $0x13] ss:$0 sm:$0xff] }
0x29ca   :  { %12086 = vmatmul.mubr.msk.f32.vlgmr.msra.gmra.mrb[56].mxu0 %vm141_vm2, %v5211_v7 }
0x29cb   :  { %12634 = vmatpush3.bf16.msra.mxu0 %v12631_v28 }
0x29cc   :  { %12636 = vmatprep.subr.bf16.mxu0 %v12635_v10 }
0x29cf   :  { %12638 = vmatpush3.bf16.msra.mxu0 %v12635_v10  ;;  %v11199_v10 = vld [vmem:[%s14492_s4 + $0x14] ss:$0 sm:$0xff] }
0x29d0   :  { %12115 = vmatprep.subr.mxu0 %v13069_v8 }
0x2a99   :  { %v5361_v11 = vpop.f32.mrb[58].mxu1 }
0x2a9a   :  { %5385 = vrot.lane.b32.xlu1 %v5361_v11, %s13083_s23  ;;  %v12092_v16 = vpop.f32.mrb[59].mxu1 }
0x2a9d   :  { %v5285_v15 = vpop.f32.mrb[56].mxu0 }
0x2a9e   :  { %5383 = vrot.lane.b32.xlu0 %v5285_v15, %s13083_s23  ;;  %v12087_v18 = vpop.f32.mrb[57].mxu0 }
0x2b0c   :  { %v5386_v26 = vpop.permute.xlu1 %5385 }
0x2b0d   :  { %v5394_v35 = vsel %vm1494_vm3, %v5392_v31, %v5386_v26 }
0x2b10   :  { %v5384_v30 = vpop.permute.xlu0 %5383 }
0x2b11   :  { %v5393_v32 = vsel %vm1494_vm3, %v5391_v29, %v5384_v30 }
0x2b12   :  { %12101 = vmatprep.mubr.msk.f32.mxu0 %vm51_vm0, %v5393_v32 }
0x2b13   :  { %12102 = vmatmul.mubr.msk.f32.vlgmr.msra.gmra.mrb[58].mxu0 %vm51_vm0, %v5394_v35 }
0x2b14   :  { %12116 = vmatpush3.xpose.msk.msra.mxu0 %vm141_vm2, %v13803_v37  ;;  %12117 = vmatprep.mubr.msk.f32.mxu0 %vm13070_vm1, %v13069_v8 }
0x2b15   :  { %12125 = vmatprep.subr.mxu0 %v13069_v8 }
0x2be6   :  { %v12103_v12 = vpop.f32.mrb[58].mxu0 }
0x2be7   :  { %v5477_v25 = vadd.f32 %v12103_v12, %v11194_v2  ;;  %v5471_v3 = vpop.f32.mrb[59].mxu0 }
0x2be8   :  { %v5472_v36 = vadd.f32 %v11194_v2, %v5471_v3 }
0x2be9   :  { %v5481_v39 = vadd.f32 %v5477_v25, %v13612_v59 }
0x2bea   :  { %v5480_v40 = vadd.f32 %v5472_v36, %v13608_v22  ;;  %v5522_v22 = vld [vmem:[#allocation2 + $0x180] sm:$0xff] }
0x2beb   :  { %v5487_v42 = vsel %vm51_vm0, %v5481_v39, 0.0  ;;  %v12639_v48 = vpack.c.bf16 %v5523_v54, %v5522_v22 }
0x2bec   :  { %5488 = vadd.xlane.f32.xlu1 %v5487_v42  ;;  %v5484_v44 = vsel %vm51_vm0, %v5480_v40, 0.0 }
0x2bed   :  { %5485 = vadd.xlane.f32.xlu0 %v5484_v44  ;;  %12640 = vmatprep.subr.bf16.mxu1 %v12639_v48 }
0x2bee   :  { %12642 = vmatpush3.bf16.msra.mxu1 %v12639_v48 }
0x2bef   :  { %12644 = vmatprep.subr.bf16.mxu1 %v12643_v58 }
0x2bf2   :  { %12646 = vmatpush3.bf16.msra.mxu1 %v12643_v58 }
0x2bf3   :  { %12120 = vmatprep.subr.mxu1 %v13069_v8 }
0x2c79   :  { %v5489_v45 = vpop.xlane.xlu1 %5488 }
0x2c7a   :  { %v5491_v47 = vmul.f32 0.03125, %v5489_v45  ;;  %v5486_v49 = vpop.xlane.xlu0 %5485 }
0x2c7b   :  { %v5490_v33 = vmul.f32 0.03125, %v5486_v49 }
0x2c7c   :  { %v5493_v34 = vsub.f32 %v5481_v39, %v5491_v47 }
0x2c7d   :  { %v5492_v43 = vsub.f32 %v5480_v40, %v5490_v33 }
0x2c7e   :  { %v5495_v52 = vmul.f32 %v5493_v34, %v5493_v34 }
0x2c7f   :  { %v5494_v46 = vmul.f32 %v5492_v43, %v5492_v43 }
0x2c80   :  { %v5499_v59 = vsel %vm51_vm0, %v5495_v52, 0.0 }
0x2c81   :  { %v5496_v50 = vsel %vm51_vm0, %v5494_v46, 0.0 }
0x2c82   :  { %5497 = vadd.xlane.f32.xlu0 %v5496_v50 }
0x2c86   :  { %5500 = vadd.xlane.f32.xlu0 %v5499_v59 }
0x2d0f   :  { %v5498_v41 = vpop.xlane.xlu0 %5497 }
0x2d10   :  { %v5502_v13 = vmul.f32 0.03125, %v5498_v41 }
0x2d12   :  { %v5504_v53 = vadd.f32 1e-12, %v5502_v13 }
0x2d13   :  { %v5501_v60 = vpop.xlane.xlu0 %5500 }
0x2d14   :  { %12906 = vrsqrt.f32 %v5504_v53  ;;  %v5503_v51 = vmul.f32 0.03125, %v5501_v60 }
0x2d16   :  { %v5505_v61 = vadd.f32 1e-12, %v5503_v51 }
0x2d18   :  { %12908 = vrsqrt.f32 %v5505_v61 }
0x2d1e   :  { %v12907_v62 = vpop.eup %12906 }
0x2d1f   :  { %v5508_v0 = vmul.f32 %v12907_v62, %v5492_v43 }
0x2d21   :  { %v5514_v7 = vmul.f32 %v11197_v63, %v5508_v0 }
0x2d22   :  { %v12909_v5 = vpop.eup %12908 }
0x2d23   :  { %v5509_v4 = vmul.f32 %v12909_v5, %v5493_v34  ;;  %v13829_v6 = vadd.f32 %v11198_v1, %v5514_v7 }
0x2d25   :  { %v5515_v28 = vmul.f32 %v11197_v63, %v5509_v4  ;;  %12112 = vmatprep.mubr.msk.f32.mxu1 %vm51_vm0, %v13829_v6 }
0x2d27   :  { %v13833_v9 = vadd.f32 %v11198_v1, %v5515_v28 }
0x2d29   :  { %12113 = vmatmul.mubr.msk.f32.vlgmr.msra.gmra.mrb[60].mxu1 %vm51_vm0, %v13833_v9 }
0x2d2a   :  { %12121 = vmatpush3.xpose.msk.msra.mxu1 %vm141_vm2, %v13625_v24  ;;  %12122 = vmatprep.mubr.msk.f32.mxu1 %vm13070_vm1, %v13069_v8 }
0x2d2b   :  { %12130 = vmatprep.subr.mxu1 %v13069_v8 }
0x2dfc   :  { %v12114_v11 = vpop.f32.mrb[60].mxu1 }
0x2dfd   :  { %v13845_v16 = vadd.f32 %v12114_v11, %v11199_v10  ;;  %v5603_v15 = vpop.f32.mrb[61].mxu1 }
0x2dfe   :  { %v13847_v18 = vadd.f32 %v11199_v10, %v5603_v15 }
0x2dff   :  { %12123 = vmatmul.mubr.msk.f32.vlgmr.msra.gmra.mrb[62].mxu1 %vm141_vm2, %v13845_v16 }
0x2e00   :  { %12118 = vmatmul.mubr.msk.f32.vlgmr.msra.gmra.mrb[60].mxu0 %vm141_vm2, %v13847_v18  ;;  %12132 = vmatprep.mubr.msk.f32.mxu1 %vm13070_vm1, %v13069_v8 }
0x2e01   :  { %12127 = vmatprep.mubr.msk.f32.mxu0 %vm13070_vm1, %v13069_v8 }
0x2ed2   :  { %v5765_v19 = vpop.f32.mrb[62].mxu1 }
0x2ed3   :  { %v5770_v20 = vmul.f32 0.35355338, %v5765_v19  ;;  %v5689_v21 = vpop.f32.mrb[60].mxu0  ;;  %v12124_v23 = vpop.f32.mrb[63].mxu1 }
0x2ed4   :  { %v5769_v57 = vmul.f32 0.35355338, %v5689_v21  ;;  %v12119_v26 = vpop.f32.mrb[61].mxu0 }
0x2ed5   :  { %v5774_v27 = vsel %vm141_vm2, %v5770_v20, -inf }
0x2ed6   :  { %5775 = vmax.xlane.f32.xlu0 %v5774_v27  ;;  %v5771_v29 = vsel %vm141_vm2, %v5769_v57, -inf }
0x2ed7   :  { %5772 = vmax.xlane.f32.xlu1 %v5771_v29 }
0x2ee8   :  { %5793 = vrot.lane.b32.xlu1 %v13803_v37, %s13071_s0 }
0x2eec   :  { %5869 = vrot.lane.b32.xlu0 %v13625_v24, %s13071_s0  ;;  %5947 = vrot.lane.b32.xlu1 %v13803_v37, %s13074_s14 }
0x2ef0   :  { %6025 = vrot.lane.b32.xlu1 %v13625_v24, %s13074_s14 }
0x2f63   :  { %v5776_v30 = vpop.xlane.xlu0 %5775 }
0x2f64   :  { %v5778_v31 = vsub.f32 %v5770_v20, %v5776_v30  ;;  %v5773_v32 = vpop.xlane.xlu1 %5772 }
0x2f65   :  { %v5777_v35 = vsub.f32 %v5769_v57, %v5773_v32 }
0x2f66   :  { %v5781_v2 = vmul.f32 1.442695, %v5778_v31 }
0x2f67   :  { %v5779_v12 = vmul.f32 1.442695, %v5777_v35  ;;  %v5870_v25 = vpop.permute.xlu0 %5869 }
0x2f68   :  { %12910 = vpow2.f32 %v5781_v2  ;;  %12131 = vmatpush3.msra.mxu1 %v5870_v25  ;;  %v5794_v3 = vpop.permute.xlu1 %5793 }
0x2f69   :  { %12912 = vpow2.f32 %v5779_v12  ;;  %12126 = vmatpush3.msra.mxu0 %v5794_v3  ;;  %12140 = vmatprep.subr.mxu1 %v13069_v8 }
0x2f6a   :  { %12135 = vmatprep.subr.mxu0 %v13069_v8 }
0x2f6c   :  { %v5948_v44 = vpop.permute.xlu1 %5947 }
0x2f70   :  { %v6026_v45 = vpop.permute.xlu1 %6025 }
0x2f72   :  { %v12911_v36 = vpop.eup %12910 }
0x2f73   :  { %v12913_v39 = vpop.eup %12912  ;;  %v5786_v40 = vsel %vm141_vm2, %v12911_v36, 0.0 }
0x2f74   :  { %5787 = vadd.xlane.f32.xlu0 %v5786_v40  ;;  %v5783_v42 = vsel %vm141_vm2, %v12913_v39, 0.0 }
0x2f75   :  { %5784 = vadd.xlane.f32.xlu1 %v5783_v42 }
0x2f86   :  { %6023 = vrot.lane.b32.xlu1 %v13845_v16, %s13074_s14 }
0x2f8a   :  { %5945 = vrot.lane.b32.xlu0 %v13847_v18, %s13074_s14 }
0x3001   :  { %v5788_v47 = vpop.xlane.xlu0 %5787 }
0x3002   :  { %12914 = vrcp.f32 %v5788_v47  ;;  %v5785_v49 = vpop.xlane.xlu1 %5784 }
0x3003   :  { %12916 = vrcp.f32 %v5785_v49 }
0x3005   :  { %v5946_v52 = vpop.permute.xlu0 %5945 }
0x3006   :  { %v6024_v50 = vpop.permute.xlu1 %6023 }
0x300c   :  { %v12915_v33 = vpop.eup %12914 }
0x300d   :  { %v12917_v34 = vpop.eup %12916  ;;  %v5792_v43 = vmul.f32 %v12915_v33, %v12911_v36 }
0x300e   :  { %v5791_v46 = vmul.f32 %v12917_v34, %v12913_v39 }
0x300f   :  { %12133 = vmatmul.mubr.msk.f32.vlgmr.msra.gmra.mrb[64].mxu1 %vm141_vm2, %v5792_v43 }
0x3010   :  { %12141 = vmatpush3.xpose.msk.msra.mxu1 %vm141_vm2, %v6026_v45  ;;  %12128 = vmatmul.mubr.msk.f32.vlgmr.msra.gmra.mrb[62].mxu0 %vm141_vm2, %v5791_v46 }
0x3011   :  { %12136 = vmatpush3.xpose.msk.msra.mxu0 %vm141_vm2, %v5948_v44  ;;  %12142 = vmatprep.mubr.msk.f32.mxu1 %vm13070_vm1, %v13069_v8 }
0x3012   :  { %12137 = vmatprep.mubr.msk.f32.mxu0 %vm13070_vm1, %v13069_v8  ;;  %12145 = vmatprep.subr.mxu0 %v13069_v8 }
0x3013   :  { %12143 = vmatmul.mubr.msk.f32.vlgmr.msra.gmra.mrb[66].mxu1 %vm141_vm2, %v6024_v50  ;;  %12150 = vmatprep.subr.mxu1 %v13069_v8 }
0x3014   :  { %12138 = vmatmul.mubr.msk.f32.vlgmr.msra.gmra.mrb[64].mxu0 %vm141_vm2, %v5946_v52  ;;  %12152 = vmatprep.mubr.msk.f32.mxu1 %vm13070_vm1, %v13069_v8 }
0x3015   :  { %12147 = vmatprep.mubr.msk.f32.mxu0 %vm13070_vm1, %v13069_v8 }
0x30e2   :  { %v13891_v59 = vpop.f32.mrb[64].mxu1 }
0x30e3   :  { %v13893_v22 = vpop.f32.mrb[62].mxu0  ;;  %v12134_v54 = vpop.f32.mrb[65].mxu1 }
0x30e4   :  { %v12129_v55 = vpop.f32.mrb[63].mxu0 }
0x30e6   :  { %v6097_v48 = vpop.f32.mrb[66].mxu1 }
0x30e7   :  { %v6102_v56 = vmul.f32 0.35355338, %v6097_v48  ;;  %v6019_v58 = vpop.f32.mrb[64].mxu0  ;;  %v12144_v41 = vpop.f32.mrb[67].mxu1 }
0x30e8   :  { %v6101_v13 = vmul.f32 0.35355338, %v6019_v58  ;;  %v12139_v53 = vpop.f32.mrb[65].mxu0 }
0x30e9   :  { %v6106_v60 = vsel %vm141_vm2, %v6102_v56, -inf }
0x30ea   :  { %6107 = vmax.xlane.f32.xlu1 %v6106_v60  ;;  %v6103_v51 = vsel %vm141_vm2, %v6101_v13, -inf }
0x30eb   :  { %6104 = vmax.xlane.f32.xlu0 %v6103_v51 }
0x30fb   :  { %6125 = vrot.lane.b32.xlu1 %v13803_v37, %s13073_s13 }
0x30ff   :  { %6279 = vrot.lane.b32.xlu1 %v13803_v37, %s13077_s17 }
0x3101   :  { %6201 = vrot.lane.b32.xlu0 %v13625_v24, %s13073_s13 }
0x3103   :  { %6357 = vrot.lane.b32.xlu1 %v13625_v24, %s13077_s17 }
0x3107   :  { %6355 = vrot.lane.b32.xlu1 %v13845_v16, %s13077_s17 }
0x3177   :  { %v6108_v61 = vpop.xlane.xlu1 %6107 }
0x3178   :  { %v6110_v62 = vsub.f32 %v6102_v56, %v6108_v61  ;;  %v6105_v63 = vpop.xlane.xlu0 %6104 }
0x3179   :  { %v6109_v0 = vsub.f32 %v6101_v13, %v6105_v63 }
0x317a   :  { %v6113_v1 = vmul.f32 1.442695, %v6110_v62 }
0x317b   :  { %v6111_v7 = vmul.f32 1.442695, %v6109_v0  ;;  %v6126_v5 = vpop.permute.xlu1 %6125 }
0x317c   :  { %12918 = vpow2.f32 %v6113_v1  ;;  %12146 = vmatpush3.msra.mxu0 %v6126_v5  ;;  %v6202_v4 = vpop.permute.xlu0 %6201 }
0x317d   :  { %12151 = vmatpush3.msra.mxu1 %v6202_v4  ;;  %12155 = vmatprep.subr.mxu0 %v13069_v8  ;;  %12920 = vpow2.f32 %v6111_v7 }
0x317e   :  { %12160 = vmatprep.subr.mxu1 %v13069_v8 }
0x317f   :  { %v6280_v21 = vpop.permute.xlu1 %6279 }
0x3183   :  { %v6358_v57 = vpop.permute.xlu1 %6357 }
0x3186   :  { %v12919_v28 = vpop.eup %12918 }
0x3187   :  { %v6118_v10 = vsel %vm141_vm2, %v12919_v28, 0.0  ;;  %v12921_v11 = vpop.eup %12920  ;;  %v6356_v30 = vpop.permute.xlu1 %6355 }
0x3188   :  { %6119 = vadd.xlane.f32.xlu0 %v6118_v10  ;;  %v6115_v15 = vsel %vm141_vm2, %v12921_v11, 0.0 }
0x318c   :  { %6116 = vadd.xlane.f32.xlu0 %v6115_v15 }
0x31a2   :  { %6277 = vrot.lane.b32.xlu0 %v13847_v18, %s13077_s17 }
0x3215   :  { %v6120_v19 = vpop.xlane.xlu0 %6119 }
0x3216   :  { %12922 = vrcp.f32 %v6120_v19 }
0x3219   :  { %v6117_v20 = vpop.xlane.xlu0 %6116 }
0x321a   :  { %12924 = vrcp.f32 %v6117_v20 }
0x321d   :  { %v6278_v31 = vpop.permute.xlu0 %6277 }
0x3220   :  { %v12923_v23 = vpop.eup %12922 }
0x3221   :  { %v6124_v26 = vmul.f32 %v12923_v23, %v12919_v28 }
0x3223   :  { %12153 = vmatmul.mubr.msk.f32.vlgmr.msra.gmra.mrb[68].mxu1 %vm141_vm2, %v6124_v26 }
0x3224   :  { %v12925_v27 = vpop.eup %12924  ;;  %12161 = vmatpush3.xpose.msk.msra.mxu1 %vm141_vm2, %v6358_v57  ;;  %12162 = vmatprep.mubr.msk.f32.mxu1 %vm13070_vm1, %v13069_v8 }
0x3225   :  { %v6123_v29 = vmul.f32 %v12925_v27, %v12921_v11  ;;  %12170 = vmatprep.subr.mxu1 %v13069_v8 }
0x3227   :  { %12148 = vmatmul.mubr.msk.f32.vlgmr.msra.gmra.mrb[66].mxu0 %vm141_vm2, %v6123_v29  ;;  %12163 = vmatmul.mubr.msk.f32.vlgmr.msra.gmra.mrb[70].mxu1 %vm141_vm2, %v6356_v30 }
0x3228   :  { %12156 = vmatpush3.xpose.msk.msra.mxu0 %vm141_vm2, %v6280_v21  ;;  %12157 = vmatprep.mubr.msk.f32.mxu0 %vm13070_vm1, %v13069_v8 }
0x3229   :  { %12165 = vmatprep.subr.mxu0 %v13069_v8  ;;  %12172 = vmatprep.mubr.msk.f32.mxu1 %vm13070_vm1, %v13069_v8 }
0x322b   :  { %12158 = vmatmul.mubr.msk.f32.vlgmr.msra.gmra.mrb[68].mxu0 %vm141_vm2, %v6278_v31 }
0x322c   :  { %12167 = vmatprep.mubr.msk.f32.mxu0 %vm13070_vm1, %v13069_v8 }
0x32f6   :  { %v13929_v32 = vpop.f32.mrb[68].mxu1 }
0x32f7   :  { %v12154_v35 = vpop.f32.mrb[69].mxu1 }
0x32fa   :  { %v13931_v2 = vpop.f32.mrb[66].mxu0  ;;  %v6429_v12 = vpop.f32.mrb[70].mxu1 }
0x32fb   :  { %v6434_v25 = vmul.f32 0.35355338, %v6429_v12  ;;  %v12149_v3 = vpop.f32.mrb[67].mxu0  ;;  %v12164_v36 = vpop.f32.mrb[71].mxu1 }
0x32fd   :  { %v6438_v39 = vsel %vm141_vm2, %v6434_v25, -inf }
0x32fe   :  { %6439 = vmax.xlane.f32.xlu1 %v6438_v39  ;;  %v6351_v40 = vpop.f32.mrb[68].mxu0 }
0x32ff   :  { %v6433_v42 = vmul.f32 0.35355338, %v6351_v40  ;;  %v12159_v44 = vpop.f32.mrb[69].mxu0 }
0x3300   :  { %v5613_v44 = vld [vmem:[#allocation2 + $0x1c8] sm:$0xff] }
0x3301   :  { %v6435_v45 = vsel %vm141_vm2, %v6433_v42, -inf }
0x3302   :  { %6436 = vmax.xlane.f32.xlu0 %v6435_v45 }
0x330f   :  { %6457 = vrot.lane.b32.xlu1 %v13803_v37, %s13076_s16 }
0x3313   :  { %6611 = vrot.lane.b32.xlu1 %v13803_v37, %s13080_s20 }
0x3317   :  { %6689 = vrot.lane.b32.xlu1 %v13625_v24, %s13080_s20 }
0x3318   :  { %6533 = vrot.lane.b32.xlu0 %v13625_v24, %s13076_s16 }
0x331b   :  { %6687 = vrot.lane.b32.xlu1 %v13845_v16, %s13080_s20 }
0x338b   :  { %v6440_v47 = vpop.xlane.xlu1 %6439 }
0x338c   :  { %v6442_v49 = vsub.f32 %v6434_v25, %v6440_v47  ;;  %v5615_v47 = vld [vmem:[#allocation2 + $0x1d8] sm:$0xff] }
0x338e   :  { %v6445_v33 = vmul.f32 1.442695, %v6442_v49 }
0x338f   :  { %v6458_v34 = vpop.permute.xlu1 %6457  ;;  %v6437_v43 = vpop.xlane.xlu0 %6436 }
0x3390   :  { %12926 = vpow2.f32 %v6445_v33  ;;  %v6441_v46 = vsub.f32 %v6433_v42, %v6437_v43  ;;  %12166 = vmatpush3.msra.mxu0 %v6458_v34  ;;  %v5612_v42 = vld [vmem:[#allocation2 + $0x1c0] sm:$0xff] }
0x3391   :  { %12175 = vmatprep.subr.mxu0 %v13069_v8  ;;  %v12647_v45 = vpack.c.bf16 %v5613_v44, %v5612_v42 }
0x3392   :  { %v6443_v50 = vmul.f32 1.442695, %v6441_v46 }
0x3393   :  { %v6534_v52 = vpop.permute.xlu0 %6533  ;;  %v6612_v41 = vpop.permute.xlu1 %6611 }
0x3394   :  { %12928 = vpow2.f32 %v6443_v50  ;;  %12171 = vmatpush3.msra.mxu1 %v6534_v52 }
0x3395   :  { %12180 = vmatprep.subr.mxu1 %v13069_v8 }
0x3397   :  { %v6690_v53 = vpop.permute.xlu1 %6689 }
0x339a   :  { %v12927_v54 = vpop.eup %12926 }
0x339b   :  { %v6450_v55 = vsel %vm141_vm2, %v12927_v54, 0.0 }
0x339c   :  { %6451 = vadd.xlane.f32.xlu0 %v6450_v55 }
0x339e   :  { %v12929_v16 = vpop.eup %12928 }
0x339f   :  { %v6447_v48 = vsel %vm141_vm2, %v12929_v16, 0.0 }
0x33a0   :  { %6448 = vadd.xlane.f32.xlu0 %v6447_v48 }
0x33b6   :  { %6609 = vrot.lane.b32.xlu0 %v13847_v18, %s13080_s20  ;;  %v6688_v18 = vpop.permute.xlu1 %6687 }
0x3429   :  { %v6452_v56 = vpop.xlane.xlu0 %6451 }
0x342a   :  { %12930 = vrcp.f32 %v6452_v56 }
0x342d   :  { %v6449_v58 = vpop.xlane.xlu0 %6448 }
0x342e   :  { %12932 = vrcp.f32 %v6449_v58 }
0x3431   :  { %v6610_v62 = vpop.permute.xlu0 %6609 }
0x3434   :  { %v12931_v13 = vpop.eup %12930 }
0x3435   :  { %v6456_v60 = vmul.f32 %v12931_v13, %v12927_v54 }
0x3437   :  { %12173 = vmatmul.mubr.msk.f32.vlgmr.msra.gmra.mrb[72].mxu1 %vm141_vm2, %v6456_v60 }
0x3438   :  { %v12933_v51 = vpop.eup %12932  ;;  %12181 = vmatpush3.xpose.msk.msra.mxu1 %vm141_vm2, %v6690_v53  ;;  %12182 = vmatprep.mubr.msk.f32.mxu1 %vm13070_vm1, %v13069_v8 }
0x3439   :  { %v6455_v61 = vmul.f32 %v12933_v51, %v12929_v16  ;;  %12190 = vmatprep.subr.mxu1 %v13069_v8 }
0x343b   :  { %12168 = vmatmul.mubr.msk.f32.vlgmr.msra.gmra.mrb[70].mxu0 %vm141_vm2, %v6455_v61  ;;  %12183 = vmatmul.mubr.msk.f32.vlgmr.msra.gmra.mrb[74].mxu1 %vm141_vm2, %v6688_v18 }
0x343c   :  { %12176 = vmatpush3.xpose.msk.msra.mxu0 %vm141_vm2, %v6612_v41  ;;  %12177 = vmatprep.mubr.msk.f32.mxu0 %vm13070_vm1, %v13069_v8 }
0x343d   :  { %12185 = vmatprep.subr.mxu0 %v13069_v8  ;;  %12192 = vmatprep.mubr.msk.f32.mxu1 %vm13070_vm1, %v13069_v8 }
0x343f   :  { %12178 = vmatmul.mubr.msk.f32.vlgmr.msra.gmra.mrb[72].mxu0 %vm141_vm2, %v6610_v62 }
0x3440   :  { %12187 = vmatprep.mubr.msk.f32.mxu0 %vm13070_vm1, %v13069_v8 }
0x350a   :  { %v6605_v63 = vpop.f32.mrb[72].mxu1 }
0x350b   :  { %v12174_v0 = vpop.f32.mrb[73].mxu1 }
0x350e   :  { %v6529_v1 = vpop.f32.mrb[70].mxu0  ;;  %v6761_v7 = vpop.f32.mrb[74].mxu1 }
0x350f   :  { %v6766_v5 = vmul.f32 0.35355338, %v6761_v7  ;;  %v12169_v4 = vpop.f32.mrb[71].mxu0  ;;  %v12184_v28 = vpop.f32.mrb[75].mxu1 }
0x3511   :  { %v6770_v10 = vsel %vm141_vm2, %v6766_v5, -inf }
0x3512   :  { %6771 = vmax.xlane.f32.xlu1 %v6770_v10  ;;  %v6683_v11 = vpop.f32.mrb[72].mxu0 }
0x3513   :  { %v6765_v15 = vmul.f32 0.35355338, %v6683_v11  ;;  %v12179_v19 = vpop.f32.mrb[73].mxu0 }
0x3515   :  { %v6767_v20 = vsel %vm141_vm2, %v6765_v15, -inf }
0x3516   :  { %6768 = vmax.xlane.f32.xlu0 %v6767_v20 }
0x3523   :  { %6789 = vrot.lane.b32.xlu1 %v13803_v37, %s13079_s19 }
0x3527   :  { %6943 = vrot.lane.b32.xlu1 %v13931_v2, %s13068_s29 }
0x352b   :  { %6945 = vrot.lane.b32.xlu1 %v13929_v32, %s13068_s29 }
0x352f   :  { %6953 = vrot.lane.b32.xlu1 %v6605_v63, %s13082_s22 }
0x359f   :  { %v6772_v21 = vpop.xlane.xlu1 %6771 }
0x35a0   :  { %v6774_v23 = vsub.f32 %v6766_v5, %v6772_v21  ;;  %v7099_v21 = vld [vmem:[#allocation2 + $0x1e8] sm:$0xff] }
0x35a2   :  { %v6777_v57 = vmul.f32 1.442695, %v6774_v23  ;;  %v7100_v23 = vld [vmem:[#allocation2 + $0x1f0] sm:$0xff] }
0x35a3   :  { %v6790_v26 = vpop.permute.xlu1 %6789  ;;  %v6769_v27 = vpop.xlane.xlu0 %6768 }
0x35a4   :  { %12934 = vpow2.f32 %v6777_v57  ;;  %v6773_v29 = vsub.f32 %v6765_v15, %v6769_v27  ;;  %12186 = vmatpush3.msra.mxu0 %v6790_v26  ;;  %v7101_v26 = vld [vmem:[#allocation2 + $0x1f8] sm:$0xff] }
0x35a5   :  { %12648 = vmatprep.subr.bf16.mxu0 %v12647_v45  ;;  %v12659_v27 = vpack.c.bf16 %v7101_v26, %v7100_v23 }
0x35a6   :  { %v6775_v30 = vmul.f32 1.442695, %v6773_v29  ;;  %v7342_v29 = vld [vmem:[#allocation2 + $0x2a0] sm:$0xff] }
0x35a7   :  { %v6944_v50 = vpop.permute.xlu1 %6943 }
0x35a8   :  { %12936 = vpow2.f32 %v6775_v30  ;;  %v6965_v16 = vsel %vm141_vm2, %v13893_v22, %v6944_v50  ;;  %v11226_v22 = vld [vmem:[%s14492_s4 + $0x16] ss:$0 sm:$0xff]  ;;  %v7343_v30 = vld [vmem:[#allocation2 + $0x2a8] sm:$0xff] }
0x35a9   :  { %v7207_v50 = vld [vmem:[#allocation2 + $0x208] sm:$0xff] }
0x35ab   :  { %v6946_v52 = vpop.permute.xlu1 %6945 }
0x35ac   :  { %v6966_v56 = vsel %vm141_vm2, %v13891_v59, %v6946_v52 }
0x35ae   :  { %v12935_v31 = vpop.eup %12934 }
0x35af   :  { %v6782_v37 = vsel %vm141_vm2, %v12935_v31, 0.0  ;;  %v6954_v54 = vpop.permute.xlu1 %6953 }
0x35b0   :  { %6783 = vadd.xlane.f32.xlu0 %v6782_v37  ;;  %v6968_v13 = vsel %vm1491_vm4, %v6966_v56, %v6954_v54  ;;  %v7208_v54 = vld [vmem:[#allocation2 + $0x210] sm:$0xff]  ;;  %v7211_v56 = vld [vmem:[#allocation2 + $0x228] sm:$0xff] }
0x35b2   :  { %v12937_v35 = vpop.eup %12936 }
0x35b3   :  { %v6779_v2 = vsel %vm141_vm2, %v12937_v35, 0.0 }
0x35b4   :  { %6780 = vadd.xlane.f32.xlu0 %v6779_v2 }
0x35ca   :  { %6865 = vrot.lane.b32.xlu0 %v13625_v24, %s13079_s19  ;;  %v5614_v24 = vld [vmem:[#allocation2 + $0x1d0] sm:$0xff] }
0x35cb   :  { %v12651_v49 = vpack.c.bf16 %v5615_v47, %v5614_v24  ;;  %v7344_v47 = vld [vmem:[#allocation2 + $0x2b0] sm:$0xff] }
0x35ce   :  { %6951 = vrot.lane.b32.xlu0 %v6529_v1, %s13082_s22 }
0x363d   :  { %v6784_v32 = vpop.xlane.xlu0 %6783 }
0x363e   :  { %12938 = vrcp.f32 %v6784_v32 }
0x3641   :  { %v6781_v12 = vpop.xlane.xlu0 %6780 }
0x3642   :  { %12940 = vrcp.f32 %v6781_v12 }
0x3645   :  { %v6866_v25 = vpop.permute.xlu0 %6865 }
0x3646   :  { %12191 = vmatpush3.msra.mxu1 %v6866_v25 }
0x3648   :  { %v12939_v3 = vpop.eup %12938 }
0x3649   :  { %v6788_v36 = vmul.f32 %v12939_v3, %v12935_v31  ;;  %v6952_v55 = vpop.permute.xlu0 %6951  ;;  %v12679_v31 = vpack.c.bf16 %v7343_v30, %v7342_v29 }
0x364a   :  { %v6967_v58 = vsel %vm1491_vm4, %v6965_v16, %v6952_v55  ;;  %v7209_v55 = vld [vmem:[#allocation2 + $0x218] sm:$0xff] }
0x364b   :  { %12193 = vmatmul.mubr.msk.f32.vlgmr.msra.gmra.mrb[76].mxu1 %vm141_vm2, %v6788_v36  ;;  %v11229_v36 = vld [vmem:[%s14492_s4 + $0x17] ss:$0 sm:$0xff]  ;;  %v12667_v16 = vpack.c.bf16 %v7209_v55, %v7208_v54 }
0x364c   :  { %v12941_v39 = vpop.eup %12940 }
0x364d   :  { %v6787_v40 = vmul.f32 %v12941_v39, %v12937_v35 }
0x364f   :  { %12188 = vmatmul.mubr.msk.f32.vlgmr.msra.gmra.mrb[74].mxu0 %vm141_vm2, %v6787_v40  ;;  %v11230_v40 = vld [vmem:[%s14492_s4 + $0x18] ss:$0 sm:$0xff] }
0x3650   :  { %12650 = vmatpush3.bf16.msra.mxu0 %v12647_v45 }
0x3651   :  { %12652 = vmatprep.subr.bf16.mxu0 %v12651_v49 }
0x3654   :  { %12654 = vmatpush3.bf16.msra.mxu0 %v12651_v49  ;;  %v7345_v49 = vld [vmem:[#allocation2 + $0x2b8] sm:$0xff] }
0x371e   :  { %v6937_v33 = vpop.f32.mrb[76].mxu1 }
0x371f   :  { %6961 = vrot.lane.b32.xlu1 %v6937_v33, %s13083_s23  ;;  %v12194_v34 = vpop.f32.mrb[77].mxu1 }
0x3722   :  { %v6861_v43 = vpop.f32.mrb[74].mxu0 }
0x3723   :  { %6959 = vrot.lane.b32.xlu0 %v6861_v43, %s13083_s23  ;;  %v12189_v46 = vpop.f32.mrb[75].mxu0  ;;  %v12683_v43 = vpack.c.bf16 %v7345_v49, %v7344_v47 }
0x3724   :  { %v7206_v46 = vld [vmem:[#allocation2 + $0x200] sm:$0xff] }
0x3725   :  { %v12663_v52 = vpack.c.bf16 %v7207_v50, %v7206_v46  ;;  %v7429_v46 = vld [vmem:[#allocation2 + $0x258] sm:$0xff] }
0x3727   :  { %12664 = vmatprep.subr.bf16.mxu0 %v12663_v52 }
0x3791   :  { %v6962_v48 = vpop.permute.xlu1 %6961 }
0x3792   :  { %v6970_v60 = vsel %vm1494_vm3, %v6968_v13, %v6962_v48  ;;  %v7210_v48 = vld [vmem:[#allocation2 + $0x220] sm:$0xff]  ;;  %v7213_v13 = vld [vmem:[#allocation2 + $0x238] sm:$0xff] }
0x3795   :  { %v6960_v41 = vpop.permute.xlu0 %6959 }
0x3796   :  { %v6969_v53 = vsel %vm1494_vm3, %v6967_v58, %v6960_v41  ;;  %v12671_v58 = vpack.c.bf16 %v7211_v56, %v7210_v48  ;;  %v7212_v41 = vld [vmem:[#allocation2 + $0x230] sm:$0xff] }
0x3797   :  { %12203 = vmatprep.mubr.msk.f32.mxu0 %vm51_vm0, %v6969_v53 }
0x3798   :  { %12204 = vmatmul.mubr.msk.f32.vlgmr.msra.gmra.mrb[76].mxu0 %vm51_vm0, %v6970_v60 }
0x3799   :  { %12666 = vmatpush3.bf16.msra.mxu0 %v12663_v52 }
0x379a   :  { %12668 = vmatprep.subr.bf16.mxu0 %v12667_v16 }
0x379d   :  { %12670 = vmatpush3.bf16.msra.mxu0 %v12667_v16 }
0x379e   :  { %12672 = vmatprep.subr.bf16.mxu0 %v12671_v58 }
0x37a1   :  { %12674 = vmatpush3.bf16.msra.mxu0 %v12671_v58 }
0x386b   :  { %v12205_v51 = vpop.f32.mrb[76].mxu0 }
0x386c   :  { %v7053_v61 = vadd.f32 %v12205_v51, %v11226_v22  ;;  %v7047_v59 = vpop.f32.mrb[77].mxu0 }
0x386d   :  { %v7048_v18 = vadd.f32 %v11226_v22, %v7047_v59 }
0x386e   :  { %v7057_v62 = vadd.f32 %v7053_v61, %v13833_v9 }
0x386f   :  { %v7056_v63 = vadd.f32 %v7048_v18, %v13829_v6  ;;  %v7098_v6 = vld [vmem:[#allocation2 + $0x1e0] sm:$0xff] }
0x3870   :  { %v7063_v0 = vsel %vm51_vm0, %v7057_v62, 0.0  ;;  %v12655_v57 = vpack.c.bf16 %v7099_v21, %v7098_v6 }
0x3871   :  { %7064 = vadd.xlane.f32.xlu1 %v7063_v0  ;;  %v7060_v1 = vsel %vm51_vm0, %v7056_v63, 0.0 }
0x3872   :  { %7061 = vadd.xlane.f32.xlu0 %v7060_v1  ;;  %12656 = vmatprep.subr.bf16.mxu1 %v12655_v57 }
0x3873   :  { %12658 = vmatpush3.bf16.msra.mxu1 %v12655_v57 }
0x3874   :  { %12660 = vmatprep.subr.bf16.mxu1 %v12659_v27 }
0x3877   :  { %12662 = vmatpush3.bf16.msra.mxu1 %v12659_v27  ;;  %v11234_v27 = vld [vmem:[%s14492_s4 + $0x1a] ss:$0 sm:$0xff] }
0x3878   :  { %12680 = vmatprep.subr.bf16.mxu1 %v12679_v31 }
0x38fe   :  { %v7065_v7 = vpop.xlane.xlu1 %7064 }
0x38ff   :  { %v7067_v5 = vmul.f32 0.03125, %v7065_v7  ;;  %v7062_v4 = vpop.xlane.xlu0 %7061 }
0x3900   :  { %v7066_v28 = vmul.f32 0.03125, %v7062_v4 }
0x3901   :  { %v7069_v10 = vsub.f32 %v7057_v62, %v7067_v5 }
0x3902   :  { %v7068_v11 = vsub.f32 %v7056_v63, %v7066_v28  ;;  %v14029_v63 = vld [vmem:[%s14492_s4 + $0x22] ss:$0 sm:$0xff] }
0x3903   :  { %v7071_v20 = vmul.f32 %v7069_v10, %v7069_v10 }
0x3904   :  { %v7070_v15 = vmul.f32 %v7068_v11, %v7068_v11 }
0x3905   :  { %v7075_v9 = vsel %vm51_vm0, %v7071_v20, 0.0 }
0x3906   :  { %v7072_v19 = vsel %vm51_vm0, %v7070_v15, 0.0 }
0x3907   :  { %7073 = vadd.xlane.f32.xlu0 %v7072_v19 }
0x390b   :  { %7076 = vadd.xlane.f32.xlu0 %v7075_v9 }
0x3994   :  { %v7074_v37 = vpop.xlane.xlu0 %7073 }
0x3995   :  { %v7078_v35 = vmul.f32 0.03125, %v7074_v37 }
0x3997   :  { %v7080_v2 = vadd.f32 1e-12, %v7078_v35 }
0x3998   :  { %v7077_v32 = vpop.xlane.xlu0 %7076 }
0x3999   :  { %12942 = vrsqrt.f32 %v7080_v2  ;;  %v7079_v12 = vmul.f32 0.03125, %v7077_v32 }
0x399b   :  { %v7081_v25 = vadd.f32 1e-12, %v7079_v12 }
0x399d   :  { %12944 = vrsqrt.f32 %v7081_v25 }
0x39a3   :  { %v12943_v3 = vpop.eup %12942 }
0x39a4   :  { %v7084_v39 = vmul.f32 %v12943_v3, %v7068_v11 }
0x39a6   :  { %v7090_v42 = vmul.f32 %v11229_v36, %v7084_v39 }
0x39a7   :  { %v12945_v44 = vpop.eup %12944 }
0x39a8   :  { %v7085_v45 = vmul.f32 %v12945_v44, %v7069_v10  ;;  %v14010_v24 = vadd.f32 %v11230_v40, %v7090_v42 }
0x39aa   :  { %v7091_v33 = vmul.f32 %v11229_v36, %v7085_v45  ;;  %12214 = vmatprep.mubr.msk.f32.mxu1 %vm51_vm0, %v14010_v24 }
0x39ac   :  { %v14014_v34 = vadd.f32 %v11230_v40, %v7091_v33  ;;  %v7427_v33 = vld [vmem:[#allocation2 + $0x248] sm:$0xff] }
0x39ae   :  { %12215 = vmatmul.mubr.msk.f32.vlgmr.msra.gmra.mrb[78].mxu1 %vm51_vm0, %v14014_v34 }
0x39af   :  { %12682 = vmatpush3.bf16.msra.mxu1 %v12679_v31  ;;  %12244 = vmatprep.mubr.msk.f32.mxu1 %vm51_vm0, %v13597_v14  ;;  %v12675_v14 = vpack.c.bf16 %v7213_v13, %v7212_v41  ;;  %v11237_v41 = vld [vmem:[%s14492_s4 + $0x1b] ss:$0 sm:$0xff] }
0x39b0   :  { %12684 = vmatprep.subr.bf16.mxu1 %v12683_v43 }
0x39b1   :  { %12676 = vmatprep.subr.bf16.mxu0 %v12675_v14 }
0x39b2   :  { %12678 = vmatpush3.bf16.msra.mxu0 %v12675_v14 }
0x39b3   :  { %12686 = vmatpush3.bf16.msra.mxu1 %v12683_v43  ;;  %12258 = vmatprep.subr.mxu0 %v13069_v8 }
0x39b6   :  { %12245 = vmatmul.mubr.msk.f32.vlgmr.msra.gmra.mrb[80].mxu1 %vm51_vm0, %v13599_v17  ;;  %v11231_v17 = vld [vmem:[%s14492_s4 + $0x19] ss:$0 sm:$0xff] }
0x3a81   :  { %v12216_v53 = vpop.f32.mrb[78].mxu1 }
0x3a82   :  { %v7185_v60 = vadd.f32 %v12216_v53, %v11231_v17  ;;  %v7179_v22 = vpop.f32.mrb[79].mxu1  ;;  %v11238_v53 = vld [vmem:[%s14492_s4 + $0x1c] ss:$0 sm:$0xff] }
0x3a83   :  { %v7180_v51 = vadd.f32 %v11231_v17, %v7179_v22 }
0x3a84   :  { %v7191_v61 = vmul.f32 0.044715, %v7185_v60  ;;  %v7189_v23 = vmul.f32 0.5, %v7185_v60 }
0x3a85   :  { %v7190_v59 = vmul.f32 0.044715, %v7180_v51  ;;  %v7188_v6 = vmul.f32 0.5, %v7180_v51 }
0x3a86   :  { %v7193_v18 = vmul.f32 %v7191_v61, %v7185_v60 }
0x3a87   :  { %v7192_v62 = vmul.f32 %v7190_v59, %v7180_v51  ;;  %v11242_v59 = vld [vmem:[%s14492_s4 + $0x1d] ss:$0 sm:$0xff] }
0x3a88   :  { %v7195_v0 = vmul.f32 %v7193_v18, %v7185_v60 }
0x3a89   :  { %v7194_v1 = vmul.f32 %v7192_v62, %v7180_v51  ;;  %v12246_v7 = vpop.f32.mrb[80].mxu1 }
0x3a8a   :  { %v7197_v5 = vadd.f32 %v7195_v0, %v7185_v60  ;;  %v14032_v4 = vadd.f32 %v12246_v7, %v14029_v63  ;;  %v14034_v28 = vpop.f32.mrb[81].mxu1 }
0x3a8b   :  { %v7196_v10 = vadd.f32 %v7194_v1, %v7180_v51 }
0x3a8c   :  { %v7199_v11 = vmul.f32 0.7978846, %v7197_v5 }
0x3a8d   :  { %v7198_v15 = vmul.f32 0.7978846, %v7196_v10 }
0x3a8e   :  { %12946 = vtanh.f32 %v7199_v11 }
0x3a8f   :  { %12948 = vtanh.f32 %v7198_v15 }
0x3a98   :  { %v12947_v19 = vpop.eup %12946 }
0x3a99   :  { %v12949_v20 = vpop.eup %12948  ;;  %v7203_v9 = vadd.f32 1.0, %v12947_v19 }
0x3a9a   :  { %v7202_v21 = vadd.f32 1.0, %v12949_v20 }
0x3a9b   :  { %v7205_v26 = vmul.f32 %v7203_v9, %v7189_v23 }
0x3a9c   :  { %v7204_v57 = vmul.f32 %v7202_v21, %v7188_v6 }
0x3a9e   :  { %12233 = vmatprep.mubr.msk.f32.mxu0 %vm1746_vm5, %v7204_v57 }
0x3a9f   :  { %12234 = vmatmul.mubr.msk.f32.vlgmr.msra.gmra.mrb[78].mxu0 %vm1746_vm5, %v7205_v26 }
0x3aa0   :  { %12260 = vmatprep.mubr.msk.f32.mxu0 %vm13070_vm1, %v13069_v8 }
0x3b72   :  { %v12235_v29 = vpop.f32.mrb[78].mxu0 }
0x3b73   :  { %v7297_v30 = vadd.f32 %v12235_v29, %v11234_v27  ;;  %v7291_v31 = vpop.f32.mrb[79].mxu0 }
0x3b74   :  { %v7292_v37 = vadd.f32 %v11234_v27, %v7291_v31 }
0x3b75   :  { %v7301_v35 = vadd.f32 %v7297_v30, %v14014_v34  ;;  %v7428_v34 = vld [vmem:[#allocation2 + $0x250] sm:$0xff] }
0x3b76   :  { %v7300_v2 = vadd.f32 %v7292_v37, %v14010_v24  ;;  %v7426_v24 = vld [vmem:[#allocation2 + $0x240] sm:$0xff]  ;;  %v12691_v50 = vpack.c.bf16 %v7429_v46, %v7428_v34 }
0x3b77   :  { %v7307_v32 = vsel %vm51_vm0, %v7301_v35, 0.0  ;;  %v12687_v43 = vpack.c.bf16 %v7427_v33, %v7426_v24 }
0x3b78   :  { %7308 = vadd.xlane.f32.xlu0 %v7307_v32  ;;  %v7304_v12 = vsel %vm51_vm0, %v7300_v2, 0.0 }
0x3b79   :  { %7305 = vadd.xlane.f32.xlu1 %v7304_v12  ;;  %12688 = vmatprep.subr.bf16.mxu1 %v12687_v43 }
0x3b7a   :  { %12690 = vmatpush3.bf16.msra.mxu1 %v12687_v43 }
0x3b7b   :  { %12692 = vmatprep.subr.bf16.mxu1 %v12691_v50 }
0x3b7e   :  { %12694 = vmatpush3.bf16.msra.mxu1 %v12691_v50 }
0x3b7f   :  { %12263 = vmatprep.subr.mxu1 %v13069_v8 }
0x3c05   :  { %v7309_v25 = vpop.xlane.xlu0 %7308 }
0x3c06   :  { %v7311_v3 = vmul.f32 0.03125, %v7309_v25  ;;  %v7306_v36 = vpop.xlane.xlu1 %7305 }
0x3c07   :  { %v7310_v39 = vmul.f32 0.03125, %v7306_v36 }
0x3c08   :  { %v7313_v40 = vsub.f32 %v7301_v35, %v7311_v3 }
0x3c09   :  { %v7312_v42 = vsub.f32 %v7300_v2, %v7310_v39 }
0x3c0a   :  { %v7315_v44 = vmul.f32 %v7313_v40, %v7313_v40 }
0x3c0b   :  { %v7314_v45 = vmul.f32 %v7312_v42, %v7312_v42 }
0x3c0c   :  { %v7319_v47 = vsel %vm51_vm0, %v7315_v44, 0.0 }
0x3c0d   :  { %7320 = vadd.xlane.f32.xlu0 %v7319_v47  ;;  %v7316_v49 = vsel %vm51_vm0, %v7314_v45, 0.0 }
0x3c0e   :  { %7317 = vadd.xlane.f32.xlu1 %v7316_v49 }
0x3c9a   :  { %v7321_v52 = vpop.xlane.xlu0 %7320 }
0x3c9b   :  { %v7323_v54 = vmul.f32 0.03125, %v7321_v52  ;;  %v7318_v55 = vpop.xlane.xlu1 %7317 }
0x3c9c   :  { %v7322_v16 = vmul.f32 0.03125, %v7318_v55 }
0x3c9d   :  { %v7325_v48 = vadd.f32 1e-12, %v7323_v54 }
0x3c9e   :  { %v7324_v56 = vadd.f32 1e-12, %v7322_v16 }
0x3c9f   :  { %12950 = vrsqrt.f32 %v7325_v48 }
0x3ca0   :  { %12952 = vrsqrt.f32 %v7324_v56 }
0x3ca9   :  { %v12951_v58 = vpop.eup %12950 }
0x3caa   :  { %v12953_v13 = vpop.eup %12952  ;;  %v7329_v14 = vmul.f32 %v12951_v58, %v7313_v40 }
0x3cab   :  { %v7328_v17 = vmul.f32 %v12953_v13, %v7312_v42 }
0x3cac   :  { %v7335_v60 = vmul.f32 %v11237_v41, %v7329_v14 }
0x3cad   :  { %v7334_v22 = vmul.f32 %v11237_v41, %v7328_v17 }
0x3cae   :  { %v14058_v61 = vadd.f32 %v11238_v53, %v7335_v60 }
0x3caf   :  { %v14056_v51 = vadd.f32 %v11238_v53, %v7334_v22 }
0x3cb1   :  { %12255 = vmatprep.mubr.msk.f32.mxu1 %vm51_vm0, %v14056_v51 }
0x3cb2   :  { %12256 = vmatmul.mubr.msk.f32.vlgmr.msra.gmra.mrb[82].mxu1 %vm51_vm0, %v14058_v61 }
0x3cb3   :  { %12265 = vmatprep.mubr.msk.f32.mxu1 %vm13070_vm1, %v13069_v8 }
0x3d85   :  { %v12257_v18 = vpop.f32.mrb[82].mxu1 }
0x3d86   :  { %v14069_v62 = vadd.f32 %v12257_v18, %v11242_v59  ;;  %v7507_v0 = vpop.f32.mrb[83].mxu1 }
0x3d87   :  { %v14071_v1 = vadd.f32 %v11242_v59, %v7507_v0 }
0x3d88   :  { %7599 = vrot.lane.b32.xlu0 %v14069_v62, %s13071_s0 }
0x3d89   :  { %7522 = vrot.lane.b32.xlu1 %v14071_v1, %s13071_s0 }
0x3dfa   :  { %v7600_v7 = vpop.permute.xlu0 %7599 }
0x3dfb   :  { %12264 = vmatpush3.xpose.msk.msra.mxu1 %vm141_vm2, %v7600_v7  ;;  %v7523_v5 = vpop.permute.xlu1 %7522 }
0x3dfc   :  { %12259 = vmatpush3.xpose.msk.msra.mxu0 %vm141_vm2, %v7523_v5  ;;  %12273 = vmatprep.subr.mxu1 %v13069_v8 }
0x3dfd   :  { %12268 = vmatprep.subr.mxu0 %v13069_v8 }
0x3dfe   :  { %12266 = vmatmul.mubr.msk.f32.vlgmr.msra.gmra.mrb[84].mxu1 %vm141_vm2, %v14069_v62 }
0x3dff   :  { %12261 = vmatmul.mubr.msk.f32.vlgmr.msra.gmra.mrb[80].mxu0 %vm141_vm2, %v14071_v1  ;;  %12275 = vmatprep.mubr.msk.f32.mxu1 %vm13070_vm1, %v13069_v8 }
0x3e00   :  { %12270 = vmatprep.mubr.msk.f32.mxu0 %vm13070_vm1, %v13069_v8 }
0x3ed1   :  { %v7671_v10 = vpop.f32.mrb[84].mxu1 }
0x3ed2   :  { %v7676_v11 = vmul.f32 0.35355338, %v7671_v10  ;;  %v7594_v15 = vpop.f32.mrb[80].mxu0  ;;  %v12267_v19 = vpop.f32.mrb[85].mxu1 }
0x3ed3   :  { %v7675_v20 = vmul.f32 0.35355338, %v7594_v15  ;;  %v12262_v9 = vpop.f32.mrb[81].mxu0 }
0x3ed4   :  { %v7678_v6 = vadd.f32 %v7676_v11, %v13655_v38 }
0x3ed5   :  { %v7677_v21 = vadd.f32 %v7675_v20, %v13655_v38 }
0x3ed6   :  { %v7682_v23 = vsel %vm141_vm2, %v7678_v6, -inf }
0x3ed7   :  { %7683 = vmax.xlane.f32.xlu0 %v7682_v23  ;;  %v7679_v57 = vsel %vm141_vm2, %v7677_v21, -inf }
0x3ed8   :  { %7680 = vmax.xlane.f32.xlu1 %v7679_v57 }
0x3ee9   :  { %7701 = vrot.lane.b32.xlu1 %v14071_v1, %s13072_s12 }
0x3eed   :  { %7777 = vrot.lane.b32.xlu0 %v14069_v62, %s13072_s12  ;;  %7855 = vrot.lane.b32.xlu1 %v14071_v1, %s13073_s13 }
0x3ef1   :  { %7933 = vrot.lane.b32.xlu1 %v14069_v62, %s13073_s13 }
0x3f64   :  { %v7684_v26 = vpop.xlane.xlu0 %7683 }
0x3f65   :  { %v7686_v27 = vsub.f32 %v7678_v6, %v7684_v26  ;;  %v7681_v29 = vpop.xlane.xlu1 %7680 }
0x3f66   :  { %v7685_v30 = vsub.f32 %v7677_v21, %v7681_v29 }
0x3f67   :  { %v7689_v31 = vmul.f32 1.442695, %v7686_v27 }
0x3f68   :  { %v7687_v37 = vmul.f32 1.442695, %v7685_v30  ;;  %v7778_v35 = vpop.permute.xlu0 %7777 }
0x3f69   :  { %12954 = vpow2.f32 %v7689_v31  ;;  %12274 = vmatpush3.msra.mxu1 %v7778_v35  ;;  %v7702_v2 = vpop.permute.xlu1 %7701 }
0x3f6a   :  { %12956 = vpow2.f32 %v7687_v37  ;;  %12269 = vmatpush3.msra.mxu0 %v7702_v2  ;;  %12283 = vmatprep.subr.mxu1 %v13069_v8 }
0x3f6b   :  { %12278 = vmatprep.subr.mxu0 %v13069_v8 }
0x3f6d   :  { %v7856_v36 = vpop.permute.xlu1 %7855 }
0x3f71   :  { %v7934_v39 = vpop.permute.xlu1 %7933 }
0x3f73   :  { %v12955_v32 = vpop.eup %12954 }
0x3f74   :  { %v12957_v12 = vpop.eup %12956  ;;  %v7694_v25 = vsel %vm141_vm2, %v12955_v32, 0.0 }
0x3f75   :  { %7695 = vadd.xlane.f32.xlu0 %v7694_v25  ;;  %v7691_v3 = vsel %vm141_vm2, %v12957_v12, 0.0 }
0x3f76   :  { %7692 = vadd.xlane.f32.xlu1 %v7691_v3 }
0x3f87   :  { %7931 = vrot.lane.b32.xlu1 %v14069_v62, %s13074_s14 }
0x3f8b   :  { %7853 = vrot.lane.b32.xlu0 %v14071_v1, %s13074_s14 }
0x4002   :  { %v7696_v40 = vpop.xlane.xlu0 %7695 }
0x4003   :  { %12958 = vrcp.f32 %v7696_v40  ;;  %v7693_v42 = vpop.xlane.xlu1 %7692 }
0x4004   :  { %12960 = vrcp.f32 %v7693_v42 }
0x4006   :  { %v7854_v33 = vpop.permute.xlu0 %7853 }
0x4007   :  { %v7932_v24 = vpop.permute.xlu1 %7931 }
0x400d   :  { %v12959_v44 = vpop.eup %12958 }
0x400e   :  { %v12961_v45 = vpop.eup %12960  ;;  %v7700_v47 = vmul.f32 %v12959_v44, %v12955_v32 }
0x400f   :  { %v7699_v49 = vmul.f32 %v12961_v45, %v12957_v12 }
0x4010   :  { %12276 = vmatmul.mubr.msk.f32.vlgmr.msra.gmra.mrb[86].mxu1 %vm141_vm2, %v7700_v47 }
0x4011   :  { %12284 = vmatpush3.xpose.msk.msra.mxu1 %vm141_vm2, %v7934_v39  ;;  %12271 = vmatmul.mubr.msk.f32.vlgmr.msra.gmra.mrb[82].mxu0 %vm141_vm2, %v7699_v49 }
0x4012   :  { %12279 = vmatpush3.xpose.msk.msra.mxu0 %vm141_vm2, %v7856_v36  ;;  %12285 = vmatprep.mubr.msk.f32.mxu1 %vm13070_vm1, %v13069_v8 }
0x4013   :  { %12280 = vmatprep.mubr.msk.f32.mxu0 %vm13070_vm1, %v13069_v8  ;;  %12288 = vmatprep.subr.mxu0 %v13069_v8 }
0x4014   :  { %12286 = vmatmul.mubr.msk.f32.vlgmr.msra.gmra.mrb[88].mxu1 %vm141_vm2, %v7932_v24  ;;  %12293 = vmatprep.subr.mxu1 %v13069_v8 }
0x4015   :  { %12281 = vmatmul.mubr.msk.f32.vlgmr.msra.gmra.mrb[84].mxu0 %vm141_vm2, %v7854_v33  ;;  %12295 = vmatprep.mubr.msk.f32.mxu1 %vm13070_vm1, %v13069_v8 }
0x4016   :  { %12290 = vmatprep.mubr.msk.f32.mxu0 %vm13070_vm1, %v13069_v8 }
0x40e3   :  { %v14125_v34 = vpop.f32.mrb[86].mxu1 }
0x40e4   :  { %v14127_v43 = vpop.f32.mrb[82].mxu0  ;;  %v12277_v46 = vpop.f32.mrb[87].mxu1 }
0x40e5   :  { %v12272_v50 = vpop.f32.mrb[83].mxu0 }
0x40e7   :  { %v8005_v52 = vpop.f32.mrb[88].mxu1 }
0x40e8   :  { %v8010_v54 = vmul.f32 0.35355338, %v8005_v52  ;;  %v7927_v55 = vpop.f32.mrb[84].mxu0  ;;  %v12287_v16 = vpop.f32.mrb[89].mxu1 }
0x40e9   :  { %v8009_v48 = vmul.f32 0.35355338, %v7927_v55  ;;  %v12282_v56 = vpop.f32.mrb[85].mxu0 }
0x40ea   :  { %v8012_v58 = vadd.f32 %v8010_v54, %v13655_v38 }
0x40eb   :  { %v8011_v41 = vadd.f32 %v8009_v48, %v13655_v38 }
0x40ec   :  { %v8016_v13 = vsel %vm141_vm2, %v8012_v58, -inf }
0x40ed   :  { %8017 = vmax.xlane.f32.xlu1 %v8016_v13  ;;  %v8013_v14 = vsel %vm141_vm2, %v8011_v41, -inf }
0x40ee   :  { %8014 = vmax.xlane.f32.xlu0 %v8013_v14 }
0x40fe   :  { %8035 = vrot.lane.b32.xlu1 %v14071_v1, %s13075_s15 }
0x4102   :  { %8189 = vrot.lane.b32.xlu1 %v14071_v1, %s13076_s16 }
0x4104   :  { %8111 = vrot.lane.b32.xlu0 %v14069_v62, %s13075_s15 }
0x4106   :  { %8267 = vrot.lane.b32.xlu1 %v14069_v62, %s13076_s16 }
0x410a   :  { %8265 = vrot.lane.b32.xlu1 %v14069_v62, %s13077_s17 }
0x417a   :  { %v8018_v17 = vpop.xlane.xlu1 %8017 }
0x417b   :  { %v8020_v53 = vsub.f32 %v8012_v58, %v8018_v17  ;;  %v8015_v60 = vpop.xlane.xlu0 %8014 }
0x417c   :  { %v8019_v22 = vsub.f32 %v8011_v41, %v8015_v60 }
0x417d   :  { %v8023_v59 = vmul.f32 1.442695, %v8020_v53 }
0x417e   :  { %v8021_v18 = vmul.f32 1.442695, %v8019_v22  ;;  %v8036_v0 = vpop.permute.xlu1 %8035 }
0x417f   :  { %12962 = vpow2.f32 %v8023_v59  ;;  %12289 = vmatpush3.msra.mxu0 %v8036_v0  ;;  %v8112_v7 = vpop.permute.xlu0 %8111 }
0x4180   :  { %12294 = vmatpush3.msra.mxu1 %v8112_v7  ;;  %12298 = vmatprep.subr.mxu0 %v13069_v8  ;;  %12964 = vpow2.f32 %v8021_v18 }
0x4181   :  { %12303 = vmatprep.subr.mxu1 %v13069_v8 }
0x4182   :  { %v8190_v9 = vpop.permute.xlu1 %8189 }
0x4186   :  { %v8268_v21 = vpop.permute.xlu1 %8267 }
0x4189   :  { %v12963_v5 = vpop.eup %12962 }
0x418a   :  { %v8028_v10 = vsel %vm141_vm2, %v12963_v5, 0.0  ;;  %v12965_v11 = vpop.eup %12964  ;;  %v8266_v27 = vpop.permute.xlu1 %8265 }
0x418b   :  { %8029 = vadd.xlane.f32.xlu0 %v8028_v10  ;;  %v8025_v15 = vsel %vm141_vm2, %v12965_v11, 0.0 }
0x418f   :  { %8026 = vadd.xlane.f32.xlu0 %v8025_v15 }
0x41a5   :  { %8187 = vrot.lane.b32.xlu0 %v14071_v1, %s13077_s17 }
0x4218   :  { %v8030_v19 = vpop.xlane.xlu0 %8029 }
0x4219   :  { %12966 = vrcp.f32 %v8030_v19 }
0x421c   :  { %v8027_v20 = vpop.xlane.xlu0 %8026 }
0x421d   :  { %12968 = vrcp.f32 %v8027_v20 }
0x4220   :  { %v8188_v29 = vpop.permute.xlu0 %8187 }
0x4223   :  { %v12967_v6 = vpop.eup %12966 }
0x4224   :  { %v8034_v23 = vmul.f32 %v12967_v6, %v12963_v5 }
0x4226   :  { %12296 = vmatmul.mubr.msk.f32.vlgmr.msra.gmra.mrb[90].mxu1 %vm141_vm2, %v8034_v23 }
0x4227   :  { %v12969_v57 = vpop.eup %12968  ;;  %12304 = vmatpush3.xpose.msk.msra.mxu1 %vm141_vm2, %v8268_v21  ;;  %12305 = vmatprep.mubr.msk.f32.mxu1 %vm13070_vm1, %v13069_v8 }
0x4228   :  { %v8033_v26 = vmul.f32 %v12969_v57, %v12965_v11  ;;  %12313 = vmatprep.subr.mxu1 %v13069_v8 }
0x422a   :  { %12291 = vmatmul.mubr.msk.f32.vlgmr.msra.gmra.mrb[86].mxu0 %vm141_vm2, %v8033_v26  ;;  %12306 = vmatmul.mubr.msk.f32.vlgmr.msra.gmra.mrb[92].mxu1 %vm141_vm2, %v8266_v27 }
0x422b   :  { %12299 = vmatpush3.xpose.msk.msra.mxu0 %vm141_vm2, %v8190_v9  ;;  %12300 = vmatprep.mubr.msk.f32.mxu0 %vm13070_vm1, %v13069_v8 }
0x422c   :  { %12308 = vmatprep.subr.mxu0 %v13069_v8  ;;  %12315 = vmatprep.mubr.msk.f32.mxu1 %vm13070_vm1, %v13069_v8 }
0x422e   :  { %12301 = vmatmul.mubr.msk.f32.vlgmr.msra.gmra.mrb[88].mxu0 %vm141_vm2, %v8188_v29 }
0x422f   :  { %12310 = vmatprep.mubr.msk.f32.mxu0 %vm13070_vm1, %v13069_v8 }
0x42f9   :  { %v14165_v30 = vpop.f32.mrb[90].mxu1 }
0x42fa   :  { %v12297_v31 = vpop.f32.mrb[91].mxu1 }
0x42fd   :  { %v14167_v37 = vpop.f32.mrb[86].mxu0  ;;  %v8339_v35 = vpop.f32.mrb[92].mxu1 }
0x42fe   :  { %v8344_v2 = vmul.f32 0.35355338, %v8339_v35  ;;  %v12292_v32 = vpop.f32.mrb[87].mxu0  ;;  %v12307_v12 = vpop.f32.mrb[93].mxu1 }
0x4300   :  { %v8346_v25 = vadd.f32 %v8344_v2, %v13655_v38 }
0x4301   :  { %v8261_v3 = vpop.f32.mrb[88].mxu0 }
0x4302   :  { %v8343_v36 = vmul.f32 0.35355338, %v8261_v3  ;;  %v12302_v39 = vpop.f32.mrb[89].mxu0  ;;  %v8350_v40 = vsel %vm141_vm2, %v8346_v25, -inf }
0x4303   :  { %8351 = vmax.xlane.f32.xlu1 %v8350_v40 }
0x4304   :  { %v8345_v42 = vadd.f32 %v8343_v36, %v13655_v38 }
0x4306   :  { %v8347_v44 = vsel %vm141_vm2, %v8345_v42, -inf }
0x4307   :  { %8348 = vmax.xlane.f32.xlu0 %v8347_v44  ;;  %v7516_v44 = vld [vmem:[#allocation2 + $0x260] sm:$0xff] }
0x4314   :  { %8369 = vrot.lane.b32.xlu1 %v14071_v1, %s13078_s18 }
0x4318   :  { %8523 = vrot.lane.b32.xlu1 %v14071_v1, %s13079_s19 }
0x431c   :  { %8601 = vrot.lane.b32.xlu1 %v14069_v62, %s13079_s19 }
0x431d   :  { %8445 = vrot.lane.b32.xlu0 %v14069_v62, %s13078_s18 }
0x4320   :  { %8599 = vrot.lane.b32.xlu1 %v14069_v62, %s13080_s20 }
0x4390   :  { %v8352_v45 = vpop.xlane.xlu1 %8351 }
0x4391   :  { %v8354_v47 = vsub.f32 %v8346_v25, %v8352_v45  ;;  %v7517_v45 = vld [vmem:[#allocation2 + $0x268] sm:$0xff] }
0x4393   :  { %v8357_v49 = vmul.f32 1.442695, %v8354_v47  ;;  %v7518_v47 = vld [vmem:[#allocation2 + $0x270] sm:$0xff] }
0x4394   :  { %v8370_v24 = vpop.permute.xlu1 %8369  ;;  %v8349_v33 = vpop.xlane.xlu0 %8348 }
0x4395   :  { %12970 = vpow2.f32 %v8357_v49  ;;  %v8353_v46 = vsub.f32 %v8345_v42, %v8349_v33  ;;  %12309 = vmatpush3.msra.mxu0 %v8370_v24  ;;  %v7519_v49 = vld [vmem:[#allocation2 + $0x278] sm:$0xff] }
0x4396   :  { %12318 = vmatprep.subr.mxu0 %v13069_v8  ;;  %v12699_v24 = vpack.c.bf16 %v7519_v49, %v7518_v47  ;;  %v11274_v47 = vld [vmem:[%s14492_s4 + $0x21] ss:$0 sm:$0xff] }
0x4397   :  { %v8355_v50 = vmul.f32 1.442695, %v8353_v46 }
0x4398   :  { %v8446_v52 = vpop.permute.xlu0 %8445  ;;  %v8524_v41 = vpop.permute.xlu1 %8523 }
0x4399   :  { %12972 = vpow2.f32 %v8355_v50  ;;  %12314 = vmatpush3.msra.mxu1 %v8446_v52 }
0x439a   :  { %12323 = vmatprep.subr.mxu1 %v13069_v8 }
0x439c   :  { %v8602_v14 = vpop.permute.xlu1 %8601 }
0x439f   :  { %v12971_v54 = vpop.eup %12970 }
0x43a0   :  { %v8362_v55 = vsel %vm141_vm2, %v12971_v54, 0.0  ;;  %v8600_v22 = vpop.permute.xlu1 %8599 }
0x43a1   :  { %8363 = vadd.xlane.f32.xlu0 %v8362_v55 }
0x43a3   :  { %v12973_v16 = vpop.eup %12972 }
0x43a4   :  { %v8359_v48 = vsel %vm141_vm2, %v12973_v16, 0.0 }
0x43a5   :  { %8360 = vadd.xlane.f32.xlu0 %v8359_v48 }
0x43bb   :  { %8521 = vrot.lane.b32.xlu0 %v14071_v1, %s13080_s20 }
0x442e   :  { %v8364_v56 = vpop.xlane.xlu0 %8363 }
0x442f   :  { %12974 = vrcp.f32 %v8364_v56 }
0x4432   :  { %v8361_v58 = vpop.xlane.xlu0 %8360 }
0x4433   :  { %12976 = vrcp.f32 %v8361_v58 }
0x4436   :  { %v8522_v59 = vpop.permute.xlu0 %8521 }
0x4439   :  { %v12975_v13 = vpop.eup %12974 }
0x443a   :  { %v8368_v17 = vmul.f32 %v12975_v13, %v12971_v54 }
0x443c   :  { %12316 = vmatmul.mubr.msk.f32.vlgmr.msra.gmra.mrb[94].mxu1 %vm141_vm2, %v8368_v17 }
0x443d   :  { %v12977_v53 = vpop.eup %12976  ;;  %12324 = vmatpush3.xpose.msk.msra.mxu1 %vm141_vm2, %v8602_v14  ;;  %12325 = vmatprep.mubr.msk.f32.mxu1 %vm13070_vm1, %v13069_v8 }
0x443e   :  { %v8367_v60 = vmul.f32 %v12977_v53, %v12973_v16  ;;  %12333 = vmatprep.subr.mxu1 %v13069_v8 }
0x4440   :  { %12311 = vmatmul.mubr.msk.f32.vlgmr.msra.gmra.mrb[90].mxu0 %vm141_vm2, %v8367_v60  ;;  %12326 = vmatmul.mubr.msk.f32.vlgmr.msra.gmra.mrb[96].mxu1 %vm141_vm2, %v8600_v22  ;;  %v14235_v60 = vadd.f32 %v14029_v63, %v14034_v28 }
0x4441   :  { %12319 = vmatpush3.xpose.msk.msra.mxu0 %vm141_vm2, %v8524_v41  ;;  %12320 = vmatprep.mubr.msk.f32.mxu0 %vm13070_vm1, %v13069_v8 }
0x4442   :  { %12328 = vmatprep.subr.mxu0 %v13069_v8  ;;  %12335 = vmatprep.mubr.msk.f32.mxu1 %vm13070_vm1, %v13069_v8 }
0x4444   :  { %12321 = vmatmul.mubr.msk.f32.vlgmr.msra.gmra.mrb[92].mxu0 %vm141_vm2, %v8522_v59 }
0x4445   :  { %12330 = vmatprep.mubr.msk.f32.mxu0 %vm13070_vm1, %v13069_v8 }
0x450f   :  { %v8517_v18 = vpop.f32.mrb[94].mxu1 }
0x4510   :  { %v12317_v0 = vpop.f32.mrb[95].mxu1 }
0x4513   :  { %v8441_v7 = vpop.f32.mrb[90].mxu0  ;;  %v8673_v5 = vpop.f32.mrb[96].mxu1 }
0x4514   :  { %v8678_v10 = vmul.f32 0.35355338, %v8673_v5  ;;  %v12312_v11 = vpop.f32.mrb[91].mxu0  ;;  %v12327_v15 = vpop.f32.mrb[97].mxu1 }
0x4516   :  { %v8680_v19 = vadd.f32 %v8678_v10, %v13655_v38 }
0x4517   :  { %v8595_v20 = vpop.f32.mrb[92].mxu0 }
0x4518   :  { %v8677_v9 = vmul.f32 0.35355338, %v8595_v20  ;;  %v12322_v6 = vpop.f32.mrb[93].mxu0  ;;  %v8684_v21 = vsel %vm141_vm2, %v8680_v19, -inf }
0x4519   :  { %8685 = vmax.xlane.f32.xlu1 %v8684_v21 }
0x451a   :  { %v8679_v23 = vadd.f32 %v8677_v9, %v13655_v38 }
0x451c   :  { %v8681_v57 = vsel %vm141_vm2, %v8679_v23, -inf }
0x451d   :  { %8682 = vmax.xlane.f32.xlu0 %v8681_v57  ;;  %v9013_v57 = vld [vmem:[#allocation2 + $0x288] sm:$0xff] }
0x452a   :  { %8703 = vrot.lane.b32.xlu1 %v14071_v1, %s13081_s21 }
0x452e   :  { %8857 = vrot.lane.b32.xlu1 %v14167_v37, %s13068_s29 }
0x4532   :  { %8859 = vrot.lane.b32.xlu1 %v14165_v30, %s13068_s29 }
0x4536   :  { %8867 = vrot.lane.b32.xlu1 %v8517_v18, %s13082_s22 }
0x45a6   :  { %v8686_v26 = vpop.xlane.xlu1 %8685 }
0x45a7   :  { %v8688_v27 = vsub.f32 %v8680_v19, %v8686_v26 }
0x45a9   :  { %v8691_v29 = vmul.f32 1.442695, %v8688_v27  ;;  %v9014_v27 = vld [vmem:[#allocation2 + $0x290] sm:$0xff] }
0x45aa   :  { %v8704_v31 = vpop.permute.xlu1 %8703  ;;  %v8683_v35 = vpop.xlane.xlu0 %8682 }
0x45ab   :  { %12978 = vpow2.f32 %v8691_v29  ;;  %v8687_v38 = vsub.f32 %v8679_v23, %v8683_v35  ;;  %12329 = vmatpush3.msra.mxu0 %v8704_v31  ;;  %v9015_v29 = vld [vmem:[#allocation2 + $0x298] sm:$0xff] }
0x45ac   :  { %v12707_v31 = vpack.c.bf16 %v9015_v29, %v9014_v27 }
0x45ad   :  { %v8689_v2 = vmul.f32 1.442695, %v8687_v38 }
0x45ae   :  { %v8858_v54 = vpop.permute.xlu1 %8857 }
0x45af   :  { %12980 = vpow2.f32 %v8689_v2  ;;  %v8879_v56 = vsel %vm141_vm2, %v14127_v43, %v8858_v54 }
0x45b2   :  { %v8860_v55 = vpop.permute.xlu1 %8859 }
0x45b3   :  { %v8880_v41 = vsel %vm141_vm2, %v14125_v34, %v8860_v55  ;;  %v11269_v34 = vld [vmem:[%s14492_s4 + $0x1e] ss:$0 sm:$0xff] }
0x45b5   :  { %v12979_v32 = vpop.eup %12978 }
0x45b6   :  { %v8696_v1 = vsel %vm141_vm2, %v12979_v32, 0.0  ;;  %v8868_v16 = vpop.permute.xlu1 %8867 }
0x45b7   :  { %8697 = vadd.xlane.f32.xlu0 %v8696_v1  ;;  %v8882_v17 = vsel %vm1491_vm4, %v8880_v41, %v8868_v16 }
0x45b9   :  { %v12981_v37 = vpop.eup %12980 }
0x45ba   :  { %v8693_v12 = vsel %vm141_vm2, %v12981_v37, 0.0 }
0x45bb   :  { %8694 = vadd.xlane.f32.xlu0 %v8693_v12 }
0x45d1   :  { %8779 = vrot.lane.b32.xlu0 %v14069_v62, %s13081_s21  ;;  %v12695_v62 = vpack.c.bf16 %v7517_v45, %v7516_v44 }
0x45d3   :  { %12696 = vmatprep.subr.bf16.mxu0 %v12695_v62 }
0x45d5   :  { %8865 = vrot.lane.b32.xlu0 %v8441_v7, %s13082_s22 }
0x4644   :  { %v8698_v30 = vpop.xlane.xlu0 %8697 }
0x4645   :  { %12982 = vrcp.f32 %v8698_v30  ;;  %v11272_v30 = vld [vmem:[%s14492_s4 + $0x1f] ss:$0 sm:$0xff] }
0x4648   :  { %v8695_v25 = vpop.xlane.xlu0 %8694 }
0x4649   :  { %12984 = vrcp.f32 %v8695_v25 }
0x464c   :  { %v8780_v3 = vpop.permute.xlu0 %8779 }
0x464d   :  { %12334 = vmatpush3.msra.mxu1 %v8780_v3  ;;  %v11273_v3 = vld [vmem:[%s14492_s4 + $0x20] ss:$0 sm:$0xff] }
0x464f   :  { %v12983_v36 = vpop.eup %12982 }
0x4650   :  { %v8702_v39 = vmul.f32 %v12983_v36, %v12979_v32  ;;  %v8866_v48 = vpop.permute.xlu0 %8865 }
0x4651   :  { %v8881_v13 = vsel %vm1491_vm4, %v8879_v56, %v8866_v48 }
0x4652   :  { %12336 = vmatmul.mubr.msk.f32.vlgmr.msra.gmra.mrb[98].mxu1 %vm141_vm2, %v8702_v39 }
0x4653   :  { %v12985_v40 = vpop.eup %12984 }
0x4654   :  { %v8701_v42 = vmul.f32 %v12985_v40, %v12981_v37 }
0x4656   :  { %12331 = vmatmul.mubr.msk.f32.vlgmr.msra.gmra.mrb[94].mxu0 %vm141_vm2, %v8701_v42 }
0x4657   :  { %12698 = vmatpush3.bf16.msra.mxu0 %v12695_v62 }
0x4658   :  { %12700 = vmatprep.subr.bf16.mxu0 %v12699_v24 }
0x465b   :  { %12702 = vmatpush3.bf16.msra.mxu0 %v12699_v24 }
0x465c   :  { %12360 = vmatprep.subr.mxu0 %v13069_v8 }
0x4725   :  { %v8851_v33 = vpop.f32.mrb[98].mxu1 }
0x4726   :  { %8875 = vrot.lane.b32.xlu1 %v8851_v33, %s13083_s23  ;;  %v12337_v46 = vpop.f32.mrb[99].mxu1 }
0x4729   :  { %v8775_v50 = vpop.f32.mrb[94].mxu0 }
0x472a   :  { %8873 = vrot.lane.b32.xlu0 %v8775_v50, %s13083_s23  ;;  %v12332_v52 = vpop.f32.mrb[95].mxu0 }
0x4798   :  { %v8876_v58 = vpop.permute.xlu1 %8875 }
0x4799   :  { %v8884_v22 = vsel %vm1494_vm3, %v8882_v17, %v8876_v58 }
0x479c   :  { %v8874_v14 = vpop.permute.xlu0 %8873 }
0x479d   :  { %v8883_v53 = vsel %vm1494_vm3, %v8881_v13, %v8874_v14 }
0x479e   :  { %12346 = vmatprep.mubr.msk.f32.mxu0 %vm51_vm0, %v8883_v53 }
0x479f   :  { %12347 = vmatmul.mubr.msk.f32.vlgmr.msra.gmra.mrb[96].mxu0 %vm51_vm0, %v8884_v22 }
0x47a0   :  { %12361 = vmatpush3.xpose.msk.msra.mxu0 %vm141_vm2, %v14235_v60  ;;  %12362 = vmatprep.mubr.msk.f32.mxu0 %vm13070_vm1, %v13069_v8 }
0x47a1   :  { %12370 = vmatprep.subr.mxu0 %v13069_v8 }
0x4872   :  { %v12348_v63 = vpop.f32.mrb[96].mxu0 }
0x4873   :  { %v8967_v28 = vadd.f32 %v12348_v63, %v11269_v34  ;;  %v8961_v43 = vpop.f32.mrb[97].mxu0 }
0x4874   :  { %v8962_v59 = vadd.f32 %v11269_v34, %v8961_v43 }
0x4875   :  { %v8971_v18 = vadd.f32 %v8967_v28, %v14058_v61 }
0x4876   :  { %v8970_v0 = vadd.f32 %v8962_v59, %v14056_v51  ;;  %v9012_v51 = vld [vmem:[#allocation2 + $0x280] sm:$0xff] }
0x4877   :  { %v8977_v7 = vsel %vm51_vm0, %v8971_v18, 0.0  ;;  %v12703_v26 = vpack.c.bf16 %v9013_v57, %v9012_v51 }
0x4878   :  { %8978 = vadd.xlane.f32.xlu1 %v8977_v7  ;;  %v8974_v5 = vsel %vm51_vm0, %v8970_v0, 0.0 }
0x4879   :  { %8975 = vadd.xlane.f32.xlu0 %v8974_v5  ;;  %12704 = vmatprep.subr.bf16.mxu1 %v12703_v26 }
0x487a   :  { %12706 = vmatpush3.bf16.msra.mxu1 %v12703_v26 }
0x487b   :  { %12708 = vmatprep.subr.bf16.mxu1 %v12707_v31 }
0x487e   :  { %12710 = vmatpush3.bf16.msra.mxu1 %v12707_v31 }
0x487f   :  { %12365 = vmatprep.subr.mxu1 %v13069_v8 }
0x4905   :  { %v8979_v10 = vpop.xlane.xlu1 %8978 }
0x4906   :  { %v8981_v11 = vmul.f32 0.03125, %v8979_v10  ;;  %v8976_v15 = vpop.xlane.xlu0 %8975 }
0x4907   :  { %v8980_v19 = vmul.f32 0.03125, %v8976_v15 }
0x4908   :  { %v8983_v20 = vsub.f32 %v8971_v18, %v8981_v11 }
0x4909   :  { %v8982_v9 = vsub.f32 %v8970_v0, %v8980_v19 }
0x490a   :  { %v8985_v23 = vmul.f32 %v8983_v20, %v8983_v20 }
0x490b   :  { %v8984_v6 = vmul.f32 %v8982_v9, %v8982_v9 }
0x490c   :  { %v8989_v61 = vsel %vm51_vm0, %v8985_v23, 0.0 }
0x490d   :  { %v8986_v21 = vsel %vm51_vm0, %v8984_v6, 0.0 }
0x490e   :  { %8987 = vadd.xlane.f32.xlu0 %v8986_v21 }
0x4912   :  { %8990 = vadd.xlane.f32.xlu0 %v8989_v61 }
0x499b   :  { %v8988_v35 = vpop.xlane.xlu0 %8987 }
0x499c   :  { %v8992_v38 = vmul.f32 0.03125, %v8988_v35 }
0x499e   :  { %v8994_v2 = vadd.f32 1e-12, %v8992_v38 }
0x499f   :  { %v8991_v32 = vpop.xlane.xlu0 %8990 }
0x49a0   :  { %12986 = vrsqrt.f32 %v8994_v2  ;;  %v8993_v1 = vmul.f32 0.03125, %v8991_v32 }
0x49a2   :  { %v8995_v37 = vadd.f32 1e-12, %v8993_v1 }
0x49a4   :  { %12988 = vrsqrt.f32 %v8995_v37 }
0x49aa   :  { %v12987_v12 = vpop.eup %12986 }
0x49ab   :  { %v8998_v25 = vmul.f32 %v12987_v12, %v8982_v9 }
0x49ad   :  { %v9004_v36 = vmul.f32 %v11272_v30, %v8998_v25 }
0x49ae   :  { %v12989_v39 = vpop.eup %12988 }
0x49af   :  { %v8999_v40 = vmul.f32 %v12989_v39, %v8983_v20  ;;  %v14261_v42 = vadd.f32 %v11273_v3, %v9004_v36 }
0x49b1   :  { %v9005_v44 = vmul.f32 %v11272_v30, %v8999_v40  ;;  %12357 = vmatprep.mubr.msk.f32.mxu1 %vm51_vm0, %v14261_v42 }
0x49b3   :  { %v14265_v45 = vadd.f32 %v11273_v3, %v9005_v44 }
0x49b5   :  { %12358 = vmatmul.mubr.msk.f32.vlgmr.msra.gmra.mrb[100].mxu1 %vm51_vm0, %v14265_v45 }
0x49b6   :  { %12366 = vmatpush3.xpose.msk.msra.mxu1 %vm141_vm2, %v14032_v4  ;;  %12367 = vmatprep.mubr.msk.f32.mxu1 %vm13070_vm1, %v13069_v8 }
0x49b7   :  { %12375 = vmatprep.subr.mxu1 %v13069_v8 }
0x4a88   :  { %v12359_v62 = vpop.f32.mrb[100].mxu1 }
0x4a89   :  { %v14277_v49 = vadd.f32 %v12359_v62, %v11274_v47  ;;  %v9093_v24 = vpop.f32.mrb[101].mxu1 }
0x4a8a   :  { %v14279_v33 = vadd.f32 %v11274_v47, %v9093_v24 }
0x4a8b   :  { %12368 = vmatmul.mubr.msk.f32.vlgmr.msra.gmra.mrb[102].mxu1 %vm141_vm2, %v14277_v49 }
0x4a8c   :  { %12363 = vmatmul.mubr.msk.f32.vlgmr.msra.gmra.mrb[98].mxu0 %vm141_vm2, %v14279_v33  ;;  %12377 = vmatprep.mubr.msk.f32.mxu1 %vm13070_vm1, %v13069_v8 }
0x4a8d   :  { %12372 = vmatprep.mubr.msk.f32.mxu0 %vm13070_vm1, %v13069_v8 }
0x4b5e   :  { %v9255_v46 = vpop.f32.mrb[102].mxu1 }
0x4b5f   :  { %v9260_v50 = vmul.f32 0.35355338, %v9255_v46  ;;  %v9179_v52 = vpop.f32.mrb[98].mxu0  ;;  %v12369_v54 = vpop.f32.mrb[103].mxu1 }
0x4b60   :  { %v9259_v55 = vmul.f32 0.35355338, %v9179_v52  ;;  %v12364_v16 = vpop.f32.mrb[99].mxu0 }
0x4b61   :  { %v9264_v48 = vsel %vm141_vm2, %v9260_v50, -inf }
0x4b62   :  { %9265 = vmax.xlane.f32.xlu0 %v9264_v48  ;;  %v9261_v56 = vsel %vm141_vm2, %v9259_v55, -inf }
0x4b63   :  { %9262 = vmax.xlane.f32.xlu1 %v9261_v56 }
0x4b74   :  { %9283 = vrot.lane.b32.xlu1 %v14235_v60, %s13071_s0 }
0x4b78   :  { %9359 = vrot.lane.b32.xlu0 %v14032_v4, %s13071_s0  ;;  %9437 = vrot.lane.b32.xlu1 %v14235_v60, %s13074_s14 }
0x4b7c   :  { %9515 = vrot.lane.b32.xlu1 %v14032_v4, %s13074_s14 }
0x4bef   :  { %v9266_v58 = vpop.xlane.xlu0 %9265 }
0x4bf0   :  { %v9268_v41 = vsub.f32 %v9260_v50, %v9266_v58  ;;  %v9263_v13 = vpop.xlane.xlu1 %9262 }
0x4bf1   :  { %v9267_v14 = vsub.f32 %v9259_v55, %v9263_v13 }
0x4bf2   :  { %v9271_v17 = vmul.f32 1.442695, %v9268_v41 }
0x4bf3   :  { %v9269_v53 = vmul.f32 1.442695, %v9267_v14  ;;  %v9360_v22 = vpop.permute.xlu0 %9359 }
0x4bf4   :  { %12990 = vpow2.f32 %v9271_v17  ;;  %12376 = vmatpush3.msra.mxu1 %v9360_v22  ;;  %v9284_v34 = vpop.permute.xlu1 %9283 }
0x4bf5   :  { %12992 = vpow2.f32 %v9269_v53  ;;  %12371 = vmatpush3.msra.mxu0 %v9284_v34  ;;  %12385 = vmatprep.subr.mxu1 %v13069_v8 }
0x4bf6   :  { %12380 = vmatprep.subr.mxu0 %v13069_v8 }
0x4bf8   :  { %v9438_v18 = vpop.permute.xlu1 %9437 }
0x4bfc   :  { %v9516_v0 = vpop.permute.xlu1 %9515 }
0x4bfe   :  { %v12991_v63 = vpop.eup %12990 }
0x4bff   :  { %v12993_v28 = vpop.eup %12992  ;;  %v9276_v43 = vsel %vm141_vm2, %v12991_v63, 0.0 }
0x4c00   :  { %9277 = vadd.xlane.f32.xlu0 %v9276_v43  ;;  %v9273_v59 = vsel %vm141_vm2, %v12993_v28, 0.0 }
0x4c01   :  { %9274 = vadd.xlane.f32.xlu1 %v9273_v59 }
0x4c12   :  { %9513 = vrot.lane.b32.xlu1 %v14277_v49, %s13074_s14 }
0x4c16   :  { %9435 = vrot.lane.b32.xlu0 %v14279_v33, %s13074_s14 }
0x4c8d   :  { %v9278_v7 = vpop.xlane.xlu0 %9277 }
0x4c8e   :  { %12994 = vrcp.f32 %v9278_v7  ;;  %v9275_v5 = vpop.xlane.xlu1 %9274 }
0x4c8f   :  { %12996 = vrcp.f32 %v9275_v5 }
0x4c91   :  { %v9436_v9 = vpop.permute.xlu0 %9435 }
0x4c92   :  { %v9514_v20 = vpop.permute.xlu1 %9513 }
0x4c98   :  { %v12995_v10 = vpop.eup %12994 }
0x4c99   :  { %v12997_v11 = vpop.eup %12996  ;;  %v9282_v15 = vmul.f32 %v12995_v10, %v12991_v63 }
0x4c9a   :  { %v9281_v19 = vmul.f32 %v12997_v11, %v12993_v28 }
0x4c9b   :  { %12378 = vmatmul.mubr.msk.f32.vlgmr.msra.gmra.mrb[104].mxu1 %vm141_vm2, %v9282_v15 }
0x4c9c   :  { %12386 = vmatpush3.xpose.msk.msra.mxu1 %vm141_vm2, %v9516_v0  ;;  %12373 = vmatmul.mubr.msk.f32.vlgmr.msra.gmra.mrb[100].mxu0 %vm141_vm2, %v9281_v19 }
0x4c9d   :  { %12381 = vmatpush3.xpose.msk.msra.mxu0 %vm141_vm2, %v9438_v18  ;;  %12387 = vmatprep.mubr.msk.f32.mxu1 %vm13070_vm1, %v13069_v8 }
0x4c9e   :  { %12382 = vmatprep.mubr.msk.f32.mxu0 %vm13070_vm1, %v13069_v8  ;;  %12390 = vmatprep.subr.mxu0 %v13069_v8 }
0x4c9f   :  { %12388 = vmatmul.mubr.msk.f32.vlgmr.msra.gmra.mrb[106].mxu1 %vm141_vm2, %v9514_v20  ;;  %12395 = vmatprep.subr.mxu1 %v13069_v8 }
0x4ca0   :  { %12383 = vmatmul.mubr.msk.f32.vlgmr.msra.gmra.mrb[102].mxu0 %vm141_vm2, %v9436_v9  ;;  %12397 = vmatprep.mubr.msk.f32.mxu1 %vm13070_vm1, %v13069_v8 }
0x4ca1   :  { %12392 = vmatprep.mubr.msk.f32.mxu0 %vm13070_vm1, %v13069_v8 }
0x4d6e   :  { %v14323_v6 = vpop.f32.mrb[104].mxu1 }
0x4d6f   :  { %v14325_v21 = vpop.f32.mrb[100].mxu0  ;;  %v12379_v23 = vpop.f32.mrb[105].mxu1 }
0x4d70   :  { %v12374_v61 = vpop.f32.mrb[101].mxu0 }
0x4d72   :  { %v9587_v51 = vpop.f32.mrb[106].mxu1 }
0x4d73   :  { %v9592_v57 = vmul.f32 0.35355338, %v9587_v51  ;;  %v9509_v26 = vpop.f32.mrb[102].mxu0  ;;  %v12389_v27 = vpop.f32.mrb[107].mxu1 }
0x4d74   :  { %v9591_v29 = vmul.f32 0.35355338, %v9509_v26  ;;  %v12384_v31 = vpop.f32.mrb[103].mxu0 }
0x4d75   :  { %v9596_v35 = vsel %vm141_vm2, %v9592_v57, -inf }
0x4d76   :  { %9597 = vmax.xlane.f32.xlu1 %v9596_v35  ;;  %v9593_v38 = vsel %vm141_vm2, %v9591_v29, -inf }
0x4d77   :  { %9594 = vmax.xlane.f32.xlu0 %v9593_v38 }
0x4d87   :  { %9615 = vrot.lane.b32.xlu1 %v14235_v60, %s13073_s13 }
0x4d8b   :  { %9769 = vrot.lane.b32.xlu1 %v14235_v60, %s13077_s17 }
0x4d8d   :  { %9691 = vrot.lane.b32.xlu0 %v14032_v4, %s13073_s13 }
0x4d8f   :  { %9847 = vrot.lane.b32.xlu1 %v14032_v4, %s13077_s17 }
0x4d93   :  { %9845 = vrot.lane.b32.xlu1 %v14277_v49, %s13077_s17 }
0x4e03   :  { %v9598_v2 = vpop.xlane.xlu1 %9597 }
0x4e04   :  { %v9600_v32 = vsub.f32 %v9592_v57, %v9598_v2  ;;  %v9595_v1 = vpop.xlane.xlu0 %9594 }
0x4e05   :  { %v9599_v37 = vsub.f32 %v9591_v29, %v9595_v1 }
0x4e06   :  { %v9603_v12 = vmul.f32 1.442695, %v9600_v32 }
0x4e07   :  { %v9601_v30 = vmul.f32 1.442695, %v9599_v37  ;;  %v9616_v25 = vpop.permute.xlu1 %9615 }
0x4e08   :  { %12998 = vpow2.f32 %v9603_v12  ;;  %12391 = vmatpush3.msra.mxu0 %v9616_v25  ;;  %v9692_v3 = vpop.permute.xlu0 %9691 }
0x4e09   :  { %12396 = vmatpush3.msra.mxu1 %v9692_v3  ;;  %12400 = vmatprep.subr.mxu0 %v13069_v8  ;;  %13000 = vpow2.f32 %v9601_v30 }
0x4e0a   :  { %12405 = vmatprep.subr.mxu1 %v13069_v8 }
0x4e0b   :  { %v9770_v24 = vpop.permute.xlu1 %9769 }
0x4e0f   :  { %v9848_v50 = vpop.permute.xlu1 %9847 }
0x4e12   :  { %v12999_v36 = vpop.eup %12998 }
0x4e13   :  { %v9608_v39 = vsel %vm141_vm2, %v12999_v36, 0.0  ;;  %v13001_v40 = vpop.eup %13000  ;;  %v9846_v16 = vpop.permute.xlu1 %9845 }
0x4e14   :  { %9609 = vadd.xlane.f32.xlu0 %v9608_v39  ;;  %v9605_v44 = vsel %vm141_vm2, %v13001_v40, 0.0 }
0x4e18   :  { %9606 = vadd.xlane.f32.xlu0 %v9605_v44 }
0x4e2e   :  { %9767 = vrot.lane.b32.xlu0 %v14279_v33, %s13077_s17 }
0x4ea1   :  { %v9610_v47 = vpop.xlane.xlu0 %9609 }
0x4ea2   :  { %13002 = vrcp.f32 %v9610_v47 }
0x4ea5   :  { %v9607_v62 = vpop.xlane.xlu0 %9606 }
0x4ea6   :  { %13004 = vrcp.f32 %v9607_v62 }
0x4ea9   :  { %v9768_v48 = vpop.permute.xlu0 %9767 }
0x4eac   :  { %v13003_v46 = vpop.eup %13002 }
0x4ead   :  { %v9614_v52 = vmul.f32 %v13003_v46, %v12999_v36 }
0x4eaf   :  { %12398 = vmatmul.mubr.msk.f32.vlgmr.msra.gmra.mrb[108].mxu1 %vm141_vm2, %v9614_v52 }
0x4eb0   :  { %v13005_v54 = vpop.eup %13004  ;;  %12406 = vmatpush3.xpose.msk.msra.mxu1 %vm141_vm2, %v9848_v50  ;;  %12407 = vmatprep.mubr.msk.f32.mxu1 %vm13070_vm1, %v13069_v8 }
0x4eb1   :  { %v9613_v55 = vmul.f32 %v13005_v54, %v13001_v40  ;;  %12415 = vmatprep.subr.mxu1 %v13069_v8 }
0x4eb3   :  { %12393 = vmatmul.mubr.msk.f32.vlgmr.msra.gmra.mrb[104].mxu0 %vm141_vm2, %v9613_v55  ;;  %12408 = vmatmul.mubr.msk.f32.vlgmr.msra.gmra.mrb[110].mxu1 %vm141_vm2, %v9846_v16 }
0x4eb4   :  { %12401 = vmatpush3.xpose.msk.msra.mxu0 %vm141_vm2, %v9770_v24  ;;  %12402 = vmatprep.mubr.msk.f32.mxu0 %vm13070_vm1, %v13069_v8 }
0x4eb5   :  { %12410 = vmatprep.subr.mxu0 %v13069_v8  ;;  %12417 = vmatprep.mubr.msk.f32.mxu1 %vm13070_vm1, %v13069_v8 }
0x4eb7   :  { %12403 = vmatmul.mubr.msk.f32.vlgmr.msra.gmra.mrb[106].mxu0 %vm141_vm2, %v9768_v48 }
0x4eb8   :  { %12412 = vmatprep.mubr.msk.f32.mxu0 %vm13070_vm1, %v13069_v8 }
0x4f82   :  { %v14361_v56 = vpop.f32.mrb[108].mxu1 }
0x4f83   :  { %v12399_v58 = vpop.f32.mrb[109].mxu1 }
0x4f86   :  { %v14363_v41 = vpop.f32.mrb[104].mxu0  ;;  %v9919_v13 = vpop.f32.mrb[110].mxu1 }
0x4f87   :  { %v9924_v14 = vmul.f32 0.35355338, %v9919_v13  ;;  %v12394_v17 = vpop.f32.mrb[105].mxu0  ;;  %v12409_v53 = vpop.f32.mrb[111].mxu1 }
0x4f88   :  { %v9102_v17 = vld [vmem:[#allocation2 + $0x2c0] sm:$0xff]  ;;  %v9103_v53 = vld [vmem:[#allocation2 + $0x2c8] sm:$0xff] }
0x4f89   :  { %v9928_v22 = vsel %vm141_vm2, %v9924_v14, -inf }
0x4f8a   :  { %9929 = vmax.xlane.f32.xlu1 %v9928_v22  ;;  %v9841_v34 = vpop.f32.mrb[106].mxu0  ;;  %v12711_v22 = vpack.c.bf16 %v9103_v53, %v9102_v17  ;;  %v10697_v17 = vld [vmem:[#allocation2 + $0x308] sm:$0xff] }
0x4f8b   :  { %v9923_v63 = vmul.f32 0.35355338, %v9841_v34  ;;  %v12404_v28 = vpop.f32.mrb[107].mxu0  ;;  %v9105_v34 = vld [vmem:[#allocation2 + $0x2d8] sm:$0xff] }
0x4f8d   :  { %v9925_v43 = vsel %vm141_vm2, %v9923_v63, -inf }
0x4f8e   :  { %9926 = vmax.xlane.f32.xlu0 %v9925_v43 }
0x4f9b   :  { %9947 = vrot.lane.b32.xlu1 %v14235_v60, %s13076_s16 }
0x4f9f   :  { %10101 = vrot.lane.b32.xlu1 %v14235_v60, %s13080_s20 }
0x4fa3   :  { %10179 = vrot.lane.b32.xlu1 %v14032_v4, %s13080_s20 }
0x4fa4   :  { %10023 = vrot.lane.b32.xlu0 %v14032_v4, %s13076_s16 }
0x4fa7   :  { %10177 = vrot.lane.b32.xlu1 %v14277_v49, %s13080_s20 }
0x5017   :  { %v9930_v59 = vpop.xlane.xlu1 %9929 }
0x5018   :  { %v9932_v18 = vsub.f32 %v9924_v14, %v9930_v59 }
0x501a   :  { %v9935_v0 = vmul.f32 1.442695, %v9932_v18 }
0x501b   :  { %v9948_v7 = vpop.permute.xlu1 %9947  ;;  %v9927_v5 = vpop.xlane.xlu0 %9926 }
0x501c   :  { %13006 = vpow2.f32 %v9935_v0  ;;  %v9931_v10 = vsub.f32 %v9923_v63, %v9927_v5  ;;  %12411 = vmatpush3.msra.mxu0 %v9948_v7 }
0x501d   :  { %12420 = vmatprep.subr.mxu0 %v13069_v8 }
0x501e   :  { %v9933_v11 = vmul.f32 1.442695, %v9931_v10 }
0x501f   :  { %v10024_v15 = vpop.permute.xlu0 %10023  ;;  %v10102_v51 = vpop.permute.xlu1 %10101 }
0x5020   :  { %13008 = vpow2.f32 %v9933_v11  ;;  %12416 = vmatpush3.msra.mxu1 %v10024_v15 }
0x5021   :  { %12425 = vmatprep.subr.mxu1 %v13069_v8 }
0x5023   :  { %v10180_v26 = vpop.permute.xlu1 %10179 }
0x5026   :  { %v13007_v19 = vpop.eup %13006 }
0x5027   :  { %v9940_v20 = vsel %vm141_vm2, %v13007_v19, 0.0 }
0x5028   :  { %9941 = vadd.xlane.f32.xlu0 %v9940_v20 }
0x502a   :  { %v13009_v49 = vpop.eup %13008 }
0x502b   :  { %v9937_v9 = vsel %vm141_vm2, %v13009_v49, 0.0 }
0x502c   :  { %9938 = vadd.xlane.f32.xlu0 %v9937_v9 }
0x5042   :  { %10099 = vrot.lane.b32.xlu0 %v14279_v33, %s13080_s20  ;;  %v10178_v33 = vpop.permute.xlu1 %10177 }
0x50b5   :  { %v9942_v23 = vpop.xlane.xlu0 %9941 }
0x50b6   :  { %13010 = vrcp.f32 %v9942_v23 }
0x50b9   :  { %v9939_v61 = vpop.xlane.xlu0 %9938 }
0x50ba   :  { %13012 = vrcp.f32 %v9939_v61 }
0x50bd   :  { %v10100_v35 = vpop.permute.xlu0 %10099 }
0x50c0   :  { %v13011_v57 = vpop.eup %13010 }
0x50c1   :  { %v9946_v27 = vmul.f32 %v13011_v57, %v13007_v19 }
0x50c3   :  { %12418 = vmatmul.mubr.msk.f32.vlgmr.msra.gmra.mrb[112].mxu1 %vm141_vm2, %v9946_v27 }
0x50c4   :  { %v13013_v29 = vpop.eup %13012  ;;  %12426 = vmatpush3.xpose.msk.msra.mxu1 %vm141_vm2, %v10180_v26  ;;  %12427 = vmatprep.mubr.msk.f32.mxu1 %vm13070_vm1, %v13069_v8 }
0x50c5   :  { %v9945_v31 = vmul.f32 %v13013_v29, %v13009_v49  ;;  %12435 = vmatprep.subr.mxu1 %v13069_v8 }
0x50c7   :  { %12413 = vmatmul.mubr.msk.f32.vlgmr.msra.gmra.mrb[108].mxu0 %vm141_vm2, %v9945_v31  ;;  %12428 = vmatmul.mubr.msk.f32.vlgmr.msra.gmra.mrb[114].mxu1 %vm141_vm2, %v10178_v33 }
0x50c8   :  { %12421 = vmatpush3.xpose.msk.msra.mxu0 %vm141_vm2, %v10102_v51  ;;  %12422 = vmatprep.mubr.msk.f32.mxu0 %vm13070_vm1, %v13069_v8 }
0x50c9   :  { %12430 = vmatprep.subr.mxu0 %v13069_v8  ;;  %12437 = vmatprep.mubr.msk.f32.mxu1 %vm13070_vm1, %v13069_v8 }
0x50cb   :  { %12423 = vmatmul.mubr.msk.f32.vlgmr.msra.gmra.mrb[110].mxu0 %vm141_vm2, %v10100_v35 }
0x50cc   :  { %12432 = vmatprep.mubr.msk.f32.mxu0 %vm13070_vm1, %v13069_v8 }
0x5196   :  { %v10095_v38 = vpop.f32.mrb[112].mxu1 }
0x5197   :  { %v12419_v2 = vpop.f32.mrb[113].mxu1 }
0x519a   :  { %v10019_v32 = vpop.f32.mrb[108].mxu0  ;;  %v10251_v1 = vpop.f32.mrb[114].mxu1 }
0x519b   :  { %v10256_v37 = vmul.f32 0.35355338, %v10251_v1  ;;  %v12414_v12 = vpop.f32.mrb[109].mxu0  ;;  %v12429_v30 = vpop.f32.mrb[115].mxu1 }
0x519d   :  { %v10260_v25 = vsel %vm141_vm2, %v10256_v37, -inf }
0x519e   :  { %10261 = vmax.xlane.f32.xlu1 %v10260_v25  ;;  %v10173_v3 = vpop.f32.mrb[110].mxu0 }
0x519f   :  { %v10255_v36 = vmul.f32 0.35355338, %v10173_v3  ;;  %v12424_v39 = vpop.f32.mrb[111].mxu0  ;;  %v10589_v3 = vld [vmem:[#allocation2 + $0x2e8] sm:$0xff] }
0x51a0   :  { %v10590_v39 = vld [vmem:[#allocation2 + $0x2f0] sm:$0xff] }
0x51a1   :  { %v10257_v40 = vsel %vm141_vm2, %v10255_v36, -inf }
0x51a2   :  { %10258 = vmax.xlane.f32.xlu0 %v10257_v40  ;;  %v10591_v40 = vld [vmem:[#allocation2 + $0x2f8] sm:$0xff] }
0x51af   :  { %10279 = vrot.lane.b32.xlu1 %v14235_v60, %s13079_s19 }
0x51b3   :  { %10433 = vrot.lane.b32.xlu1 %v14363_v41, %s13068_s29 }
0x51b7   :  { %10435 = vrot.lane.b32.xlu1 %v14361_v56, %s13068_s29 }
0x51bb   :  { %10443 = vrot.lane.b32.xlu1 %v10095_v38, %s13082_s22 }
0x522b   :  { %v10262_v8 = vpop.xlane.xlu1 %10261 }
0x522c   :  { %v10264_v44 = vsub.f32 %v10256_v37, %v10262_v8  ;;  %v12723_v8 = vpack.c.bf16 %v10591_v40, %v10590_v39 }
0x522e   :  { %v10267_v47 = vmul.f32 1.442695, %v10264_v44 }
0x522f   :  { %v10280_v62 = vpop.permute.xlu1 %10279  ;;  %v10259_v24 = vpop.xlane.xlu0 %10258 }
0x5230   :  { %13014 = vpow2.f32 %v10267_v47  ;;  %v10263_v46 = vsub.f32 %v10255_v36, %v10259_v24  ;;  %12431 = vmatpush3.msra.mxu0 %v10280_v62 }
0x5231   :  { %12712 = vmatprep.subr.bf16.mxu0 %v12711_v22 }
0x5232   :  { %v10265_v50 = vmul.f32 1.442695, %v10263_v46 }
0x5233   :  { %v10434_v0 = vpop.permute.xlu1 %10433 }
0x5234   :  { %13016 = vpow2.f32 %v10265_v50  ;;  %v10455_v11 = vsel %vm141_vm2, %v14325_v21, %v10434_v0  ;;  %v11301_v21 = vld [vmem:[%s14492_s4 + $0x23] ss:$0 sm:$0xff] }
0x5237   :  { %v10436_v7 = vpop.permute.xlu1 %10435 }
0x5238   :  { %v10456_v19 = vsel %vm141_vm2, %v14323_v6, %v10436_v7  ;;  %v11306_v7 = vld [vmem:[%s14492_s4 + $0x26] ss:$0 sm:$0xff] }
0x523a   :  { %v13015_v52 = vpop.eup %13014 }
0x523b   :  { %v10272_v60 = vsel %vm141_vm2, %v13015_v52, 0.0  ;;  %v10444_v5 = vpop.permute.xlu1 %10443 }
0x523c   :  { %10273 = vadd.xlane.f32.xlu0 %v10272_v60  ;;  %v10458_v9 = vsel %vm1491_vm4, %v10456_v19, %v10444_v5  ;;  %v11304_v60 = vld [vmem:[%s14492_s4 + $0x24] ss:$0 sm:$0xff] }
0x523e   :  { %v13017_v54 = vpop.eup %13016 }
0x523f   :  { %v10269_v55 = vsel %vm141_vm2, %v13017_v54, 0.0 }
0x5240   :  { %10270 = vadd.xlane.f32.xlu0 %v10269_v55  ;;  %v11305_v55 = vld [vmem:[%s14492_s4 + $0x25] ss:$0 sm:$0xff] }
0x5256   :  { %10355 = vrot.lane.b32.xlu0 %v14032_v4, %s13079_s19  ;;  %v9104_v4 = vld [vmem:[#allocation2 + $0x2d0] sm:$0xff] }
0x5257   :  { %v12715_v63 = vpack.c.bf16 %v9105_v34, %v9104_v4  ;;  %v10699_v4 = vld [vmem:[#allocation2 + $0x318] sm:$0xff] }
0x525a   :  { %10441 = vrot.lane.b32.xlu0 %v10019_v32, %s13082_s22 }
0x52c9   :  { %v10274_v16 = vpop.xlane.xlu0 %10273 }
0x52ca   :  { %13018 = vrcp.f32 %v10274_v16 }
0x52cd   :  { %v10271_v48 = vpop.xlane.xlu0 %10270 }
0x52ce   :  { %13020 = vrcp.f32 %v10271_v48 }
0x52d1   :  { %v10356_v56 = vpop.permute.xlu0 %10355 }
0x52d2   :  { %12436 = vmatpush3.msra.mxu1 %v10356_v56 }
0x52d4   :  { %v13019_v58 = vpop.eup %13018 }
0x52d5   :  { %v10278_v41 = vmul.f32 %v13019_v58, %v13015_v52  ;;  %v10442_v10 = vpop.permute.xlu0 %10441 }
0x52d6   :  { %v10457_v20 = vsel %vm1491_vm4, %v10455_v11, %v10442_v10 }
0x52d7   :  { %12438 = vmatmul.mubr.msk.f32.vlgmr.msra.gmra.mrb[116].mxu1 %vm141_vm2, %v10278_v41 }
0x52d8   :  { %v13021_v13 = vpop.eup %13020 }
0x52d9   :  { %v10277_v14 = vmul.f32 %v13021_v13, %v13017_v54 }
0x52db   :  { %12433 = vmatmul.mubr.msk.f32.vlgmr.msra.gmra.mrb[112].mxu0 %vm141_vm2, %v10277_v14  ;;  %v10696_v14 = vld [vmem:[#allocation2 + $0x300] sm:$0xff] }
0x52dc   :  { %12714 = vmatpush3.bf16.msra.mxu0 %v12711_v22  ;;  %v12727_v53 = vpack.c.bf16 %v10697_v17, %v10696_v14  ;;  %v10698_v22 = vld [vmem:[#allocation2 + $0x310] sm:$0xff] }
0x52dd   :  { %12716 = vmatprep.subr.bf16.mxu0 %v12715_v63  ;;  %v12731_v34 = vpack.c.bf16 %v10699_v4, %v10698_v22  ;;  %v11312_v22 = vld [vmem:[%s14492_s4 + $0x28] ss:$0 sm:$0xff] }
0x52e0   :  { %12718 = vmatpush3.bf16.msra.mxu0 %v12715_v63  ;;  %v10700_v63 = vld [vmem:[#allocation2 + $0x320] sm:$0xff] }
0x52e1   :  { %12728 = vmatprep.subr.bf16.mxu0 %v12727_v53 }
0x53aa   :  { %v10427_v28 = vpop.f32.mrb[116].mxu1 }
0x53ab   :  { %10451 = vrot.lane.b32.xlu1 %v10427_v28, %s13083_s23  ;;  %v12439_v43 = vpop.f32.mrb[117].mxu1  ;;  %v10701_v28 = vld [vmem:[#allocation2 + $0x328] sm:$0xff] }
0x53ac   :  { %v12735_v43 = vpack.c.bf16 %v10701_v28, %v10700_v63  ;;  %v11313_v28 = vld [vmem:[%s14492_s4 + $0x29] ss:$0 sm:$0xff] }
0x53ae   :  { %v10351_v59 = vpop.f32.mrb[112].mxu0 }
0x53af   :  { %10449 = vrot.lane.b32.xlu0 %v10351_v59, %s13083_s23  ;;  %v12434_v18 = vpop.f32.mrb[113].mxu0  ;;  %v10702_v59 = vld [vmem:[#allocation2 + $0x330] sm:$0xff] }
0x53b0   :  { %v10703_v18 = vld [vmem:[#allocation2 + $0x338] sm:$0xff] }
0x53b1   :  { %v12739_v0 = vpack.c.bf16 %v10703_v18, %v10702_v59 }
0x541d   :  { %v10452_v15 = vpop.permute.xlu1 %10451 }
0x541e   :  { %v10460_v61 = vsel %vm1494_vm3, %v10458_v9, %v10452_v15 }
0x5421   :  { %v10450_v49 = vpop.permute.xlu0 %10449 }
0x5422   :  { %v10459_v23 = vsel %vm1494_vm3, %v10457_v20, %v10450_v49 }
0x5423   :  { %12448 = vmatprep.mubr.msk.f32.mxu0 %vm51_vm0, %v10459_v23 }
0x5424   :  { %12449 = vmatmul.mubr.msk.f32.vlgmr.msra.gmra.mrb[114].mxu0 %vm51_vm0, %v10460_v61 }
0x5425   :  { %12730 = vmatpush3.bf16.msra.mxu0 %v12727_v53 }
0x5426   :  { %12732 = vmatprep.subr.bf16.mxu0 %v12731_v34 }
0x5429   :  { %12734 = vmatpush3.bf16.msra.mxu0 %v12731_v34 }
0x542a   :  { %12736 = vmatprep.subr.bf16.mxu0 %v12735_v43 }
0x542d   :  { %12738 = vmatpush3.bf16.msra.mxu0 %v12735_v43 }
0x542e   :  { %12740 = vmatprep.subr.bf16.mxu0 %v12739_v0 }
0x5431   :  { %12742 = vmatpush3.bf16.msra.mxu0 %v12739_v0 }
0x54f7   :  { %v12450_v51 = vpop.f32.mrb[114].mxu0 }
0x54f8   :  { %v10543_v57 = vadd.f32 %v12450_v51, %v11301_v21  ;;  %v10537_v6 = vpop.f32.mrb[115].mxu0 }
0x54f9   :  { %v10538_v26 = vadd.f32 %v11301_v21, %v10537_v6 }
0x54fa   :  { %v10547_v27 = vadd.f32 %v10543_v57, %v14265_v45 }
0x54fb   :  { %v10546_v29 = vadd.f32 %v10538_v26, %v14261_v42  ;;  %v10588_v42 = vld [vmem:[#allocation2 + $0x2e0] sm:$0xff] }
0x54fc   :  { %v10553_v31 = vsel %vm51_vm0, %v10547_v27, 0.0  ;;  %v12719_v36 = vpack.c.bf16 %v10589_v3, %v10588_v42 }
0x54fd   :  { %10554 = vadd.xlane.f32.xlu1 %v10553_v31  ;;  %v10550_v33 = vsel %vm51_vm0, %v10546_v29, 0.0 }
0x54fe   :  { %10551 = vadd.xlane.f32.xlu0 %v10550_v33  ;;  %12720 = vmatprep.subr.bf16.mxu1 %v12719_v36 }
0x54ff   :  { %12722 = vmatpush3.bf16.msra.mxu1 %v12719_v36 }
0x5500   :  { %12724 = vmatprep.subr.bf16.mxu1 %v12723_v8 }
0x5503   :  { %12726 = vmatpush3.bf16.msra.mxu1 %v12723_v8 }
0x558a   :  { %v10555_v35 = vpop.xlane.xlu1 %10554 }
0x558b   :  { %v10557_v38 = vmul.f32 0.03125, %v10555_v35  ;;  %v10552_v2 = vpop.xlane.xlu0 %10551 }
0x558c   :  { %v10556_v32 = vmul.f32 0.03125, %v10552_v2 }
0x558d   :  { %v10559_v1 = vsub.f32 %v10547_v27, %v10557_v38 }
0x558e   :  { %v10558_v37 = vsub.f32 %v10546_v29, %v10556_v32  ;;  %v11309_v32 = vld [vmem:[%s14492_s4 + $0x27] ss:$0 sm:$0xff] }
0x558f   :  { %v10561_v25 = vmul.f32 %v10559_v1, %v10559_v1 }
0x5590   :  { %v10560_v12 = vmul.f32 %v10558_v37, %v10558_v37 }
0x5591   :  { %v10565_v45 = vsel %vm51_vm0, %v10561_v25, 0.0 }
0x5592   :  { %v10562_v30 = vsel %vm51_vm0, %v10560_v12, 0.0 }
0x5593   :  { %10563 = vadd.xlane.f32.xlu0 %v10562_v30 }
0x5597   :  { %10566 = vadd.xlane.f32.xlu0 %v10565_v45 }
0x5620   :  { %v10564_v44 = vpop.xlane.xlu0 %10563 }
0x5621   :  { %v10568_v47 = vmul.f32 0.03125, %v10564_v44 }
0x5623   :  { %v10570_v62 = vadd.f32 1e-12, %v10568_v47 }
0x5624   :  { %v10567_v24 = vpop.xlane.xlu0 %10566 }
0x5625   :  { %13022 = vrsqrt.f32 %v10570_v62  ;;  %v10569_v46 = vmul.f32 0.03125, %v10567_v24 }
0x5627   :  { %v10571_v50 = vadd.f32 1e-12, %v10569_v46 }
0x5629   :  { %13024 = vrsqrt.f32 %v10571_v50 }
0x562f   :  { %v13023_v52 = vpop.eup %13022 }
0x5630   :  { %v10574_v54 = vmul.f32 %v13023_v52, %v10558_v37  ;;  %v10832_v52 = vld [vmem:[#allocation2 + $0x3e0] sm:$0xff] }
0x5632   :  { %v10580_v16 = vmul.f32 %v11304_v60, %v10574_v54 }
0x5633   :  { %v13025_v48 = vpop.eup %13024 }
0x5634   :  { %v10575_v56 = vmul.f32 %v13025_v48, %v10559_v1  ;;  %v10586_v58 = vadd.f32 %v11305_v55, %v10580_v16  ;;  %v10835_v16 = vld [vmem:[#allocation2 + $0x3f8] sm:$0xff] }
0x5636   :  { %v10581_v41 = vmul.f32 %v11304_v60, %v10575_v56  ;;  %12459 = vmatprep.mubr.msk.f32.mxu1 %vm51_vm0, %v10586_v58  ;;  %v10833_v60 = vld [vmem:[#allocation2 + $0x3e8] sm:$0xff] }
0x5637   :  { %v12743_v54 = vpack.c.bf16 %v10833_v60, %v10832_v52 }
0x5638   :  { %v10587_v13 = vadd.f32 %v11305_v55, %v10581_v41  ;;  %v10834_v55 = vld [vmem:[#allocation2 + $0x3f0] sm:$0xff] }
0x5639   :  { %12744 = vmatprep.subr.bf16.mxu1 %v12743_v54  ;;  %v12747_v48 = vpack.c.bf16 %v10835_v16, %v10834_v55 }
0x563a   :  { %12460 = vmatmul.mubr.msk.f32.vlgmr.msra.gmra.mrb[118].mxu1 %vm51_vm0, %v10587_v13 }
0x563b   :  { %12746 = vmatpush3.bf16.msra.mxu1 %v12743_v54 }
0x563c   :  { %12748 = vmatprep.subr.bf16.mxu1 %v12747_v48 }
0x563f   :  { %12750 = vmatpush3.bf16.msra.mxu1 %v12747_v48 }
0x570d   :  { %v12461_v5 = vpop.f32.mrb[118].mxu1 }
0x570e   :  { %v10675_v10 = vadd.f32 %v12461_v5, %v11306_v7  ;;  %v10669_v11 = vpop.f32.mrb[119].mxu1 }
0x570f   :  { %v10670_v15 = vadd.f32 %v11306_v7, %v10669_v11  ;;  %v11314_v7 = vld [vmem:[%s14492_s4 + $0x2d] ss:$0 sm:$0xff] }
0x5710   :  { %v10681_v19 = vmul.f32 0.044715, %v10675_v10  ;;  %v10679_v35 = vmul.f32 0.5, %v10675_v10 }
0x5711   :  { %v10680_v20 = vmul.f32 0.044715, %v10670_v15  ;;  %v10678_v31 = vmul.f32 0.5, %v10670_v15 }
0x5712   :  { %v10683_v49 = vmul.f32 %v10681_v19, %v10675_v10 }
0x5713   :  { %v10682_v9 = vmul.f32 %v10680_v20, %v10670_v15 }
0x5714   :  { %v10685_v23 = vmul.f32 %v10683_v49, %v10675_v10 }
0x5715   :  { %v10684_v61 = vmul.f32 %v10682_v9, %v10670_v15 }
0x5716   :  { %v10687_v21 = vadd.f32 %v10685_v23, %v10675_v10 }
0x5717   :  { %v10686_v51 = vadd.f32 %v10684_v61, %v10670_v15 }
0x5718   :  { %v10689_v57 = vmul.f32 0.7978846, %v10687_v21 }
0x5719   :  { %v10688_v6 = vmul.f32 0.7978846, %v10686_v51 }
0x571a   :  { %13026 = vtanh.f32 %v10689_v57 }
0x571b   :  { %13028 = vtanh.f32 %v10688_v6 }
0x5724   :  { %v13027_v26 = vpop.eup %13026 }
0x5725   :  { %v13029_v27 = vpop.eup %13028  ;;  %v10693_v29 = vadd.f32 1.0, %v13027_v26 }
0x5726   :  { %v10692_v33 = vadd.f32 1.0, %v13029_v27 }
0x5727   :  { %v10695_v2 = vmul.f32 %v10693_v29, %v10679_v35 }
0x5728   :  { %v10694_v38 = vmul.f32 %v10692_v33, %v10678_v31 }
0x572a   :  { %12478 = vmatprep.mubr.msk.f32.mxu0 %vm1746_vm5, %v10694_v38 }
0x572b   :  { %12479 = vmatmul.mubr.msk.f32.vlgmr.msra.gmra.mrb[116].mxu0 %vm1746_vm5, %v10695_v2 }
0x57fe   :  { %v12480_v1 = vpop.f32.mrb[116].mxu0 }
0x57ff   :  { %v10787_v37 = vadd.f32 %v12480_v1, %v11309_v32  ;;  %v10781_v12 = vpop.f32.mrb[117].mxu0 }
0x5800   :  { %v10782_v30 = vadd.f32 %v11309_v32, %v10781_v12 }
0x5801   :  { %v10791_v25 = vadd.f32 %v10787_v37, %v10587_v13 }
0x5802   :  { %v10790_v45 = vadd.f32 %v10782_v30, %v10586_v58 }
0x5803   :  { %v10797_v42 = vsel %vm51_vm0, %v10791_v25, 0.0 }
0x5804   :  { %10798 = vadd.xlane.f32.xlu0 %v10797_v42  ;;  %v10794_v3 = vsel %vm51_vm0, %v10790_v45, 0.0 }
0x5805   :  { %10795 = vadd.xlane.f32.xlu1 %v10794_v3 }
0x5891   :  { %v10799_v36 = vpop.xlane.xlu0 %10798 }
0x5892   :  { %v10801_v39 = vmul.f32 0.03125, %v10799_v36  ;;  %v10796_v40 = vpop.xlane.xlu1 %10795 }
0x5893   :  { %v10800_v8 = vmul.f32 0.03125, %v10796_v40 }
0x5894   :  { %v10803_v44 = vsub.f32 %v10791_v25, %v10801_v39 }
0x5895   :  { %v10802_v47 = vsub.f32 %v10790_v45, %v10800_v8  ;;  %v10980_v8 = vld [vmem:[#allocation2 + $0x3c0] sm:$0xff] }
0x5896   :  { %v10805_v62 = vmul.f32 %v10803_v44, %v10803_v44 }
0x5897   :  { %v10804_v24 = vmul.f32 %v10802_v47, %v10802_v47 }
0x5898   :  { %v10809_v46 = vsel %vm51_vm0, %v10805_v62, 0.0  ;;  %v10982_v62 = vld [vmem:[#allocation2 + $0x3d0] sm:$0xff] }
0x5899   :  { %10810 = vadd.xlane.f32.xlu0 %v10809_v46  ;;  %v10806_v50 = vsel %vm51_vm0, %v10804_v24, 0.0  ;;  %v10983_v24 = vld [vmem:[#allocation2 + $0x3d8] sm:$0xff] }
0x589a   :  { %10807 = vadd.xlane.f32.xlu1 %v10806_v50  ;;  %v12755_v46 = vpack.c.bf16 %v10983_v24, %v10982_v62 }
0x5926   :  { %v10811_v56 = vpop.xlane.xlu0 %10810 }
0x5927   :  { %v10813_v58 = vmul.f32 0.03125, %v10811_v56  ;;  %v10808_v41 = vpop.xlane.xlu1 %10807  ;;  %v11317_v56 = vld [vmem:[%s14492_s4 + $0x2e] ss:$0 sm:$0xff] }
0x5928   :  { %v10812_v13 = vmul.f32 0.03125, %v10808_v41 }
0x5929   :  { %v10815_v14 = vadd.f32 1e-12, %v10813_v58 }
0x592a   :  { %v10814_v17 = vadd.f32 1e-12, %v10812_v13 }
0x592b   :  { %13030 = vrsqrt.f32 %v10815_v14  ;;  %v11318_v14 = vld [vmem:[%s14492_s4 + $0x2f] ss:$0 sm:$0xff] }
0x592c   :  { %13032 = vrsqrt.f32 %v10814_v17 }
0x5935   :  { %v13031_v53 = vpop.eup %13030 }
0x5936   :  { %v13033_v4 = vpop.eup %13032  ;;  %v10819_v34 = vmul.f32 %v13031_v53, %v10803_v44  ;;  %v10981_v44 = vld [vmem:[#allocation2 + $0x3c8] sm:$0xff] }
0x5937   :  { %v10818_v63 = vmul.f32 %v13033_v4, %v10802_v47  ;;  %v12751_v47 = vpack.c.bf16 %v10981_v44, %v10980_v8 }
0x5938   :  { %v10825_v43 = vmul.f32 %v11312_v22, %v10819_v34  ;;  %v11319_v34 = vld [vmem:[%s14492_s4 + $0x30] ss:$0 sm:$0xff] }
0x5939   :  { %v10824_v59 = vmul.f32 %v11312_v22, %v10818_v63  ;;  %12752 = vmatprep.subr.bf16.mxu1 %v12751_v47 }
0x593a   :  { %v10831_v0 = vadd.f32 %v11313_v28, %v10825_v43 }
0x593b   :  { %v10830_v18 = vadd.f32 %v11313_v28, %v10824_v59 }
0x593d   :  { %12489 = vmatprep.mubr.msk.f32.mxu1 %vm51_vm0, %v10830_v18 }
0x593e   :  { %12490 = vmatmul.mubr.msk.f32.vlgmr.msra.gmra.mrb[120].mxu1 %vm51_vm0, %v10831_v0 }
0x593f   :  { %12754 = vmatpush3.bf16.msra.mxu1 %v12751_v47 }
0x5940   :  { %12756 = vmatprep.subr.bf16.mxu1 %v12755_v46 }
0x5943   :  { %12758 = vmatpush3.bf16.msra.mxu1 %v12755_v46 }
0x5a11   :  { %v12491_v5 = vpop.f32.mrb[120].mxu1 }
0x5a12   :  { %v10919_v10 = vadd.f32 %v12491_v5, %v11314_v7  ;;  %v10913_v11 = vpop.f32.mrb[121].mxu1 }
0x5a13   :  { %v10914_v15 = vadd.f32 %v11314_v7, %v10913_v11 }
0x5a14   :  { %v10925_v19 = vmul.f32 0.044715, %v10919_v10  ;;  %v10923_v29 = vmul.f32 0.5, %v10919_v10 }
0x5a15   :  { %v10924_v20 = vmul.f32 0.044715, %v10914_v15  ;;  %v10922_v33 = vmul.f32 0.5, %v10914_v15 }
0x5a16   :  { %v10927_v49 = vmul.f32 %v10925_v19, %v10919_v10 }
0x5a17   :  { %v10926_v9 = vmul.f32 %v10924_v20, %v10914_v15 }
0x5a18   :  { %v10929_v23 = vmul.f32 %v10927_v49, %v10919_v10 }
0x5a19   :  { %v10928_v61 = vmul.f32 %v10926_v9, %v10914_v15 }
0x5a1a   :  { %v10931_v21 = vadd.f32 %v10929_v23, %v10919_v10 }
0x5a1b   :  { %v10930_v51 = vadd.f32 %v10928_v61, %v10914_v15 }
0x5a1c   :  { %v10933_v57 = vmul.f32 0.7978846, %v10931_v21 }
0x5a1d   :  { %v10932_v6 = vmul.f32 0.7978846, %v10930_v51 }
0x5a1e   :  { %13034 = vtanh.f32 %v10933_v57 }
0x5a1f   :  { %13036 = vtanh.f32 %v10932_v6 }
0x5a28   :  { %v13035_v26 = vpop.eup %13034 }
0x5a29   :  { %v13037_v27 = vpop.eup %13036  ;;  %v10937_v31 = vadd.f32 1.0, %v13035_v26 }
0x5a2a   :  { %v10936_v35 = vadd.f32 1.0, %v13037_v27 }
0x5a2b   :  { %v10939_v38 = vmul.f32 %v10937_v31, %v10923_v29 }
0x5a2c   :  { %v10938_v2 = vmul.f32 %v10936_v35, %v10922_v33 }
0x5a2d   :  { %v10945_v32 = vsel %vm51_vm0, %v10939_v38, 0.0 }
0x5a2e   :  { %10946 = vadd.xlane.f32.xlu0 %v10945_v32  ;;  %v10942_v1 = vsel %vm51_vm0, %v10938_v2, 0.0 }
0x5a2f   :  { %10943 = vadd.xlane.f32.xlu1 %v10942_v1 }
0x5abb   :  { %v10947_v37 = vpop.xlane.xlu0 %10946 }
0x5abc   :  { %v10949_v12 = vmul.f32 0.03125, %v10947_v37  ;;  %v10944_v30 = vpop.xlane.xlu1 %10943 }
0x5abd   :  { %v10948_v25 = vmul.f32 0.03125, %v10944_v30 }
0x5abe   :  { %v10951_v45 = vsub.f32 %v10939_v38, %v10949_v12 }
0x5abf   :  { %v10950_v42 = vsub.f32 %v10938_v2, %v10948_v25 }
0x5ac0   :  { %v10953_v3 = vmul.f32 %v10951_v45, %v10951_v45 }
0x5ac1   :  { %v10952_v36 = vmul.f32 %v10950_v42, %v10950_v42 }
0x5ac2   :  { %v10957_v39 = vsel %vm51_vm0, %v10953_v3, 0.0 }
0x5ac3   :  { %10958 = vadd.xlane.f32.xlu0 %v10957_v39  ;;  %v10954_v40 = vsel %vm51_vm0, %v10952_v36, 0.0 }
0x5ac4   :  { %10955 = vadd.xlane.f32.xlu1 %v10954_v40 }
0x5b50   :  { %v10959_v50 = vpop.xlane.xlu0 %10958 }
0x5b51   :  { %v10961_v52 = vmul.f32 0.03125, %v10959_v50  ;;  %v10956_v60 = vpop.xlane.xlu1 %10955 }
0x5b52   :  { %v10960_v54 = vmul.f32 0.03125, %v10956_v60 }
0x5b53   :  { %v10963_v55 = vadd.f32 1e-12, %v10961_v52 }
0x5b54   :  { %v10962_v16 = vadd.f32 1e-12, %v10960_v54 }
0x5b55   :  { %13038 = vrsqrt.f32 %v10963_v55 }
0x5b56   :  { %13040 = vrsqrt.f32 %v10962_v16 }
0x5b5f   :  { %v13039_v48 = vpop.eup %13038 }
0x5b60   :  { %v13041_v58 = vpop.eup %13040  ;;  %v10967_v41 = vmul.f32 %v13039_v48, %v10951_v45 }
0x5b61   :  { %v10966_v13 = vmul.f32 %v13041_v58, %v10950_v42 }
0x5b62   :  { %v10973_v17 = vmul.f32 %v11317_v56, %v10967_v41 }
0x5b63   :  { %v10972_v53 = vmul.f32 %v11317_v56, %v10966_v13 }
0x5b64   :  { %v10979_v4 = vadd.f32 %v11318_v14, %v10973_v17 }
0x5b65   :  { %v10978_v22 = vadd.f32 %v11318_v14, %v10972_v53 }
0x5b67   :  { %12500 = vmatprep.mubr.msk.f32.mxu1 %vm51_vm0, %v10978_v22 }
0x5b68   :  { %12501 = vmatmul.mubr.msk.f32.vlgmr.msra.gmra.mrb[122].mxu1 %vm51_vm0, %v10979_v4 }
0x5c3b   :  { %v12502_v63 = vpop.f32.mrb[122].mxu1 }
0x5c3c   :  { %v11067_v28 = vadd.f32 %v12502_v63, %v11319_v34  ;;  %v11061_v43 = vpop.f32.mrb[123].mxu1 }
0x5c3d   :  { %v11062_v59 = vadd.f32 %v11319_v34, %v11061_v43 }
0x5c3e   :  { %11071 = vst [vmem:[%s14493_s5 + $0x8] sm:$0xff] %v11067_v28 }
0x5c3f   :  { %11070 = vst [vmem:[%s14493_s5] sm:$0xff] %v11062_v59 }
0x5c40   :  { %11076 = vsyncpa [#allocation3], 1 }

</bundles_post_ra>
